<compile_context>
chip_gen: v7x
topology: tpu7x:2x2x1
jax: 0.10.0
libtpu: 0.0.40
codegen_flags: <defaults>
</compile_context>

<pallas_src>
import functools

import numpy as np
import jax
import jax.numpy as jnp
from jax.experimental import pallas as pl
from jax.experimental.pallas import tpu as pltpu


# ----------------------------------------------------------------------------
# Layer specs (mirror the PyTorch module)
# ----------------------------------------------------------------------------
_LAYER_SPECS = [
    # (kind, cin, cout, kernel)
    ("convT", 4, 8, 9),
    ("convT", 8, 8, 7),
    ("convT", 8, 8, 7),
    ("convT", 8, 8, 5),
    ("conv",  8, 1, 3),   # Conv2d(..., padding=1)
]


def init_decoder_params(key):
    """Deterministic synthetic params, kept in the PyTorch weight layouts."""
    params = []
    for kind, cin, cout, k in _LAYER_SPECS:
        key, wk, bk = jax.random.split(key, 3)
        if kind == "convT":
            # torch ConvTranspose2d weight: (Cin, Cout, kH, kW)
            w = 0.05 * jax.random.normal(wk, (cin, cout, k, k), jnp.float32)
        else:
            # torch Conv2d weight: (Cout, Cin, kH, kW)
            w = 0.05 * jax.random.normal(wk, (cout, cin, k, k), jnp.float32)
        b = 0.05 * jax.random.normal(bk, (cout,), jnp.float32)
        params.append((kind, k, w, b))
    return params


# ----------------------------------------------------------------------------
# Init-time weight preparation (hoisted out of the hot path)
# ----------------------------------------------------------------------------
def _banded_weight(w_eff, w_in, pad):
    """Expand an HWIO correlation kernel into per-row-offset banded matrices.

    w_eff: (KH, KW, Cin, Cout).  Returns band of shape
    (KH, w_in*Cin, w_out*Cout) such that, for a row-buffer B with
    B[i, src*Cin + ci] = x_padded_vertically[i, src, ci] (no horizontal pad),

        out[h, w*Cout + co] = sum_kh ( B[h + kh, :] @ band[kh] )[w*Cout + co]

    equals the `pad`-padded "valid" correlation of x with w_eff.
    Horizontal padding is folded in by simply dropping out-of-range taps.
    """
    kh_n, kw_n, cin, cout = w_eff.shape
    w_out = w_in + 2 * pad - kw_n + 1
    band = np.zeros((kh_n, w_in * cin, w_out * cout), np.float32)
    w_np = np.asarray(w_eff, np.float32)
    for kh in range(kh_n):
        for kw in range(kw_n):
            blk = w_np[kh, kw]                      # (Cin, Cout)
            for w in range(w_out):
                src = w + kw - pad                  # input column this tap reads
                if 0 <= src < w_in:
                    band[kh, src * cin:(src + 1) * cin,
                         w * cout:(w + 1) * cout] = blk
    return jnp.asarray(band)


def prepare_decoder(params, h_in, w_in):
    """Convert torch-layout params to fused-kernel operands + static metadata."""
    prep = []
    h, wdt = h_in, w_in
    for kind, k, wt, b in params:
        if kind == "convT":
            # stride-1 ConvTranspose2d == full correlation with the spatially
            # flipped, in/out-channel-transposed kernel.
            w_eff = jnp.transpose(wt[:, :, ::-1, ::-1], (2, 3, 0, 1))  # (k,k,Ci,Co)
            pad = k - 1
        else:
            w_eff = jnp.transpose(wt, (2, 3, 1, 0))                    # (k,k,Ci,Co)
            pad = 1
        kh_n, kw_n, cin, cout = w_eff.shape
        hout = h + 2 * pad - kh_n + 1
        wout = wdt + 2 * pad - kw_n + 1
        prep.append(dict(
            KH=kh_n, pad=pad, H_in=h, W_in=wdt, Cin=cin,
            Hout=hout, Wout=wout, Cout=cout,
            wb=_banded_weight(w_eff, wdt, pad),                 # (KH, Win*Ci, Wout*Co)
            bt=jnp.tile(b, wout).reshape(1, wout * cout),       # lane-tiled bias
        ))
        h, wdt = hout, wout
    return prep


# ----------------------------------------------------------------------------
# Fused Pallas kernel: one grid step == one full batch element through all
# 5 layers.  Activations never leave VMEM.
# ----------------------------------------------------------------------------
def _decoder_kernel(*refs, meta):
    n_l = len(meta)
    x_ref = refs[0]
    w_refs = refs[1:1 + 2 * n_l:2]      # banded weights, one per layer
    b_refs = refs[2:2 + 2 * n_l:2]      # lane-tiled biases
    o_ref = refs[1 + 2 * n_l]           # (1, 1, Hf, Wf) output block (NCHW)
    bufs = refs[2 + 2 * n_l:]           # per-layer vertically-padded input bufs

    def store_vpadded(buf, rows, pad):
        # rows: (H_in, W_in*Cin) -> buf (H_in+2*pad, W_in*Cin), zero pad rows.
        hp, wd = buf.shape
        zrow = jnp.zeros((pad, wd), jnp.float32)
        buf[0:pad, :] = zrow
        buf[hp - pad:hp, :] = zrow
        buf[pad:hp - pad, :] = rows

    # Stage the (already lane-flattened NHWC) input into the first padded buffer.
    store_vpadded(bufs[0], x_ref[0], meta[0]["pad"])

    y = None
    for i, m in enumerate(meta):
        hout = m["Hout"]
        n_out = m["Wout"] * m["Cout"]
        acc = jnp.zeros((hout, n_out), jnp.float32)
        # KH static-slice matmuls: (Hout, Win*Cin) @ (Win*Cin, Wout*Cout)
        for kh in range(m["KH"]):
            acc = acc + jnp.dot(bufs[i][kh:kh + hout, :], w_refs[i][kh],
                                preferred_element_type=jnp.float32)
        acc = acc + b_refs[i][...]
        if i < n_l - 1:
            y = jnp.maximum(acc, 0.0)                       # ReLU
            store_vpadded(bufs[i + 1], y, meta[i + 1]["pad"])
        else:
            y = jax.nn.sigmoid(acc)                         # final Sigmoid

    # Final layer has Cout == 1, so y is (Hf, Wf) == the NCHW channel plane.
    o_ref[0, 0] = y


def decoder_forward_pallas(prep, x_nchw):
    """Public wrapper: NCHW in, NCHW out (matches the PyTorch module)."""
    n, c0, h0, w0 = x_nchw.shape
    assert prep[-1]["Cout"] == 1
    # NCHW -> NHWC -> (N, H, W*C): channels become the fastest lane index.
    x_rows = jnp.transpose(x_nchw, (0, 2, 3, 1)).reshape(n, h0, w0 * c0)

    meta = [{k: m[k] for k in ("KH", "pad", "H_in", "W_in", "Cin",
                               "Hout", "Wout", "Cout")} for m in prep]
    hf, wf = prep[-1]["Hout"], prep[-1]["Wout"]

    in_specs = [pl.BlockSpec((1, h0, w0 * c0), lambda b: (b, 0, 0))]
    operands = [x_rows]
    for m in prep:
        in_specs.append(pl.BlockSpec(m["wb"].shape, lambda b: (0, 0, 0)))
        in_specs.append(pl.BlockSpec(m["bt"].shape, lambda b: (0, 0)))
        operands += [m["wb"], m["bt"]]

    scratch = [pltpu.VMEM((m["H_in"] + 2 * m["pad"], m["W_in"] * m["Cin"]),
                          jnp.float32) for m in prep]

    kernel = functools.partial(_decoder_kernel, meta=meta)
    return pl.pallas_call(
        kernel,
        out_shape=jax.ShapeDtypeStruct((n, 1, hf, wf), jnp.float32),
        grid_spec=pltpu.PrefetchScalarGridSpec(
            num_scalar_prefetch=0,
            grid=(n,),
            in_specs=in_specs,
            out_specs=pl.BlockSpec((1, 1, hf, wf), lambda b: (b, 0, 0, 0)),
            scratch_shapes=scratch,
        ),
        compiler_params=pltpu.CompilerParams(
            dimension_semantics=("parallel",),
            vmem_limit_bytes=40 * 1024 * 1024,
        ),
    )(*operands)


# ----------------------------------------------------------------------------
# Plain-JAX reference (correctness check only)
# ----------------------------------------------------------------------------
def decoder_forward_ref(params, x_nchw):
    x = jnp.transpose(x_nchw, (0, 2, 3, 1))  # NCHW -> NHWC
    n_layers = len(params)
    for i, (kind, k, wt, b) in enumerate(params):
        if kind == "convT":
            w_hwio = jnp.transpose(wt[:, :, ::-1, ::-1], (2, 3, 0, 1))
            pad = k - 1
        else:
            w_hwio = jnp.transpose(wt, (2, 3, 1, 0))
            pad = 1
        x = jax.lax.conv_general_dilated(
            x, w_hwio, window_strides=(1, 1),
            padding=[(pad, pad), (pad, pad)],
            dimension_numbers=("NHWC", "HWIO", "NHWC")) + b
        x = jax.nn.sigmoid(x) if i == n_layers - 1 else jnp.maximum(x, 0.0)
    return jnp.transpose(x, (0, 3, 1, 2))    # NHWC -> NCHW


if __name__ == "__main__":
    key = jax.random.PRNGKey(0)
    key, xk = jax.random.split(key)
    x = jax.random.normal(xk, (2, 4, 16, 16), jnp.float32)   # NCHW, like torch
    params = init_decoder_params(key)
    prep = prepare_decoder(params, 16, 16)

    out = jax.block_until_ready(decoder_forward_pallas(prep, x))
    assert out.shape == (2, 1, 40, 40), out.shape   # 16->24->30->36->40->40

    ref = jax.block_until_ready(decoder_forward_ref(params, x))
    max_err = float(jnp.max(jnp.abs(out - ref)))
    assert jnp.allclose(out, ref, atol=1e-3, rtol=1e-3), max_err

    print("KERNEL_OK")
</pallas_src>

<mosaic_0001>
module attributes {stable_mosaic.version = 11 : i64} {
  func.func @_decoder_kernel(%arg0: i32, %arg1: memref<1x16x64xf32, #tpu.memory_space<vmem>>, %arg2: memref<9x64x192xf32, #tpu.memory_space<vmem>>, %arg3: memref<1x192xf32, #tpu.memory_space<vmem>>, %arg4: memref<7x192x240xf32, #tpu.memory_space<vmem>>, %arg5: memref<1x240xf32, #tpu.memory_space<vmem>>, %arg6: memref<7x240x288xf32, #tpu.memory_space<vmem>>, %arg7: memref<1x288xf32, #tpu.memory_space<vmem>>, %arg8: memref<5x288x320xf32, #tpu.memory_space<vmem>>, %arg9: memref<1x320xf32, #tpu.memory_space<vmem>>, %arg10: memref<3x320x40xf32, #tpu.memory_space<vmem>>, %arg11: memref<1x40xf32, #tpu.memory_space<vmem>>, %arg12: memref<1x1x40x40xf32, #tpu.memory_space<vmem>>, %arg13: memref<32x64xf32, #tpu.memory_space<vmem>>, %arg14: memref<36x192xf32, #tpu.memory_space<vmem>>, %arg15: memref<42x240xf32, #tpu.memory_space<vmem>>, %arg16: memref<44x288xf32, #tpu.memory_space<vmem>>, %arg17: memref<42x320xf32, #tpu.memory_space<vmem>>) attributes {dimension_semantics = [#tpu.dimension_semantics<parallel>], iteration_bounds = array<i64: 2>, scalar_prefetch = 0 : i64, scratch_operands = 5 : i64, tpu.core_type = #tpu.core_type<tc>, window_params = [{transform_indices = @transform_0, window_bounds = array<i64: 1, 16, 64>}, {pipeline_mode = #tpu.pipeline_mode<synchronous>, transform_indices = @transform_1, window_bounds = array<i64: 9, 64, 192>}, {pipeline_mode = #tpu.pipeline_mode<synchronous>, transform_indices = @transform_2, window_bounds = array<i64: 1, 192>}, {pipeline_mode = #tpu.pipeline_mode<synchronous>, transform_indices = @transform_3, window_bounds = array<i64: 7, 192, 240>}, {pipeline_mode = #tpu.pipeline_mode<synchronous>, transform_indices = @transform_4, window_bounds = array<i64: 1, 240>}, {pipeline_mode = #tpu.pipeline_mode<synchronous>, transform_indices = @transform_5, window_bounds = array<i64: 7, 240, 288>}, {pipeline_mode = #tpu.pipeline_mode<synchronous>, transform_indices = @transform_6, window_bounds = array<i64: 1, 288>}, {pipeline_mode = #tpu.pipeline_mode<synchronous>, transform_indices = @transform_7, window_bounds = array<i64: 5, 288, 320>}, {pipeline_mode = #tpu.pipeline_mode<synchronous>, transform_indices = @transform_8, window_bounds = array<i64: 1, 320>}, {pipeline_mode = #tpu.pipeline_mode<synchronous>, transform_indices = @transform_9, window_bounds = array<i64: 3, 320, 40>}, {pipeline_mode = #tpu.pipeline_mode<synchronous>, transform_indices = @transform_10, window_bounds = array<i64: 1, 40>}, {transform_indices = @transform_11, window_bounds = array<i64: 1, 1, 40, 40>}]} {
    %c0 = arith.constant 0 : index
    %c0_0 = arith.constant 0 : index
    %c0_1 = arith.constant 0 : index
    %0 = vector.load %arg1[%c0, %c0_0, %c0_1] : memref<1x16x64xf32, #tpu.memory_space<vmem>>, vector<1x16x64xf32>
    %1 = vector.shape_cast %0 : vector<1x16x64xf32> to vector<16x64xf32>
    %cst = arith.constant 0.000000e+00 : f32
    %2 = vector.broadcast %cst : f32 to vector<8x64xf32>
    %c0_2 = arith.constant 0 : index
    %c0_3 = arith.constant 0 : index
    %3 = vector.load %arg13[%c0_2, %c0_3] : memref<32x64xf32, #tpu.memory_space<vmem>>, vector<8x64xf32>
    tpu.vector_store %arg13[%c0_2, %c0_3], %2 {strides = array<i32>} : memref<32x64xf32, #tpu.memory_space<vmem>>, vector<8x64xf32>,
    %c24 = arith.constant 24 : index
    %c0_4 = arith.constant 0 : index
    %4 = vector.load %arg13[%c24, %c0_4] : memref<32x64xf32, #tpu.memory_space<vmem>>, vector<8x64xf32>
    tpu.vector_store %arg13[%c24, %c0_4], %2 {strides = array<i32>} : memref<32x64xf32, #tpu.memory_space<vmem>>, vector<8x64xf32>,
    %c8 = arith.constant 8 : index
    %c0_5 = arith.constant 0 : index
    %5 = vector.load %arg13[%c8, %c0_5] : memref<32x64xf32, #tpu.memory_space<vmem>>, vector<16x64xf32>
    tpu.vector_store %arg13[%c8, %c0_5], %1 {strides = array<i32>} : memref<32x64xf32, #tpu.memory_space<vmem>>, vector<16x64xf32>,
    %cst_6 = arith.constant 0.000000e+00 : f32
    %6 = vector.broadcast %cst_6 : f32 to vector<24x192xf32>
    %c0_7 = arith.constant 0 : index
    %c0_8 = arith.constant 0 : index
    %7 = vector.load %arg13[%c0_7, %c0_8] : memref<32x64xf32, #tpu.memory_space<vmem>>, vector<24x64xf32>
    %c0_9 = arith.constant 0 : index
    %c0_10 = arith.constant 0 : index
    %c0_11 = arith.constant 0 : index
    %8 = vector.load %arg2[%c0_9, %c0_10, %c0_11] : memref<9x64x192xf32, #tpu.memory_space<vmem>>, vector<1x64x192xf32>
    %9 = vector.shape_cast %8 : vector<1x64x192xf32> to vector<64x192xf32>
    %cst_12 = arith.constant dense<0.000000e+00> : vector<24x192xf32>
    %10 = tpu.matmul %7, %9, %cst_12 {dimension_numbers = #tpu.dot_dimension_numbers<[1], [0], [0], [1], [0, 0, 1, 1], [], []>} : vector<24x64xf32>, vector<64x192xf32>, vector<24x192xf32> -> vector<24x192xf32>
    %11 = arith.addf %6, %10 : vector<24x192xf32>
    %c1 = arith.constant 1 : index
    %c0_13 = arith.constant 0 : index
    %12 = vector.load %arg13[%c1, %c0_13] : memref<32x64xf32, #tpu.memory_space<vmem>>, vector<24x64xf32>
    %c1_14 = arith.constant 1 : index
    %c0_15 = arith.constant 0 : index
    %c0_16 = arith.constant 0 : index
    %13 = vector.load %arg2[%c1_14, %c0_15, %c0_16] : memref<9x64x192xf32, #tpu.memory_space<vmem>>, vector<1x64x192xf32>
    %14 = vector.shape_cast %13 : vector<1x64x192xf32> to vector<64x192xf32>
    %cst_17 = arith.constant dense<0.000000e+00> : vector<24x192xf32>
    %15 = tpu.matmul %12, %14, %cst_17 {dimension_numbers = #tpu.dot_dimension_numbers<[1], [0], [0], [1], [0, 0, 1, 1], [], []>} : vector<24x64xf32>, vector<64x192xf32>, vector<24x192xf32> -> vector<24x192xf32>
    %16 = arith.addf %11, %15 : vector<24x192xf32>
    %c2 = arith.constant 2 : index
    %c0_18 = arith.constant 0 : index
    %17 = vector.load %arg13[%c2, %c0_18] : memref<32x64xf32, #tpu.memory_space<vmem>>, vector<24x64xf32>
    %c2_19 = arith.constant 2 : index
    %c0_20 = arith.constant 0 : index
    %c0_21 = arith.constant 0 : index
    %18 = vector.load %arg2[%c2_19, %c0_20, %c0_21] : memref<9x64x192xf32, #tpu.memory_space<vmem>>, vector<1x64x192xf32>
    %19 = vector.shape_cast %18 : vector<1x64x192xf32> to vector<64x192xf32>
    %cst_22 = arith.constant dense<0.000000e+00> : vector<24x192xf32>
    %20 = tpu.matmul %17, %19, %cst_22 {dimension_numbers = #tpu.dot_dimension_numbers<[1], [0], [0], [1], [0, 0, 1, 1], [], []>} : vector<24x64xf32>, vector<64x192xf32>, vector<24x192xf32> -> vector<24x192xf32>
    %21 = arith.addf %16, %20 : vector<24x192xf32>
    %c3 = arith.constant 3 : index
    %c0_23 = arith.constant 0 : index
    %22 = vector.load %arg13[%c3, %c0_23] : memref<32x64xf32, #tpu.memory_space<vmem>>, vector<24x64xf32>
    %c3_24 = arith.constant 3 : index
    %c0_25 = arith.constant 0 : index
    %c0_26 = arith.constant 0 : index
    %23 = vector.load %arg2[%c3_24, %c0_25, %c0_26] : memref<9x64x192xf32, #tpu.memory_space<vmem>>, vector<1x64x192xf32>
    %24 = vector.shape_cast %23 : vector<1x64x192xf32> to vector<64x192xf32>
    %cst_27 = arith.constant dense<0.000000e+00> : vector<24x192xf32>
    %25 = tpu.matmul %22, %24, %cst_27 {dimension_numbers = #tpu.dot_dimension_numbers<[1], [0], [0], [1], [0, 0, 1, 1], [], []>} : vector<24x64xf32>, vector<64x192xf32>, vector<24x192xf32> -> vector<24x192xf32>
    %26 = arith.addf %21, %25 : vector<24x192xf32>
    %c4 = arith.constant 4 : index
    %c0_28 = arith.constant 0 : index
    %27 = vector.load %arg13[%c4, %c0_28] : memref<32x64xf32, #tpu.memory_space<vmem>>, vector<24x64xf32>
    %c4_29 = arith.constant 4 : index
    %c0_30 = arith.constant 0 : index
    %c0_31 = arith.constant 0 : index
    %28 = vector.load %arg2[%c4_29, %c0_30, %c0_31] : memref<9x64x192xf32, #tpu.memory_space<vmem>>, vector<1x64x192xf32>
    %29 = vector.shape_cast %28 : vector<1x64x192xf32> to vector<64x192xf32>
    %cst_32 = arith.constant dense<0.000000e+00> : vector<24x192xf32>
    %30 = tpu.matmul %27, %29, %cst_32 {dimension_numbers = #tpu.dot_dimension_numbers<[1], [0], [0], [1], [0, 0, 1, 1], [], []>} : vector<24x64xf32>, vector<64x192xf32>, vector<24x192xf32> -> vector<24x192xf32>
    %31 = arith.addf %26, %30 : vector<24x192xf32>
    %c5 = arith.constant 5 : index
    %c0_33 = arith.constant 0 : index
    %32 = vector.load %arg13[%c5, %c0_33] : memref<32x64xf32, #tpu.memory_space<vmem>>, vector<24x64xf32>
    %c5_34 = arith.constant 5 : index
    %c0_35 = arith.constant 0 : index
    %c0_36 = arith.constant 0 : index
    %33 = vector.load %arg2[%c5_34, %c0_35, %c0_36] : memref<9x64x192xf32, #tpu.memory_space<vmem>>, vector<1x64x192xf32>
    %34 = vector.shape_cast %33 : vector<1x64x192xf32> to vector<64x192xf32>
    %cst_37 = arith.constant dense<0.000000e+00> : vector<24x192xf32>
    %35 = tpu.matmul %32, %34, %cst_37 {dimension_numbers = #tpu.dot_dimension_numbers<[1], [0], [0], [1], [0, 0, 1, 1], [], []>} : vector<24x64xf32>, vector<64x192xf32>, vector<24x192xf32> -> vector<24x192xf32>
    %36 = arith.addf %31, %35 : vector<24x192xf32>
    %c6 = arith.constant 6 : index
    %c0_38 = arith.constant 0 : index
    %37 = vector.load %arg13[%c6, %c0_38] : memref<32x64xf32, #tpu.memory_space<vmem>>, vector<24x64xf32>
    %c6_39 = arith.constant 6 : index
    %c0_40 = arith.constant 0 : index
    %c0_41 = arith.constant 0 : index
    %38 = vector.load %arg2[%c6_39, %c0_40, %c0_41] : memref<9x64x192xf32, #tpu.memory_space<vmem>>, vector<1x64x192xf32>
    %39 = vector.shape_cast %38 : vector<1x64x192xf32> to vector<64x192xf32>
    %cst_42 = arith.constant dense<0.000000e+00> : vector<24x192xf32>
    %40 = tpu.matmul %37, %39, %cst_42 {dimension_numbers = #tpu.dot_dimension_numbers<[1], [0], [0], [1], [0, 0, 1, 1], [], []>} : vector<24x64xf32>, vector<64x192xf32>, vector<24x192xf32> -> vector<24x192xf32>
    %41 = arith.addf %36, %40 : vector<24x192xf32>
    %c7 = arith.constant 7 : index
    %c0_43 = arith.constant 0 : index
    %42 = vector.load %arg13[%c7, %c0_43] : memref<32x64xf32, #tpu.memory_space<vmem>>, vector<24x64xf32>
    %c7_44 = arith.constant 7 : index
    %c0_45 = arith.constant 0 : index
    %c0_46 = arith.constant 0 : index
    %43 = vector.load %arg2[%c7_44, %c0_45, %c0_46] : memref<9x64x192xf32, #tpu.memory_space<vmem>>, vector<1x64x192xf32>
    %44 = vector.shape_cast %43 : vector<1x64x192xf32> to vector<64x192xf32>
    %cst_47 = arith.constant dense<0.000000e+00> : vector<24x192xf32>
    %45 = tpu.matmul %42, %44, %cst_47 {dimension_numbers = #tpu.dot_dimension_numbers<[1], [0], [0], [1], [0, 0, 1, 1], [], []>} : vector<24x64xf32>, vector<64x192xf32>, vector<24x192xf32> -> vector<24x192xf32>
    %46 = arith.addf %41, %45 : vector<24x192xf32>
    %c8_48 = arith.constant 8 : index
    %c0_49 = arith.constant 0 : index
    %47 = vector.load %arg13[%c8_48, %c0_49] : memref<32x64xf32, #tpu.memory_space<vmem>>, vector<24x64xf32>
    %c8_50 = arith.constant 8 : index
    %c0_51 = arith.constant 0 : index
    %c0_52 = arith.constant 0 : index
    %48 = vector.load %arg2[%c8_50, %c0_51, %c0_52] : memref<9x64x192xf32, #tpu.memory_space<vmem>>, vector<1x64x192xf32>
    %49 = vector.shape_cast %48 : vector<1x64x192xf32> to vector<64x192xf32>
    %cst_53 = arith.constant dense<0.000000e+00> : vector<24x192xf32>
    %50 = tpu.matmul %47, %49, %cst_53 {dimension_numbers = #tpu.dot_dimension_numbers<[1], [0], [0], [1], [0, 0, 1, 1], [], []>} : vector<24x64xf32>, vector<64x192xf32>, vector<24x192xf32> -> vector<24x192xf32>
    %51 = arith.addf %46, %50 : vector<24x192xf32>
    %c0_54 = arith.constant 0 : index
    %c0_55 = arith.constant 0 : index
    %52 = vector.load %arg3[%c0_54, %c0_55] : memref<1x192xf32, #tpu.memory_space<vmem>>, vector<1x192xf32>
    %53 = vector.broadcast %52 : vector<1x192xf32> to vector<24x192xf32>
    %54 = arith.addf %51, %53 : vector<24x192xf32>
    %cst_56 = arith.constant 0.000000e+00 : f32
    %55 = vector.broadcast %cst_56 : f32 to vector<24x192xf32>
    %56 = arith.maximumf %54, %55 : vector<24x192xf32>
    %cst_57 = arith.constant 0.000000e+00 : f32
    %57 = vector.broadcast %cst_57 : f32 to vector<6x192xf32>
    %c0_58 = arith.constant 0 : index
    %c0_59 = arith.constant 0 : index
    %58 = vector.load %arg14[%c0_58, %c0_59] : memref<36x192xf32, #tpu.memory_space<vmem>>, vector<6x192xf32>
    tpu.vector_store %arg14[%c0_58, %c0_59], %57 {strides = array<i32>} : memref<36x192xf32, #tpu.memory_space<vmem>>, vector<6x192xf32>,
    %c30 = arith.constant 30 : index
    %c0_60 = arith.constant 0 : index
    %59 = vector.load %arg14[%c30, %c0_60] : memref<36x192xf32, #tpu.memory_space<vmem>>, vector<6x192xf32>
    tpu.vector_store %arg14[%c30, %c0_60], %57 {strides = array<i32>} : memref<36x192xf32, #tpu.memory_space<vmem>>, vector<6x192xf32>,
    %c6_61 = arith.constant 6 : index
    %c0_62 = arith.constant 0 : index
    %60 = vector.load %arg14[%c6_61, %c0_62] : memref<36x192xf32, #tpu.memory_space<vmem>>, vector<24x192xf32>
    tpu.vector_store %arg14[%c6_61, %c0_62], %56 {strides = array<i32>} : memref<36x192xf32, #tpu.memory_space<vmem>>, vector<24x192xf32>,
    %cst_63 = arith.constant 0.000000e+00 : f32
    %61 = vector.broadcast %cst_63 : f32 to vector<30x240xf32>
    %c0_64 = arith.constant 0 : index
    %c0_65 = arith.constant 0 : index
    %62 = vector.load %arg14[%c0_64, %c0_65] : memref<36x192xf32, #tpu.memory_space<vmem>>, vector<30x192xf32>
    %c0_66 = arith.constant 0 : index
    %c0_67 = arith.constant 0 : index
    %c0_68 = arith.constant 0 : index
    %63 = vector.load %arg4[%c0_66, %c0_67, %c0_68] : memref<7x192x240xf32, #tpu.memory_space<vmem>>, vector<1x192x240xf32>
    %64 = vector.shape_cast %63 : vector<1x192x240xf32> to vector<192x240xf32>
    %cst_69 = arith.constant dense<0.000000e+00> : vector<30x240xf32>
    %65 = tpu.matmul %62, %64, %cst_69 {dimension_numbers = #tpu.dot_dimension_numbers<[1], [0], [0], [1], [0, 0, 1, 1], [], []>} : vector<30x192xf32>, vector<192x240xf32>, vector<30x240xf32> -> vector<30x240xf32>
    %66 = arith.addf %61, %65 : vector<30x240xf32>
    %c1_70 = arith.constant 1 : index
    %c0_71 = arith.constant 0 : index
    %67 = vector.load %arg14[%c1_70, %c0_71] : memref<36x192xf32, #tpu.memory_space<vmem>>, vector<30x192xf32>
    %c1_72 = arith.constant 1 : index
    %c0_73 = arith.constant 0 : index
    %c0_74 = arith.constant 0 : index
    %68 = vector.load %arg4[%c1_72, %c0_73, %c0_74] : memref<7x192x240xf32, #tpu.memory_space<vmem>>, vector<1x192x240xf32>
    %69 = vector.shape_cast %68 : vector<1x192x240xf32> to vector<192x240xf32>
    %cst_75 = arith.constant dense<0.000000e+00> : vector<30x240xf32>
    %70 = tpu.matmul %67, %69, %cst_75 {dimension_numbers = #tpu.dot_dimension_numbers<[1], [0], [0], [1], [0, 0, 1, 1], [], []>} : vector<30x192xf32>, vector<192x240xf32>, vector<30x240xf32> -> vector<30x240xf32>
    %71 = arith.addf %66, %70 : vector<30x240xf32>
    %c2_76 = arith.constant 2 : index
    %c0_77 = arith.constant 0 : index
    %72 = vector.load %arg14[%c2_76, %c0_77] : memref<36x192xf32, #tpu.memory_space<vmem>>, vector<30x192xf32>
    %c2_78 = arith.constant 2 : index
    %c0_79 = arith.constant 0 : index
    %c0_80 = arith.constant 0 : index
    %73 = vector.load %arg4[%c2_78, %c0_79, %c0_80] : memref<7x192x240xf32, #tpu.memory_space<vmem>>, vector<1x192x240xf32>
    %74 = vector.shape_cast %73 : vector<1x192x240xf32> to vector<192x240xf32>
    %cst_81 = arith.constant dense<0.000000e+00> : vector<30x240xf32>
    %75 = tpu.matmul %72, %74, %cst_81 {dimension_numbers = #tpu.dot_dimension_numbers<[1], [0], [0], [1], [0, 0, 1, 1], [], []>} : vector<30x192xf32>, vector<192x240xf32>, vector<30x240xf32> -> vector<30x240xf32>
    %76 = arith.addf %71, %75 : vector<30x240xf32>
    %c3_82 = arith.constant 3 : index
    %c0_83 = arith.constant 0 : index
    %77 = vector.load %arg14[%c3_82, %c0_83] : memref<36x192xf32, #tpu.memory_space<vmem>>, vector<30x192xf32>
    %c3_84 = arith.constant 3 : index
    %c0_85 = arith.constant 0 : index
    %c0_86 = arith.constant 0 : index
    %78 = vector.load %arg4[%c3_84, %c0_85, %c0_86] : memref<7x192x240xf32, #tpu.memory_space<vmem>>, vector<1x192x240xf32>
    %79 = vector.shape_cast %78 : vector<1x192x240xf32> to vector<192x240xf32>
    %cst_87 = arith.constant dense<0.000000e+00> : vector<30x240xf32>
    %80 = tpu.matmul %77, %79, %cst_87 {dimension_numbers = #tpu.dot_dimension_numbers<[1], [0], [0], [1], [0, 0, 1, 1], [], []>} : vector<30x192xf32>, vector<192x240xf32>, vector<30x240xf32> -> vector<30x240xf32>
    %81 = arith.addf %76, %80 : vector<30x240xf32>
    %c4_88 = arith.constant 4 : index
    %c0_89 = arith.constant 0 : index
    %82 = vector.load %arg14[%c4_88, %c0_89] : memref<36x192xf32, #tpu.memory_space<vmem>>, vector<30x192xf32>
    %c4_90 = arith.constant 4 : index
    %c0_91 = arith.constant 0 : index
    %c0_92 = arith.constant 0 : index
    %83 = vector.load %arg4[%c4_90, %c0_91, %c0_92] : memref<7x192x240xf32, #tpu.memory_space<vmem>>, vector<1x192x240xf32>
    %84 = vector.shape_cast %83 : vector<1x192x240xf32> to vector<192x240xf32>
    %cst_93 = arith.constant dense<0.000000e+00> : vector<30x240xf32>
    %85 = tpu.matmul %82, %84, %cst_93 {dimension_numbers = #tpu.dot_dimension_numbers<[1], [0], [0], [1], [0, 0, 1, 1], [], []>} : vector<30x192xf32>, vector<192x240xf32>, vector<30x240xf32> -> vector<30x240xf32>
    %86 = arith.addf %81, %85 : vector<30x240xf32>
    %c5_94 = arith.constant 5 : index
    %c0_95 = arith.constant 0 : index
    %87 = vector.load %arg14[%c5_94, %c0_95] : memref<36x192xf32, #tpu.memory_space<vmem>>, vector<30x192xf32>
    %c5_96 = arith.constant 5 : index
    %c0_97 = arith.constant 0 : index
    %c0_98 = arith.constant 0 : index
    %88 = vector.load %arg4[%c5_96, %c0_97, %c0_98] : memref<7x192x240xf32, #tpu.memory_space<vmem>>, vector<1x192x240xf32>
    %89 = vector.shape_cast %88 : vector<1x192x240xf32> to vector<192x240xf32>
    %cst_99 = arith.constant dense<0.000000e+00> : vector<30x240xf32>
    %90 = tpu.matmul %87, %89, %cst_99 {dimension_numbers = #tpu.dot_dimension_numbers<[1], [0], [0], [1], [0, 0, 1, 1], [], []>} : vector<30x192xf32>, vector<192x240xf32>, vector<30x240xf32> -> vector<30x240xf32>
    %91 = arith.addf %86, %90 : vector<30x240xf32>
    %c6_100 = arith.constant 6 : index
    %c0_101 = arith.constant 0 : index
    %92 = vector.load %arg14[%c6_100, %c0_101] : memref<36x192xf32, #tpu.memory_space<vmem>>, vector<30x192xf32>
    %c6_102 = arith.constant 6 : index
    %c0_103 = arith.constant 0 : index
    %c0_104 = arith.constant 0 : index
    %93 = vector.load %arg4[%c6_102, %c0_103, %c0_104] : memref<7x192x240xf32, #tpu.memory_space<vmem>>, vector<1x192x240xf32>
    %94 = vector.shape_cast %93 : vector<1x192x240xf32> to vector<192x240xf32>
    %cst_105 = arith.constant dense<0.000000e+00> : vector<30x240xf32>
    %95 = tpu.matmul %92, %94, %cst_105 {dimension_numbers = #tpu.dot_dimension_numbers<[1], [0], [0], [1], [0, 0, 1, 1], [], []>} : vector<30x192xf32>, vector<192x240xf32>, vector<30x240xf32> -> vector<30x240xf32>
    %96 = arith.addf %91, %95 : vector<30x240xf32>
    %c0_106 = arith.constant 0 : index
    %c0_107 = arith.constant 0 : index
    %97 = vector.load %arg5[%c0_106, %c0_107] : memref<1x240xf32, #tpu.memory_space<vmem>>, vector<1x240xf32>
    %98 = vector.broadcast %97 : vector<1x240xf32> to vector<30x240xf32>
    %99 = arith.addf %96, %98 : vector<30x240xf32>
    %cst_108 = arith.constant 0.000000e+00 : f32
    %100 = vector.broadcast %cst_108 : f32 to vector<30x240xf32>
    %101 = arith.maximumf %99, %100 : vector<30x240xf32>
    %cst_109 = arith.constant 0.000000e+00 : f32
    %102 = vector.broadcast %cst_109 : f32 to vector<6x240xf32>
    %c0_110 = arith.constant 0 : index
    %c0_111 = arith.constant 0 : index
    %103 = vector.load %arg15[%c0_110, %c0_111] : memref<42x240xf32, #tpu.memory_space<vmem>>, vector<6x240xf32>
    tpu.vector_store %arg15[%c0_110, %c0_111], %102 {strides = array<i32>} : memref<42x240xf32, #tpu.memory_space<vmem>>, vector<6x240xf32>,
    %c36 = arith.constant 36 : index
    %c0_112 = arith.constant 0 : index
    %104 = vector.load %arg15[%c36, %c0_112] : memref<42x240xf32, #tpu.memory_space<vmem>>, vector<6x240xf32>
    tpu.vector_store %arg15[%c36, %c0_112], %102 {strides = array<i32>} : memref<42x240xf32, #tpu.memory_space<vmem>>, vector<6x240xf32>,
    %c6_113 = arith.constant 6 : index
    %c0_114 = arith.constant 0 : index
    %105 = vector.load %arg15[%c6_113, %c0_114] : memref<42x240xf32, #tpu.memory_space<vmem>>, vector<30x240xf32>
    tpu.vector_store %arg15[%c6_113, %c0_114], %101 {strides = array<i32>} : memref<42x240xf32, #tpu.memory_space<vmem>>, vector<30x240xf32>,
    %cst_115 = arith.constant 0.000000e+00 : f32
    %106 = vector.broadcast %cst_115 : f32 to vector<36x288xf32>
    %c0_116 = arith.constant 0 : index
    %c0_117 = arith.constant 0 : index
    %107 = vector.load %arg15[%c0_116, %c0_117] : memref<42x240xf32, #tpu.memory_space<vmem>>, vector<36x240xf32>
    %c0_118 = arith.constant 0 : index
    %c0_119 = arith.constant 0 : index
    %c0_120 = arith.constant 0 : index
    %108 = vector.load %arg6[%c0_118, %c0_119, %c0_120] : memref<7x240x288xf32, #tpu.memory_space<vmem>>, vector<1x240x288xf32>
    %109 = vector.shape_cast %108 : vector<1x240x288xf32> to vector<240x288xf32>
    %cst_121 = arith.constant dense<0.000000e+00> : vector<36x288xf32>
    %110 = tpu.matmul %107, %109, %cst_121 {dimension_numbers = #tpu.dot_dimension_numbers<[1], [0], [0], [1], [0, 0, 1, 1], [], []>} : vector<36x240xf32>, vector<240x288xf32>, vector<36x288xf32> -> vector<36x288xf32>
    %111 = arith.addf %106, %110 : vector<36x288xf32>
    %c1_122 = arith.constant 1 : index
    %c0_123 = arith.constant 0 : index
    %112 = vector.load %arg15[%c1_122, %c0_123] : memref<42x240xf32, #tpu.memory_space<vmem>>, vector<36x240xf32>
    %c1_124 = arith.constant 1 : index
    %c0_125 = arith.constant 0 : index
    %c0_126 = arith.constant 0 : index
    %113 = vector.load %arg6[%c1_124, %c0_125, %c0_126] : memref<7x240x288xf32, #tpu.memory_space<vmem>>, vector<1x240x288xf32>
    %114 = vector.shape_cast %113 : vector<1x240x288xf32> to vector<240x288xf32>
    %cst_127 = arith.constant dense<0.000000e+00> : vector<36x288xf32>
    %115 = tpu.matmul %112, %114, %cst_127 {dimension_numbers = #tpu.dot_dimension_numbers<[1], [0], [0], [1], [0, 0, 1, 1], [], []>} : vector<36x240xf32>, vector<240x288xf32>, vector<36x288xf32> -> vector<36x288xf32>
    %116 = arith.addf %111, %115 : vector<36x288xf32>
    %c2_128 = arith.constant 2 : index
    %c0_129 = arith.constant 0 : index
    %117 = vector.load %arg15[%c2_128, %c0_129] : memref<42x240xf32, #tpu.memory_space<vmem>>, vector<36x240xf32>
    %c2_130 = arith.constant 2 : index
    %c0_131 = arith.constant 0 : index
    %c0_132 = arith.constant 0 : index
    %118 = vector.load %arg6[%c2_130, %c0_131, %c0_132] : memref<7x240x288xf32, #tpu.memory_space<vmem>>, vector<1x240x288xf32>
    %119 = vector.shape_cast %118 : vector<1x240x288xf32> to vector<240x288xf32>
    %cst_133 = arith.constant dense<0.000000e+00> : vector<36x288xf32>
    %120 = tpu.matmul %117, %119, %cst_133 {dimension_numbers = #tpu.dot_dimension_numbers<[1], [0], [0], [1], [0, 0, 1, 1], [], []>} : vector<36x240xf32>, vector<240x288xf32>, vector<36x288xf32> -> vector<36x288xf32>
    %121 = arith.addf %116, %120 : vector<36x288xf32>
    %c3_134 = arith.constant 3 : index
    %c0_135 = arith.constant 0 : index
    %122 = vector.load %arg15[%c3_134, %c0_135] : memref<42x240xf32, #tpu.memory_space<vmem>>, vector<36x240xf32>
    %c3_136 = arith.constant 3 : index
    %c0_137 = arith.constant 0 : index
    %c0_138 = arith.constant 0 : index
    %123 = vector.load %arg6[%c3_136, %c0_137, %c0_138] : memref<7x240x288xf32, #tpu.memory_space<vmem>>, vector<1x240x288xf32>
    %124 = vector.shape_cast %123 : vector<1x240x288xf32> to vector<240x288xf32>
    %cst_139 = arith.constant dense<0.000000e+00> : vector<36x288xf32>
    %125 = tpu.matmul %122, %124, %cst_139 {dimension_numbers = #tpu.dot_dimension_numbers<[1], [0], [0], [1], [0, 0, 1, 1], [], []>} : vector<36x240xf32>, vector<240x288xf32>, vector<36x288xf32> -> vector<36x288xf32>
    %126 = arith.addf %121, %125 : vector<36x288xf32>
    %c4_140 = arith.constant 4 : index
    %c0_141 = arith.constant 0 : index
    %127 = vector.load %arg15[%c4_140, %c0_141] : memref<42x240xf32, #tpu.memory_space<vmem>>, vector<36x240xf32>
    %c4_142 = arith.constant 4 : index
    %c0_143 = arith.constant 0 : index
    %c0_144 = arith.constant 0 : index
    %128 = vector.load %arg6[%c4_142, %c0_143, %c0_144] : memref<7x240x288xf32, #tpu.memory_space<vmem>>, vector<1x240x288xf32>
    %129 = vector.shape_cast %128 : vector<1x240x288xf32> to vector<240x288xf32>
    %cst_145 = arith.constant dense<0.000000e+00> : vector<36x288xf32>
    %130 = tpu.matmul %127, %129, %cst_145 {dimension_numbers = #tpu.dot_dimension_numbers<[1], [0], [0], [1], [0, 0, 1, 1], [], []>} : vector<36x240xf32>, vector<240x288xf32>, vector<36x288xf32> -> vector<36x288xf32>
    %131 = arith.addf %126, %130 : vector<36x288xf32>
    %c5_146 = arith.constant 5 : index
    %c0_147 = arith.constant 0 : index
    %132 = vector.load %arg15[%c5_146, %c0_147] : memref<42x240xf32, #tpu.memory_space<vmem>>, vector<36x240xf32>
    %c5_148 = arith.constant 5 : index
    %c0_149 = arith.constant 0 : index
    %c0_150 = arith.constant 0 : index
    %133 = vector.load %arg6[%c5_148, %c0_149, %c0_150] : memref<7x240x288xf32, #tpu.memory_space<vmem>>, vector<1x240x288xf32>
    %134 = vector.shape_cast %133 : vector<1x240x288xf32> to vector<240x288xf32>
    %cst_151 = arith.constant dense<0.000000e+00> : vector<36x288xf32>
    %135 = tpu.matmul %132, %134, %cst_151 {dimension_numbers = #tpu.dot_dimension_numbers<[1], [0], [0], [1], [0, 0, 1, 1], [], []>} : vector<36x240xf32>, vector<240x288xf32>, vector<36x288xf32> -> vector<36x288xf32>
    %136 = arith.addf %131, %135 : vector<36x288xf32>
    %c6_152 = arith.constant 6 : index
    %c0_153 = arith.constant 0 : index
    %137 = vector.load %arg15[%c6_152, %c0_153] : memref<42x240xf32, #tpu.memory_space<vmem>>, vector<36x240xf32>
    %c6_154 = arith.constant 6 : index
    %c0_155 = arith.constant 0 : index
    %c0_156 = arith.constant 0 : index
    %138 = vector.load %arg6[%c6_154, %c0_155, %c0_156] : memref<7x240x288xf32, #tpu.memory_space<vmem>>, vector<1x240x288xf32>
    %139 = vector.shape_cast %138 : vector<1x240x288xf32> to vector<240x288xf32>
    %cst_157 = arith.constant dense<0.000000e+00> : vector<36x288xf32>
    %140 = tpu.matmul %137, %139, %cst_157 {dimension_numbers = #tpu.dot_dimension_numbers<[1], [0], [0], [1], [0, 0, 1, 1], [], []>} : vector<36x240xf32>, vector<240x288xf32>, vector<36x288xf32> -> vector<36x288xf32>
    %141 = arith.addf %136, %140 : vector<36x288xf32>
    %c0_158 = arith.constant 0 : index
    %c0_159 = arith.constant 0 : index
    %142 = vector.load %arg7[%c0_158, %c0_159] : memref<1x288xf32, #tpu.memory_space<vmem>>, vector<1x288xf32>
    %143 = vector.broadcast %142 : vector<1x288xf32> to vector<36x288xf32>
    %144 = arith.addf %141, %143 : vector<36x288xf32>
    %cst_160 = arith.constant 0.000000e+00 : f32
    %145 = vector.broadcast %cst_160 : f32 to vector<36x288xf32>
    %146 = arith.maximumf %144, %145 : vector<36x288xf32>
    %cst_161 = arith.constant 0.000000e+00 : f32
    %147 = vector.broadcast %cst_161 : f32 to vector<4x288xf32>
    %c0_162 = arith.constant 0 : index
    %c0_163 = arith.constant 0 : index
    %148 = vector.load %arg16[%c0_162, %c0_163] : memref<44x288xf32, #tpu.memory_space<vmem>>, vector<4x288xf32>
    tpu.vector_store %arg16[%c0_162, %c0_163], %147 {strides = array<i32>} : memref<44x288xf32, #tpu.memory_space<vmem>>, vector<4x288xf32>,
    %c40 = arith.constant 40 : index
    %c0_164 = arith.constant 0 : index
    %149 = vector.load %arg16[%c40, %c0_164] : memref<44x288xf32, #tpu.memory_space<vmem>>, vector<4x288xf32>
    tpu.vector_store %arg16[%c40, %c0_164], %147 {strides = array<i32>} : memref<44x288xf32, #tpu.memory_space<vmem>>, vector<4x288xf32>,
    %c4_165 = arith.constant 4 : index
    %c0_166 = arith.constant 0 : index
    %150 = vector.load %arg16[%c4_165, %c0_166] : memref<44x288xf32, #tpu.memory_space<vmem>>, vector<36x288xf32>
    tpu.vector_store %arg16[%c4_165, %c0_166], %146 {strides = array<i32>} : memref<44x288xf32, #tpu.memory_space<vmem>>, vector<36x288xf32>,
    %cst_167 = arith.constant 0.000000e+00 : f32
    %151 = vector.broadcast %cst_167 : f32 to vector<40x320xf32>
    %c0_168 = arith.constant 0 : index
    %c0_169 = arith.constant 0 : index
    %152 = vector.load %arg16[%c0_168, %c0_169] : memref<44x288xf32, #tpu.memory_space<vmem>>, vector<40x288xf32>
    %c0_170 = arith.constant 0 : index
    %c0_171 = arith.constant 0 : index
    %c0_172 = arith.constant 0 : index
    %153 = vector.load %arg8[%c0_170, %c0_171, %c0_172] : memref<5x288x320xf32, #tpu.memory_space<vmem>>, vector<1x288x320xf32>
    %154 = vector.shape_cast %153 : vector<1x288x320xf32> to vector<288x320xf32>
    %cst_173 = arith.constant dense<0.000000e+00> : vector<40x320xf32>
    %155 = tpu.matmul %152, %154, %cst_173 {dimension_numbers = #tpu.dot_dimension_numbers<[1], [0], [0], [1], [0, 0, 1, 1], [], []>} : vector<40x288xf32>, vector<288x320xf32>, vector<40x320xf32> -> vector<40x320xf32>
    %156 = arith.addf %151, %155 : vector<40x320xf32>
    %c1_174 = arith.constant 1 : index
    %c0_175 = arith.constant 0 : index
    %157 = vector.load %arg16[%c1_174, %c0_175] : memref<44x288xf32, #tpu.memory_space<vmem>>, vector<40x288xf32>
    %c1_176 = arith.constant 1 : index
    %c0_177 = arith.constant 0 : index
    %c0_178 = arith.constant 0 : index
    %158 = vector.load %arg8[%c1_176, %c0_177, %c0_178] : memref<5x288x320xf32, #tpu.memory_space<vmem>>, vector<1x288x320xf32>
    %159 = vector.shape_cast %158 : vector<1x288x320xf32> to vector<288x320xf32>
    %cst_179 = arith.constant dense<0.000000e+00> : vector<40x320xf32>
    %160 = tpu.matmul %157, %159, %cst_179 {dimension_numbers = #tpu.dot_dimension_numbers<[1], [0], [0], [1], [0, 0, 1, 1], [], []>} : vector<40x288xf32>, vector<288x320xf32>, vector<40x320xf32> -> vector<40x320xf32>
    %161 = arith.addf %156, %160 : vector<40x320xf32>
    %c2_180 = arith.constant 2 : index
    %c0_181 = arith.constant 0 : index
    %162 = vector.load %arg16[%c2_180, %c0_181] : memref<44x288xf32, #tpu.memory_space<vmem>>, vector<40x288xf32>
    %c2_182 = arith.constant 2 : index
    %c0_183 = arith.constant 0 : index
    %c0_184 = arith.constant 0 : index
    %163 = vector.load %arg8[%c2_182, %c0_183, %c0_184] : memref<5x288x320xf32, #tpu.memory_space<vmem>>, vector<1x288x320xf32>
    %164 = vector.shape_cast %163 : vector<1x288x320xf32> to vector<288x320xf32>
    %cst_185 = arith.constant dense<0.000000e+00> : vector<40x320xf32>
    %165 = tpu.matmul %162, %164, %cst_185 {dimension_numbers = #tpu.dot_dimension_numbers<[1], [0], [0], [1], [0, 0, 1, 1], [], []>} : vector<40x288xf32>, vector<288x320xf32>, vector<40x320xf32> -> vector<40x320xf32>
    %166 = arith.addf %161, %165 : vector<40x320xf32>
    %c3_186 = arith.constant 3 : index
    %c0_187 = arith.constant 0 : index
    %167 = vector.load %arg16[%c3_186, %c0_187] : memref<44x288xf32, #tpu.memory_space<vmem>>, vector<40x288xf32>
    %c3_188 = arith.constant 3 : index
    %c0_189 = arith.constant 0 : index
    %c0_190 = arith.constant 0 : index
    %168 = vector.load %arg8[%c3_188, %c0_189, %c0_190] : memref<5x288x320xf32, #tpu.memory_space<vmem>>, vector<1x288x320xf32>
    %169 = vector.shape_cast %168 : vector<1x288x320xf32> to vector<288x320xf32>
    %cst_191 = arith.constant dense<0.000000e+00> : vector<40x320xf32>
    %170 = tpu.matmul %167, %169, %cst_191 {dimension_numbers = #tpu.dot_dimension_numbers<[1], [0], [0], [1], [0, 0, 1, 1], [], []>} : vector<40x288xf32>, vector<288x320xf32>, vector<40x320xf32> -> vector<40x320xf32>
    %171 = arith.addf %166, %170 : vector<40x320xf32>
    %c4_192 = arith.constant 4 : index
    %c0_193 = arith.constant 0 : index
    %172 = vector.load %arg16[%c4_192, %c0_193] : memref<44x288xf32, #tpu.memory_space<vmem>>, vector<40x288xf32>
    %c4_194 = arith.constant 4 : index
    %c0_195 = arith.constant 0 : index
    %c0_196 = arith.constant 0 : index
    %173 = vector.load %arg8[%c4_194, %c0_195, %c0_196] : memref<5x288x320xf32, #tpu.memory_space<vmem>>, vector<1x288x320xf32>
    %174 = vector.shape_cast %173 : vector<1x288x320xf32> to vector<288x320xf32>
    %cst_197 = arith.constant dense<0.000000e+00> : vector<40x320xf32>
    %175 = tpu.matmul %172, %174, %cst_197 {dimension_numbers = #tpu.dot_dimension_numbers<[1], [0], [0], [1], [0, 0, 1, 1], [], []>} : vector<40x288xf32>, vector<288x320xf32>, vector<40x320xf32> -> vector<40x320xf32>
    %176 = arith.addf %171, %175 : vector<40x320xf32>
    %c0_198 = arith.constant 0 : index
    %c0_199 = arith.constant 0 : index
    %177 = vector.load %arg9[%c0_198, %c0_199] : memref<1x320xf32, #tpu.memory_space<vmem>>, vector<1x320xf32>
    %178 = vector.broadcast %177 : vector<1x320xf32> to vector<40x320xf32>
    %179 = arith.addf %176, %178 : vector<40x320xf32>
    %cst_200 = arith.constant 0.000000e+00 : f32
    %180 = vector.broadcast %cst_200 : f32 to vector<40x320xf32>
    %181 = arith.maximumf %179, %180 : vector<40x320xf32>
    %cst_201 = arith.constant 0.000000e+00 : f32
    %182 = vector.broadcast %cst_201 : f32 to vector<1x320xf32>
    %c0_202 = arith.constant 0 : index
    %c0_203 = arith.constant 0 : index
    %183 = vector.load %arg17[%c0_202, %c0_203] : memref<42x320xf32, #tpu.memory_space<vmem>>, vector<1x320xf32>
    tpu.vector_store %arg17[%c0_202, %c0_203], %182 {strides = array<i32>} : memref<42x320xf32, #tpu.memory_space<vmem>>, vector<1x320xf32>,
    %c41 = arith.constant 41 : index
    %c0_204 = arith.constant 0 : index
    %184 = vector.load %arg17[%c41, %c0_204] : memref<42x320xf32, #tpu.memory_space<vmem>>, vector<1x320xf32>
    tpu.vector_store %arg17[%c41, %c0_204], %182 {strides = array<i32>} : memref<42x320xf32, #tpu.memory_space<vmem>>, vector<1x320xf32>,
    %c1_205 = arith.constant 1 : index
    %c0_206 = arith.constant 0 : index
    %185 = vector.load %arg17[%c1_205, %c0_206] : memref<42x320xf32, #tpu.memory_space<vmem>>, vector<40x320xf32>
    tpu.vector_store %arg17[%c1_205, %c0_206], %181 {strides = array<i32>} : memref<42x320xf32, #tpu.memory_space<vmem>>, vector<40x320xf32>,
    %cst_207 = arith.constant 0.000000e+00 : f32
    %186 = vector.broadcast %cst_207 : f32 to vector<40x40xf32>
    %c0_208 = arith.constant 0 : index
    %c0_209 = arith.constant 0 : index
    %187 = vector.load %arg17[%c0_208, %c0_209] : memref<42x320xf32, #tpu.memory_space<vmem>>, vector<40x320xf32>
    %c0_210 = arith.constant 0 : index
    %c0_211 = arith.constant 0 : index
    %c0_212 = arith.constant 0 : index
    %188 = vector.load %arg10[%c0_210, %c0_211, %c0_212] : memref<3x320x40xf32, #tpu.memory_space<vmem>>, vector<1x320x40xf32>
    %189 = vector.shape_cast %188 : vector<1x320x40xf32> to vector<320x40xf32>
    %cst_213 = arith.constant dense<0.000000e+00> : vector<40x40xf32>
    %190 = tpu.matmul %187, %189, %cst_213 {dimension_numbers = #tpu.dot_dimension_numbers<[1], [0], [0], [1], [0, 0, 1, 1], [], []>} : vector<40x320xf32>, vector<320x40xf32>, vector<40x40xf32> -> vector<40x40xf32>
    %191 = arith.addf %186, %190 : vector<40x40xf32>
    %c1_214 = arith.constant 1 : index
    %c0_215 = arith.constant 0 : index
    %192 = vector.load %arg17[%c1_214, %c0_215] : memref<42x320xf32, #tpu.memory_space<vmem>>, vector<40x320xf32>
    %c1_216 = arith.constant 1 : index
    %c0_217 = arith.constant 0 : index
    %c0_218 = arith.constant 0 : index
    %193 = vector.load %arg10[%c1_216, %c0_217, %c0_218] : memref<3x320x40xf32, #tpu.memory_space<vmem>>, vector<1x320x40xf32>
    %194 = vector.shape_cast %193 : vector<1x320x40xf32> to vector<320x40xf32>
    %cst_219 = arith.constant dense<0.000000e+00> : vector<40x40xf32>
    %195 = tpu.matmul %192, %194, %cst_219 {dimension_numbers = #tpu.dot_dimension_numbers<[1], [0], [0], [1], [0, 0, 1, 1], [], []>} : vector<40x320xf32>, vector<320x40xf32>, vector<40x40xf32> -> vector<40x40xf32>
    %196 = arith.addf %191, %195 : vector<40x40xf32>
    %c2_220 = arith.constant 2 : index
    %c0_221 = arith.constant 0 : index
    %197 = vector.load %arg17[%c2_220, %c0_221] : memref<42x320xf32, #tpu.memory_space<vmem>>, vector<40x320xf32>
    %c2_222 = arith.constant 2 : index
    %c0_223 = arith.constant 0 : index
    %c0_224 = arith.constant 0 : index
    %198 = vector.load %arg10[%c2_222, %c0_223, %c0_224] : memref<3x320x40xf32, #tpu.memory_space<vmem>>, vector<1x320x40xf32>
    %199 = vector.shape_cast %198 : vector<1x320x40xf32> to vector<320x40xf32>
    %cst_225 = arith.constant dense<0.000000e+00> : vector<40x40xf32>
    %200 = tpu.matmul %197, %199, %cst_225 {dimension_numbers = #tpu.dot_dimension_numbers<[1], [0], [0], [1], [0, 0, 1, 1], [], []>} : vector<40x320xf32>, vector<320x40xf32>, vector<40x40xf32> -> vector<40x40xf32>
    %201 = arith.addf %196, %200 : vector<40x40xf32>
    %c0_226 = arith.constant 0 : index
    %c0_227 = arith.constant 0 : index
    %202 = vector.load %arg11[%c0_226, %c0_227] : memref<1x40xf32, #tpu.memory_space<vmem>>, vector<1x40xf32>
    %203 = vector.broadcast %202 : vector<1x40xf32> to vector<40x40xf32>
    %204 = arith.addf %201, %203 : vector<40x40xf32>
    %205 = arith.negf %204 : vector<40x40xf32>
    %206 = math.exp %205 : vector<40x40xf32>
    %cst_228 = arith.constant 1.000000e+00 : f32
    %207 = vector.broadcast %cst_228 : f32 to vector<40x40xf32>
    %208 = arith.addf %207, %206 : vector<40x40xf32>
    %209 = arith.divf %207, %208 : vector<40x40xf32>
    %c0_229 = arith.constant 0 : index
    %c0_230 = arith.constant 0 : index
    %c0_231 = arith.constant 0 : index
    %c0_232 = arith.constant 0 : index
    %210 = vector.load %arg12[%c0_229, %c0_230, %c0_231, %c0_232] : memref<1x1x40x40xf32, #tpu.memory_space<vmem>>, vector<1x1x40x40xf32>
    %211 = vector.shape_cast %210 : vector<1x1x40x40xf32> to vector<40x40xf32>
    %212 = vector.shape_cast %209 : vector<40x40xf32> to vector<1x1x40x40xf32>
    tpu.vector_store %arg12[%c0_229, %c0_230, %c0_231, %c0_232], %212 {strides = array<i32>} : memref<1x1x40x40xf32, #tpu.memory_space<vmem>>, vector<1x1x40x40xf32>,
    return
  }
  func.func @transform_0(%arg0: i32) -> (i32, i32, i32) {
    %c0_i32 = arith.constant 0 : i32
    %c0_i32_0 = arith.constant 0 : i32
    %c0_i32_1 = arith.constant 0 : i32
    return %arg0, %c0_i32, %c0_i32_0 : i32, i32, i32
  }
  func.func @transform_1(%arg0: i32) -> (i32, i32, i32) {
    %c0_i32 = arith.constant 0 : i32
    %c0_i32_0 = arith.constant 0 : i32
    %c0_i32_1 = arith.constant 0 : i32
    %c0_i32_2 = arith.constant 0 : i32
    return %c0_i32, %c0_i32_0, %c0_i32_1 : i32, i32, i32
  }
  func.func @transform_2(%arg0: i32) -> (i32, i32) {
    %c0_i32 = arith.constant 0 : i32
    %c0_i32_0 = arith.constant 0 : i32
    %c0_i32_1 = arith.constant 0 : i32
    return %c0_i32, %c0_i32_0 : i32, i32
  }
  func.func @transform_3(%arg0: i32) -> (i32, i32, i32) {
    %c0_i32 = arith.constant 0 : i32
    %c0_i32_0 = arith.constant 0 : i32
    %c0_i32_1 = arith.constant 0 : i32
    %c0_i32_2 = arith.constant 0 : i32
    return %c0_i32, %c0_i32_0, %c0_i32_1 : i32, i32, i32
  }
  func.func @transform_4(%arg0: i32) -> (i32, i32) {
    %c0_i32 = arith.constant 0 : i32
    %c0_i32_0 = arith.constant 0 : i32
    %c0_i32_1 = arith.constant 0 : i32
    return %c0_i32, %c0_i32_0 : i32, i32
  }
  func.func @transform_5(%arg0: i32) -> (i32, i32, i32) {
    %c0_i32 = arith.constant 0 : i32
    %c0_i32_0 = arith.constant 0 : i32
    %c0_i32_1 = arith.constant 0 : i32
    %c0_i32_2 = arith.constant 0 : i32
    return %c0_i32, %c0_i32_0, %c0_i32_1 : i32, i32, i32
  }
  func.func @transform_6(%arg0: i32) -> (i32, i32) {
    %c0_i32 = arith.constant 0 : i32
    %c0_i32_0 = arith.constant 0 : i32
    %c0_i32_1 = arith.constant 0 : i32
    return %c0_i32, %c0_i32_0 : i32, i32
  }
  func.func @transform_7(%arg0: i32) -> (i32, i32, i32) {
    %c0_i32 = arith.constant 0 : i32
    %c0_i32_0 = arith.constant 0 : i32
    %c0_i32_1 = arith.constant 0 : i32
    %c0_i32_2 = arith.constant 0 : i32
    return %c0_i32, %c0_i32_0, %c0_i32_1 : i32, i32, i32
  }
  func.func @transform_8(%arg0: i32) -> (i32, i32) {
    %c0_i32 = arith.constant 0 : i32
    %c0_i32_0 = arith.constant 0 : i32
    %c0_i32_1 = arith.constant 0 : i32
    return %c0_i32, %c0_i32_0 : i32, i32
  }
  func.func @transform_9(%arg0: i32) -> (i32, i32, i32) {
    %c0_i32 = arith.constant 0 : i32
    %c0_i32_0 = arith.constant 0 : i32
    %c0_i32_1 = arith.constant 0 : i32
    %c0_i32_2 = arith.constant 0 : i32
    return %c0_i32, %c0_i32_0, %c0_i32_1 : i32, i32, i32
  }
  func.func @transform_10(%arg0: i32) -> (i32, i32) {
    %c0_i32 = arith.constant 0 : i32
    %c0_i32_0 = arith.constant 0 : i32
    %c0_i32_1 = arith.constant 0 : i32
    return %c0_i32, %c0_i32_0 : i32, i32
  }
  func.func @transform_11(%arg0: i32) -> (i32, i32, i32, i32) {
    %c0_i32 = arith.constant 0 : i32
    %c0_i32_0 = arith.constant 0 : i32
    %c0_i32_1 = arith.constant 0 : i32
    %c0_i32_2 = arith.constant 0 : i32
    return %arg0, %c0_i32, %c0_i32_0, %c0_i32_1 : i32, i32, i32, i32
  }
}

</mosaic_0001>

<bundles_post_ra>
// kernel: tpu_custom_call.1
= control target key start
LH: loop header
LB: loop body
LE: loop exit
PB: predicated region body
PF: predicated region fallthrough
CT: control target
= control target key end

     0   :  { %16 = vsyncpa [#allocation8], 0  ;;  %s21086_s0 = inlined_call_operand.vmem [shape: f32[2,16,64], index: 0, kind: input, shape index: {}]   ;;  %s21087_s1 = inlined_call_operand.vmem [shape: f32[9,64,192], index: 1, kind: input, shape index: {}]   ;;  %s21088_s2 = inlined_call_operand.vmem [shape: f32[1,192], index: 2, kind: input, shape index: {}]   ;;  %s21089_s3 = inlined_call_operand.vmem [shape: f32[7,192,240], index: 3, kind: input, shape index: {}]   ;;  %s21090_s4 = inlined_call_operand.vmem [shape: f32[1,240], index: 4, kind: input, shape index: {}]   ;;  %s21091_s5 = inlined_call_operand.vmem [shape: f32[7,240,288], index: 5, kind: input, shape index: {}]   ;;  %s21092_s6 = inlined_call_operand.vmem [shape: f32[1,288], index: 6, kind: input, shape index: {}]   ;;  %s21093_s7 = inlined_call_operand.vmem [shape: f32[5,288,320], index: 7, kind: input, shape index: {}]   ;;  %s21094_s8 = inlined_call_operand.vmem [shape: f32[1,320], index: 8, kind: input, shape index: {}]   ;;  %s21095_s9 = inlined_call_operand.vmem [shape: f32[3,320,40], index: 9, kind: input, shape index: {}]   ;;  %s21096_s10 = inlined_call_operand.vmem [shape: f32[1,40], index: 10, kind: input, shape index: {}]   ;;  %s21097_s11 = inlined_call_operand.hbm [shape: f32[2,1,40,40], index: 11, kind: output, shape index: {}]  }
   0x1   :  { %18 = vsyncpa [#allocation8 + $0x1], 0  ;;  %s13820_s17 = smov 0   ;;  %s13822_s18 = smov 0  }
   0x2   :  { %s13824_s19 = smov 0   ;;  %s13826_s20 = smov 0  }
   0x3 LB: > { %21117 = sst [smem:[#allocation10_spill]] %s13748_s19  ;;  %s13841_s21 = sadd.s32 4294967295, %s13752_s20   ;;  %s13752_s20 = sphi %s13826_s20, %s21148_s20   ;;  %s13748_s19 = sphi %s13824_s19, %s21145_s19   ;;  %s13744_s18 = sphi %s13822_s18, %s21147_s18   ;;  %s13740_s17 = sphi %s13820_s17, %s21146_s17  }
   0x4   : > { %s9118_s22 = sadd.s32 4294967294, %s13752_s20   ;;  %s13845_s23 = sadd.s32 1, %s13752_s20  }
   0x5   : > { %s267_s24 = sadd.s32 1, %s13748_s19  ;;  %s264_s25 = ssub.s32 %s13752_s20, %s13845_s23 }
   0x6   : > { %p277_p0 = scmp.ne.s32.totalorder %s13748_s19, %s13744_s18  ;;  %p265_p1 = scmp.eq.s32.totalorder %s264_s25, 0 }
   0x7   : > { %p278_p2 = scmp.eq.s32.totalorder %s13841_s21, 1  ;;  %p283_p3 = scmp.ne.s32.totalorder %s13744_s18, %s13740_s17 }
   0x8   : > { %p284_p4 = scmp.eq.s32.totalorder %s9118_s22, 1  ;;  %p9121_p7 = scmp.ge.s32.totalorder %s13752_s20, 1 }
   0x9   : > { %s13856_s26 = scalar_select %p265_p1, %s13748_s19, %s267_s24  }
   0xa   : > { %p13858_p5 = por %p278_p2, %p277_p0  ;;  %p13862_p6 = por %p284_p4, %p283_p3 }
   0xb   : > { %21118 = sst [smem:[#allocation11_spill]] %s13856_s26  ;;  %p340_p8 = scmp.lt.s32.totalorder %s13752_s20, 3 }
   0xd   : > { %p341_p9 = pnand %p9121_p7, %p340_p8 }
   0xf   : > { %344 = sbr.rel (%p341_p9) target bundleno = 2612 (0xa34), region = 64 }
  0x16   : > { %v9125_v0 = vld [vmem:[%s21087_s1 + $0x88] sm:$0xff]  ;;  %v9127_v1 = vld [vmem:[%s21087_s1 + $0x98] sm:$0xff]  ;;  %v9124_v2 = vld [vmem:[%s21087_s1 + $0x80] sm:$0xff]  ;;  %p380_p10 = scmp.lt.s32.totalorder %s13841_s21, 1  ;;  %vm387_vm0 = vcmask 523264   ;;  %v21099_v7 = vmov 0.0  }
  0x17   : > { %v11460_v3 = vpack.c.bf16 %v9127_v1, %v9125_v0  ;;  %v9126_v4 = vld [vmem:[%s21087_s1 + $0x90] sm:$0xff]  ;;  %v9129_v5 = vld [vmem:[%s21087_s1 + $0xa8] sm:$0xff]  ;;  %v9131_v6 = vld [vmem:[%s21087_s1 + $0xb8] sm:$0xff]  ;;  %504 = vmatprep.mubr.f32.mxu0 %v21099_v7  ;;  %1465 = vst [vmem:[#allocation3] sm:$0x3f] %v21099_v7  ;;  %vm1469_vm2 = vcmask 523270  }
  0x18   : > { %1468 = vst [vmem:[#allocation3 + $0x30] sm:$0xc0] %v21099_v7  ;;  %1471 = vst [vmem:[#allocation3 + $0x40] sm:$0xf] %v21099_v7  ;;  %v11462_v8 = vpack.c.bf16 %v9126_v4, %v9124_v2  ;;  %v11464_v9 = vpack.c.bf16 %v9131_v6, %v9129_v5  ;;  %v9128_v10 = vld [vmem:[%s21087_s1 + $0xa0] sm:$0xff]  ;;  %v9130_v11 = vld [vmem:[%s21087_s1 + $0xb0] sm:$0xff] }
  0x19   : > { %2799 = vst [vmem:[#allocation4] sm:$0x3f] %v21099_v7  ;;  %2802 = vst [vmem:[#allocation4 + $0x40] sm:$0xf0] %v21099_v7  ;;  %v9133_v12 = vld [vmem:[%s21087_s1 + $0xc8] sm:$0xff]  ;;  %s381_s24 = scalar_select %p380_p10, %s13841_s21, 1  ;;  %11461 = vmatprep.subr.bf16.mxu0 %v11460_v3  ;;  %v11466_v14 = vpack.c.bf16 %v9130_v11, %v9128_v10 }
  0x1a   : > { %2805 = vst [vmem:[#allocation4 + $0x50] sm:$0x3] %v21099_v7  ;;  %5204 = vst [vmem:[#allocation5] sm:$0xf] %v21099_v7  ;;  %v9135_v13 = vld [vmem:[%s21087_s1 + $0xd8] sm:$0xff]  ;;  %11463 = vmatpush1.bf16.msra.mxu0 %v11462_v8  ;;  %v9132_v16 = vld [vmem:[%s21087_s1 + $0xc0] sm:$0xff] }
  0x1b   : > { %5205 = vst [vmem:[#allocation5 + $0x8] sm:$0xf] %v21099_v7  ;;  %5208 = vst [vmem:[#allocation5 + $0x78] sm:$0xf] %v21099_v7  ;;  %s10791_s30 = sshll.u32 %s381_s24, 4  ;;  %11465 = vmatprep.subr.bf16.mxu0 %v11464_v9  ;;  %v11468_v15 = vpack.c.bf16 %v9135_v13, %v9133_v12  ;;  %v9134_v17 = vld [vmem:[%s21087_s1 + $0xd0] sm:$0xff] }
  0x1c   : > { %5209 = vst [vmem:[#allocation5 + $0x80] sm:$0xf] %v21099_v7  ;;  %388 = vst.msk [vmem:[#allocation2] sm:$0xff] %vm387_vm0, %v21099_v7  ;;  %s384_s26 = scalar_lea.vmem %s21086_s0, %s10791_s30  ;;  %v9137_v18 = vld [vmem:[%s21087_s1 + $0xe8] sm:$0xff]  ;;  %v9139_v19 = vld [vmem:[%s21087_s1 + $0xf8] sm:$0xff]  ;;  %v11470_v21 = vpack.c.bf16 %v9134_v17, %v9132_v16  ;;  %vm1466_vm3 = vcmask 521216  }
  0x1d   : > { %389 = vst.msk [vmem:[#allocation2 + $0x18] sm:$0xff] %vm387_vm0, %v21099_v7  ;;  %v385_v20 = vld [vmem:[%s384_s26] sm:$0xff]  ;;  %v11472_v22 = vpack.c.bf16 %v9139_v19, %v9137_v18  ;;  %v9138_v24 = vld [vmem:[%s21087_s1 + $0xf0] sm:$0xff]  ;;  %v386_v25 = vld [vmem:[%s384_s26 + $0x8] sm:$0xff]  ;;  %vm1472_vm4 = vcmask 519168   ;;  %vm1480_vm5 = vcmask 1045504  }
  0x1e   : > { %390 = vst.msk [vmem:[#allocation2 + $0x8] sm:$0xff] %vm387_vm0, %v385_v20  ;;  %11467 = vmatpush1.bf16.msra.mxu0 %v11466_v14  ;;  %v9136_v23 = vld [vmem:[%s21087_s1 + $0xe0] sm:$0xff]  ;;  %v396_v26 = vld [vmem:[%s21087_s1 + $0x8] sm:$0xff]  ;;  %v398_v27 = vld [vmem:[%s21087_s1 + $0x18] sm:$0xff]  ;;  %vm1624_vm6 = vcmask 1046528   ;;  %vm2088_vm7 = vcmask 1044480  }
  0x1f   : > { %11469 = vmatprep.subr.bf16.mxu0 %v11468_v15  ;;  %391 = vst.msk [vmem:[#allocation2 + $0x10] sm:$0xff] %vm387_vm0, %v386_v25  ;;  %v11474_v28 = vpack.c.bf16 %v9138_v24, %v9136_v23  ;;  %v11476_v29 = vpack.c.bf16 %v398_v27, %v396_v26  ;;  %v395_v30 = vld [vmem:[%s21087_s1] sm:$0xff]  ;;  %v397_v31 = vld [vmem:[%s21087_s1 + $0x10] sm:$0xff]  ;;  %v400_v32 = vld [vmem:[%s21087_s1 + $0x28] sm:$0xff]  ;;  %vm2273_vm8 = vcmask 1043456   ;;  %vm2458_vm9 = vcmask 1042432  }
  0x20   : > { %v402_v33 = vld [vmem:[%s21087_s1 + $0x38] sm:$0xff]  ;;  %v11478_v35 = vpack.c.bf16 %v397_v31, %v395_v30  ;;  %v399_v37 = vld [vmem:[%s21087_s1 + $0x20] sm:$0xff]  ;;  %v401_v38 = vld [vmem:[%s21087_s1 + $0x30] sm:$0xff]  ;;  %1470 = vst.msk [vmem:[#allocation3 + $0x38] sm:$0xc0] %vm1469_vm2, %v21099_v7  ;;  %vm2643_vm10 = vcmask 1041408  }
  0x21   : > { %v11480_v36 = vpack.c.bf16 %v402_v33, %v400_v32  ;;  %v404_v39 = vld [vmem:[%s21087_s1 + $0x48] sm:$0xff]  ;;  %v406_v40 = vld [vmem:[%s21087_s1 + $0x58] sm:$0xff]  ;;  %v11482_v41 = vpack.c.bf16 %v401_v38, %v399_v37  ;;  %v403_v44 = vld [vmem:[%s21087_s1 + $0x40] sm:$0xff]  ;;  %1467 = vst.msk [vmem:[#allocation3 + $0x8] sm:$0x3f] %vm1466_vm3, %v21099_v7  ;;  %vm2800_vm11 = vcmask 914432  }
  0x22   : > { %11471 = vmatpush1.bf16.msra.mxu0 %v11470_v21  ;;  %v11484_v43 = vpack.c.bf16 %v406_v40, %v404_v39  ;;  %v405_v45 = vld [vmem:[%s21087_s1 + $0x50] sm:$0xff]  ;;  %v408_v46 = vld [vmem:[%s21087_s1 + $0x68] sm:$0xff]  ;;  %v410_v47 = vld [vmem:[%s21087_s1 + $0x78] sm:$0xff]  ;;  %1473 = vst.msk [vmem:[#allocation3 + $0x48] sm:$0xf] %vm1472_vm4, %v21099_v7  ;;  %vm2803_vm12 = vcmask 916484  }
  0x23   : > { %11473 = vmatprep.subr.bf16.mxu0 %v11472_v22  ;;  %v11486_v48 = vpack.c.bf16 %v405_v45, %v403_v44  ;;  %v11488_v50 = vpack.c.bf16 %v410_v47, %v408_v46  ;;  %v407_v51 = vld [vmem:[%s21087_s1 + $0x60] sm:$0xff]  ;;  %v409_v52 = vld [vmem:[%s21087_s1 + $0x70] sm:$0xff]  ;;  %v9147_v53 = vld [vmem:[%s21087_s1 + $0x108] sm:$0xff]  ;;  %2801 = vst.msk [vmem:[#allocation4 + $0x8] sm:$0x3f] %vm2800_vm11, %v21099_v7  ;;  %vm2806_vm13 = vcmask 910336  }
  0x24   : > { %v9149_v54 = vld [vmem:[%s21087_s1 + $0x118] sm:$0xff]  ;;  %v11490_v55 = vpack.c.bf16 %v409_v52, %v407_v51  ;;  %v9146_v57 = vld [vmem:[%s21087_s1 + $0x100] sm:$0xff]  ;;  %v9148_v58 = vld [vmem:[%s21087_s1 + $0x110] sm:$0xff]  ;;  %2804 = vst.msk [vmem:[#allocation4 + $0x48] sm:$0xf0] %vm2803_vm12, %v21099_v7  ;;  %vm2841_vm14 = vcmask 916486  }
  0x25   : > { %v411_v34 = vld [vmem:[#allocation2 + $0x1] sm:$0xff]  ;;  %v11492_v56 = vpack.c.bf16 %v9149_v54, %v9147_v53  ;;  %v9153_v60 = vld [vmem:[%s21087_s1 + $0x138] sm:$0xff]  ;;  %v11494_v62 = vpack.c.bf16 %v9148_v58, %v9146_v57  ;;  %v9152_v1 = vld [vmem:[%s21087_s1 + $0x130] sm:$0xff]  ;;  %2807 = vst.msk [vmem:[#allocation4 + $0x58] sm:$0x3] %vm2806_vm13, %v21099_v7  ;;  %vm2844_vm15 = vcmask 916480  }
  0x26   : > { %11475 = vmatpush1.bf16.msra.mxu0 %v11474_v28  ;;  %v412_v42 = vld [vmem:[#allocation2 + $0x9] sm:$0xff]  ;;  %v413_v49 = vld [vmem:[#allocation2 + $0x11] sm:$0xff]  ;;  %v392_v61 = vld [vmem:[#allocation2] sm:$0xff]  ;;  %vm5274_vm4 = vcmask 261120   ;;  %s377_s16 = sand.u32 1, %s13744_s18   ;;  %s13604_s29 = smul.u32 640, %s13841_s21 }
  0x27   : > { %11477 = vmatprep.subr.bf16.mxu0 %v11476_v29  ;;  %v9151_v59 = vld [vmem:[%s21087_s1 + $0x128] sm:$0xff]  ;;  %v9150_v0 = vld [vmem:[%s21087_s1 + $0x120] sm:$0xff]  ;;  %v9157_v3 = vld [vmem:[%s21087_s1 + $0x158] sm:$0xff]  ;;  %s13603_s22 = smul.u32 40, %s377_s16  ;;  %s21045_s30 = scalar_lea.sflag [#allocation8], %s377_s16 }
  0x28   : > { %v11496_v63 = vpack.c.bf16 %v9153_v60, %v9151_v59  ;;  %v9155_v2 = vld [vmem:[%s21087_s1 + $0x148] sm:$0xff]  ;;  %v11498_v4 = vpack.c.bf16 %v9152_v1, %v9150_v0  ;;  %v9154_v8 = vld [vmem:[%s21087_s1 + $0x140] sm:$0xff]  ;;  %v9156_v9 = vld [vmem:[%s21087_s1 + $0x150] sm:$0xff]  ;;  %s21038_s13 = scalar_lea.hbm %s21097_s11, %s13604_s29  ;;  %s13757_s14 = smov [#allocation7]  }
  0x29   : > { %9140 = vmatmul.mubr.msk.f32.vlgmr.msra.gmra.mrb[0].mxu0 %vm387_vm0, %v411_v34  ;;  %v14026_v5 = vld [vmem:[#allocation2 + $0x8] sm:$0xff]  ;;  %v11500_v6 = vpack.c.bf16 %v9157_v3, %v9155_v2  ;;  %v9161_v11 = vld [vmem:[%s21087_s1 + $0x178] sm:$0xff]  ;;  %v11502_v12 = vpack.c.bf16 %v9156_v9, %v9154_v8  ;;  %v14043_v13 = vld [vmem:[#allocation2 + $0x10] sm:$0xff]  ;;  %s379_s25 = scalar_lea.vmem [#allocation7], %s13603_s22  ;;  %s13694_s19 = sshll.u32 %s13757_s14, 4  ;;  %s13695_s19 = int_to_ptr.vmem [resolvable:$false] %s13694_s19 }
  0x2a   : > { %11479 = vmatpush1.bf16.msra.mxu0 %v11478_v35  ;;  %510 = vmatprep.mubr.f32.mxu0 %v21099_v7  ;;  %v9159_v10 = vld [vmem:[%s21087_s1 + $0x168] sm:$0xff]  ;;  %v9158_v15 = vld [vmem:[%s21087_s1 + $0x160] sm:$0xff]  ;;  %v9160_v16 = vld [vmem:[%s21087_s1 + $0x170] sm:$0xff]  ;;  %s9056_s24 = sshll.u32 %s379_s25, 4  ;;  %s13696_s15 = scalar_lea.vmem %s13695_s19, 1280  ;;  %s21040_s24 = int_to_ptr.vmem [resolvable:$true] %s9056_s24 }
  0x2b   : > { %11481 = vmatprep.subr.bf16.mxu0 %v11480_v36  ;;  %v11504_v14 = vpack.c.bf16 %v9161_v11, %v9159_v10  ;;  %v9166_v17 = vld [vmem:[%s21087_s1 + $0x188] sm:$0xff]  ;;  %v9168_v18 = vld [vmem:[%s21087_s1 + $0x198] sm:$0xff]  ;;  %v11506_v19 = vpack.c.bf16 %v9160_v16, %v9158_v15  ;;  %v9165_v21 = vld [vmem:[%s21087_s1 + $0x180] sm:$0xff]  ;;  %s13690_s21 = scalar_lea.vmem %s21040_s24, 640  ;;  %p13697_p0 = scmp.lt.s32.totalorder %s21040_s24, %s13695_s19 }
  0x2c   : > { %v11508_v20 = vpack.c.bf16 %v9168_v18, %v9166_v17  ;;  %v9167_v22 = vld [vmem:[%s21087_s1 + $0x190] sm:$0xff]  ;;  %v9170_v23 = vld [vmem:[%s21087_s1 + $0x1a8] sm:$0xff]  ;;  %v9172_v24 = vld [vmem:[%s21087_s1 + $0x1b8] sm:$0xff]  ;;  %p13691_p11 = scmp.ne.s32.totalorder %s21040_s24, %s13690_s21  ;;  %p13698_p1 = scmp.lt.s32.totalorder %s13696_s15, %s13690_s21 }
  0x2d   : > { %9141 = vmatmul.mubr.msk.f32.gmra.mrb[2].mxu0 %vm387_vm0, %v412_v42  ;;  %v615_v25 = vld [vmem:[#allocation2 + $0x2] sm:$0xff]  ;;  %v11510_v26 = vpack.c.bf16 %v9167_v22, %v9165_v21  ;;  %v11512_v27 = vpack.c.bf16 %v9172_v24, %v9170_v23  ;;  %v9171_v29 = vld [vmem:[%s21087_s1 + $0x1b0] sm:$0xff]  ;;  %v9176_v31 = vld [vmem:[%s21087_s1 + $0x1d8] sm:$0xff] }
  0x2e   : > { %11483 = vmatpush1.bf16.msra.mxu0 %v11482_v41  ;;  %516 = vmatprep.mubr.f32.mxu0 %v21099_v7  ;;  %v9169_v28 = vld [vmem:[%s21087_s1 + $0x1a0] sm:$0xff]  ;;  %v9174_v30 = vld [vmem:[%s21087_s1 + $0x1c8] sm:$0xff]  ;;  %v9175_v36 = vld [vmem:[%s21087_s1 + $0x1d0] sm:$0xff]  ;;  %p13692_p12 = pnand %p13691_p11, %p13858_p5  ;;  %p13699_p2 = por %p13698_p1, %p13697_p0 }
  0x2f   : > { %11485 = vmatprep.subr.bf16.mxu0 %v11484_v43  ;;  %v11514_v32 = vpack.c.bf16 %v9171_v29, %v9169_v28  ;;  %v616_v33 = vld [vmem:[#allocation2 + $0xa] sm:$0xff]  ;;  %v11516_v34 = vpack.c.bf16 %v9176_v31, %v9174_v30  ;;  %v9173_v35 = vld [vmem:[%s21087_s1 + $0x1c0] sm:$0xff]  ;;  %v9180_v38 = vld [vmem:[%s21087_s1 + $0x1f8] sm:$0xff] }
  0x30   : > { %v9178_v37 = vld [vmem:[%s21087_s1 + $0x1e8] sm:$0xff]  ;;  %v617_v39 = vld [vmem:[#allocation2 + $0x12] sm:$0xff]  ;;  %v9177_v40 = vld [vmem:[%s21087_s1 + $0x1e0] sm:$0xff]  ;;  %v11518_v41 = vpack.c.bf16 %v9175_v36, %v9173_v35  ;;  %p13693_p13 = pneg %p13692_p12 }
  0x31   : > { %9142 = vmatmul.mubr.msk.f32.gmra.mrb[4].mxu0 %vm387_vm0, %v413_v49  ;;  %v9179_v42 = vld [vmem:[%s21087_s1 + $0x1f0] sm:$0xff]  ;;  %v9185_v43 = vld [vmem:[%s21087_s1 + $0x208] sm:$0xff]  ;;  %v9187_v44 = vld [vmem:[%s21087_s1 + $0x218] sm:$0xff]  ;;  %v11520_v45 = vpack.c.bf16 %v9180_v38, %v9178_v37 }
  0x32   : > { %11487 = vmatpush1.bf16.msra.mxu0 %v11486_v48  ;;  %596 = vmatprep.mubr.f32.mxu0 %v21099_v7  ;;  %v9280_v46 = vld [vmem:[%s21089_s3 + $0x188] sm:$0xff]  ;;  %v9282_v47 = vld [vmem:[%s21089_s3 + $0x198] sm:$0xff]  ;;  %v9279_v48 = vld [vmem:[%s21089_s3 + $0x180] sm:$0xff]  ;;  %v11522_v57 = vpack.c.bf16 %v9179_v42, %v9177_v40  ;;  %v11524_v60 = vpack.c.bf16 %v9187_v44, %v9185_v43  ;;  %p13700_p3 = pnand %p13699_p2, %p13693_p13 }
  0x33   : > { %11489 = vmatprep.subr.bf16.mxu0 %v11488_v50  ;;  %v11604_v49 = vpack.c.bf16 %v9282_v47, %v9280_v46  ;;  %v9281_v50 = vld [vmem:[%s21089_s3 + $0x190] sm:$0xff]  ;;  %v9284_v51 = vld [vmem:[%s21089_s3 + $0x1a8] sm:$0xff]  ;;  %v9286_v52 = vld [vmem:[%s21089_s3 + $0x1b8] sm:$0xff] }
  0x34   : > { %v11606_v53 = vpack.c.bf16 %v9281_v50, %v9279_v48  ;;  %v11608_v54 = vpack.c.bf16 %v9286_v52, %v9284_v51  ;;  %v9288_v58 = vld [vmem:[%s21089_s3 + $0x1c8] sm:$0xff]  ;;  %v9290_v59 = vld [vmem:[%s21089_s3 + $0x1d8] sm:$0xff]  ;;  %v9287_v3 = vld [vmem:[%s21089_s3 + $0x1c0] sm:$0xff] }
  0x35   : > { %11605 = vmatprep.subr.bf16.mxu1 %v11604_v49  ;;  %v9191_v0 = vld [vmem:[%s21087_s1 + $0x238] sm:$0xff]  ;;  %v11612_v2 = vpack.c.bf16 %v9290_v59, %v9288_v58  ;;  %v9292_v9 = vld [vmem:[%s21089_s3 + $0x1e8] sm:$0xff]  ;;  %v9198_v40 = vld [vmem:[%s21087_s1 + $0x270] sm:$0xff] }
  0x36   : > { %11491 = vmatpush1.bf16.msra.mxu0 %v11490_v55  ;;  %v9283_v55 = vld [vmem:[%s21089_s3 + $0x1a0] sm:$0xff]  ;;  %11607 = vmatpush1.bf16.msra.mxu1 %v11606_v53  ;;  %v9294_v10 = vld [vmem:[%s21089_s3 + $0x1f8] sm:$0xff]  ;;  %v9193_v15 = vld [vmem:[%s21087_s1 + $0x248] sm:$0xff] }
  0x37   : > { %11493 = vmatprep.subr.bf16.mxu0 %v11492_v56  ;;  %v9285_v56 = vld [vmem:[%s21089_s3 + $0x1b0] sm:$0xff]  ;;  %11609 = vmatprep.subr.bf16.mxu1 %v11608_v54  ;;  %v9195_v16 = vld [vmem:[%s21087_s1 + $0x258] sm:$0xff]  ;;  %v11616_v18 = vpack.c.bf16 %v9294_v10, %v9292_v9  ;;  %v9296_v23 = vld [vmem:[%s21089_s3 + $0x208] sm:$0xff] }
  0x38   : > { %v11610_v1 = vpack.c.bf16 %v9285_v56, %v9283_v55  ;;  %v734_v22 = vld [vmem:[#allocation2 + $0xb] sm:$0xff]  ;;  %v9298_v24 = vld [vmem:[%s21089_s3 + $0x218] sm:$0xff]  ;;  %v9203_v49 = vld [vmem:[%s21087_s1 + $0x280] sm:$0xff] }
  0x39   : > { %9143 = vmatmul.mubr.msk.f32.vlgmr.msra.gmra.mrb[0].mxu0 %vm387_vm0, %v392_v61  ;;  %v9184_v61 = vld [vmem:[%s21087_s1 + $0x200] sm:$0xff]  ;;  %v9197_v28 = vld [vmem:[%s21087_s1 + $0x268] sm:$0xff]  ;;  %v9199_v29 = vld [vmem:[%s21087_s1 + $0x278] sm:$0xff]  ;;  %v11620_v31 = vpack.c.bf16 %v9298_v24, %v9296_v23 }
  0x3a   : > { %11495 = vmatpush1.bf16.msra.mxu0 %v11494_v62  ;;  %602 = vmatprep.mubr.f32.mxu0 %v21099_v7  ;;  %v9186_v62 = vld [vmem:[%s21087_s1 + $0x210] sm:$0xff]  ;;  %v9300_v36 = vld [vmem:[%s21089_s3 + $0x228] sm:$0xff]  ;;  %v9302_v37 = vld [vmem:[%s21089_s3 + $0x238] sm:$0xff]  ;;  %v11536_v38 = vpack.c.bf16 %v9199_v29, %v9197_v28 }
  0x3b   : > { %11497 = vmatprep.subr.bf16.mxu0 %v11496_v63  ;;  %v9189_v63 = vld [vmem:[%s21087_s1 + $0x228] sm:$0xff]  ;;  %v11526_v8 = vpack.c.bf16 %v9186_v62, %v9184_v61  ;;  %11611 = vmatpush1.bf16.msra.mxu1 %v11610_v1  ;;  %v735_v35 = vld [vmem:[#allocation2 + $0x13] sm:$0xff]  ;;  %v11624_v44 = vpack.c.bf16 %v9302_v37, %v9300_v36  ;;  %v9215_v9 = vld [vmem:[%s21087_s1 + $0x2e0] sm:$0xff] }
  0x3c   : > { %v11528_v11 = vpack.c.bf16 %v9191_v0, %v9189_v63  ;;  %11613 = vmatprep.subr.bf16.mxu1 %v11612_v2  ;;  %v9206_v42 = vld [vmem:[%s21087_s1 + $0x298] sm:$0xff]  ;;  %v9301_v46 = vld [vmem:[%s21089_s3 + $0x230] sm:$0xff]  ;;  %v9208_v51 = vld [vmem:[%s21087_s1 + $0x2a8] sm:$0xff] }
  0x3d   : > { %9144 = vmatmul.mubr.msk.f32.gmra.mrb[2].mxu0 %vm387_vm0, %v14026_v5  ;;  %v9205_v50 = vld [vmem:[%s21087_s1 + $0x290] sm:$0xff]  ;;  %v9210_v52 = vld [vmem:[%s21087_s1 + $0x2b8] sm:$0xff]  ;;  %v851_v54 = vld [vmem:[#allocation2 + $0x4] sm:$0xff] }
  0x3e   : > { %11499 = vmatpush1.bf16.msra.mxu0 %v11498_v4  ;;  %608 = vmatprep.mubr.f32.mxu0 %v21099_v7  ;;  %v9289_v4 = vld [vmem:[%s21089_s3 + $0x1d0] sm:$0xff]  ;;  %v11542_v55 = vpack.c.bf16 %v9205_v50, %v9203_v49  ;;  %v11544_v56 = vpack.c.bf16 %v9210_v52, %v9208_v51  ;;  %v9212_v59 = vld [vmem:[%s21087_s1 + $0x2c8] sm:$0xff]  ;;  %v9211_v0 = vld [vmem:[%s21087_s1 + $0x2c0] sm:$0xff] }
  0x3f   : > { %11501 = vmatprep.subr.bf16.mxu0 %v11500_v6  ;;  %v733_v6 = vld [vmem:[#allocation2 + $0x3] sm:$0xff]  ;;  %v11614_v17 = vpack.c.bf16 %v9289_v4, %v9287_v3  ;;  %v9209_v58 = vld [vmem:[%s21087_s1 + $0x2b0] sm:$0xff]  ;;  %v9218_v3 = vld [vmem:[%s21087_s1 + $0x2f8] sm:$0xff] }
  0x40   : > { %v852_v62 = vld [vmem:[#allocation2 + $0xc] sm:$0xff]  ;;  %v9226_v23 = vld [vmem:[%s21087_s1 + $0x320] sm:$0xff] }
  0x41   : > { %9145 = vmatmul.mubr.msk.f32.gmra.mrb[4].mxu0 %vm387_vm0, %v14043_v13  ;;  %11615 = vmatpush1.bf16.msra.mxu1 %v11614_v17  ;;  %v9213_v1 = vld [vmem:[%s21087_s1 + $0x2d0] sm:$0xff]  ;;  %v9216_v2 = vld [vmem:[%s21087_s1 + $0x2e8] sm:$0xff]  ;;  %v9234_v37 = vld [vmem:[%s21087_s1 + $0x360] sm:$0xff] }
  0x42   : > { %11503 = vmatpush1.bf16.msra.mxu0 %v11502_v12  ;;  %708 = vmatprep.mubr.f32.mxu0 %v21099_v7  ;;  %v9188_v12 = vld [vmem:[%s21087_s1 + $0x220] sm:$0xff]  ;;  %v11550_v4 = vpack.c.bf16 %v9213_v1, %v9211_v0  ;;  %v9217_v10 = vld [vmem:[%s21087_s1 + $0x2f0] sm:$0xff]  ;;  %v9250_v52 = vld [vmem:[%s21087_s1 + $0x3c8] sm:$0xff] }
  0x43   : > { %11505 = vmatprep.subr.bf16.mxu0 %v11504_v14  ;;  %v9190_v14 = vld [vmem:[%s21087_s1 + $0x230] sm:$0xff]  ;;  %11617 = vmatprep.subr.bf16.mxu1 %v11616_v18  ;;  %v9227_v18 = vld [vmem:[%s21087_s1 + $0x328] sm:$0xff]  ;;  %v9245_v50 = vld [vmem:[%s21087_s1 + $0x3a0] sm:$0xff] }
  0x44   : > { %v11530_v21 = vpack.c.bf16 %v9190_v14, %v9188_v12  ;;  %v9225_v12 = vld [vmem:[%s21087_s1 + $0x318] sm:$0xff]  ;;  %v11554_v14 = vpack.c.bf16 %v9217_v10, %v9215_v9  ;;  %v9224_v17 = vld [vmem:[%s21087_s1 + $0x310] sm:$0xff]  ;;  %v9253_v0 = vld [vmem:[%s21087_s1 + $0x3e0] sm:$0xff] }
  0x45   : > { %v9228_v24 = vld [vmem:[%s21087_s1 + $0x330] sm:$0xff]  ;;  %v9265_v10 = vld [vmem:[%s21087_s1 + $0x428] sm:$0xff] }
  0x46   : > { %11507 = vmatpush1.bf16.msra.mxu0 %v11506_v19  ;;  %v9291_v19 = vld [vmem:[%s21089_s3 + $0x1e0] sm:$0xff]  ;;  %v970_v28 = vld [vmem:[#allocation2 + $0xd] sm:$0xff] }
  0x47   : > { %11509 = vmatprep.subr.bf16.mxu0 %v11508_v20  ;;  %v9293_v20 = vld [vmem:[%s21089_s3 + $0x1f0] sm:$0xff] }
  0x48   : > { %v11618_v30 = vpack.c.bf16 %v9293_v20, %v9291_v19  ;;  %v9229_v19 = vld [vmem:[%s21087_s1 + $0x338] sm:$0xff]  ;;  %v969_v20 = vld [vmem:[#allocation2 + $0x5] sm:$0xff]  ;;  %v9247_v51 = vld [vmem:[%s21087_s1 + $0x3b0] sm:$0xff] }
  0x49   : > { %9162 = vmatmul.mubr.msk.f32.vlgmr.msra.gmra.mrb[0].mxu0 %vm387_vm0, %v615_v25  ;;  %v11532_v25 = vpack.c.bf16 %v9195_v16, %v9193_v15  ;;  %v9222_v16 = vld [vmem:[%s21087_s1 + $0x300] sm:$0xff]  ;;  %v9255_v1 = vld [vmem:[%s21087_s1 + $0x3f0] sm:$0xff] }
  0x4a   : > { %11511 = vmatpush1.bf16.msra.mxu0 %v11510_v26  ;;  %714 = vmatprep.mubr.f32.mxu0 %v21099_v7  ;;  %v9192_v26 = vld [vmem:[%s21087_s1 + $0x240] sm:$0xff]  ;;  %v9262_v9 = vld [vmem:[%s21087_s1 + $0x410] sm:$0xff] }
  0x4b   : > { %11513 = vmatprep.subr.bf16.mxu0 %v11512_v27  ;;  %v9194_v27 = vld [vmem:[%s21087_s1 + $0x250] sm:$0xff]  ;;  %11619 = vmatpush1.bf16.msra.mxu1 %v11618_v30  ;;  %v9230_v30 = vld [vmem:[%s21087_s1 + $0x340] sm:$0xff] }
  0x4c   : > { %11621 = vmatprep.subr.bf16.mxu1 %v11620_v31  ;;  %v9232_v31 = vld [vmem:[%s21087_s1 + $0x350] sm:$0xff] }
  0x4d   : > { %9163 = vmatmul.mubr.msk.f32.gmra.mrb[2].mxu0 %vm387_vm0, %v616_v33  ;;  %v9297_v33 = vld [vmem:[%s21089_s3 + $0x210] sm:$0xff] }
  0x4e   : > { %11515 = vmatpush1.bf16.msra.mxu0 %v11514_v32  ;;  %720 = vmatprep.mubr.f32.mxu0 %v21099_v7  ;;  %v9295_v32 = vld [vmem:[%s21089_s3 + $0x200] sm:$0xff] }
  0x4f   : > { %11517 = vmatprep.subr.bf16.mxu0 %v11516_v34  ;;  %v11534_v34 = vpack.c.bf16 %v9194_v27, %v9192_v26  ;;  %v11622_v43 = vpack.c.bf16 %v9297_v33, %v9295_v32  ;;  %v9233_v26 = vld [vmem:[%s21087_s1 + $0x358] sm:$0xff]  ;;  %v11562_v27 = vpack.c.bf16 %v9228_v24, %v9226_v23  ;;  %v9235_v32 = vld [vmem:[%s21087_s1 + $0x368] sm:$0xff]  ;;  %v9268_v23 = vld [vmem:[%s21087_s1 + $0x440] sm:$0xff] }
  0x50   : > { %v9237_v33 = vld [vmem:[%s21087_s1 + $0x378] sm:$0xff]  ;;  %v9270_v24 = vld [vmem:[%s21087_s1 + $0x450] sm:$0xff] }
  0x51   : > { %9164 = vmatmul.mubr.msk.f32.gmra.mrb[4].mxu0 %vm387_vm0, %v617_v39  ;;  %v9196_v39 = vld [vmem:[%s21087_s1 + $0x260] sm:$0xff]  ;;  %11623 = vmatpush1.bf16.msra.mxu1 %v11622_v43  ;;  %v11568_v36 = vpack.c.bf16 %v9237_v33, %v9235_v32  ;;  %v1325_v33 = vld [vmem:[#allocation2 + $0x18] sm:$0xff] }
  0x52   : > { %11519 = vmatpush1.bf16.msra.mxu0 %v11518_v41  ;;  %826 = vmatprep.mubr.f32.mxu0 %v21099_v7  ;;  %v9204_v41 = vld [vmem:[%s21087_s1 + $0x288] sm:$0xff]  ;;  %v11538_v47 = vpack.c.bf16 %v9198_v40, %v9196_v39  ;;  %v9244_v40 = vld [vmem:[%s21087_s1 + $0x398] sm:$0xff]  ;;  %v9241_v43 = vld [vmem:[%s21087_s1 + $0x380] sm:$0xff] }
  0x53   : > { %11521 = vmatprep.subr.bf16.mxu0 %v11520_v45  ;;  %v9299_v45 = vld [vmem:[%s21089_s3 + $0x220] sm:$0xff]  ;;  %v11540_v48 = vpack.c.bf16 %v9206_v42, %v9204_v41  ;;  %11625 = vmatprep.subr.bf16.mxu1 %v11624_v44  ;;  %v9242_v39 = vld [vmem:[%s21087_s1 + $0x388] sm:$0xff]  ;;  %v9243_v44 = vld [vmem:[%s21087_s1 + $0x390] sm:$0xff] }
  0x54   : > { %v11626_v53 = vpack.c.bf16 %v9301_v46, %v9299_v45  ;;  %v11572_v42 = vpack.c.bf16 %v9244_v40, %v9242_v39  ;;  %v9246_v45 = vld [vmem:[%s21087_s1 + $0x3a8] sm:$0xff]  ;;  %v9248_v46 = vld [vmem:[%s21087_s1 + $0x3b8] sm:$0xff] }
  0x55   : > { %v11576_v49 = vpack.c.bf16 %v9248_v46, %v9246_v45  ;;  %v9310_v39 = vld [vmem:[%s21089_s3 + $0x278] sm:$0xff]  ;;  %v9312_v45 = vld [vmem:[%s21089_s3 + $0x288] sm:$0xff] }
  0x56   : > { %11523 = vmatpush1.bf16.msra.mxu0 %v11522_v57  ;;  %v9207_v57 = vld [vmem:[%s21087_s1 + $0x2a0] sm:$0xff]  ;;  %11627 = vmatpush1.bf16.msra.mxu1 %v11626_v53  ;;  %v9252_v53 = vld [vmem:[%s21087_s1 + $0x3d8] sm:$0xff] }
  0x57   : > { %11525 = vmatprep.subr.bf16.mxu0 %v11524_v60  ;;  %v9214_v60 = vld [vmem:[%s21087_s1 + $0x2d8] sm:$0xff]  ;;  %v11546_v61 = vpack.c.bf16 %v9209_v58, %v9207_v57  ;;  %v9249_v57 = vld [vmem:[%s21087_s1 + $0x3c0] sm:$0xff]  ;;  %v9251_v58 = vld [vmem:[%s21087_s1 + $0x3d0] sm:$0xff] }
  0x58   : > { %v11548_v63 = vpack.c.bf16 %v9214_v60, %v9212_v59  ;;  %v9254_v59 = vld [vmem:[%s21087_s1 + $0x3e8] sm:$0xff]  ;;  %v9256_v60 = vld [vmem:[%s21087_s1 + $0x3f8] sm:$0xff] }
  0x59   : > { %9181 = vmatmul.mubr.msk.f32.vlgmr.msra.gmra.mrb[0].mxu0 %vm387_vm0, %v733_v6  ;;  %v853_v6 = vld [vmem:[#allocation2 + $0x14] sm:$0xff] }
  0x5a   : > { %11527 = vmatpush1.bf16.msra.mxu0 %v11526_v8  ;;  %832 = vmatprep.mubr.f32.mxu0 %v21099_v7  ;;  %v11552_v8 = vpack.c.bf16 %v9218_v3, %v9216_v2  ;;  %v9261_v2 = vld [vmem:[%s21087_s1 + $0x408] sm:$0xff]  ;;  %v9263_v3 = vld [vmem:[%s21087_s1 + $0x418] sm:$0xff] }
  0x5b   : > { %11529 = vmatprep.subr.bf16.mxu0 %v11528_v11  ;;  %v9223_v11 = vld [vmem:[%s21087_s1 + $0x308] sm:$0xff]  ;;  %v9314_v46 = vld [vmem:[%s21089_s3 + $0x298] sm:$0xff] }
  0x5c   : > { %v11556_v15 = vpack.c.bf16 %v9225_v12, %v9223_v11  ;;  %v9267_v11 = vld [vmem:[%s21087_s1 + $0x438] sm:$0xff]  ;;  %v1205_v12 = vld [vmem:[#allocation2 + $0x7] sm:$0xff] }
  0x5d   : > { %9182 = vmatmul.mubr.msk.f32.gmra.mrb[2].mxu0 %vm387_vm0, %v734_v22  ;;  %v11560_v22 = vpack.c.bf16 %v9229_v19, %v9227_v18  ;;  %v9269_v18 = vld [vmem:[%s21087_s1 + $0x448] sm:$0xff]  ;;  %v9271_v19 = vld [vmem:[%s21087_s1 + $0x458] sm:$0xff] }
  0x5e   : > { %11531 = vmatpush1.bf16.msra.mxu0 %v11530_v21  ;;  %838 = vmatprep.mubr.f32.mxu0 %v21099_v7  ;;  %v11558_v21 = vpack.c.bf16 %v9224_v17, %v9222_v16  ;;  %v9264_v16 = vld [vmem:[%s21087_s1 + $0x420] sm:$0xff]  ;;  %v9266_v17 = vld [vmem:[%s21087_s1 + $0x430] sm:$0xff] }
  0x5f   : > { %11533 = vmatprep.subr.bf16.mxu0 %v11532_v25  ;;  %v9231_v25 = vld [vmem:[%s21087_s1 + $0x348] sm:$0xff] }
  0x60   : > { %v11564_v29 = vpack.c.bf16 %v9233_v26, %v9231_v25  ;;  %v9273_v25 = vld [vmem:[%s21087_s1 + $0x468] sm:$0xff]  ;;  %v9275_v26 = vld [vmem:[%s21087_s1 + $0x478] sm:$0xff] }
  0x61   : > { %9183 = vmatmul.mubr.msk.f32.gmra.mrb[4].mxu0 %vm387_vm0, %v735_v35  ;;  %v971_v35 = vld [vmem:[#allocation2 + $0x15] sm:$0xff] }
  0x62   : > { %11535 = vmatpush1.bf16.msra.mxu0 %v11534_v34  ;;  %944 = vmatprep.mubr.f32.mxu0 %v21099_v7  ;;  %v11566_v34 = vpack.c.bf16 %v9232_v31, %v9230_v30  ;;  %v9272_v30 = vld [vmem:[%s21087_s1 + $0x460] sm:$0xff]  ;;  %v9274_v31 = vld [vmem:[%s21087_s1 + $0x470] sm:$0xff] }
  0x63   : > { %11537 = vmatprep.subr.bf16.mxu0 %v11536_v38  ;;  %v9236_v38 = vld [vmem:[%s21087_s1 + $0x370] sm:$0xff]  ;;  %v11602_v32 = vpack.c.bf16 %v9274_v31, %v9272_v30 }
  0x64   : > { %v11570_v41 = vpack.c.bf16 %v9236_v38, %v9234_v37  ;;  %v9308_v38 = vld [vmem:[%s21089_s3 + $0x268] sm:$0xff] }
  0x65   : > { %v11632_v40 = vpack.c.bf16 %v9310_v39, %v9308_v38 }
  0x66   : > { %11539 = vmatpush1.bf16.msra.mxu0 %v11538_v47  ;;  %v1087_v47 = vld [vmem:[#allocation2 + $0x6] sm:$0xff] }
  0x67   : > { %11541 = vmatprep.subr.bf16.mxu0 %v11540_v48  ;;  %v11574_v48 = vpack.c.bf16 %v9243_v44, %v9241_v43  ;;  %v1443_v44 = vlaneseq }
  0x69   : > { %9200 = vmatmul.mubr.msk.f32.vlgmr.msra.gmra.mrb[0].mxu0 %vm387_vm0, %v851_v54  ;;  %v11578_v54 = vpack.c.bf16 %v9247_v51, %v9245_v50  ;;  %vm8071_vm1 = vcmp.lt.s32.totalorder %v1443_v44, 320  ;;  %v9316_v51 = vld [vmem:[%s21089_s3 + $0x2a8] sm:$0xff] }
  0x6a   : > { %11543 = vmatpush1.bf16.msra.mxu0 %v11542_v55  ;;  %950 = vmatprep.mubr.f32.mxu0 %v21099_v7  ;;  %v1088_v55 = vld [vmem:[#allocation2 + $0xe] sm:$0xff]  ;;  %8073 = vst.msk [vmem:[#allocation6] ss:$8 sm:$0x7] %vm8071_vm1, %v21099_v7 }
  0x6b   : > { %11545 = vmatprep.subr.bf16.mxu0 %v11544_v56  ;;  %v11580_v56 = vpack.c.bf16 %v9252_v53, %v9250_v52  ;;  %8076 = vst.msk [vmem:[#allocation6 + $0x79] ss:$8 sm:$0x7] %vm8071_vm1, %v21099_v7  ;;  %v9318_v52 = vld [vmem:[%s21089_s3 + $0x2b8] sm:$0xff]  ;;  %vm2851_vm1 = vcmask 912384  }
  0x6c   : > { %v11640_v53 = vpack.c.bf16 %v9318_v52, %v9316_v51 }
  0x6d   : > { %9201 = vmatmul.mubr.msk.f32.gmra.mrb[2].mxu0 %vm387_vm0, %v852_v62  ;;  %v1089_v62 = vld [vmem:[#allocation2 + $0x16] sm:$0xff] }
  0x6e   : > { %11547 = vmatpush1.bf16.msra.mxu0 %v11546_v61  ;;  %956 = vmatprep.mubr.f32.mxu0 %v21099_v7  ;;  %v11582_v61 = vpack.c.bf16 %v9251_v58, %v9249_v57  ;;  %v9320_v57 = vld [vmem:[%s21089_s3 + $0x2c8] sm:$0xff]  ;;  %v9322_v58 = vld [vmem:[%s21089_s3 + $0x2d8] sm:$0xff] }
  0x6f   : > { %11549 = vmatprep.subr.bf16.mxu0 %v11548_v63  ;;  %v11584_v63 = vpack.c.bf16 %v9256_v60, %v9254_v59  ;;  %v11644_v59 = vpack.c.bf16 %v9322_v58, %v9320_v57  ;;  %v9319_v60 = vld [vmem:[%s21089_s3 + $0x2c0] sm:$0xff]  ;;  %v1521_v58 = vld [vmem:[%s21089_s3 + $0x30] sm:$0xff] }
  0x70   : > { %v1519_v57 = vld [vmem:[%s21089_s3 + $0x20] sm:$0xff] }
  0x71   : > { %9202 = vmatmul.mubr.msk.f32.gmra.mrb[4].mxu0 %vm387_vm0, %v853_v6  ;;  %v11588_v6 = vpack.c.bf16 %v9263_v3, %v9261_v2  ;;  %v9325_v3 = vld [vmem:[%s21089_s3 + $0x2f0] sm:$0xff] }
  0x72   : > { %11551 = vmatpush1.bf16.msra.mxu0 %v11550_v4  ;;  %1062 = vmatprep.mubr.f32.mxu0 %v21099_v7  ;;  %v11586_v4 = vpack.c.bf16 %v9255_v1, %v9253_v0  ;;  %v9326_v0 = vld [vmem:[%s21089_s3 + $0x2f8] sm:$0xff]  ;;  %v9323_v1 = vld [vmem:[%s21089_s3 + $0x2e0] sm:$0xff] }
  0x73   : > { %11553 = vmatprep.subr.bf16.mxu0 %v11552_v8  ;;  %v9260_v8 = vld [vmem:[%s21087_s1 + $0x400] sm:$0xff] }
  0x76   : > { %11555 = vmatpush1.bf16.msra.mxu0 %v11554_v14  ;;  %v11590_v14 = vpack.c.bf16 %v9262_v9, %v9260_v8  ;;  %v1518_v8 = vld [vmem:[%s21089_s3 + $0x18] sm:$0xff] }
  0x77   : > { %11557 = vmatprep.subr.bf16.mxu0 %v11556_v15  ;;  %v11592_v15 = vpack.c.bf16 %v9267_v11, %v9265_v10  ;;  %v14542_v10 = vshrl.u32 %v1443_v44, 7 }
  0x79   : > { %9219 = vmatmul.mubr.msk.f32.vlgmr.msra.gmra.mrb[0].mxu0 %vm387_vm0, %v969_v20  ;;  %v11594_v20 = vpack.c.bf16 %v9266_v17, %v9264_v16  ;;  %21121 = vst [vmem:[#allocation12_spill] sm:$0xff] %v14542_v10  ;;  %v14545_v11 = vsub.s32 0, %v14542_v10 }
  0x7a   : > { %11559 = vmatpush1.bf16.msra.mxu0 %v11558_v21  ;;  %1068 = vmatprep.mubr.f32.mxu0 %v21099_v7  ;;  %v1206_v21 = vld [vmem:[#allocation2 + $0xf] sm:$0xff] }
  0x7b   : > { %11561 = vmatprep.subr.bf16.mxu0 %v11560_v22  ;;  %v11596_v22 = vpack.c.bf16 %v9271_v19, %v9269_v18  ;;  %21122 = vst [vmem:[#allocation13_spill] sm:$0xff] %v14545_v11 }
  0x7d   : > { %9220 = vmatmul.mubr.msk.f32.gmra.mrb[2].mxu0 %vm387_vm0, %v970_v28  ;;  %v1207_v28 = vld [vmem:[#allocation2 + $0x17] sm:$0xff] }
  0x7e   : > { %11563 = vmatpush1.bf16.msra.mxu0 %v11562_v27  ;;  %1074 = vmatprep.mubr.f32.mxu0 %v21099_v7  ;;  %v11598_v27 = vpack.c.bf16 %v9270_v24, %v9268_v23 }
  0x7f   : > { %11565 = vmatprep.subr.bf16.mxu0 %v11564_v29  ;;  %v11600_v29 = vpack.c.bf16 %v9275_v26, %v9273_v25 }
  0x81   : > { %9221 = vmatmul.mubr.msk.f32.gmra.mrb[4].mxu0 %vm387_vm0, %v971_v35  ;;  %v9306_v35 = vld [vmem:[%s21089_s3 + $0x258] sm:$0xff] }
  0x82   : > { %11567 = vmatpush1.bf16.msra.mxu0 %v11566_v34  ;;  %1180 = vmatprep.mubr.f32.mxu0 %v21099_v7  ;;  %v9304_v34 = vld [vmem:[%s21089_s3 + $0x248] sm:$0xff] }
  0x83   : > { %11569 = vmatprep.subr.bf16.mxu0 %v11568_v36  ;;  %v11628_v36 = vpack.c.bf16 %v9306_v35, %v9304_v34 }
  0x85   : > { %11629 = vmatprep.subr.bf16.mxu1 %v11628_v36 }
  0x86   : > { %11571 = vmatpush1.bf16.msra.mxu0 %v11570_v41  ;;  %v9307_v41 = vld [vmem:[%s21089_s3 + $0x260] sm:$0xff] }
  0x87   : > { %11573 = vmatprep.subr.bf16.mxu0 %v11572_v42  ;;  %v9309_v42 = vld [vmem:[%s21089_s3 + $0x270] sm:$0xff] }
  0x88   : > { %v11634_v43 = vpack.c.bf16 %v9309_v42, %v9307_v41 }
  0x89   : > { %9238 = vmatmul.mubr.msk.f32.vlgmr.msra.gmra.mrb[0].mxu0 %vm387_vm0, %v1087_v47  ;;  %v11636_v47 = vpack.c.bf16 %v9314_v46, %v9312_v45  ;;  %v1515_v45 = vld [vmem:[%s21089_s3] sm:$0xff]  ;;  %v1517_v46 = vld [vmem:[%s21089_s3 + $0x10] sm:$0xff] }
  0x8a   : > { %11575 = vmatpush1.bf16.msra.mxu0 %v11574_v48  ;;  %1186 = vmatprep.mubr.f32.mxu0 %v21099_v7  ;;  %v9311_v48 = vld [vmem:[%s21089_s3 + $0x280] sm:$0xff] }
  0x8b   : > { %11577 = vmatprep.subr.bf16.mxu0 %v11576_v49  ;;  %v9313_v49 = vld [vmem:[%s21089_s3 + $0x290] sm:$0xff] }
  0x8c   : > { %v11638_v50 = vpack.c.bf16 %v9313_v49, %v9311_v48  ;;  %v1520_v49 = vld [vmem:[%s21089_s3 + $0x28] sm:$0xff] }
  0x8d   : > { %9239 = vmatmul.mubr.msk.f32.gmra.mrb[2].mxu0 %vm387_vm0, %v1088_v55  ;;  %v9317_v55 = vld [vmem:[%s21089_s3 + $0x2b0] sm:$0xff] }
  0x8e   : > { %11579 = vmatpush1.bf16.msra.mxu0 %v11578_v54  ;;  %1192 = vmatprep.mubr.f32.mxu0 %v21099_v7  ;;  %v9315_v54 = vld [vmem:[%s21089_s3 + $0x2a0] sm:$0xff] }
  0x8f   : > { %11581 = vmatprep.subr.bf16.mxu0 %v11580_v56  ;;  %v11642_v56 = vpack.c.bf16 %v9317_v55, %v9315_v54  ;;  %v11654_v54 = vpack.c.bf16 %v1517_v46, %v1515_v45 }
  0x91   : > { %9240 = vmatmul.mubr.msk.f32.gmra.mrb[4].mxu0 %vm387_vm0, %v1089_v62 }
  0x92   : > { %11583 = vmatpush1.bf16.msra.mxu0 %v11582_v61  ;;  %1298 = vmatprep.mubr.f32.mxu0 %v21099_v7  ;;  %v9321_v61 = vld [vmem:[%s21089_s3 + $0x2d0] sm:$0xff] }
  0x93   : > { %11585 = vmatprep.subr.bf16.mxu0 %v11584_v63  ;;  %v11646_v62 = vpack.c.bf16 %v9321_v61, %v9319_v60  ;;  %v9324_v63 = vld [vmem:[%s21089_s3 + $0x2e8] sm:$0xff] }
  0x94   : > { %v11648_v2 = vpack.c.bf16 %v9326_v0, %v9324_v63  ;;  %v1524_v63 = vld [vmem:[%s21089_s3 + $0x48] sm:$0xff]  ;;  %v1526_v0 = vld [vmem:[%s21089_s3 + $0x58] sm:$0xff] }
  0x96   : > { %11587 = vmatpush1.bf16.msra.mxu0 %v11586_v4  ;;  %v11650_v4 = vpack.c.bf16 %v9325_v3, %v9323_v1 }
  0x97   : > { %11589 = vmatprep.subr.bf16.mxu0 %v11588_v6  ;;  %v1516_v6 = vld [vmem:[%s21089_s3 + $0x8] sm:$0xff] }
  0x98   : > { %v11652_v9 = vpack.c.bf16 %v1518_v8, %v1516_v6 }
  0x99   : > { %9257 = vmatmul.mubr.msk.f32.vlgmr.msra.gmra.mrb[0].mxu0 %vm387_vm0, %v1205_v12  ;;  %v1441_v12 = vld [vmem:[%s21088_s2] sm:$0x3] }
  0x9a   : > { %11591 = vmatpush1.bf16.msra.mxu0 %v11590_v14  ;;  %1304 = vmatprep.mubr.f32.mxu0 %v21099_v7  ;;  %v14551_v14 = vsub.s32 1, %v14542_v10 }
  0x9b   : > { %11593 = vmatprep.subr.bf16.mxu0 %v11592_v15  ;;  %v1446_v15 = vrot.slane %v1441_v12, %v14545_v11 }
  0x9c   : > { %21123 = vst [vmem:[#allocation14_spill] sm:$0xff] %v14551_v14  ;;  %v1450_v16 = vrot.slane %v1441_v12, %v14551_v14  ;;  %v11660_v12 = vpack.c.bf16 %v1526_v0, %v1524_v63  ;;  %v1539_v63 = vld [vmem:[%s21089_s3 + $0xc0] sm:$0xff]  ;;  %v1541_v0 = vld [vmem:[%s21089_s3 + $0xd0] sm:$0xff] }
  0x9d   : > { %9258 = vmatmul.mubr.msk.f32.gmra.mrb[2].mxu0 %vm387_vm0, %v1206_v21 }
  0x9e   : > { %11595 = vmatpush1.bf16.msra.mxu0 %v11594_v20  ;;  %1310 = vmatprep.mubr.f32.mxu0 %v21099_v7 }
  0x9f   : > { %11597 = vmatprep.subr.bf16.mxu0 %v11596_v22 }
  0xa1   : > { %9259 = vmatmul.mubr.msk.f32.gmra.mrb[4].mxu0 %vm387_vm0, %v1207_v28 }
  0xa2   : > { %11599 = vmatpush1.bf16.msra.mxu0 %v11598_v27  ;;  %1416 = vmatprep.mubr.f32.mxu0 %v21099_v7 }
  0xa3   : > { %11601 = vmatprep.subr.bf16.mxu0 %v11600_v29 }
  0xa6   : > { %11603 = vmatpush1.bf16.msra.mxu0 %v11602_v32 }
  0xa9   : > { %9276 = vmatmul.mubr.msk.f32.vlgmr.msra.gmra.mrb[0].mxu0 %vm387_vm0, %v14026_v5  ;;  %v9303_v5 = vld [vmem:[%s21089_s3 + $0x240] sm:$0xff] }
  0xaa   : > { %1422 = vmatprep.mubr.f32.mxu0 %v21099_v7 }
  0xad   : > { %9277 = vmatmul.mubr.msk.f32.gmra.mrb[2].mxu0 %vm387_vm0, %v14043_v13  ;;  %v9305_v13 = vld [vmem:[%s21089_s3 + $0x250] sm:$0xff] }
  0xae   : > { %1428 = vmatprep.mubr.f32.mxu0 %v21099_v7  ;;  %v11630_v37 = vpack.c.bf16 %v9305_v13, %v9303_v5 }
  0xb0   : > { %11631 = vmatpush1.bf16.msra.mxu1 %v11630_v37 }
  0xb1   : > { %9278 = vmatmul.mubr.msk.f32.gmra.mrb[4].mxu0 %vm387_vm0, %v1325_v33  ;;  %11633 = vmatprep.subr.bf16.mxu1 %v11632_v40 }
  0xb4   : > { %11635 = vmatpush1.bf16.msra.mxu1 %v11634_v43 }
  0xb5   : > { %11637 = vmatprep.subr.bf16.mxu1 %v11636_v47 }
  0xb8   : > { %11639 = vmatpush1.bf16.msra.mxu1 %v11638_v50  ;;  %v1522_v50 = vld [vmem:[%s21089_s3 + $0x38] sm:$0xff] }
  0xb9   : > { %11641 = vmatprep.subr.bf16.mxu1 %v11640_v53 }
  0xbc   : > { %11643 = vmatpush1.bf16.msra.mxu1 %v11642_v56  ;;  %v11656_v56 = vpack.c.bf16 %v1522_v50, %v1520_v49 }
  0xbd   : > { %11645 = vmatprep.subr.bf16.mxu1 %v11644_v59 }
  0xc0   : > { %11647 = vmatpush1.bf16.msra.mxu1 %v11646_v62 }
  0xc1   : > { %11649 = vmatprep.subr.bf16.mxu1 %v11648_v2 }
  0xc4   : > { %11651 = vmatpush1.bf16.msra.mxu1 %v11650_v4  ;;  %v11658_v4 = vpack.c.bf16 %v1521_v58, %v1519_v57  ;;  %v1542_v57 = vld [vmem:[%s21089_s3 + $0xd8] sm:$0xff] }
  0xc5   : > { %11653 = vmatprep.subr.bf16.mxu1 %v11652_v9 }
 0x17c   : > { %v1418_v17 = vpop.f32.mrb[0].mxu0 }
 0x17d   : > { %v1453_v18 = vadd.f32 %v1446_v15, %v1418_v17  ;;  %v1420_v19 = vpop.f32.mrb[1].mxu0 }
 0x17e   : > { %v1454_v20 = vadd.f32 %v1450_v16, %v1420_v19 }
 0x17f   : > { %v1459_v21 = vmax.f32 %v1453_v18, 0.0 }
 0x180   : > { %v1460_v22 = vmax.f32 %v1454_v20, 0.0  ;;  %v1424_v23 = vpop.f32.mrb[2].mxu0  ;;  %v1528_v20 = vld [vmem:[%s21089_s3 + $0x68] sm:$0xff] }
 0x181   : > { %v1481_v24 = vrot.slane %v1459_v21, 2  ;;  %v1455_v25 = vadd.f32 %v1446_v15, %v1424_v23  ;;  %v1426_v26 = vpop.f32.mrb[3].mxu0  ;;  %v1530_v21 = vld [vmem:[%s21089_s3 + $0x78] sm:$0xff] }
 0x182   : > { %v1482_v27 = vrot.slane %v1460_v22, 2  ;;  %v1456_v28 = vadd.f32 %v1450_v16, %v1426_v26 }
 0x183   : > { %1499 = vst [vmem:[#allocation3] sm:$0xc0] %v1481_v24  ;;  %v1461_v29 = vmax.f32 %v1455_v25, 0.0 }
 0x184   : > { %1500 = vst.msk [vmem:[#allocation3 + $0x8] sm:$0xc0] %vm1469_vm2, %v1482_v27  ;;  %v1462_v30 = vmax.f32 %v1456_v28, 0.0  ;;  %v1430_v31 = vpop.f32.mrb[4].mxu0  ;;  %v11664_v28 = vpack.c.bf16 %v1530_v21, %v1528_v20  ;;  %v1547_v20 = vld [vmem:[%s21089_s3 + $0x100] sm:$0xff]  ;;  %v1549_v21 = vld [vmem:[%s21089_s3 + $0x110] sm:$0xff] }
 0x185   : > { %v1483_v32 = vrot.slane %v1461_v29, 2  ;;  %v1457_v33 = vadd.f32 %v1446_v15, %v1430_v31  ;;  %v1432_v34 = vpop.f32.mrb[5].mxu0  ;;  %v1523_v15 = vld [vmem:[%s21089_s3 + $0x40] sm:$0xff]  ;;  %vm5206_vm2 = vcmask 257024  }
 0x186   : > { %v1485_v35 = vrot.slane %v1462_v30, 2  ;;  %v1458_v36 = vadd.f32 %v1450_v16, %v1432_v34  ;;  %v1525_v16 = vld [vmem:[%s21089_s3 + $0x50] sm:$0xff]  ;;  %v1527_v29 = vld [vmem:[%s21089_s3 + $0x60] sm:$0xff] }
 0x187   : > { %v14557_v5 = vsel %vm1480_vm5, %v1481_v24, %v1483_v32  ;;  %v1463_v13 = vmax.f32 %v1457_v33, 0.0  ;;  %v11662_v25 = vpack.c.bf16 %v1525_v16, %v1523_v15  ;;  %v1529_v30 = vld [vmem:[%s21089_s3 + $0x70] sm:$0xff]  ;;  %v1534_v33 = vld [vmem:[%s21089_s3 + $0x98] sm:$0xff]  ;;  %v1548_v15 = vld [vmem:[%s21089_s3 + $0x108] sm:$0xff] }
 0x188   : > { %1501 = vst [vmem:[#allocation3 + $0x10] sm:$0xff] %v14557_v5  ;;  %v1486_v37 = vsel %vm1480_vm5, %v1482_v27, %v1485_v35  ;;  %v1464_v38 = vmax.f32 %v1458_v36, 0.0  ;;  %v1626_v53 = vrot.slane %v14557_v5, 1  ;;  %v11666_v36 = vpack.c.bf16 %v1529_v30, %v1527_v29  ;;  %v1550_v16 = vld [vmem:[%s21089_s3 + $0x118] sm:$0xff]  ;;  %v1551_v29 = vld [vmem:[%s21089_s3 + $0x120] sm:$0xff]  ;;  %v1553_v30 = vld [vmem:[%s21089_s3 + $0x130] sm:$0xff] }
 0x189   : > { %1502 = vst.msk [vmem:[#allocation3 + $0x18] sm:$0xff] %vm387_vm0, %v1486_v37  ;;  %v1487_v39 = vrot.slane %v1463_v13, 2 }
 0x18a   : > { %v1489_v40 = vrot.slane %v1464_v38, 2  ;;  %v1563_v43 = vld [vmem:[#allocation3] sm:$0xfe] }
 0x18b   : > { %v14563_v41 = vsel %vm1480_vm5, %v1483_v32, %v1487_v39  ;;  %1505 = vst [vmem:[#allocation3 + $0x30] sm:$0x3f] %v1487_v39  ;;  %v1564_v44 = vld [vmem:[#allocation3 + $0x8] sm:$0xfe]  ;;  %v1625_v48 = vrot.slane %v1563_v43, 1 }
 0x18c   : > { %1503 = vst [vmem:[#allocation3 + $0x20] sm:$0xff] %v14563_v41  ;;  %v1490_v42 = vsel %vm1480_vm5, %v1485_v35, %v1489_v40  ;;  %1506 = vst.msk [vmem:[#allocation3 + $0x38] sm:$0x3f] %vm1466_vm3, %v1489_v40  ;;  %v1628_v51 = vrot.slane %v1564_v44, 1  ;;  %v1631_v62 = vrot.slane %v14563_v41, 1  ;;  %v1532_v32 = vld [vmem:[%s21089_s3 + $0x88] sm:$0xff] }
 0x18d   : > { %1504 = vst.msk [vmem:[#allocation3 + $0x28] sm:$0xff] %vm387_vm0, %v1490_v42  ;;  %v1627_v60 = vsel %vm1624_vm6, %v1625_v48, %v1626_v53  ;;  %v11668_v39 = vpack.c.bf16 %v1534_v33, %v1532_v32  ;;  %v1531_v40 = vld [vmem:[%s21089_s3 + $0x80] sm:$0xff]  ;;  %v1533_v42 = vld [vmem:[%s21089_s3 + $0x90] sm:$0xff]  ;;  %v1536_v43 = vld [vmem:[%s21089_s3 + $0xa8] sm:$0xff]  ;;  %v11690_v33 = vpack.c.bf16 %v1553_v30, %v1551_v29  ;;  %vm5270_vm3 = vcmask 261124  }
 0x18e   : > { %v1632_v18 = vsel %vm1624_vm6, %v1626_v53, %v1631_v62  ;;  %v1538_v44 = vld [vmem:[%s21089_s3 + $0xb8] sm:$0xff]  ;;  %v1508_v46 = vld [vmem:[#allocation3 + $0x8] sm:$0xff]  ;;  %v11670_v49 = vpack.c.bf16 %v1533_v42, %v1531_v40  ;;  %v1535_v53 = vld [vmem:[%s21089_s3 + $0xa0] sm:$0xff] }
 0x18f   : > { %v1558_v32 = vld [vmem:[%s21089_s3 + $0x158] sm:$0xff]  ;;  %v1560_v40 = vld [vmem:[%s21089_s3 + $0x168] sm:$0xff] }
 0x190   : > { %v14575_v47 = vld [vmem:[#allocation3 + $0x18] sm:$0xff]  ;;  %v9352_v29 = vld [vmem:[%s21089_s3 + $0x388] sm:$0xff] }
 0x191   : > { %v1629_v52 = vrot.slane %v14575_v47, 1  ;;  %v2093_v6 = vrot.slane %v14575_v47, 3  ;;  %v2278_v26 = vrot.slane %v14575_v47, 4  ;;  %v2463_v13 = vrot.slane %v14575_v47, 5  ;;  %v1562_v42 = vld [vmem:[%s21089_s3 + $0x178] sm:$0xff] }
 0x192   : > { %v1565_v3 = vld [vmem:[#allocation3 + $0x30] sm:$0x7f]  ;;  %v2648_v50 = vrot.slane %v14575_v47, 6  ;;  %v9354_v30 = vld [vmem:[%s21089_s3 + $0x398] sm:$0xff] }
 0x193   : > { %v1630_v55 = vsel %vm1624_vm6, %v1628_v51, %v1629_v52  ;;  %v1566_v59 = vld [vmem:[#allocation3 + $0x38] sm:$0x7f]  ;;  %v1635_v19 = vrot.slane %v1565_v3, 1  ;;  %v11678_v3 = vpack.c.bf16 %v1541_v0, %v1539_v63 }
 0x194   : > { %9327 = vmatprep.mubr.msk.f32.mxu1 %vm387_vm0, %v1630_v55  ;;  %v14594_v61 = vld [vmem:[#allocation3 + $0x28] sm:$0xff]  ;;  %v1637_v2 = vrot.slane %v1566_v59, 1  ;;  %v14613_v17 = vld [vmem:[#allocation3 + $0x38] sm:$0xff] }
 0x195   : > { %1716 = vmatmul.mubr.f32.vlgmr.msra.gmra.mrb[0].mxu1 %v1627_v60  ;;  %v1633_v1 = vrot.slane %v14594_v61, 1  ;;  %v2097_v8 = vrot.slane %v14594_v61, 3  ;;  %v2282_v24 = vrot.slane %v14594_v61, 4  ;;  %v2286_v27 = vrot.slane %v14613_v17, 4 }
 0x196   : > { %11655 = vmatpush1.bf16.msra.mxu1 %v11654_v54  ;;  %v1636_v31 = vsel %vm1624_vm6, %v1631_v62, %v1635_v19  ;;  %v2467_v37 = vrot.slane %v14594_v61, 5  ;;  %v2471_v38 = vrot.slane %v14613_v17, 5  ;;  %v2652_v51 = vrot.slane %v14594_v61, 6  ;;  %v1537_v54 = vld [vmem:[%s21089_s3 + $0xb0] sm:$0xff] }
 0x197   : > { %v1634_v9 = vsel %vm1624_vm6, %v1629_v52, %v1633_v1  ;;  %11657 = vmatprep.subr.bf16.mxu1 %v11656_v56  ;;  %v14628_v22 = vsel %vm2088_vm7, %v2093_v6, %v2097_v8  ;;  %v1638_v23 = vsel %vm1624_vm6, %v1633_v1, %v1637_v2  ;;  %v14651_v34 = vsel %vm2273_vm8, %v2278_v26, %v2282_v24  ;;  %v1540_v56 = vld [vmem:[%s21089_s3 + $0xc8] sm:$0xff] }
 0x198   : > { %9328 = vmatprep.mubr.msk.f32.mxu1 %vm387_vm0, %v1634_v9  ;;  %v14656_v35 = vsel %vm2273_vm8, %v2282_v24, %v2286_v27  ;;  %v14677_v45 = vsel %vm2458_vm9, %v2463_v13, %v2467_v37  ;;  %v14682_v48 = vsel %vm2458_vm9, %v2467_v37, %v2471_v38  ;;  %v11672_v52 = vpack.c.bf16 %v1538_v44, %v1536_v43  ;;  %v1544_v1 = vld [vmem:[%s21089_s3 + $0xe8] sm:$0xff]  ;;  %v1543_v9 = vld [vmem:[%s21089_s3 + $0xe0] sm:$0xff]  ;;  %v1554_v24 = vld [vmem:[%s21089_s3 + $0x138] sm:$0xff] }
 0x199   : > { %1722 = vmatmul.mubr.f32.gmra.mrb[2].mxu1 %v1632_v18  ;;  %v2656_v55 = vrot.slane %v14613_v17, 6  ;;  %v14703_v58 = vsel %vm2643_vm10, %v2648_v50, %v2652_v51  ;;  %v11674_v60 = vpack.c.bf16 %v1537_v54, %v1535_v53  ;;  %v11676_v62 = vpack.c.bf16 %v1542_v57, %v1540_v56  ;;  %v1555_v37 = vld [vmem:[%s21089_s3 + $0x140] sm:$0xff]  ;;  %v9337_v57 = vld [vmem:[%s21089_s3 + $0x310] sm:$0xff] }
 0x19a   : > { %11659 = vmatpush1.bf16.msra.mxu1 %v11658_v4  ;;  %9329 = vmatprep.mubr.msk.f32.mxu1 %vm387_vm0, %v1638_v23  ;;  %v1552_v23 = vld [vmem:[%s21089_s3 + $0x128] sm:$0xff]  ;;  %v11696_v44 = vpack.c.bf16 %v1562_v42, %v1560_v40  ;;  %v9335_v56 = vld [vmem:[%s21089_s3 + $0x300] sm:$0xff]  ;;  %v9353_v40 = vld [vmem:[%s21089_s3 + $0x390] sm:$0xff] }
 0x19b   : > { %11661 = vmatprep.subr.bf16.mxu1 %v11660_v12  ;;  %v14708_v59 = vsel %vm2643_vm10, %v2652_v51, %v2656_v55  ;;  %v1545_v12 = vld [vmem:[%s21089_s3 + $0xf0] sm:$0xff]  ;;  %v9336_v51 = vld [vmem:[%s21089_s3 + $0x308] sm:$0xff]  ;;  %v11702_v63 = vpack.c.bf16 %v9337_v57, %v9335_v56  ;;  %v9362_v56 = vld [vmem:[%s21089_s3 + $0x3d8] sm:$0xff] }
 0x19c   : > { %v11682_v18 = vpack.c.bf16 %v1545_v12, %v1543_v9  ;;  %v9346_v9 = vld [vmem:[%s21089_s3 + $0x358] sm:$0xff]  ;;  %v1513_v42 = vld [vmem:[#allocation3 + $0x30] sm:$0x3f] }
 0x19d   : > { %1728 = vmatmul.mubr.f32.gmra.mrb[4].mxu1 %v1636_v31  ;;  %v1556_v31 = vld [vmem:[%s21089_s3 + $0x148] sm:$0xff] }
 0x19e   : > { %11663 = vmatpush1.bf16.msra.mxu1 %v11662_v25  ;;  %9330 = vmatprep.mubr.msk.f32.mxu1 %vm387_vm0, %v1637_v2  ;;  %v1546_v2 = vld [vmem:[%s21089_s3 + $0xf8] sm:$0xff]  ;;  %v11686_v25 = vpack.c.bf16 %v1549_v21, %v1547_v20 }
 0x19f   : > { %11665 = vmatprep.subr.bf16.mxu1 %v11664_v28  ;;  %v11680_v4 = vpack.c.bf16 %v1546_v2, %v1544_v1  ;;  %v11688_v28 = vpack.c.bf16 %v1554_v24, %v1552_v23  ;;  %v9339_v1 = vld [vmem:[%s21089_s3 + $0x320] sm:$0xff]  ;;  %v9341_v2 = vld [vmem:[%s21089_s3 + $0x330] sm:$0xff]  ;;  %v9350_v20 = vld [vmem:[%s21089_s3 + $0x378] sm:$0xff] }
 0x1a0   : > { %v11706_v12 = vpack.c.bf16 %v9341_v2, %v9339_v1  ;;  %v9347_v24 = vld [vmem:[%s21089_s3 + $0x360] sm:$0xff]  ;;  %v9366_v1 = vld [vmem:[%s21089_s3 + $0x3f8] sm:$0xff] }
 0x1a1   : > { %1734 = vmatmul.mubr.f32.gmra.mrb[6].mxu1 %v1635_v19  ;;  %v11684_v19 = vpack.c.bf16 %v1550_v16, %v1548_v15  ;;  %v9343_v16 = vld [vmem:[%s21089_s3 + $0x340] sm:$0xff] }
 0x1a2   : > { %11667 = vmatpush1.bf16.msra.mxu1 %v11666_v36  ;;  %9331 = vmatprep.mubr.msk.f32.mxu1 %vm387_vm0, %v1508_v46  ;;  %v11692_v36 = vpack.c.bf16 %v1558_v32, %v1556_v31  ;;  %v1559_v46 = vld [vmem:[%s21089_s3 + $0x160] sm:$0xff]  ;;  %v1514_v31 = vld [vmem:[#allocation3 + $0x38] sm:$0x3f]  ;;  %v1900_v32 = vrot.slane %v14575_v47, 2 }
 0x1a3   : > { %11669 = vmatprep.subr.bf16.mxu1 %v11668_v39  ;;  %v1557_v39 = vld [vmem:[%s21089_s3 + $0x150] sm:$0xff] }
 0x1a4   : > { %v11694_v43 = vpack.c.bf16 %v1557_v39, %v1555_v37  ;;  %v11716_v37 = vpack.c.bf16 %v9354_v30, %v9352_v29  ;;  %v9351_v39 = vld [vmem:[%s21089_s3 + $0x380] sm:$0xff]  ;;  %v9373_v29 = vld [vmem:[%s21089_s3 + $0x430] sm:$0xff]  ;;  %v9376_v30 = vld [vmem:[%s21089_s3 + $0x448] sm:$0xff] }
 0x1a6   : > { %11671 = vmatpush1.bf16.msra.mxu1 %v11670_v49  ;;  %v1561_v49 = vld [vmem:[%s21089_s3 + $0x170] sm:$0xff] }
 0x1a7   : > { %11673 = vmatprep.subr.bf16.mxu1 %v11672_v52  ;;  %v9338_v52 = vld [vmem:[%s21089_s3 + $0x318] sm:$0xff]  ;;  %v11698_v53 = vpack.c.bf16 %v1561_v49, %v1559_v46  ;;  %v11718_v49 = vpack.c.bf16 %v9353_v40, %v9351_v39  ;;  %v9377_v39 = vld [vmem:[%s21089_s3 + $0x450] sm:$0xff]  ;;  %v9380_v40 = vld [vmem:[%s21089_s3 + $0x468] sm:$0xff] }
 0x1a8   : > { %v11700_v54 = vpack.c.bf16 %v9338_v52, %v9336_v51  ;;  %v9355_v52 = vld [vmem:[%s21089_s3 + $0x3a0] sm:$0xff] }
 0x1aa   : > { %11675 = vmatpush1.bf16.msra.mxu1 %v11674_v60  ;;  %v9340_v60 = vld [vmem:[%s21089_s3 + $0x328] sm:$0xff] }
 0x1ab   : > { %11677 = vmatprep.subr.bf16.mxu1 %v11676_v62  ;;  %v9342_v62 = vld [vmem:[%s21089_s3 + $0x338] sm:$0xff] }
 0x1ac   : > { %v11704_v0 = vpack.c.bf16 %v9342_v62, %v9340_v60  ;;  %v9359_v62 = vld [vmem:[%s21089_s3 + $0x3c0] sm:$0xff] }
 0x1ae   : > { %11679 = vmatpush1.bf16.msra.mxu1 %v11678_v3  ;;  %v1507_v3 = vld [vmem:[#allocation3] sm:$0xff] }
 0x1af   : > { %11681 = vmatprep.subr.bf16.mxu1 %v11680_v4  ;;  %v9344_v4 = vld [vmem:[%s21089_s3 + $0x348] sm:$0xff] }
 0x1b0   : > { %v11708_v15 = vpack.c.bf16 %v9346_v9, %v9344_v4  ;;  %v9363_v4 = vld [vmem:[%s21089_s3 + $0x3e0] sm:$0xff]  ;;  %v9365_v9 = vld [vmem:[%s21089_s3 + $0x3f0] sm:$0xff] }
 0x1b2   : > { %11683 = vmatpush1.bf16.msra.mxu1 %v11682_v18  ;;  %v9345_v18 = vld [vmem:[%s21089_s3 + $0x350] sm:$0xff] }
 0x1b3   : > { %11685 = vmatprep.subr.bf16.mxu1 %v11684_v19  ;;  %v9348_v19 = vld [vmem:[%s21089_s3 + $0x368] sm:$0xff]  ;;  %v11710_v21 = vpack.c.bf16 %v9345_v18, %v9343_v16  ;;  %v11730_v16 = vpack.c.bf16 %v9365_v9, %v9363_v4  ;;  %v9391_v9 = vld [vmem:[%s21089_s3 + $0x4a0] sm:$0xff] }
 0x1b4   : > { %v11712_v23 = vpack.c.bf16 %v9350_v20, %v9348_v19  ;;  %v9367_v19 = vld [vmem:[%s21089_s3 + $0x400] sm:$0xff]  ;;  %v9369_v20 = vld [vmem:[%s21089_s3 + $0x410] sm:$0xff] }
 0x1b6   : > { %11687 = vmatpush1.bf16.msra.mxu1 %v11686_v25  ;;  %v9349_v25 = vld [vmem:[%s21089_s3 + $0x370] sm:$0xff] }
 0x1b7   : > { %11689 = vmatprep.subr.bf16.mxu1 %v11688_v28  ;;  %v1840_v28 = vld [vmem:[#allocation3 + $0x8] sm:$0xfc] }
 0x1ba   : > { %11691 = vmatpush1.bf16.msra.mxu1 %v11690_v33  ;;  %v11714_v33 = vpack.c.bf16 %v9349_v25, %v9347_v24  ;;  %v11734_v24 = vpack.c.bf16 %v9369_v20, %v9367_v19  ;;  %v9398_v19 = vld [vmem:[%s21089_s3 + $0x4d8] sm:$0xff] }
 0x1bb   : > { %11693 = vmatprep.subr.bf16.mxu1 %v11692_v36  ;;  %v1899_v36 = vrot.slane %v1840_v28, 2  ;;  %v9371_v28 = vld [vmem:[%s21089_s3 + $0x420] sm:$0xff] }
 0x1bd   : > { %v1901_v46 = vsel %vm1480_vm5, %v1899_v36, %v1900_v32 }
 0x1be   : > { %11695 = vmatpush1.bf16.msra.mxu1 %v11694_v43  ;;  %v9356_v43 = vld [vmem:[%s21089_s3 + $0x3a8] sm:$0xff] }
 0x1bf   : > { %11697 = vmatprep.subr.bf16.mxu1 %v11696_v44  ;;  %v9358_v44 = vld [vmem:[%s21089_s3 + $0x3b8] sm:$0xff] }
 0x1c0   : > { %v11720_v51 = vpack.c.bf16 %v9358_v44, %v9356_v43 }
 0x1c2   : > { %11699 = vmatpush1.bf16.msra.mxu1 %v11698_v53  ;;  %v9357_v53 = vld [vmem:[%s21089_s3 + $0x3b0] sm:$0xff] }
 0x1c3   : > { %11701 = vmatprep.subr.bf16.mxu1 %v11700_v54  ;;  %v9360_v54 = vld [vmem:[%s21089_s3 + $0x3c8] sm:$0xff]  ;;  %v11722_v57 = vpack.c.bf16 %v9357_v53, %v9355_v52  ;;  %v9390_v52 = vld [vmem:[%s21089_s3 + $0x498] sm:$0xff]  ;;  %v1839_v53 = vld [vmem:[#allocation3] sm:$0xfc] }
 0x1c4   : > { %v11724_v60 = vpack.c.bf16 %v9362_v56, %v9360_v54 }
 0x1c5   : > { %1815 = vmatmul.mubr.f32.vlgmr.msra.gmra.mrb[0].mxu1 %v1507_v3 }
 0x1c6   : > { %9332 = vmatprep.mubr.msk.f32.mxu1 %vm387_vm0, %v14575_v47  ;;  %11703 = vmatpush1.bf16.msra.mxu1 %v11702_v63  ;;  %v9361_v63 = vld [vmem:[%s21089_s3 + $0x3d0] sm:$0xff]  ;;  %v9568_v47 = vld [vmem:[%s21089_s3 + $0x9c8] sm:$0xff] }
 0x1c7   : > { %11705 = vmatprep.subr.bf16.mxu1 %v11704_v0  ;;  %v9364_v0 = vld [vmem:[%s21089_s3 + $0x3e8] sm:$0xff]  ;;  %v11726_v2 = vpack.c.bf16 %v9361_v63, %v9359_v62  ;;  %v1896_v62 = vrot.slane %v1839_v53, 2 }
 0x1c8   : > { %v11728_v3 = vpack.c.bf16 %v9366_v1, %v9364_v0  ;;  %v9392_v63 = vld [vmem:[%s21089_s3 + $0x4a8] sm:$0xff]  ;;  %v9394_v0 = vld [vmem:[%s21089_s3 + $0x4b8] sm:$0xff]  ;;  %v1904_v1 = vrot.slane %v14594_v61, 2 }
 0x1c9   : > { %1821 = vmatmul.mubr.f32.gmra.mrb[2].mxu1 %v14557_v5  ;;  %v11752_v4 = vpack.c.bf16 %v9394_v0, %v9392_v63 }
 0x1ca   : > { %9333 = vmatprep.mubr.msk.f32.mxu1 %vm387_vm0, %v14594_v61  ;;  %11707 = vmatpush1.bf16.msra.mxu1 %v11706_v12  ;;  %v9368_v12 = vld [vmem:[%s21089_s3 + $0x408] sm:$0xff]  ;;  %v1905_v20 = vsel %vm1480_vm5, %v1900_v32, %v1904_v1 }
 0x1cb   : > { %11709 = vmatprep.subr.bf16.mxu1 %v11708_v15  ;;  %v9370_v15 = vld [vmem:[%s21089_s3 + $0x418] sm:$0xff] }
 0x1cc   : > { %v11732_v18 = vpack.c.bf16 %v9370_v15, %v9368_v12  ;;  %v9393_v12 = vld [vmem:[%s21089_s3 + $0x4b0] sm:$0xff] }
 0x1cd   : > { %1827 = vmatmul.mubr.f32.gmra.mrb[4].mxu1 %v14563_v41 }
 0x1ce   : > { %9334 = vmatprep.mubr.msk.f32.mxu1 %vm387_vm0, %v1514_v31  ;;  %11711 = vmatpush1.bf16.msra.mxu1 %v11710_v21  ;;  %v9372_v21 = vld [vmem:[%s21089_s3 + $0x428] sm:$0xff]  ;;  %v9378_v31 = vld [vmem:[%s21089_s3 + $0x458] sm:$0xff] }
 0x1cf   : > { %11713 = vmatprep.subr.bf16.mxu1 %v11712_v23  ;;  %v9374_v23 = vld [vmem:[%s21089_s3 + $0x438] sm:$0xff]  ;;  %v11740_v36 = vpack.c.bf16 %v9378_v31, %v9376_v30  ;;  %v9400_v31 = vld [vmem:[%s21089_s3 + $0x4e8] sm:$0xff] }
 0x1d0   : > { %v11736_v25 = vpack.c.bf16 %v9374_v23, %v9372_v21  ;;  %v1908_v21 = vrot.slane %v14613_v17, 2  ;;  %v14970_v23 = vld [vmem:[#allocation3 + $0x30] sm:$0xff] }
 0x1d1   : > { %1833 = vmatmul.mubr.f32.gmra.mrb[6].mxu1 %v1513_v42  ;;  %v9382_v42 = vld [vmem:[%s21089_s3 + $0x478] sm:$0xff]  ;;  %v1906_v30 = vrot.slane %v14970_v23, 2 }
 0x1d2   : > { %11715 = vmatpush1.bf16.msra.mxu1 %v11714_v33  ;;  %9383 = vmatprep.mubr.msk.f32.mxu1 %vm387_vm0, %v1901_v46  ;;  %v11738_v33 = vpack.c.bf16 %v9373_v29, %v9371_v28  ;;  %v11744_v44 = vpack.c.bf16 %v9382_v42, %v9380_v40  ;;  %v9379_v46 = vld [vmem:[%s21089_s3 + $0x460] sm:$0xff]  ;;  %v9397_v29 = vld [vmem:[%s21089_s3 + $0x4d0] sm:$0xff] }
 0x1d3   : > { %11717 = vmatprep.subr.bf16.mxu1 %v11716_v37  ;;  %v9375_v37 = vld [vmem:[%s21089_s3 + $0x440] sm:$0xff]  ;;  %v9401_v42 = vld [vmem:[%s21089_s3 + $0x4f0] sm:$0xff] }
 0x1d4   : > { %v11742_v43 = vpack.c.bf16 %v9377_v39, %v9375_v37  ;;  %v9395_v28 = vld [vmem:[%s21089_s3 + $0x4c0] sm:$0xff] }
 0x1d5   : > { %v11758_v37 = vpack.c.bf16 %v9397_v29, %v9395_v28  ;;  %v9399_v40 = vld [vmem:[%s21089_s3 + $0x4e0] sm:$0xff]  ;;  %v9422_v28 = vld [vmem:[%s21089_s3 + $0x598] sm:$0xff] }
 0x1d6   : > { %11719 = vmatpush1.bf16.msra.mxu1 %v11718_v49  ;;  %v9381_v49 = vld [vmem:[%s21089_s3 + $0x470] sm:$0xff] }
 0x1d7   : > { %11721 = vmatprep.subr.bf16.mxu1 %v11720_v51  ;;  %v9388_v51 = vld [vmem:[%s21089_s3 + $0x488] sm:$0xff]  ;;  %v11746_v54 = vpack.c.bf16 %v9381_v49, %v9379_v46  ;;  %v9406_v49 = vld [vmem:[%s21089_s3 + $0x518] sm:$0xff] }
 0x1d8   : > { %v11748_v56 = vpack.c.bf16 %v9390_v52, %v9388_v51  ;;  %v9404_v46 = vld [vmem:[%s21089_s3 + $0x508] sm:$0xff]  ;;  %v11762_v51 = vpack.c.bf16 %v9401_v42, %v9399_v40  ;;  %v9423_v40 = vld [vmem:[%s21089_s3 + $0x5a0] sm:$0xff]  ;;  %v9425_v42 = vld [vmem:[%s21089_s3 + $0x5b0] sm:$0xff] }
 0x1d9   : > { %v11764_v53 = vpack.c.bf16 %v9406_v49, %v9404_v46  ;;  %v11786_v46 = vpack.c.bf16 %v9425_v42, %v9423_v40 }
 0x1da   : > { %11723 = vmatpush1.bf16.msra.mxu1 %v11722_v57  ;;  %v9387_v57 = vld [vmem:[%s21089_s3 + $0x480] sm:$0xff] }
 0x1db   : > { %11725 = vmatprep.subr.bf16.mxu1 %v11724_v60  ;;  %v9389_v60 = vld [vmem:[%s21089_s3 + $0x490] sm:$0xff] }
 0x1de   : > { %11727 = vmatpush1.bf16.msra.mxu1 %v11726_v2  ;;  %v1897_v2 = vrot.slane %v14557_v5, 2 }
 0x1df   : > { %11729 = vmatprep.subr.bf16.mxu1 %v11728_v3  ;;  %v11750_v3 = vpack.c.bf16 %v9389_v60, %v9387_v57  ;;  %v9408_v57 = vld [vmem:[%s21089_s3 + $0x528] sm:$0xff]  ;;  %v9410_v60 = vld [vmem:[%s21089_s3 + $0x538] sm:$0xff] }
 0x1e0   : > { %v1898_v15 = vsel %vm1480_vm5, %v1896_v62, %v1897_v2  ;;  %v11768_v0 = vpack.c.bf16 %v9410_v60, %v9408_v57  ;;  %v9431_v60 = vld [vmem:[%s21089_s3 + $0x5e0] sm:$0xff] }
 0x1e2   : > { %11731 = vmatpush1.bf16.msra.mxu1 %v11730_v16  ;;  %v1902_v16 = vrot.slane %v14563_v41, 2 }
 0x1e3   : > { %11733 = vmatprep.subr.bf16.mxu1 %v11732_v18  ;;  %v9396_v18 = vld [vmem:[%s21089_s3 + $0x4c8] sm:$0xff] }
 0x1e4   : > { %v1903_v32 = vsel %vm1480_vm5, %v1897_v2, %v1902_v16  ;;  %v9409_v2 = vld [vmem:[%s21089_s3 + $0x530] sm:$0xff] }
 0x1e6   : > { %11735 = vmatpush1.bf16.msra.mxu1 %v11734_v24  ;;  %v11754_v24 = vpack.c.bf16 %v9393_v12, %v9391_v9  ;;  %v9411_v12 = vld [vmem:[%s21089_s3 + $0x540] sm:$0xff] }
 0x1e7   : > { %11737 = vmatprep.subr.bf16.mxu1 %v11736_v25  ;;  %v11756_v25 = vpack.c.bf16 %v9398_v19, %v9396_v18  ;;  %v9418_v18 = vld [vmem:[%s21089_s3 + $0x578] sm:$0xff] }
 0x1ea   : > { %11739 = vmatpush1.bf16.msra.mxu1 %v11738_v33  ;;  %v9402_v33 = vld [vmem:[%s21089_s3 + $0x4f8] sm:$0xff] }
 0x1eb   : > { %11741 = vmatprep.subr.bf16.mxu1 %v11740_v36  ;;  %v1909_v36 = vsel %vm1480_vm5, %v1904_v1, %v1908_v21  ;;  %v11760_v39 = vpack.c.bf16 %v9402_v33, %v9400_v31  ;;  %v9407_v1 = vld [vmem:[%s21089_s3 + $0x520] sm:$0xff]  ;;  %v9421_v31 = vld [vmem:[%s21089_s3 + $0x590] sm:$0xff]  ;;  %v9424_v33 = vld [vmem:[%s21089_s3 + $0x5a8] sm:$0xff] }
 0x1ee   : > { %11743 = vmatpush1.bf16.msra.mxu1 %v11742_v43  ;;  %v1907_v43 = vsel %vm1480_vm5, %v1902_v16, %v1906_v30  ;;  %v9416_v16 = vld [vmem:[%s21089_s3 + $0x568] sm:$0xff] }
 0x1ef   : > { %11745 = vmatprep.subr.bf16.mxu1 %v11744_v44  ;;  %v2020_v44 = vld [vmem:[#allocation3 + $0x8] sm:$0xf8] }
 0x1f0   : > { %v2092_v52 = vrot.slane %v2020_v44, 3  ;;  %v9430_v44 = vld [vmem:[%s21089_s3 + $0x5d8] sm:$0xff] }
 0x1f2   : > { %11747 = vmatpush1.bf16.msra.mxu1 %v11746_v54  ;;  %v9403_v54 = vld [vmem:[%s21089_s3 + $0x500] sm:$0xff]  ;;  %v2094_v62 = vsel %vm2088_vm7, %v2092_v52, %v2093_v6  ;;  %v9414_v6 = vld [vmem:[%s21089_s3 + $0x558] sm:$0xff]  ;;  %v9429_v52 = vld [vmem:[%s21089_s3 + $0x5d0] sm:$0xff] }
 0x1f3   : > { %11749 = vmatprep.subr.bf16.mxu1 %v11748_v56  ;;  %v9405_v56 = vld [vmem:[%s21089_s3 + $0x510] sm:$0xff] }
 0x1f4   : > { %v11766_v63 = vpack.c.bf16 %v9405_v56, %v9403_v54  ;;  %v9434_v54 = vld [vmem:[%s21089_s3 + $0x5f8] sm:$0xff] }
 0x1f5   : > { %1987 = vmatmul.mubr.f32.vlgmr.msra.gmra.mrb[0].mxu1 %v1898_v15  ;;  %v9413_v15 = vld [vmem:[%s21089_s3 + $0x550] sm:$0xff] }
 0x1f6   : > { %9384 = vmatprep.mubr.msk.f32.mxu1 %vm387_vm0, %v1905_v20  ;;  %11751 = vmatpush1.bf16.msra.mxu1 %v11750_v3  ;;  %v9412_v3 = vld [vmem:[%s21089_s3 + $0x548] sm:$0xff]  ;;  %v11774_v19 = vpack.c.bf16 %v9413_v15, %v9411_v12  ;;  %v11776_v20 = vpack.c.bf16 %v9418_v18, %v9416_v16  ;;  %v9446_v15 = vld [vmem:[%s21089_s3 + $0x638] sm:$0xff]  ;;  %v2090_v16 = vrot.slane %v14557_v5, 3 }
 0x1f7   : > { %11753 = vmatprep.subr.bf16.mxu1 %v11752_v4  ;;  %v11770_v4 = vpack.c.bf16 %v9409_v2, %v9407_v1  ;;  %v11772_v9 = vpack.c.bf16 %v9414_v6, %v9412_v3  ;;  %v2019_v1 = vld [vmem:[#allocation3] sm:$0xf8]  ;;  %v9444_v12 = vld [vmem:[%s21089_s3 + $0x628] sm:$0xff]  ;;  %v9450_v5 = vld [vmem:[%s21089_s3 + $0x658] sm:$0xff] }
 0x1f8   : > { %v9439_v6 = vld [vmem:[%s21089_s3 + $0x600] sm:$0xff] }
 0x1f9   : > { %1993 = vmatmul.mubr.f32.gmra.mrb[2].mxu1 %v1903_v32 }
 0x1fa   : > { %9385 = vmatprep.mubr.msk.f32.mxu1 %vm387_vm0, %v1909_v36  ;;  %11755 = vmatpush1.bf16.msra.mxu1 %v11754_v24  ;;  %v9417_v24 = vld [vmem:[%s21089_s3 + $0x570] sm:$0xff]  ;;  %v9426_v36 = vld [vmem:[%s21089_s3 + $0x5b8] sm:$0xff] }
 0x1fb   : > { %11757 = vmatprep.subr.bf16.mxu1 %v11756_v25  ;;  %v9420_v25 = vld [vmem:[%s21089_s3 + $0x588] sm:$0xff] }
 0x1fc   : > { %v11780_v32 = vpack.c.bf16 %v9422_v28, %v9420_v25  ;;  %v2095_v25 = vrot.slane %v14563_v41, 3  ;;  %v9448_v28 = vld [vmem:[%s21089_s3 + $0x648] sm:$0xff]  ;;  %v9447_v41 = vld [vmem:[%s21089_s3 + $0x640] sm:$0xff] }
 0x1fd   : > { %1999 = vmatmul.mubr.f32.gmra.mrb[4].mxu1 %v1907_v43  ;;  %v9428_v43 = vld [vmem:[%s21089_s3 + $0x5c8] sm:$0xff] }
 0x1fe   : > { %9386 = vmatprep.mubr.msk.f32.mxu1 %vm387_vm0, %v1908_v21  ;;  %11759 = vmatpush1.bf16.msra.mxu1 %v11758_v37  ;;  %v9415_v21 = vld [vmem:[%s21089_s3 + $0x560] sm:$0xff]  ;;  %v11788_v49 = vpack.c.bf16 %v9430_v44, %v9428_v43 }
 0x1ff   : > { %11761 = vmatprep.subr.bf16.mxu1 %v11760_v39  ;;  %v11778_v29 = vpack.c.bf16 %v9417_v24, %v9415_v21  ;;  %v11784_v39 = vpack.c.bf16 %v9426_v36, %v9424_v33  ;;  %v9445_v21 = vld [vmem:[%s21089_s3 + $0x630] sm:$0xff]  ;;  %v2096_v36 = vsel %vm2088_vm7, %v2090_v16, %v2095_v25  ;;  %v2027_v43 = vld [vmem:[#allocation3 + $0x40] sm:$0x1] }
 0x200   : > { %v9449_v33 = vld [vmem:[%s21089_s3 + $0x650] sm:$0xff] }
 0x201   : > { %2005 = vmatmul.mubr.f32.gmra.mrb[6].mxu1 %v1906_v30  ;;  %v9419_v30 = vld [vmem:[%s21089_s3 + $0x580] sm:$0xff]  ;;  %v11806_v44 = vpack.c.bf16 %v9449_v33, %v9447_v41 }
 0x202   : > { %11763 = vmatpush1.bf16.msra.mxu1 %v11762_v51  ;;  %9435 = vmatprep.mubr.msk.f32.mxu1 %vm387_vm0, %v2094_v62  ;;  %v11782_v37 = vpack.c.bf16 %v9421_v31, %v9419_v30  ;;  %v9427_v51 = vld [vmem:[%s21089_s3 + $0x5c0] sm:$0xff]  ;;  %v9433_v62 = vld [vmem:[%s21089_s3 + $0x5f0] sm:$0xff]  ;;  %v2028_v30 = vld [vmem:[#allocation3 + $0x48] sm:$0x1]  ;;  %v11804_v31 = vpack.c.bf16 %v9450_v5, %v9448_v28 }
 0x203   : > { %11765 = vmatprep.subr.bf16.mxu1 %v11764_v53  ;;  %v9432_v53 = vld [vmem:[%s21089_s3 + $0x5e8] sm:$0xff]  ;;  %v11790_v56 = vpack.c.bf16 %v9429_v52, %v9427_v51  ;;  %v11794_v2 = vpack.c.bf16 %v9433_v62, %v9431_v60  ;;  %v2105_v42 = vrot.slane %v2028_v30, 3  ;;  %v9453_v51 = vld [vmem:[%s21089_s3 + $0x670] sm:$0xff]  ;;  %v2103_v52 = vrot.slane %v2027_v43, 3 }
 0x204   : > { %v11792_v57 = vpack.c.bf16 %v9434_v54, %v9432_v53  ;;  %v9456_v53 = vld [vmem:[%s21089_s3 + $0x688] sm:$0xff]  ;;  %v9458_v54 = vld [vmem:[%s21089_s3 + $0x698] sm:$0xff]  ;;  %v9595_v43 = vld [vmem:[%s21091_s5 + $0x2d0] sm:$0xff] }
 0x205   : > { %v11812_v62 = vpack.c.bf16 %v9458_v54, %v9456_v53  ;;  %v9472_v30 = vld [vmem:[%s21089_s3 + $0x708] sm:$0xff]  ;;  %v9605_v54 = vld [vmem:[%s21091_s5 + $0x320] sm:$0xff] }
 0x206   : > { %11767 = vmatpush1.bf16.msra.mxu1 %v11766_v63  ;;  %v9440_v63 = vld [vmem:[%s21089_s3 + $0x608] sm:$0xff] }
 0x207   : > { %11769 = vmatprep.subr.bf16.mxu1 %v11768_v0  ;;  %v9442_v0 = vld [vmem:[%s21089_s3 + $0x618] sm:$0xff]  ;;  %v9602_v53 = vld [vmem:[%s21091_s5 + $0x308] sm:$0xff] }
 0x208   : > { %v11796_v3 = vpack.c.bf16 %v9442_v0, %v9440_v63  ;;  %v9455_v63 = vld [vmem:[%s21089_s3 + $0x680] sm:$0xff]  ;;  %v9457_v0 = vld [vmem:[%s21089_s3 + $0x690] sm:$0xff] }
 0x20a   : > { %11771 = vmatpush1.bf16.msra.mxu1 %v11770_v4  ;;  %v9441_v4 = vld [vmem:[%s21089_s3 + $0x610] sm:$0xff] }
 0x20b   : > { %11773 = vmatprep.subr.bf16.mxu1 %v11772_v9  ;;  %v2089_v9 = vrot.slane %v2019_v1, 3  ;;  %v11798_v18 = vpack.c.bf16 %v9441_v4, %v9439_v6  ;;  %v11814_v4 = vpack.c.bf16 %v9457_v0, %v9455_v63  ;;  %v9604_v63 = vld [vmem:[%s21091_s5 + $0x318] sm:$0xff] }
 0x20d   : > { %v2091_v24 = vsel %vm2088_vm7, %v2089_v9, %v2090_v16  ;;  %v9464_v16 = vld [vmem:[%s21089_s3 + $0x6c8] sm:$0xff] }
 0x20e   : > { %11775 = vmatpush1.bf16.msra.mxu1 %v11774_v19  ;;  %v11800_v19 = vpack.c.bf16 %v9446_v15, %v9444_v12  ;;  %v9459_v12 = vld [vmem:[%s21089_s3 + $0x6a0] sm:$0xff]  ;;  %v9461_v15 = vld [vmem:[%s21089_s3 + $0x6b0] sm:$0xff] }
 0x20f   : > { %11777 = vmatprep.subr.bf16.mxu1 %v11776_v20  ;;  %v9443_v20 = vld [vmem:[%s21089_s3 + $0x620] sm:$0xff] }
 0x212   : > { %11779 = vmatpush1.bf16.msra.mxu1 %v11778_v29  ;;  %v2101_v29 = vrot.slane %v14613_v17, 3 }
 0x213   : > { %11781 = vmatprep.subr.bf16.mxu1 %v11780_v32  ;;  %v11802_v32 = vpack.c.bf16 %v9445_v21, %v9443_v20  ;;  %v9463_v20 = vld [vmem:[%s21089_s3 + $0x6c0] sm:$0xff]  ;;  %v9465_v21 = vld [vmem:[%s21089_s3 + $0x6d0] sm:$0xff] }
 0x214   : > { %v2102_v40 = vsel %vm2088_vm7, %v2097_v8, %v2101_v29  ;;  %v2217_v8 = vld [vmem:[#allocation3 + $0x8] sm:$0xf0]  ;;  %v11822_v28 = vpack.c.bf16 %v9465_v21, %v9463_v20  ;;  %v9486_v20 = vld [vmem:[%s21089_s3 + $0x778] sm:$0xff] }
 0x215   : > { %v2277_v60 = vrot.slane %v2217_v8, 4 }
 0x216   : > { %11783 = vmatpush1.bf16.msra.mxu1 %v11782_v37  ;;  %v2099_v37 = vrot.slane %v14970_v23, 3 }
 0x217   : > { %11785 = vmatprep.subr.bf16.mxu1 %v11784_v39  ;;  %v9454_v39 = vld [vmem:[%s21089_s3 + $0x678] sm:$0xff]  ;;  %v2279_v6 = vsel %vm2273_vm8, %v2277_v60, %v2278_v26 }
 0x218   : > { %v2100_v61 = vsel %vm2088_vm7, %v2095_v25, %v2099_v37  ;;  %v2104_v1 = vsel %vm2088_vm7, %v2099_v37, %v2103_v52  ;;  %v9466_v26 = vld [vmem:[%s21089_s3 + $0x6d8] sm:$0xff]  ;;  %v9473_v37 = vld [vmem:[%s21089_s3 + $0x710] sm:$0xff] }
 0x219   : > { %v9470_v25 = vld [vmem:[%s21089_s3 + $0x6f8] sm:$0xff] }
 0x21a   : > { %11787 = vmatpush1.bf16.msra.mxu1 %v11786_v46  ;;  %v9482_v60 = vld [vmem:[%s21089_s3 + $0x758] sm:$0xff] }
 0x21b   : > { %11789 = vmatprep.subr.bf16.mxu1 %v11788_v49  ;;  %v9451_v49 = vld [vmem:[%s21089_s3 + $0x660] sm:$0xff] }
 0x21e   : > { %11791 = vmatpush1.bf16.msra.mxu1 %v11790_v56  ;;  %v2106_v56 = vsel %vm2088_vm7, %v2101_v29, %v2105_v42  ;;  %v9467_v29 = vld [vmem:[%s21089_s3 + $0x6e0] sm:$0xff]  ;;  %v9599_v42 = vld [vmem:[%s21091_s5 + $0x2f0] sm:$0xff] }
 0x21f   : > { %11793 = vmatprep.subr.bf16.mxu1 %v11792_v57  ;;  %v11810_v57 = vpack.c.bf16 %v9453_v51, %v9451_v49  ;;  %v9477_v49 = vld [vmem:[%s21089_s3 + $0x730] sm:$0xff] }
 0x222   : > { %11795 = vmatpush1.bf16.msra.mxu1 %v11794_v2  ;;  %v9460_v2 = vld [vmem:[%s21089_s3 + $0x6a8] sm:$0xff] }
 0x223   : > { %11797 = vmatprep.subr.bf16.mxu1 %v11796_v3  ;;  %v9462_v3 = vld [vmem:[%s21089_s3 + $0x6b8] sm:$0xff] }
 0x224   : > { %v11816_v9 = vpack.c.bf16 %v9462_v3, %v9460_v2  ;;  %v9611_v2 = vld [vmem:[%s21091_s5 + $0x350] sm:$0xff] }
 0x225   : > { %2184 = vmatmul.mubr.f32.vlgmr.msra.gmra.mrb[0].mxu1 %v2091_v24  ;;  %v9468_v24 = vld [vmem:[%s21089_s3 + $0x6e8] sm:$0xff] }
 0x226   : > { %9436 = vmatprep.mubr.msk.f32.mxu1 %vm387_vm0, %v14628_v22  ;;  %11799 = vmatpush1.bf16.msra.mxu1 %v11798_v18  ;;  %v9452_v22 = vld [vmem:[%s21089_s3 + $0x668] sm:$0xff]  ;;  %v11818_v18 = vpack.c.bf16 %v9461_v15, %v9459_v12  ;;  %v11824_v5 = vpack.c.bf16 %v9470_v25, %v9468_v24  ;;  %v9483_v25 = vld [vmem:[%s21089_s3 + $0x760] sm:$0xff] }
 0x227   : > { %11801 = vmatprep.subr.bf16.mxu1 %v11800_v19  ;;  %v11808_v46 = vpack.c.bf16 %v9454_v39, %v9452_v22  ;;  %v11820_v19 = vpack.c.bf16 %v9466_v26, %v9464_v16  ;;  %v9476_v22 = vld [vmem:[%s21089_s3 + $0x728] sm:$0xff]  ;;  %v9478_v39 = vld [vmem:[%s21089_s3 + $0x738] sm:$0xff]  ;;  %v9481_v16 = vld [vmem:[%s21089_s3 + $0x750] sm:$0xff] }
 0x228   : > { %v11832_v52 = vpack.c.bf16 %v9478_v39, %v9476_v22  ;;  %v9610_v12 = vld [vmem:[%s21091_s5 + $0x348] sm:$0xff] }
 0x229   : > { %2190 = vmatmul.mubr.f32.gmra.mrb[2].mxu1 %v2096_v36  ;;  %v9471_v36 = vld [vmem:[%s21089_s3 + $0x700] sm:$0xff]  ;;  %v9614_v26 = vld [vmem:[%s21091_s5 + $0x368] sm:$0xff] }
 0x22a   : > { %9437 = vmatprep.mubr.msk.f32.mxu1 %vm387_vm0, %v2102_v40  ;;  %11803 = vmatpush1.bf16.msra.mxu1 %v11802_v32  ;;  %v9469_v32 = vld [vmem:[%s21089_s3 + $0x6f0] sm:$0xff]  ;;  %v9596_v40 = vld [vmem:[%s21091_s5 + $0x2d8] sm:$0xff] }
 0x22b   : > { %11805 = vmatprep.subr.bf16.mxu1 %v11804_v31  ;;  %v9474_v31 = vld [vmem:[%s21089_s3 + $0x718] sm:$0xff]  ;;  %v11826_v41 = vpack.c.bf16 %v9469_v32, %v9467_v29  ;;  %v11940_v51 = vpack.c.bf16 %v9599_v42, %v9596_v40  ;;  %v9619_v42 = vld [vmem:[%s21091_s5 + $0x390] sm:$0xff] }
 0x22c   : > { %v11828_v33 = vpack.c.bf16 %v9474_v31, %v9472_v30  ;;  %v9616_v29 = vld [vmem:[%s21091_s5 + $0x378] sm:$0xff]  ;;  %v9485_v30 = vld [vmem:[%s21089_s3 + $0x770] sm:$0xff] }
 0x22d   : > { %2196 = vmatmul.mubr.f32.gmra.mrb[4].mxu1 %v2100_v61  ;;  %v9598_v61 = vld [vmem:[%s21091_s5 + $0x2e8] sm:$0xff]  ;;  %11941 = vmatprep.subr.bf16.mxu0 %v11940_v51  ;;  %v9620_v31 = vld [vmem:[%s21091_s5 + $0x398] sm:$0xff]  ;;  %v11842_v39 = vpack.c.bf16 %v9485_v30, %v9483_v25  ;;  %v2284_v30 = vrot.slane %v14970_v23, 4 }
 0x22e   : > { %9438 = vmatprep.mubr.msk.f32.mxu1 %vm387_vm0, %v2106_v56  ;;  %11807 = vmatpush1.bf16.msra.mxu1 %v11806_v44  ;;  %v11830_v44 = vpack.c.bf16 %v9473_v37, %v9471_v36  ;;  %v11942_v8 = vpack.c.bf16 %v9598_v61, %v9595_v43  ;;  %v9601_v56 = vld [vmem:[%s21091_s5 + $0x300] sm:$0xff]  ;;  %v9494_v36 = vld [vmem:[%s21089_s3 + $0x798] sm:$0xff]  ;;  %v9622_v43 = vld [vmem:[%s21091_s5 + $0x3a8] sm:$0xff] }
 0x22f   : > { %11809 = vmatprep.subr.bf16.mxu1 %v11808_v46  ;;  %v9475_v46 = vld [vmem:[%s21089_s3 + $0x720] sm:$0xff]  ;;  %v11946_v0 = vpack.c.bf16 %v9604_v63, %v9601_v56  ;;  %v9496_v51 = vld [vmem:[%s21089_s3 + $0x7a8] sm:$0xff]  ;;  %v15345_v56 = vld [vmem:[#allocation3 + $0x10] sm:$0xff] }
 0x230   : > { %11943 = vmatpush1.bf16.msra.mxu0 %v11942_v8  ;;  %v11834_v3 = vpack.c.bf16 %v9477_v49, %v9475_v46  ;;  %v2216_v37 = vld [vmem:[#allocation3] sm:$0xf0]  ;;  %v9493_v49 = vld [vmem:[%s21089_s3 + $0x790] sm:$0xff]  ;;  %v9626_v8 = vld [vmem:[%s21091_s5 + $0x3c8] sm:$0xff] }
 0x231   : > { %2202 = vmatmul.mubr.f32.gmra.mrb[6].mxu1 %v2104_v1  ;;  %v9608_v1 = vld [vmem:[%s21091_s5 + $0x338] sm:$0xff]  ;;  %v9491_v46 = vld [vmem:[%s21089_s3 + $0x780] sm:$0xff]  ;;  %v2274_v61 = vrot.slane %v2216_v37, 4 }
 0x232   : > { %11811 = vmatpush1.bf16.msra.mxu1 %v11810_v57  ;;  %9487 = vmatprep.mubr.msk.f32.mxu1 %vm387_vm0, %v2279_v6  ;;  %v9480_v57 = vld [vmem:[%s21089_s3 + $0x748] sm:$0xff]  ;;  %v9479_v6 = vld [vmem:[%s21089_s3 + $0x740] sm:$0xff]  ;;  %v9628_v63 = vld [vmem:[%s21091_s5 + $0x3d8] sm:$0xff] }
 0x233   : > { %11813 = vmatprep.subr.bf16.mxu1 %v11812_v62  ;;  %v11944_v62 = vpack.c.bf16 %v9605_v54, %v9602_v53  ;;  %v11836_v15 = vpack.c.bf16 %v9482_v60, %v9480_v57  ;;  %v11838_v24 = vpack.c.bf16 %v9481_v16, %v9479_v6  ;;  %v9629_v53 = vld [vmem:[%s21091_s5 + $0x3e0] sm:$0xff]  ;;  %v11958_v54 = vpack.c.bf16 %v9622_v43, %v9619_v42  ;;  %v9632_v16 = vld [vmem:[%s21091_s5 + $0x3f8] sm:$0xff] }
 0x234   : > { %v2275_v57 = vrot.slane %v15345_v56, 4  ;;  %v11846_v60 = vpack.c.bf16 %v9493_v49, %v9491_v46  ;;  %v11960_v6 = vpack.c.bf16 %v9629_v53, %v9626_v8  ;;  %v2218_v37 = vld [vmem:[#allocation3 + $0x40] sm:$0x3]  ;;  %v9640_v43 = vld [vmem:[%s21091_s5 + $0x438] sm:$0xff]  ;;  %v9508_v49 = vld [vmem:[%s21089_s3 + $0x808] sm:$0xff] }
 0x235   : > { %11945 = vmatprep.subr.bf16.mxu0 %v11944_v62  ;;  %v9625_v62 = vld [vmem:[%s21091_s5 + $0x3c0] sm:$0xff]  ;;  %v9510_v8 = vld [vmem:[%s21089_s3 + $0x818] sm:$0xff] }
 0x236   : > { %11815 = vmatpush1.bf16.msra.mxu1 %v11814_v4  ;;  %v11948_v4 = vpack.c.bf16 %v9611_v2, %v9608_v1  ;;  %11947 = vmatpush1.bf16.msra.mxu0 %v11946_v0  ;;  %v9495_v1 = vld [vmem:[%s21089_s3 + $0x7a0] sm:$0xff]  ;;  %v9497_v2 = vld [vmem:[%s21089_s3 + $0x7b0] sm:$0xff]  ;;  %v9644_v53 = vld [vmem:[%s21091_s5 + $0x458] sm:$0xff] }
 0x237   : > { %11817 = vmatprep.subr.bf16.mxu1 %v11816_v9  ;;  %v9607_v9 = vld [vmem:[%s21091_s5 + $0x330] sm:$0xff]  ;;  %v9637_v42 = vld [vmem:[%s21091_s5 + $0x420] sm:$0xff] }
 0x238   : > { %v11950_v21 = vpack.c.bf16 %v9610_v12, %v9607_v9  ;;  %11949 = vmatprep.subr.bf16.mxu0 %v11948_v4  ;;  %v2276_v4 = vsel %vm2273_vm8, %v2274_v61, %v2275_v57  ;;  %v15364_v9 = vld [vmem:[#allocation3 + $0x20] sm:$0xff] }
 0x239   : > { %v2280_v12 = vrot.slane %v15364_v9, 4  ;;  %v9503_v46 = vld [vmem:[%s21089_s3 + $0x7e0] sm:$0xff] }
 0x23a   : > { %11819 = vmatpush1.bf16.msra.mxu1 %v11818_v18  ;;  %v9617_v18 = vld [vmem:[%s21091_s5 + $0x380] sm:$0xff]  ;;  %11951 = vmatpush1.bf16.msra.mxu0 %v11950_v21  ;;  %v9631_v21 = vld [vmem:[%s21091_s5 + $0x3f0] sm:$0xff] }
 0x23b   : > { %11821 = vmatprep.subr.bf16.mxu1 %v11820_v19  ;;  %v9484_v19 = vld [vmem:[%s21089_s3 + $0x768] sm:$0xff]  ;;  %v2285_v61 = vsel %vm2273_vm8, %v2280_v12, %v2284_v30 }
 0x23c   : > { %v11840_v32 = vpack.c.bf16 %v9486_v20, %v9484_v19  ;;  %v11850_v19 = vpack.c.bf16 %v9497_v2, %v9495_v1  ;;  %v2219_v20 = vld [vmem:[#allocation3 + $0x48] sm:$0x3]  ;;  %v11860_v2 = vpack.c.bf16 %v9510_v8, %v9508_v49  ;;  %v9527_v49 = vld [vmem:[%s21089_s3 + $0x8a0] sm:$0xff] }
 0x23e   : > { %11823 = vmatpush1.bf16.msra.mxu1 %v11822_v28  ;;  %v11952_v28 = vpack.c.bf16 %v9617_v18, %v9614_v26  ;;  %v9635_v26 = vld [vmem:[%s21091_s5 + $0x410] sm:$0xff]  ;;  %v11962_v18 = vpack.c.bf16 %v9628_v63, %v9625_v62 }
 0x23f   : > { %11825 = vmatprep.subr.bf16.mxu1 %v11824_v5  ;;  %v9613_v5 = vld [vmem:[%s21091_s5 + $0x360] sm:$0xff]  ;;  %v9643_v63 = vld [vmem:[%s21091_s5 + $0x450] sm:$0xff] }
 0x240   : > { %v11954_v22 = vpack.c.bf16 %v9616_v29, %v9613_v5  ;;  %11953 = vmatprep.subr.bf16.mxu0 %v11952_v28  ;;  %v9499_v28 = vld [vmem:[%s21089_s3 + $0x7c0] sm:$0xff]  ;;  %v9504_v5 = vld [vmem:[%s21089_s3 + $0x7e8] sm:$0xff]  ;;  %v11964_v29 = vpack.c.bf16 %v9635_v26, %v9632_v16 }
 0x242   : > { %11827 = vmatpush1.bf16.msra.mxu1 %v11826_v41  ;;  %v9623_v41 = vld [vmem:[%s21091_s5 + $0x3b0] sm:$0xff]  ;;  %11955 = vmatpush1.bf16.msra.mxu0 %v11954_v22 }
 0x243   : > { %11829 = vmatprep.subr.bf16.mxu1 %v11828_v33  ;;  %v9492_v33 = vld [vmem:[%s21089_s3 + $0x788] sm:$0xff]  ;;  %v11956_v40 = vpack.c.bf16 %v9623_v41, %v9620_v31  ;;  %v9506_v31 = vld [vmem:[%s21089_s3 + $0x7f8] sm:$0xff] }
 0x244   : > { %v9638_v41 = vld [vmem:[%s21091_s5 + $0x428] sm:$0xff] }
 0x245   : > { %11957 = vmatprep.subr.bf16.mxu0 %v11956_v40  ;;  %v2402_v40 = vld [vmem:[#allocation3 + $0x8] sm:$0xe0] }
 0x246   : > { %11831 = vmatpush1.bf16.msra.mxu1 %v11830_v44  ;;  %v11844_v44 = vpack.c.bf16 %v9494_v36, %v9492_v33  ;;  %11959 = vmatpush1.bf16.msra.mxu0 %v11958_v54  ;;  %v9641_v33 = vld [vmem:[%s21091_s5 + $0x440] sm:$0xff]  ;;  %v2290_v36 = vrot.slane %v2219_v20, 4  ;;  %v9647_v54 = vld [vmem:[%s21091_s5 + $0x470] sm:$0xff]  ;;  %v2462_v1 = vrot.slane %v2402_v40, 5 }
 0x247   : > { %11833 = vmatprep.subr.bf16.mxu1 %v11832_v52  ;;  %v9498_v52 = vld [vmem:[%s21089_s3 + $0x7b8] sm:$0xff]  ;;  %11961 = vmatprep.subr.bf16.mxu0 %v11960_v6  ;;  %v11972_v6 = vpack.c.bf16 %v9647_v54, %v9644_v53  ;;  %v9511_v20 = vld [vmem:[%s21089_s3 + $0x820] sm:$0xff] }
 0x248   : > { %v11848_v0 = vpack.c.bf16 %v9498_v52, %v9496_v51  ;;  %v11968_v51 = vpack.c.bf16 %v9641_v33, %v9638_v41  ;;  %v2288_v52 = vrot.slane %v2218_v37, 4  ;;  %v2464_v16 = vsel %vm2458_vm9, %v2462_v1, %v2463_v13  ;;  %v9516_v13 = vld [vmem:[%s21089_s3 + $0x848] sm:$0xff]  ;;  %v9519_v41 = vld [vmem:[%s21089_s3 + $0x860] sm:$0xff]  ;;  %v9521_v33 = vld [vmem:[%s21089_s3 + $0x870] sm:$0xff] }
 0x249   : > { %v9526_v37 = vld [vmem:[%s21089_s3 + $0x898] sm:$0xff]  ;;  %v9523_v40 = vld [vmem:[%s21089_s3 + $0x880] sm:$0xff] }
 0x24a   : > { %11835 = vmatpush1.bf16.msra.mxu1 %v11834_v3  ;;  %v9500_v3 = vld [vmem:[%s21089_s3 + $0x7c8] sm:$0xff]  ;;  %11963 = vmatpush1.bf16.msra.mxu0 %v11962_v18  ;;  %v9531_v54 = vld [vmem:[%s21089_s3 + $0x8c0] sm:$0xff] }
 0x24b   : > { %11837 = vmatprep.subr.bf16.mxu1 %v11836_v15  ;;  %v9502_v15 = vld [vmem:[%s21089_s3 + $0x7d8] sm:$0xff]  ;;  %11965 = vmatprep.subr.bf16.mxu0 %v11964_v29  ;;  %v9520_v29 = vld [vmem:[%s21089_s3 + $0x868] sm:$0xff]  ;;  %v9535_v1 = vld [vmem:[%s21089_s3 + $0x8e0] sm:$0xff] }
 0x24c   : > { %v11852_v25 = vpack.c.bf16 %v9502_v15, %v9500_v3  ;;  %v9509_v3 = vld [vmem:[%s21089_s3 + $0x810] sm:$0xff]  ;;  %v9514_v15 = vld [vmem:[%s21089_s3 + $0x838] sm:$0xff] }
 0x24e   : > { %11839 = vmatpush1.bf16.msra.mxu1 %v11838_v24  ;;  %v9634_v24 = vld [vmem:[%s21091_s5 + $0x408] sm:$0xff] }
 0x24f   : > { %11841 = vmatprep.subr.bf16.mxu1 %v11840_v32  ;;  %v2281_v32 = vsel %vm2273_vm8, %v2275_v57, %v2280_v12  ;;  %v11966_v22 = vpack.c.bf16 %v9634_v24, %v9631_v21  ;;  %v2291_v57 = vsel %vm2273_vm8, %v2286_v27, %v2290_v36  ;;  %v9507_v27 = vld [vmem:[%s21089_s3 + $0x800] sm:$0xff]  ;;  %v9512_v12 = vld [vmem:[%s21089_s3 + $0x828] sm:$0xff]  ;;  %v9513_v21 = vld [vmem:[%s21089_s3 + $0x830] sm:$0xff] }
 0x250   : > { %v11862_v18 = vpack.c.bf16 %v9509_v3, %v9507_v27  ;;  %v9518_v24 = vld [vmem:[%s21089_s3 + $0x858] sm:$0xff]  ;;  %v9524_v36 = vld [vmem:[%s21089_s3 + $0x888] sm:$0xff] }
 0x251   : > { %11967 = vmatpush1.bf16.msra.mxu0 %v11966_v22  ;;  %v11874_v22 = vpack.c.bf16 %v9521_v33, %v9519_v41  ;;  %v9544_v27 = vld [vmem:[%s21089_s3 + $0x908] sm:$0xff]  ;;  %v9546_v3 = vld [vmem:[%s21089_s3 + $0x918] sm:$0xff]  ;;  %v9551_v41 = vld [vmem:[%s21089_s3 + $0x940] sm:$0xff] }
 0x252   : > { %11843 = vmatpush1.bf16.msra.mxu1 %v11842_v39  ;;  %11969 = vmatprep.subr.bf16.mxu0 %v11968_v51  ;;  %v9529_v51 = vld [vmem:[%s21089_s3 + $0x8b0] sm:$0xff] }
 0x253   : > { %11845 = vmatprep.subr.bf16.mxu1 %v11844_v44  ;;  %v11856_v44 = vpack.c.bf16 %v9506_v31, %v9504_v5  ;;  %v9517_v5 = vld [vmem:[%s21089_s3 + $0x850] sm:$0xff]  ;;  %v11882_v8 = vpack.c.bf16 %v9529_v51, %v9527_v49  ;;  %v2587_v49 = vld [vmem:[#allocation3 + $0x8] sm:$0xc0]  ;;  %v9562_v51 = vld [vmem:[%s21089_s3 + $0x998] sm:$0xff] }
 0x254   : > { %v9553_v33 = vld [vmem:[%s21089_s3 + $0x950] sm:$0xff] }
 0x255   : > { %2369 = vmatmul.mubr.f32.vlgmr.msra.gmra.mrb[0].mxu1 %v2276_v4  ;;  %v2289_v4 = vsel %vm2273_vm8, %v2284_v30, %v2288_v52  ;;  %v9534_v52 = vld [vmem:[%s21089_s3 + $0x8d8] sm:$0xff] }
 0x256   : > { %9488 = vmatprep.mubr.msk.f32.mxu1 %vm387_vm0, %v14651_v34  ;;  %11847 = vmatpush1.bf16.msra.mxu1 %v11846_v60  ;;  %v9501_v34 = vld [vmem:[%s21089_s3 + $0x7d0] sm:$0xff]  ;;  %v11970_v60 = vpack.c.bf16 %v9640_v43, %v9637_v42  ;;  %v9528_v43 = vld [vmem:[%s21089_s3 + $0x8a8] sm:$0xff] }
 0x257   : > { %11849 = vmatprep.subr.bf16.mxu1 %v11848_v0  ;;  %v11854_v39 = vpack.c.bf16 %v9501_v34, %v9499_v28  ;;  %v9646_v0 = vld [vmem:[%s21091_s5 + $0x468] sm:$0xff]  ;;  %v11868_v28 = vpack.c.bf16 %v9518_v24, %v9516_v13  ;;  %v9515_v34 = vld [vmem:[%s21089_s3 + $0x840] sm:$0xff]  ;;  %v9525_v42 = vld [vmem:[%s21089_s3 + $0x890] sm:$0xff] }
 0x258   : > { %11971 = vmatpush1.bf16.msra.mxu0 %v11970_v60  ;;  %v11974_v26 = vpack.c.bf16 %v9646_v0, %v9643_v63  ;;  %v11870_v30 = vpack.c.bf16 %v9517_v5, %v9515_v34  ;;  %v9536_v60 = vld [vmem:[%s21089_s3 + $0x8e8] sm:$0xff]  ;;  %v9547_v24 = vld [vmem:[%s21089_s3 + $0x920] sm:$0xff]  ;;  %v2465_v34 = vrot.slane %v15364_v9, 5 }
 0x259   : > { %2375 = vmatmul.mubr.f32.gmra.mrb[2].mxu1 %v2281_v32  ;;  %11973 = vmatprep.subr.bf16.mxu0 %v11972_v6  ;;  %v9522_v32 = vld [vmem:[%s21089_s3 + $0x878] sm:$0xff]  ;;  %v2401_v6 = vld [vmem:[#allocation3] sm:$0xe0]  ;;  %v9552_v5 = vld [vmem:[%s21089_s3 + $0x948] sm:$0xff] }
 0x25a   : > { %9489 = vmatprep.mubr.msk.f32.mxu1 %vm387_vm0, %v14656_v35  ;;  %11851 = vmatpush1.bf16.msra.mxu1 %v11850_v19  ;;  %v9505_v35 = vld [vmem:[%s21089_s3 + $0x7f0] sm:$0xff]  ;;  %v11864_v19 = vpack.c.bf16 %v9514_v15, %v9512_v12  ;;  %v11872_v31 = vpack.c.bf16 %v9522_v32, %v9520_v29  ;;  %v11892_v12 = vpack.c.bf16 %v9546_v3, %v9544_v27  ;;  %v9543_v15 = vld [vmem:[%s21089_s3 + $0x900] sm:$0xff]  ;;  %v9554_v29 = vld [vmem:[%s21089_s3 + $0x958] sm:$0xff] }
 0x25b   : > { %11853 = vmatprep.subr.bf16.mxu1 %v11852_v25  ;;  %v11858_v62 = vpack.c.bf16 %v9505_v35, %v9503_v46  ;;  %v11866_v25 = vpack.c.bf16 %v9513_v21, %v9511_v20  ;;  %v11878_v46 = vpack.c.bf16 %v9525_v42, %v9523_v40  ;;  %v2460_v20 = vrot.slane %v15345_v56, 5  ;;  %v2403_v40 = vld [vmem:[#allocation3 + $0x40] sm:$0x7]  ;;  %v9565_v27 = vld [vmem:[%s21089_s3 + $0x9b0] sm:$0xff] }
 0x25c   : > { %11975 = vmatpush1.bf16.msra.mxu0 %v11974_v26  ;;  %v2459_v26 = vrot.slane %v2401_v6, 5  ;;  %v11902_v42 = vpack.c.bf16 %v9553_v33, %v9551_v41  ;;  %v9581_v41 = vld [vmem:[%s21089_s3 + $0xa30] sm:$0xff]  ;;  %v9584_v33 = vld [vmem:[%s21089_s3 + $0xa48] sm:$0xff] }
 0x25d   : > { %2381 = vmatmul.mubr.f32.gmra.mrb[4].mxu1 %v2285_v61  ;;  %v9532_v61 = vld [vmem:[%s21089_s3 + $0x8c8] sm:$0xff] }
 0x25e   : > { %9490 = vmatprep.mubr.msk.f32.mxu1 %vm387_vm0, %v2291_v57  ;;  %11855 = vmatpush1.bf16.msra.mxu1 %v11854_v39  ;;  %v11876_v39 = vpack.c.bf16 %v9526_v37, %v9524_v36  ;;  %v11884_v53 = vpack.c.bf16 %v9534_v52, %v9532_v61  ;;  %v9533_v57 = vld [vmem:[%s21089_s3 + $0x8d0] sm:$0xff]  ;;  %v2466_v36 = vsel %vm2458_vm9, %v2460_v20, %v2465_v34  ;;  %v2469_v37 = vrot.slane %v14970_v23, 5  ;;  %v9555_v23 = vld [vmem:[%s21089_s3 + $0x960] sm:$0xff] }
 0x25f   : > { %11857 = vmatprep.subr.bf16.mxu1 %v11856_v44  ;;  %v9530_v44 = vld [vmem:[%s21089_s3 + $0x8b8] sm:$0xff]  ;;  %v11886_v63 = vpack.c.bf16 %v9533_v57, %v9531_v54  ;;  %v9559_v54 = vld [vmem:[%s21089_s3 + $0x980] sm:$0xff]  ;;  %v9561_v57 = vld [vmem:[%s21089_s3 + $0x990] sm:$0xff] }
 0x260   : > { %v11880_v35 = vpack.c.bf16 %v9530_v44, %v9528_v43  ;;  %v9557_v44 = vld [vmem:[%s21089_s3 + $0x970] sm:$0xff] }
 0x261   : > { %2387 = vmatmul.mubr.f32.gmra.mrb[6].mxu1 %v2289_v4  ;;  %v11906_v52 = vpack.c.bf16 %v9557_v44, %v9555_v23  ;;  %v9587_v44 = vld [vmem:[%s21089_s3 + $0xa60] sm:$0xff] }
 0x262   : > { %11859 = vmatpush1.bf16.msra.mxu1 %v11858_v62  ;;  %9539 = vmatprep.mubr.msk.f32.mxu1 %vm387_vm0, %v2464_v16  ;;  %v9538_v62 = vld [vmem:[%s21089_s3 + $0x8f8] sm:$0xff]  ;;  %v9545_v16 = vld [vmem:[%s21089_s3 + $0x910] sm:$0xff] }
 0x263   : > { %11861 = vmatprep.subr.bf16.mxu1 %v11860_v2  ;;  %v11888_v0 = vpack.c.bf16 %v9538_v62, %v9536_v60  ;;  %v9537_v2 = vld [vmem:[%s21089_s3 + $0x8f0] sm:$0xff]  ;;  %v11894_v21 = vpack.c.bf16 %v9545_v16, %v9543_v15  ;;  %v9566_v62 = vld [vmem:[%s21089_s3 + $0x9b8] sm:$0xff]  ;;  %v9572_v15 = vld [vmem:[%s21089_s3 + $0x9e8] sm:$0xff] }
 0x264   : > { %v11890_v4 = vpack.c.bf16 %v9537_v2, %v9535_v1  ;;  %v9563_v2 = vld [vmem:[%s21089_s3 + $0x9a0] sm:$0xff]  ;;  %v9574_v16 = vld [vmem:[%s21089_s3 + $0x9f8] sm:$0xff] }
 0x265   : > { %v11914_v3 = vpack.c.bf16 %v9565_v27, %v9563_v2 }
 0x266   : > { %11863 = vmatpush1.bf16.msra.mxu1 %v11862_v18  ;;  %v9548_v18 = vld [vmem:[%s21089_s3 + $0x928] sm:$0xff] }
 0x267   : > { %11865 = vmatprep.subr.bf16.mxu1 %v11864_v19  ;;  %v9550_v19 = vld [vmem:[%s21089_s3 + $0x938] sm:$0xff] }
 0x268   : > { %v11896_v13 = vpack.c.bf16 %v9550_v19, %v9548_v18  ;;  %v11920_v18 = vpack.c.bf16 %v9574_v16, %v9572_v15  ;;  %v9571_v19 = vld [vmem:[%s21089_s3 + $0x9e0] sm:$0xff]  ;;  %v9731_v15 = vld [vmem:[%s21091_s5 + $0x670] sm:$0xff]  ;;  %v9734_v16 = vld [vmem:[%s21091_s5 + $0x688] sm:$0xff] }
 0x269   : > { %v12223_v17 = vpack.c.bf16 %v9734_v16, %v9731_v15  ;;  %v9788_v15 = vld [vmem:[%s21091_s5 + $0x838] sm:$0xff] }
 0x26a   : > { %11867 = vmatpush1.bf16.msra.mxu1 %v11866_v25  ;;  %v9549_v25 = vld [vmem:[%s21089_s3 + $0x930] sm:$0xff]  ;;  %v9680_v16 = vld [vmem:[%s21091_s5 + $0x578] sm:$0xff] }
 0x26b   : > { %11869 = vmatprep.subr.bf16.mxu1 %v11868_v28  ;;  %v2461_v28 = vsel %vm2458_vm9, %v2459_v26, %v2460_v20  ;;  %v11898_v32 = vpack.c.bf16 %v9549_v25, %v9547_v24  ;;  %v9573_v20 = vld [vmem:[%s21089_s3 + $0x9f0] sm:$0xff] }
 0x26c   : > { %v11922_v24 = vpack.c.bf16 %v9573_v20, %v9571_v19  ;;  %v9743_v20 = vld [vmem:[%s21091_s5 + $0x6d0] sm:$0xff] }
 0x26e   : > { %11871 = vmatpush1.bf16.msra.mxu1 %v11870_v30  ;;  %v2404_v30 = vld [vmem:[#allocation3 + $0x48] sm:$0x7] }
 0x26f   : > { %11873 = vmatprep.subr.bf16.mxu1 %v11872_v31  ;;  %v11900_v31 = vpack.c.bf16 %v9554_v29, %v9552_v5  ;;  %v9580_v5 = vld [vmem:[%s21089_s3 + $0xa28] sm:$0xff]  ;;  %v9582_v29 = vld [vmem:[%s21089_s3 + $0xa38] sm:$0xff] }
 0x272   : > { %11875 = vmatpush1.bf16.msra.mxu1 %v11874_v22  ;;  %v9558_v22 = vld [vmem:[%s21089_s3 + $0x978] sm:$0xff] }
 0x273   : > { %11877 = vmatprep.subr.bf16.mxu1 %v11876_v39  ;;  %v2475_v39 = vrot.slane %v2404_v30, 5  ;;  %v11928_v30 = vpack.c.bf16 %v9582_v29, %v9580_v5  ;;  %v9758_v5 = vld [vmem:[%s21091_s5 + $0x748] sm:$0xff] }
 0x275   : > { %v2476_v61 = vsel %vm2458_vm9, %v2471_v38, %v2475_v39  ;;  %v9564_v38 = vld [vmem:[%s21089_s3 + $0x9a8] sm:$0xff]  ;;  %v9585_v39 = vld [vmem:[%s21089_s3 + $0xa50] sm:$0xff] }
 0x276   : > { %11879 = vmatpush1.bf16.msra.mxu1 %v11878_v46  ;;  %v2470_v46 = vsel %vm2458_vm9, %v2465_v34, %v2469_v37  ;;  %v11912_v1 = vpack.c.bf16 %v9566_v62, %v9564_v38  ;;  %v9577_v34 = vld [vmem:[%s21089_s3 + $0xa10] sm:$0xff]  ;;  %v2650_v38 = vrot.slane %v15364_v9, 6 }
 0x277   : > { %11881 = vmatprep.subr.bf16.mxu1 %v11880_v35  ;;  %v2473_v35 = vrot.slane %v2403_v40, 5  ;;  %v9588_v40 = vld [vmem:[%s21089_s3 + $0xa68] sm:$0xff]  ;;  %v13671_v9 = vld [vmem:[#allocation3 + $0x30] sm:$0xff] }
 0x278   : > { %v2654_v2 = vrot.slane %v13671_v9, 6  ;;  %v9779_v9 = vld [vmem:[%s21091_s5 + $0x7f0] sm:$0xff] }
 0x279   : > { %v2474_v60 = vsel %vm2458_vm9, %v2469_v37, %v2473_v35  ;;  %v2586_v35 = vld [vmem:[#allocation3] sm:$0xc0] }
 0x27a   : > { %11883 = vmatpush1.bf16.msra.mxu1 %v11882_v8  ;;  %v2647_v8 = vrot.slane %v2587_v49, 6 }
 0x27b   : > { %11885 = vmatprep.subr.bf16.mxu1 %v11884_v53 }
 0x27e   : > { %11887 = vmatpush1.bf16.msra.mxu1 %v11886_v63  ;;  %v2649_v63 = vsel %vm2643_vm10, %v2647_v8, %v2648_v50  ;;  %v9570_v50 = vld [vmem:[%s21089_s3 + $0x9d8] sm:$0xff] }
 0x27f   : > { %11889 = vmatprep.subr.bf16.mxu1 %v11888_v0  ;;  %v11910_v0 = vpack.c.bf16 %v9561_v57, %v9559_v54  ;;  %v11916_v6 = vpack.c.bf16 %v9570_v50, %v9568_v47  ;;  %v9713_v54 = vld [vmem:[%s21091_s5 + $0x5e0] sm:$0xff]  ;;  %v9716_v57 = vld [vmem:[%s21091_s5 + $0x5f8] sm:$0xff] }
 0x280   : > { %v12214_v62 = vpack.c.bf16 %v9716_v57, %v9713_v54  ;;  %v9725_v50 = vld [vmem:[%s21091_s5 + $0x640] sm:$0xff] }
 0x281   : > { %v9773_v54 = vld [vmem:[%s21091_s5 + $0x7c0] sm:$0xff] }
 0x282   : > { %11891 = vmatpush1.bf16.msra.mxu1 %v11890_v4  ;;  %v9567_v4 = vld [vmem:[%s21089_s3 + $0x9c0] sm:$0xff] }
 0x283   : > { %11893 = vmatprep.subr.bf16.mxu1 %v11892_v12  ;;  %v9569_v12 = vld [vmem:[%s21089_s3 + $0x9d0] sm:$0xff] }
 0x284   : > { %v11918_v26 = vpack.c.bf16 %v9569_v12, %v9567_v4 }
 0x285   : > { %2554 = vmatmul.mubr.f32.vlgmr.msra.gmra.mrb[0].mxu1 %v2461_v28  ;;  %v9575_v28 = vld [vmem:[%s21089_s3 + $0xa00] sm:$0xff] }
 0x286   : > { %9540 = vmatprep.mubr.msk.f32.mxu1 %vm387_vm0, %v14677_v45  ;;  %11895 = vmatpush1.bf16.msra.mxu1 %v11894_v21  ;;  %v9556_v45 = vld [vmem:[%s21089_s3 + $0x968] sm:$0xff] }
 0x287   : > { %11897 = vmatprep.subr.bf16.mxu1 %v11896_v13  ;;  %v11904_v43 = vpack.c.bf16 %v9558_v22, %v9556_v45  ;;  %v9576_v21 = vld [vmem:[%s21089_s3 + $0xa08] sm:$0xff]  ;;  %v9578_v13 = vld [vmem:[%s21089_s3 + $0xa18] sm:$0xff]  ;;  %v9583_v22 = vld [vmem:[%s21089_s3 + $0xa40] sm:$0xff] }
 0x288   : > { %v11924_v25 = vpack.c.bf16 %v9578_v13, %v9576_v21  ;;  %v9746_v21 = vld [vmem:[%s21091_s5 + $0x6e8] sm:$0xff] }
 0x289   : > { %2560 = vmatmul.mubr.f32.gmra.mrb[2].mxu1 %v2466_v36  ;;  %v9586_v36 = vld [vmem:[%s21089_s3 + $0xa58] sm:$0xff]  ;;  %v12229_v13 = vpack.c.bf16 %v9746_v21, %v9743_v20  ;;  %v9791_v20 = vld [vmem:[%s21091_s5 + $0x850] sm:$0xff]  ;;  %v9794_v21 = vld [vmem:[%s21091_s5 + $0x868] sm:$0xff] }
 0x28a   : > { %9541 = vmatprep.mubr.msk.f32.mxu1 %vm387_vm0, %v14682_v48  ;;  %11899 = vmatpush1.bf16.msra.mxu1 %v11898_v32  ;;  %v9560_v48 = vld [vmem:[%s21089_s3 + $0x988] sm:$0xff]  ;;  %v11926_v32 = vpack.c.bf16 %v9577_v34, %v9575_v28  ;;  %v11932_v45 = vpack.c.bf16 %v9586_v36, %v9584_v33  ;;  %v9755_v34 = vld [vmem:[%s21091_s5 + $0x730] sm:$0xff]  ;;  %v9652_v33 = vld [vmem:[%s21091_s5 + $0x498] sm:$0xff] }
 0x28b   : > { %11901 = vmatprep.subr.bf16.mxu1 %v11900_v31  ;;  %v11908_v53 = vpack.c.bf16 %v9562_v51, %v9560_v48  ;;  %v9579_v31 = vld [vmem:[%s21089_s3 + $0xa20] sm:$0xff]  ;;  %v9707_v48 = vld [vmem:[%s21091_s5 + $0x5b0] sm:$0xff]  ;;  %v9710_v51 = vld [vmem:[%s21091_s5 + $0x5c8] sm:$0xff]  ;;  %v12235_v29 = vpack.c.bf16 %v9758_v5, %v9755_v34 }
 0x28c   : > { %v11930_v37 = vpack.c.bf16 %v9581_v41, %v9579_v31  ;;  %v12211_v8 = vpack.c.bf16 %v9710_v51, %v9707_v48  ;;  %v9649_v41 = vld [vmem:[%s21091_s5 + $0x480] sm:$0xff]  ;;  %v9662_v48 = vld [vmem:[%s21091_s5 + $0x4e8] sm:$0xff] }
 0x28d   : > { %2566 = vmatmul.mubr.f32.gmra.mrb[4].mxu1 %v2470_v46  ;;  %v9589_v46 = vld [vmem:[%s21089_s3 + $0xa70] sm:$0xff]  ;;  %v9761_v36 = vld [vmem:[%s21091_s5 + $0x760] sm:$0xff] }
 0x28e   : > { %9542 = vmatprep.mubr.msk.f32.mxu1 %vm387_vm0, %v2476_v61  ;;  %11903 = vmatpush1.bf16.msra.mxu1 %v11902_v42  ;;  %v9590_v42 = vld [vmem:[%s21089_s3 + $0xa78] sm:$0xff]  ;;  %v11938_v49 = vpack.c.bf16 %v9589_v46, %v9587_v44  ;;  %v2644_v61 = vrot.slane %v2586_v35, 6  ;;  %v9767_v44 = vld [vmem:[%s21091_s5 + $0x790] sm:$0xff]  ;;  %v9770_v35 = vld [vmem:[%s21091_s5 + $0x7a8] sm:$0xff] }
 0x28f   : > { %11905 = vmatprep.subr.bf16.mxu1 %v11904_v43  ;;  %v11934_v43 = vpack.c.bf16 %v9585_v39, %v9583_v22  ;;  %v11936_v23 = vpack.c.bf16 %v9590_v42, %v9588_v40  ;;  %v9656_v39 = vld [vmem:[%s21091_s5 + $0x4b8] sm:$0xff]  ;;  %v9659_v40 = vld [vmem:[%s21091_s5 + $0x4d0] sm:$0xff]  ;;  %v9665_v51 = vld [vmem:[%s21091_s5 + $0x500] sm:$0xff] }
 0x290   : > { %v11980_v42 = vpack.c.bf16 %v9659_v40, %v9656_v39 }
 0x291   : > { %2572 = vmatmul.mubr.f32.gmra.mrb[6].mxu1 %v2474_v60 }
 0x292   : > { %11907 = vmatpush1.bf16.msra.mxu1 %v11906_v52  ;;  %9591 = vmatprep.mubr.msk.f32.mxu1 %vm387_vm0, %v2649_v63  ;;  %v2645_v52 = vrot.slane %v15345_v56, 6  ;;  %v2589_v56 = vld [vmem:[#allocation3 + $0x48] sm:$0xf]  ;;  %v9719_v63 = vld [vmem:[%s21091_s5 + $0x610] sm:$0xff] }
 0x293   : > { %11909 = vmatprep.subr.bf16.mxu1 %v11908_v53  ;;  %v21104_v53 = vmov 0.0|0.0   ;;  %v2660_v27 = vrot.slane %v2589_v56, 6  ;;  %v9668_v56 = vld [vmem:[%s21091_s5 + $0x518] sm:$0xff] }
 0x294   : > { %v2646_v60 = vsel %vm2643_vm10, %v2644_v61, %v2645_v52  ;;  %v11984_v61 = vpack.c.bf16 %v9665_v51, %v9662_v48 }
 0x296   : > { %11911 = vmatpush1.bf16.msra.mxu1 %v11910_v0  ;;  %v9722_v0 = vld [vmem:[%s21091_s5 + $0x628] sm:$0xff] }
 0x297   : > { %11913 = vmatprep.subr.bf16.mxu1 %v11912_v1  ;;  %v2651_v1 = vsel %vm2643_vm10, %v2645_v52, %v2650_v38  ;;  %v12217_v47 = vpack.c.bf16 %v9722_v0, %v9719_v63  ;;  %v9661_v52 = vld [vmem:[%s21091_s5 + $0x4e0] sm:$0xff]  ;;  %v9667_v0 = vld [vmem:[%s21091_s5 + $0x510] sm:$0xff] }
 0x29a   : > { %11915 = vmatpush1.bf16.msra.mxu1 %v11914_v3  ;;  %v9728_v3 = vld [vmem:[%s21091_s5 + $0x658] sm:$0xff] }
 0x29b   : > { %11917 = vmatprep.subr.bf16.mxu1 %v11916_v6  ;;  %v2655_v6 = vsel %vm2643_vm10, %v2650_v38, %v2654_v2  ;;  %v12220_v12 = vpack.c.bf16 %v9728_v3, %v9725_v50 }
 0x29e   : > { %11919 = vmatpush1.bf16.msra.mxu1 %v11918_v26 }
 0x29f   : > { %11921 = vmatprep.subr.bf16.mxu1 %v11920_v18  ;;  %v9740_v18 = vld [vmem:[%s21091_s5 + $0x6b8] sm:$0xff] }
 0x2a2   : > { %11923 = vmatpush1.bf16.msra.mxu1 %v11922_v24  ;;  %v9749_v24 = vld [vmem:[%s21091_s5 + $0x700] sm:$0xff] }
 0x2a3   : > { %11925 = vmatprep.subr.bf16.mxu1 %v11924_v25  ;;  %v9752_v25 = vld [vmem:[%s21091_s5 + $0x718] sm:$0xff] }
 0x2a4   : > { %v12232_v28 = vpack.c.bf16 %v9752_v25, %v9749_v24  ;;  %v12253_v24 = vpack.c.bf16 %v9794_v21, %v9791_v20  ;;  %v2771_v25 = vld [vmem:[%s21090_s4] sm:$0x3] }
 0x2a5   : > { %v2780_v34 = vrot.slane %v2771_v25, %v14551_v14  ;;  %v9711_v14 = vld [vmem:[%s21091_s5 + $0x5d0] sm:$0xff] }
 0x2a6   : > { %11927 = vmatpush1.bf16.msra.mxu1 %v11926_v32  ;;  %v9650_v32 = vld [vmem:[%s21091_s5 + $0x488] sm:$0xff] }
 0x2a7   : > { %11929 = vmatprep.subr.bf16.mxu1 %v11928_v30  ;;  %v9653_v30 = vld [vmem:[%s21091_s5 + $0x4a0] sm:$0xff] }
 0x2a8   : > { %v11976_v31 = vpack.c.bf16 %v9653_v30, %v9650_v32 }
 0x2aa   : > { %11931 = vmatpush1.bf16.msra.mxu1 %v11930_v37  ;;  %v11978_v37 = vpack.c.bf16 %v9652_v33, %v9649_v41  ;;  %11977 = vmatprep.subr.bf16.mxu0 %v11976_v31 }
 0x2ab   : > { %11933 = vmatprep.subr.bf16.mxu1 %v11932_v45  ;;  %v9764_v45 = vld [vmem:[%s21091_s5 + $0x778] sm:$0xff] }
 0x2ac   : > { %v12238_v22 = vpack.c.bf16 %v9764_v45, %v9761_v36  ;;  %11979 = vmatpush1.bf16.msra.mxu0 %v11978_v37 }
 0x2ad   : > { %11981 = vmatprep.subr.bf16.mxu0 %v11980_v42 }
 0x2ae   : > { %11935 = vmatpush1.bf16.msra.mxu1 %v11934_v43  ;;  %v9655_v43 = vld [vmem:[%s21091_s5 + $0x4b0] sm:$0xff] }
 0x2af   : > { %11937 = vmatprep.subr.bf16.mxu1 %v11936_v23  ;;  %v9658_v23 = vld [vmem:[%s21091_s5 + $0x4c8] sm:$0xff] }
 0x2b0   : > { %v11982_v46 = vpack.c.bf16 %v9658_v23, %v9655_v43 }
 0x2b2   : > { %11939 = vmatpush1.bf16.msra.mxu1 %v11938_v49  ;;  %v12241_v49 = vpack.c.bf16 %v9770_v35, %v9767_v44  ;;  %11983 = vmatpush1.bf16.msra.mxu0 %v11982_v46 }
 0x2b3   : > { %12210 = vmatprep.subr.bf16.mxu1 %v21104_v53  ;;  %11985 = vmatprep.subr.bf16.mxu0 %v11984_v61 }
 0x2b5   : > { %2739 = vmatmul.mubr.f32.vlgmr.msra.gmra.mrb[0].mxu1 %v2646_v60  ;;  %v9776_v60 = vld [vmem:[%s21091_s5 + $0x7d8] sm:$0xff] }
 0x2b6   : > { %9592 = vmatprep.mubr.msk.f32.mxu1 %vm387_vm0, %v14703_v58  ;;  %12212 = vmatpush1.bf16.msra.mxu1 %v12211_v8  ;;  %v2588_v58 = vld [vmem:[#allocation3 + $0x40] sm:$0xf]  ;;  %v9664_v8 = vld [vmem:[%s21091_s5 + $0x4f8] sm:$0xff]  ;;  %v12244_v38 = vpack.c.bf16 %v9776_v60, %v9773_v54 }
 0x2b7   : > { %12213 = vmatprep.subr.bf16.mxu1 %v21104_v53  ;;  %v2658_v4 = vrot.slane %v2588_v58, 6  ;;  %v11986_v57 = vpack.c.bf16 %v9664_v8, %v9661_v52  ;;  %v9674_v58 = vld [vmem:[%s21091_s5 + $0x548] sm:$0xff] }
 0x2b9   : > { %2745 = vmatmul.mubr.f32.gmra.mrb[2].mxu1 %v2651_v1  ;;  %v2659_v26 = vsel %vm2643_vm10, %v2654_v2, %v2658_v4  ;;  %11987 = vmatpush1.bf16.msra.mxu0 %v11986_v57  ;;  %v9670_v1 = vld [vmem:[%s21091_s5 + $0x528] sm:$0xff]  ;;  %v9676_v4 = vld [vmem:[%s21091_s5 + $0x558] sm:$0xff] }
 0x2ba   : > { %9593 = vmatprep.mubr.msk.f32.mxu1 %vm387_vm0, %v14708_v59  ;;  %12215 = vmatpush1.bf16.msra.mxu1 %v12214_v62  ;;  %v2661_v59 = vsel %vm2643_vm10, %v2656_v55, %v2660_v27  ;;  %v9737_v55 = vld [vmem:[%s21091_s5 + $0x6a0] sm:$0xff]  ;;  %v9671_v62 = vld [vmem:[%s21091_s5 + $0x530] sm:$0xff]  ;;  %v11990_v2 = vpack.c.bf16 %v9670_v1, %v9667_v0  ;;  %v9782_v27 = vld [vmem:[%s21091_s5 + $0x808] sm:$0xff] }
 0x2bb   : > { %12216 = vmatprep.subr.bf16.mxu1 %v21104_v53  ;;  %v12226_v19 = vpack.c.bf16 %v9740_v18, %v9737_v55  ;;  %v11988_v63 = vpack.c.bf16 %v9671_v62, %v9668_v56  ;;  %v12247_v50 = vpack.c.bf16 %v9782_v27, %v9779_v9  ;;  %v9679_v18 = vld [vmem:[%s21091_s5 + $0x570] sm:$0xff] }
 0x2bd   : > { %2751 = vmatmul.mubr.f32.gmra.mrb[4].mxu1 %v2655_v6  ;;  %11989 = vmatprep.subr.bf16.mxu0 %v11988_v63  ;;  %v9673_v6 = vld [vmem:[%s21091_s5 + $0x540] sm:$0xff] }
 0x2be   : > { %9594 = vmatprep.mubr.msk.f32.mxu1 %vm387_vm0, %v2661_v59  ;;  %12218 = vmatpush1.bf16.msra.mxu1 %v12217_v47  ;;  %v9677_v47 = vld [vmem:[%s21091_s5 + $0x560] sm:$0xff] }
 0x2bf   : > { %12219 = vmatprep.subr.bf16.mxu1 %v21104_v53  ;;  %v11992_v3 = vpack.c.bf16 %v9677_v47, %v9674_v58  ;;  %v9785_v59 = vld [vmem:[%s21091_s5 + $0x820] sm:$0xff]  ;;  %11991 = vmatpush1.bf16.msra.mxu0 %v11990_v2 }
 0x2c1   : > { %2757 = vmatmul.mubr.f32.gmra.mrb[6].mxu1 %v2659_v26  ;;  %v9683_v26 = vld [vmem:[%s21091_s5 + $0x590] sm:$0xff]  ;;  %11993 = vmatprep.subr.bf16.mxu0 %v11992_v3  ;;  %v9597_v3 = vld [vmem:[%s21091_s5 + $0x2e0] sm:$0xff] }
 0x2c2   : > { %12221 = vmatpush1.bf16.msra.mxu1 %v12220_v12  ;;  %v11994_v12 = vpack.c.bf16 %v9676_v4, %v9673_v6  ;;  %v11996_v55 = vpack.c.bf16 %v9683_v26, %v9680_v16  ;;  %v9600_v4 = vld [vmem:[%s21091_s5 + $0x2f8] sm:$0xff] }
 0x2c3   : > { %12222 = vmatprep.subr.bf16.mxu1 %v21104_v53 }
 0x2c4   : > { %11995 = vmatpush1.bf16.msra.mxu0 %v11994_v12  ;;  %v9810_v12 = vld [vmem:[%s21091_s5 + $0x898] sm:$0xff] }
 0x2c5   : > { %11997 = vmatprep.subr.bf16.mxu0 %v11996_v55 }
 0x2c6   : > { %12224 = vmatpush1.bf16.msra.mxu1 %v12223_v17  ;;  %v12250_v17 = vpack.c.bf16 %v9788_v15, %v9785_v59  ;;  %v9807_v59 = vld [vmem:[%s21091_s5 + $0x880] sm:$0xff] }
 0x2c7   : > { %12225 = vmatprep.subr.bf16.mxu1 %v21104_v53 }
 0x2ca   : > { %12227 = vmatpush1.bf16.msra.mxu1 %v12226_v19  ;;  %v9682_v19 = vld [vmem:[%s21091_s5 + $0x588] sm:$0xff] }
 0x2cb   : > { %12228 = vmatprep.subr.bf16.mxu1 %v21104_v53 }
 0x2ce   : > { %12230 = vmatpush1.bf16.msra.mxu1 %v12229_v13  ;;  %v11998_v13 = vpack.c.bf16 %v9682_v19, %v9679_v18 }
 0x2cf   : > { %12231 = vmatprep.subr.bf16.mxu1 %v21104_v53 }
 0x2d0   : > { %11999 = vmatpush1.bf16.msra.mxu0 %v11998_v13  ;;  %v12001_v13 = vpack.c.bf16 %v9600_v4, %v9597_v3  ;;  %v9825_v3 = vld [vmem:[%s21091_s5 + $0x910] sm:$0xff]  ;;  %v9828_v4 = vld [vmem:[%s21091_s5 + $0x928] sm:$0xff] }
 0x2d1   : > { %12000 = vmatprep.subr.bf16.mxu0 %v21104_v53 }
 0x2d2   : > { %12233 = vmatpush1.bf16.msra.mxu1 %v12232_v28  ;;  %v2776_v28 = vrot.slane %v2771_v25, %v14545_v11  ;;  %v12316_v25 = vpack.c.bf16 %v9810_v12, %v9807_v59 }
 0x2d3   : > { %12234 = vmatprep.subr.bf16.mxu1 %v21104_v53 }
 0x2d6   : > { %12236 = vmatpush1.bf16.msra.mxu1 %v12235_v29 }
 0x2d7   : > { %12237 = vmatprep.subr.bf16.mxu1 %v21104_v53 }
 0x2da   : > { %12239 = vmatpush1.bf16.msra.mxu1 %v12238_v22 }
 0x2db   : > { %12240 = vmatprep.subr.bf16.mxu1 %v21104_v53 }
 0x2de   : > { %12242 = vmatpush1.bf16.msra.mxu1 %v12241_v49 }
 0x2df   : > { %12243 = vmatprep.subr.bf16.mxu1 %v21104_v53 }
 0x2e2   : > { %12245 = vmatpush1.bf16.msra.mxu1 %v12244_v38 }
 0x2e3   : > { %12246 = vmatprep.subr.bf16.mxu1 %v21104_v53 }
 0x2e6   : > { %12248 = vmatpush1.bf16.msra.mxu1 %v12247_v50 }
 0x2e7   : > { %12249 = vmatprep.subr.bf16.mxu1 %v21104_v53 }
 0x2ea   : > { %12251 = vmatpush1.bf16.msra.mxu1 %v12250_v17 }
 0x2eb   : > { %12252 = vmatprep.subr.bf16.mxu1 %v21104_v53 }
 0x2ee   : > { %12254 = vmatpush1.bf16.msra.mxu1 %v12253_v24 }
 0x2ef   : > { %12315 = vmatprep.subr.bf16.mxu1 %v21104_v53 }
 0x388   : > { %v2740_v5 = vpop.f32.mrb[0].mxu1 }
 0x389   : > { %v2783_v29 = vadd.f32 %v2776_v28, %v2740_v5  ;;  %v2742_v32 = vpop.f32.mrb[1].mxu1 }
 0x38a   : > { %v2784_v30 = vadd.f32 %v2780_v34, %v2742_v32  ;;  %v9813_v32 = vld [vmem:[%s21091_s5 + $0x8b0] sm:$0xff] }
 0x38b   : > { %v2791_v31 = vmax.f32 %v2783_v29, 0.0  ;;  %v9606_v29 = vld [vmem:[%s21091_s5 + $0x328] sm:$0xff] }
 0x38c   : > { %v2792_v41 = vmax.f32 %v2784_v30, 0.0  ;;  %v2746_v33 = vpop.f32.mrb[2].mxu1  ;;  %v9816_v30 = vld [vmem:[%s21091_s5 + $0x8c8] sm:$0xff] }
 0x38d   : > { %v2816_v36 = vrot.slane %v2791_v31, 2  ;;  %v2785_v37 = vadd.f32 %v2776_v28, %v2746_v33  ;;  %v2748_v45 = vpop.f32.mrb[3].mxu1 }
 0x38e   : > { %v2817_v22 = vrot.slane %v2792_v41, 2  ;;  %v2786_v39 = vadd.f32 %v2780_v34, %v2748_v45 }
 0x38f   : > { %2840 = vst [vmem:[#allocation4] sm:$0xc0] %v2816_v36  ;;  %v2793_v40 = vmax.f32 %v2785_v37, 0.0 }
 0x390   : > { %2842 = vst.msk [vmem:[#allocation4 + $0x8] sm:$0xc0] %vm2841_vm14, %v2817_v22  ;;  %v2794_v42 = vmax.f32 %v2786_v39, 0.0  ;;  %v2752_v43 = vpop.f32.mrb[4].mxu1 }
 0x391   : > { %v2818_v23 = vrot.slane %v2793_v40, 2  ;;  %v2787_v44 = vadd.f32 %v2776_v28, %v2752_v43  ;;  %v2754_v46 = vpop.f32.mrb[5].mxu1  ;;  %v12319_v40 = vpack.c.bf16 %v9816_v30, %v9813_v32  ;;  %v9612_v43 = vld [vmem:[%s21091_s5 + $0x358] sm:$0xff] }
 0x392   : > { %v2820_v35 = vrot.slane %v2794_v42, 2  ;;  %v2788_v49 = vadd.f32 %v2780_v34, %v2754_v46  ;;  %v9609_v42 = vld [vmem:[%s21091_s5 + $0x340] sm:$0xff] }
 0x393   : > { %v15901_v48 = vsel %vm1480_vm5, %v2816_v36, %v2818_v23  ;;  %v2795_v51 = vmax.f32 %v2787_v44, 0.0 }
 0x394   : > { %2843 = vst [vmem:[#allocation4 + $0x10] sm:$0xff] %v15901_v48  ;;  %v2821_v61 = vsel %vm1480_vm5, %v2817_v22, %v2820_v35  ;;  %v2796_v52 = vmax.f32 %v2788_v49, 0.0  ;;  %v2758_v8 = vpop.f32.mrb[6].mxu1  ;;  %v3059_v21 = vrot.slane %v15901_v48, 1  ;;  %v3573_v24 = vrot.slane %v15901_v48, 2 }
 0x395   : > { %2845 = vst.msk [vmem:[#allocation4 + $0x18] sm:$0xff] %vm2844_vm15, %v2821_v61  ;;  %v2822_v54 = vrot.slane %v2795_v51, 2  ;;  %v2789_v57 = vadd.f32 %v2776_v28, %v2758_v8  ;;  %v2760_v60 = vpop.f32.mrb[7].mxu1  ;;  %v9603_v28 = vld [vmem:[%s21091_s5 + $0x310] sm:$0xff] }
 0x396   : > { %v2824_v38 = vrot.slane %v2796_v52, 2  ;;  %v2790_v56 = vadd.f32 %v2780_v34, %v2760_v60  ;;  %v2953_v2 = vld [vmem:[#allocation4] sm:$0xfe]  ;;  %v12004_v39 = vpack.c.bf16 %v9606_v29, %v9603_v28 }
 0x397   : > { %v15907_v62 = vsel %vm1480_vm5, %v2818_v23, %v2822_v54  ;;  %v2797_v63 = vmax.f32 %v2789_v57, 0.0  ;;  %v3473_v27 = vld [vmem:[#allocation4] sm:$0xfc]  ;;  %v2954_v47 = vld [vmem:[#allocation4 + $0x8] sm:$0xfe]  ;;  %v3058_v26 = vrot.slane %v2953_v2, 1 }
 0x398   : > { %2846 = vst [vmem:[#allocation4 + $0x20] sm:$0xff] %v15907_v62  ;;  %v2825_v0 = vsel %vm1480_vm5, %v2820_v35, %v2824_v38  ;;  %v2798_v1 = vmax.f32 %v2790_v56, 0.0  ;;  %v3474_v50 = vld [vmem:[#allocation4 + $0x8] sm:$0xfc]  ;;  %v3572_v17 = vrot.slane %v3473_v27, 2  ;;  %v3061_v55 = vrot.slane %v2954_v47, 1 }
 0x399   : > { %2847 = vst.msk [vmem:[#allocation4 + $0x28] sm:$0xff] %vm2844_vm15, %v2825_v0  ;;  %v2826_v9 = vrot.slane %v2797_v63, 2  ;;  %v3575_v19 = vrot.slane %v3474_v50, 2  ;;  %v15959_v31 = vsel %vm1624_vm6, %v3058_v26, %v3059_v21  ;;  %v3064_v36 = vrot.slane %v15907_v62, 1  ;;  %v9819_v23 = vld [vmem:[%s21091_s5 + $0x8e0] sm:$0xff]  ;;  %v9822_v35 = vld [vmem:[%s21091_s5 + $0x8f8] sm:$0xff] }
 0x39a   : > { %v2828_v58 = vrot.slane %v2798_v1, 2  ;;  %v15962_v41 = vsel %vm1480_vm5, %v3572_v17, %v3573_v24  ;;  %v3578_v37 = vrot.slane %v15907_v62, 2  ;;  %v12007_v0 = vpack.c.bf16 %v9612_v43, %v9609_v42  ;;  %v9615_v27 = vld [vmem:[%s21091_s5 + $0x370] sm:$0xff]  ;;  %v3806_v29 = vld [vmem:[#allocation4 + $0x8] sm:$0xf8] }
 0x39b   : > { %v15916_v6 = vsel %vm1480_vm5, %v2822_v54, %v2826_v9  ;;  %2850 = vst [vmem:[#allocation4 + $0x40] sm:$0xf] %v2826_v9  ;;  %v15997_v61 = vsel %vm1624_vm6, %v3059_v21, %v3064_v36  ;;  %v12322_v1 = vpack.c.bf16 %v9822_v35, %v9819_v23  ;;  %v9624_v21 = vld [vmem:[%s21091_s5 + $0x3b8] sm:$0xff]  ;;  %v9633_v35 = vld [vmem:[%s21091_s5 + $0x400] sm:$0xff] }
 0x39c   : > { %2848 = vst [vmem:[#allocation4 + $0x30] sm:$0xff] %v15916_v6  ;;  %v2829_v15 = vsel %vm1480_vm5, %v2824_v38, %v2828_v58  ;;  %2852 = vst.msk [vmem:[#allocation4 + $0x48] sm:$0xf] %vm2851_vm1, %v2828_v58  ;;  %v15929_v16 = vld [vmem:[#allocation4 + $0x18] sm:$0xff]  ;;  %v16000_v52 = vsel %vm1480_vm5, %v3573_v24, %v3578_v37  ;;  %v3068_v54 = vrot.slane %v15916_v6, 1  ;;  %v3582_v57 = vrot.slane %v15916_v6, 2 }
 0x39d   : > { %2849 = vst.msk [vmem:[#allocation4 + $0x38] sm:$0xff] %vm2844_vm15, %v2829_v15  ;;  %v3062_v18 = vrot.slane %v15929_v16, 1  ;;  %v3576_v20 = vrot.slane %v15929_v16, 2  ;;  %v9618_v58 = vld [vmem:[%s21091_s5 + $0x388] sm:$0xff]  ;;  %v9834_v24 = vld [vmem:[%s21091_s5 + $0x958] sm:$0xff] }
 0x39e   : > { %v16039_v59 = vsel %vm1624_vm6, %v3064_v36, %v3068_v54  ;;  %v16042_v12 = vsel %vm1480_vm5, %v3578_v37, %v3582_v57  ;;  %v12010_v17 = vpack.c.bf16 %v9618_v58, %v9615_v27  ;;  %v3908_v36 = vrot.slane %v15929_v16, 3  ;;  %v9627_v37 = vld [vmem:[%s21091_s5 + $0x3d0] sm:$0xff]  ;;  %v9645_v27 = vld [vmem:[%s21091_s5 + $0x460] sm:$0xff]  ;;  %v9648_v58 = vld [vmem:[%s21091_s5 + $0x478] sm:$0xff] }
 0x39f   : > { %v15940_v34 = vsel %vm1624_vm6, %v3061_v55, %v3062_v18  ;;  %v15943_v5 = vsel %vm1480_vm5, %v3575_v19, %v3576_v20  ;;  %v12325_v19 = vpack.c.bf16 %v9828_v4, %v9825_v3  ;;  %v9855_v3 = vld [vmem:[%s21091_s5 + $0xa00] sm:$0xff]  ;;  %v9858_v4 = vld [vmem:[%s21091_s5 + $0xa18] sm:$0xff] }
 0x3a0   : > { %9685 = vmatprep.mubr.msk.f32.mxu0 %vm2844_vm15, %v15940_v34  ;;  %9800 = vmatprep.mubr.msk.f32.mxu1 %vm2844_vm15, %v15943_v5  ;;  %v15964_v33 = vld [vmem:[#allocation4 + $0x28] sm:$0xff] }
 0x3a1   : > { %3156 = vmatmul.mubr.f32.vlgmr.msra.gmra.mrb[6].mxu0 %v15959_v31  ;;  %3765 = vmatmul.mubr.f32.vlgmr.msra.gmra.mrb[8].mxu1 %v15962_v41  ;;  %v3066_v45 = vrot.slane %v15964_v33, 1  ;;  %v3580_v22 = vrot.slane %v15964_v33, 2 }
 0x3a2   : > { %12002 = vmatpush1.bf16.msra.mxu0 %v12001_v13  ;;  %12317 = vmatpush1.bf16.msra.mxu1 %v12316_v25  ;;  %v2955_v56 = vld [vmem:[#allocation4 + $0x40] sm:$0x1f]  ;;  %v9831_v13 = vld [vmem:[%s21091_s5 + $0x940] sm:$0xff] }
 0x3a3   : > { %v15982_v44 = vsel %vm1624_vm6, %v3062_v18, %v3066_v45  ;;  %12003 = vmatprep.subr.bf16.mxu0 %v21104_v53  ;;  %v15986_v46 = vsel %vm1480_vm5, %v3576_v20, %v3580_v22  ;;  %12318 = vmatprep.subr.bf16.mxu1 %v21104_v53  ;;  %v2956_v49 = vld [vmem:[#allocation4 + $0x48] sm:$0x1f]  ;;  %v3475_v63 = vld [vmem:[#allocation4 + $0x40] sm:$0x3f]  ;;  %v16044_v15 = vrot.slane %v2955_v56, 1  ;;  %v9621_v20 = vld [vmem:[%s21091_s5 + $0x3a0] sm:$0xff]  ;;  %v12328_v30 = vpack.c.bf16 %v9834_v24, %v9831_v13 }
 0x3a4   : > { %v3476_v51 = vld [vmem:[#allocation4 + $0x48] sm:$0x3f]  ;;  %9686 = vmatprep.mubr.msk.f32.mxu0 %vm2844_vm15, %v15982_v44  ;;  %9801 = vmatprep.mubr.msk.f32.mxu1 %vm2844_vm15, %v15986_v46  ;;  %v16002_v8 = vld [vmem:[#allocation4 + $0x38] sm:$0xff]  ;;  %v16010_v9 = vrot.slane %v2956_v49, 1  ;;  %v16046_v26 = vrot.slane %v3475_v63, 2  ;;  %v12013_v32 = vpack.c.bf16 %v9624_v21, %v9621_v20  ;;  %v9849_v56 = vld [vmem:[%s21091_s5 + $0x9d0] sm:$0xff] }
 0x3a5   : > { %3162 = vmatmul.mubr.f32.gmra.mrb[8].mxu0 %v15997_v61  ;;  %3770 = vmatmul.mubr.f32.gmra.mrb[10].mxu1 %v16000_v52  ;;  %v3070_v60 = vrot.slane %v16002_v8, 1  ;;  %v3584_v38 = vrot.slane %v16002_v8, 2  ;;  %v16012_v2 = vrot.slane %v3476_v51, 2  ;;  %v16078_v25 = vsel %vm1624_vm6, %v3068_v54, %v16044_v15  ;;  %v9636_v49 = vld [vmem:[%s21091_s5 + $0x418] sm:$0xff]  ;;  %v9843_v51 = vld [vmem:[%s21091_s5 + $0x9a0] sm:$0xff]  ;;  %v9852_v63 = vld [vmem:[%s21091_s5 + $0x9e8] sm:$0xff] }
 0x3a6   : > { %12005 = vmatpush1.bf16.msra.mxu0 %v12004_v39  ;;  %12320 = vmatpush1.bf16.msra.mxu1 %v12319_v40  ;;  %v16082_v28 = vsel %vm1480_vm5, %v3582_v57, %v16046_v26  ;;  %v9840_v39 = vld [vmem:[%s21091_s5 + $0x988] sm:$0xff]  ;;  %v3907_v40 = vrot.slane %v3806_v29, 3  ;;  %v9846_v54 = vld [vmem:[%s21091_s5 + $0x9b8] sm:$0xff]  ;;  %v9651_v20 = vld [vmem:[%s21091_s5 + $0x490] sm:$0xff] }
 0x3a7   : > { %v16021_v47 = vsel %vm1624_vm6, %v3066_v45, %v3070_v60  ;;  %12006 = vmatprep.subr.bf16.mxu0 %v21104_v53  ;;  %v16025_v50 = vsel %vm1480_vm5, %v3580_v22, %v3584_v38  ;;  %12321 = vmatprep.subr.bf16.mxu1 %v21104_v53  ;;  %v16052_v55 = vsel %vm1624_vm6, %v3070_v60, %v16010_v9  ;;  %v9630_v45 = vld [vmem:[%s21091_s5 + $0x3e8] sm:$0xff]  ;;  %v9837_v22 = vld [vmem:[%s21091_s5 + $0x970] sm:$0xff] }
 0x3a8   : > { %9687 = vmatprep.mubr.msk.f32.mxu0 %vm2844_vm15, %v16021_v47  ;;  %9802 = vmatprep.mubr.msk.f32.mxu1 %vm2844_vm15, %v16025_v50  ;;  %v16056_v18 = vsel %vm1480_vm5, %v3584_v38, %v16012_v2  ;;  %v16110_v42 = vsel %vm2088_vm7, %v3907_v40, %v3908_v36  ;;  %v12016_v43 = vpack.c.bf16 %v9630_v45, %v9627_v37  ;;  %v9639_v60 = vld [vmem:[%s21091_s5 + $0x430] sm:$0xff]  ;;  %v9642_v38 = vld [vmem:[%s21091_s5 + $0x448] sm:$0xff]  ;;  %v9660_v37 = vld [vmem:[%s21091_s5 + $0x4d8] sm:$0xff] }
 0x3a9   : > { %3168 = vmatmul.mubr.f32.gmra.mrb[10].mxu0 %v16039_v59  ;;  %3775 = vmatmul.mubr.f32.gmra.mrb[12].mxu1 %v16042_v12  ;;  %v12331_v23 = vpack.c.bf16 %v9840_v39, %v9837_v22  ;;  %v12334_v57 = vpack.c.bf16 %v9846_v54, %v9843_v51  ;;  %v9654_v21 = vld [vmem:[%s21091_s5 + $0x4a8] sm:$0xff]  ;;  %v9861_v13 = vld [vmem:[%s21091_s5 + $0xa30] sm:$0xff]  ;;  %v9867_v45 = vld [vmem:[%s21091_s5 + $0xa60] sm:$0xff] }
 0x3aa   : > { %12008 = vmatpush1.bf16.msra.mxu0 %v12007_v0  ;;  %12323 = vmatpush1.bf16.msra.mxu1 %v12322_v1  ;;  %v12022_v0 = vpack.c.bf16 %v9642_v38, %v9639_v60  ;;  %v12337_v1 = vpack.c.bf16 %v9852_v63, %v9849_v56  ;;  %v9864_v24 = vld [vmem:[%s21091_s5 + $0xa48] sm:$0xff]  ;;  %v12028_v29 = vpack.c.bf16 %v9654_v21, %v9651_v20  ;;  %v9870_v22 = vld [vmem:[%s21091_s5 + $0xa78] sm:$0xff]  ;;  %v9879_v60 = vld [vmem:[%s21091_s5 + $0xac0] sm:$0xff] }
 0x3ab   : > { %9688 = vmatprep.mubr.msk.f32.mxu0 %vm2844_vm15, %v16052_v55  ;;  %9803 = vmatprep.mubr.msk.f32.mxu1 %vm2844_vm15, %v16056_v18  ;;  %v12346_v40 = vpack.c.bf16 %v9870_v22, %v9867_v45  ;;  %v9882_v38 = vld [vmem:[%s21091_s5 + $0xad8] sm:$0xff]  ;;  %v9891_v20 = vld [vmem:[%s21091_s5 + $0xb20] sm:$0xff] }
 0x3ac   : > { %12009 = vmatprep.subr.bf16.mxu0 %v21104_v53  ;;  %12324 = vmatprep.subr.bf16.mxu1 %v21104_v53  ;;  %v12352_v63 = vpack.c.bf16 %v9882_v38, %v9879_v60  ;;  %v9894_v21 = vld [vmem:[%s21091_s5 + $0xb38] sm:$0xff]  ;;  %v2863_v45 = vld [vmem:[%s21091_s5] sm:$0xff]  ;;  %v2872_v60 = vld [vmem:[%s21091_s5 + $0x48] sm:$0xff] }
 0x3ad   : > { %3174 = vmatmul.mubr.f32.gmra.mrb[12].mxu0 %v16078_v25  ;;  %3780 = vmatmul.mubr.f32.gmra.mrb[14].mxu1 %v16082_v28  ;;  %v2866_v22 = vld [vmem:[%s21091_s5 + $0x18] sm:$0xff] }
 0x3ae   : > { %12011 = vmatpush1.bf16.msra.mxu0 %v12010_v17  ;;  %12326 = vmatpush1.bf16.msra.mxu1 %v12325_v19  ;;  %v12025_v17 = vpack.c.bf16 %v9648_v58, %v9645_v27  ;;  %v12340_v19 = vpack.c.bf16 %v9858_v4, %v9855_v3  ;;  %v9885_v27 = vld [vmem:[%s21091_s5 + $0xaf0] sm:$0xff]  ;;  %v9888_v58 = vld [vmem:[%s21091_s5 + $0xb08] sm:$0xff] }
 0x3af   : > { %9689 = vmatprep.mubr.msk.f32.mxu0 %vm2844_vm15, %v16010_v9  ;;  %9804 = vmatprep.mubr.msk.f32.mxu1 %vm2844_vm15, %v16012_v2  ;;  %v12355_v4 = vpack.c.bf16 %v9888_v58, %v9885_v27  ;;  %v2876_v27 = vld [vmem:[%s21091_s5 + $0x68] sm:$0xff]  ;;  %v2879_v58 = vld [vmem:[%s21091_s5 + $0x80] sm:$0xff] }
 0x3b0   : > { %12012 = vmatprep.subr.bf16.mxu0 %v21104_v53  ;;  %12327 = vmatprep.subr.bf16.mxu1 %v21104_v53 }
 0x3b1   : > { %3180 = vmatmul.mubr.f32.gmra.mrb[14].mxu0 %v16044_v15  ;;  %3785 = vmatmul.mubr.f32.gmra.mrb[16].mxu1 %v16046_v26 }
 0x3b2   : > { %12014 = vmatpush1.bf16.msra.mxu0 %v12013_v32  ;;  %12329 = vmatpush1.bf16.msra.mxu1 %v12328_v30  ;;  %v12343_v32 = vpack.c.bf16 %v9864_v24, %v9861_v13  ;;  %v9657_v30 = vld [vmem:[%s21091_s5 + $0x4c0] sm:$0xff]  ;;  %v2864_v13 = vld [vmem:[%s21091_s5 + $0x8] sm:$0xff] }
 0x3b3   : > { %9690 = vmatprep.mubr.msk.f32.mxu0 %vm2844_vm15, %v15940_v34  ;;  %9900 = vmatprep.mubr.msk.f32.mxu1 %vm2844_vm15, %v16110_v42  ;;  %v12019_v34 = vpack.c.bf16 %v9636_v49, %v9633_v35  ;;  %v12031_v39 = vpack.c.bf16 %v9660_v37, %v9657_v30  ;;  %v9873_v35 = vld [vmem:[%s21091_s5 + $0xa90] sm:$0xff]  ;;  %v9876_v49 = vld [vmem:[%s21091_s5 + $0xaa8] sm:$0xff]  ;;  %v2867_v24 = vld [vmem:[%s21091_s5 + $0x20] sm:$0xff]  ;;  %v12358_v30 = vpack.c.bf16 %v9894_v21, %v9891_v20 }
 0x3b4   : > { %12015 = vmatprep.subr.bf16.mxu0 %v21104_v53  ;;  %12330 = vmatprep.subr.bf16.mxu1 %v21104_v53  ;;  %v12349_v54 = vpack.c.bf16 %v9876_v49, %v9873_v35  ;;  %v12045_v37 = vpack.c.bf16 %v2867_v24, %v2864_v13  ;;  %v2873_v35 = vld [vmem:[%s21091_s5 + $0x50] sm:$0xff]  ;;  %v3905_v49 = vrot.slane %v15901_v48, 3  ;;  %v3808_v20 = vld [vmem:[#allocation4 + $0x48] sm:$0x7f]  ;;  %v12053_v21 = vpack.c.bf16 %v2879_v58, %v2876_v27  ;;  %v9934_v27 = vld [vmem:[%s21091_s5 + $0xc28] sm:$0xff] }
 0x3b5   : > { %v3914_v13 = vrot.slane %v15916_v6, 3  ;;  %v9919_v24 = vld [vmem:[%s21091_s5 + $0xbb0] sm:$0xff]  ;;  %v4138_v58 = vld [vmem:[#allocation4 + $0x8] sm:$0xf0] }
 0x3b6   : > { %12017 = vmatpush1.bf16.msra.mxu0 %v12016_v43  ;;  %12332 = vmatpush1.bf16.msra.mxu1 %v12331_v23  ;;  %v9663_v43 = vld [vmem:[%s21091_s5 + $0x4f0] sm:$0xff]  ;;  %v9666_v23 = vld [vmem:[%s21091_s5 + $0x508] sm:$0xff] }
 0x3b7   : > { %12018 = vmatprep.subr.bf16.mxu0 %v21104_v53  ;;  %12333 = vmatprep.subr.bf16.mxu1 %v21104_v53  ;;  %v12034_v51 = vpack.c.bf16 %v9666_v23, %v9663_v43  ;;  %v9910_v43 = vld [vmem:[%s21091_s5 + $0xb68] sm:$0xff]  ;;  %v2870_v23 = vld [vmem:[%s21091_s5 + $0x38] sm:$0xff] }
 0x3ba   : > { %12020 = vmatpush1.bf16.msra.mxu0 %v12019_v34  ;;  %12335 = vmatpush1.bf16.msra.mxu1 %v12334_v57  ;;  %v9669_v34 = vld [vmem:[%s21091_s5 + $0x520] sm:$0xff]  ;;  %v9672_v57 = vld [vmem:[%s21091_s5 + $0x538] sm:$0xff] }
 0x3bb   : > { %12021 = vmatprep.subr.bf16.mxu0 %v21104_v53  ;;  %12336 = vmatprep.subr.bf16.mxu1 %v21104_v53  ;;  %v12037_v56 = vpack.c.bf16 %v9672_v57, %v9669_v34  ;;  %v2869_v57 = vld [vmem:[%s21091_s5 + $0x30] sm:$0xff] }
 0x3be   : > { %12023 = vmatpush1.bf16.msra.mxu0 %v12022_v0  ;;  %12338 = vmatpush1.bf16.msra.mxu1 %v12337_v1  ;;  %v9675_v0 = vld [vmem:[%s21091_s5 + $0x550] sm:$0xff]  ;;  %v9678_v1 = vld [vmem:[%s21091_s5 + $0x568] sm:$0xff] }
 0x3bf   : > { %12024 = vmatprep.subr.bf16.mxu0 %v21104_v53  ;;  %12339 = vmatprep.subr.bf16.mxu1 %v21104_v53  ;;  %v12040_v3 = vpack.c.bf16 %v9678_v1, %v9675_v0  ;;  %v9913_v0 = vld [vmem:[%s21091_s5 + $0xb80] sm:$0xff]  ;;  %v9916_v1 = vld [vmem:[%s21091_s5 + $0xb98] sm:$0xff] }
 0x3c2   : > { %12026 = vmatpush1.bf16.msra.mxu0 %v12025_v17  ;;  %12341 = vmatpush1.bf16.msra.mxu1 %v12340_v19  ;;  %v9681_v17 = vld [vmem:[%s21091_s5 + $0x580] sm:$0xff]  ;;  %v9684_v19 = vld [vmem:[%s21091_s5 + $0x598] sm:$0xff] }
 0x3c3   : > { %12027 = vmatprep.subr.bf16.mxu0 %v21104_v53  ;;  %12342 = vmatprep.subr.bf16.mxu1 %v21104_v53 }
 0x3c6   : > { %12029 = vmatpush1.bf16.msra.mxu0 %v12028_v29  ;;  %12344 = vmatpush1.bf16.msra.mxu1 %v12343_v32  ;;  %v3805_v29 = vld [vmem:[#allocation4] sm:$0xf8]  ;;  %v12043_v32 = vpack.c.bf16 %v9684_v19, %v9681_v17  ;;  %v12424_v17 = vpack.c.bf16 %v9916_v1, %v9913_v0  ;;  %v2875_v19 = vld [vmem:[%s21091_s5 + $0x60] sm:$0xff] }
 0x3c7   : > { %12030 = vmatprep.subr.bf16.mxu0 %v21104_v53  ;;  %12345 = vmatprep.subr.bf16.mxu1 %v21104_v53  ;;  %v9931_v1 = vld [vmem:[%s21091_s5 + $0xc10] sm:$0xff] }
 0x3ca   : > { %12032 = vmatpush1.bf16.msra.mxu0 %v12031_v39  ;;  %12347 = vmatpush1.bf16.msra.mxu1 %v12346_v40  ;;  %v3904_v39 = vrot.slane %v3805_v29, 3  ;;  %v9907_v40 = vld [vmem:[%s21091_s5 + $0xb50] sm:$0xff]  ;;  %v9922_v29 = vld [vmem:[%s21091_s5 + $0xbc8] sm:$0xff] }
 0x3cb   : > { %12033 = vmatprep.subr.bf16.mxu0 %v21104_v53  ;;  %12348 = vmatprep.subr.bf16.mxu1 %v21104_v53  ;;  %v12421_v34 = vpack.c.bf16 %v9910_v43, %v9907_v40  ;;  %v2881_v40 = vld [vmem:[%s21091_s5 + $0x90] sm:$0xff] }
 0x3cc   : > { %v16278_v38 = vsel %vm2088_vm7, %v3904_v39, %v3905_v49  ;;  %v12427_v39 = vpack.c.bf16 %v9922_v29, %v9919_v24  ;;  %v9940_v24 = vld [vmem:[%s21091_s5 + $0xc58] sm:$0xff]  ;;  %v2900_v29 = vld [vmem:[%s21091_s5 + $0x128] sm:$0xff] }
 0x3ce   : > { %12035 = vmatpush1.bf16.msra.mxu0 %v12034_v51  ;;  %12350 = vmatpush1.bf16.msra.mxu1 %v12349_v54  ;;  %v12047_v51 = vpack.c.bf16 %v2866_v22, %v2863_v45  ;;  %v3912_v54 = vrot.slane %v15964_v33, 3 }
 0x3cf   : > { %12036 = vmatprep.subr.bf16.mxu0 %v21104_v53  ;;  %12351 = vmatprep.subr.bf16.mxu1 %v21104_v53 }
 0x3d2   : > { %12038 = vmatpush1.bf16.msra.mxu0 %v12037_v56  ;;  %12353 = vmatpush1.bf16.msra.mxu1 %v12352_v63  ;;  %v12049_v56 = vpack.c.bf16 %v2873_v35, %v2870_v23  ;;  %v3910_v63 = vrot.slane %v15907_v62, 3 }
 0x3d3   : > { %12039 = vmatprep.subr.bf16.mxu0 %v21104_v53  ;;  %12354 = vmatprep.subr.bf16.mxu1 %v21104_v53 }
 0x3d4   : > { %v16346_v43 = vsel %vm2088_vm7, %v3910_v63, %v3914_v13 }
 0x3d6   : > { %12041 = vmatpush1.bf16.msra.mxu0 %v12040_v3  ;;  %12356 = vmatpush1.bf16.msra.mxu1 %v12355_v4  ;;  %v16300_v3 = vsel %vm2088_vm7, %v3908_v36, %v3912_v54  ;;  %v3916_v4 = vrot.slane %v16002_v8, 3  ;;  %v16312_v36 = vsel %vm2088_vm7, %v3905_v49, %v3910_v63  ;;  %v9925_v49 = vld [vmem:[%s21091_s5 + $0xbe0] sm:$0xff]  ;;  %v2890_v63 = vld [vmem:[%s21091_s5 + $0xd8] sm:$0xff] }
 0x3d7   : > { %12042 = vmatprep.subr.bf16.mxu0 %v21104_v53  ;;  %12357 = vmatprep.subr.bf16.mxu1 %v21104_v53 }
 0x3d8   : > { %v16333_v45 = vsel %vm2088_vm7, %v3912_v54, %v3916_v4  ;;  %v2888_v54 = vld [vmem:[%s21091_s5 + $0xc8] sm:$0xff] }
 0x3da   : > { %12044 = vmatpush1.bf16.msra.mxu0 %v12043_v32  ;;  %12359 = vmatpush1.bf16.msra.mxu1 %v12358_v30  ;;  %v2882_v32 = vld [vmem:[%s21091_s5 + $0x98] sm:$0xff]  ;;  %v2885_v30 = vld [vmem:[%s21091_s5 + $0xb0] sm:$0xff] }
 0x3db   : > { %12046 = vmatprep.subr.bf16.mxu0 %v12045_v37  ;;  %12420 = vmatprep.subr.bf16.mxu1 %v21104_v53  ;;  %v3807_v37 = vld [vmem:[#allocation4 + $0x40] sm:$0x7f]  ;;  %v12057_v23 = vpack.c.bf16 %v2885_v30, %v2882_v32  ;;  %v2903_v32 = vld [vmem:[%s21091_s5 + $0x140] sm:$0xff]  ;;  %v16424_v30 = vld [vmem:[#allocation4 + $0x8] sm:$0xff] }
 0x3dc   : > { %v16349_v35 = vrot.slane %v3807_v37, 3 }
 0x3dd   : > { %3251 = vmatmul.mubr.f32.vlgmr.msra.gmra.mrb[16].mxu0 %v15959_v31  ;;  %4097 = vmatmul.mubr.f32.vlgmr.msra.gmra.mrb[18].mxu1 %v16278_v38  ;;  %v12051_v31 = vpack.c.bf16 %v2872_v60, %v2869_v57 }
 0x3de   : > { %9691 = vmatprep.mubr.msk.f32.mxu0 %vm2844_vm15, %v15982_v44  ;;  %12048 = vmatpush1.bf16.msra.mxu0 %v12047_v51  ;;  %v2878_v44 = vld [vmem:[%s21091_s5 + $0x78] sm:$0xff] }
 0x3df   : > { %9901 = vmatprep.mubr.msk.f32.mxu1 %vm2844_vm15, %v16300_v3  ;;  %12422 = vmatpush1.bf16.msra.mxu1 %v12421_v34  ;;  %v12055_v22 = vpack.c.bf16 %v2878_v44, %v2875_v19  ;;  %v9928_v51 = vld [vmem:[%s21091_s5 + $0xbf8] sm:$0xff]  ;;  %v2891_v34 = vld [vmem:[%s21091_s5 + $0xe0] sm:$0xff]  ;;  %v4240_v19 = vrot.slane %v15929_v16, 4  ;;  %v2893_v44 = vld [vmem:[%s21091_s5 + $0xf0] sm:$0xff] }
 0x3e0   : > { %12050 = vmatprep.subr.bf16.mxu0 %v12049_v56  ;;  %12423 = vmatprep.subr.bf16.mxu1 %v21104_v53  ;;  %v2887_v56 = vld [vmem:[%s21091_s5 + $0xc0] sm:$0xff]  ;;  %v12061_v0 = vpack.c.bf16 %v2891_v34, %v2888_v54  ;;  %v2909_v54 = vld [vmem:[%s21091_s5 + $0x170] sm:$0xff] }
 0x3e1   : > { %3256 = vmatmul.mubr.f32.gmra.mrb[18].mxu0 %v15997_v61  ;;  %4102 = vmatmul.mubr.f32.gmra.mrb[20].mxu1 %v16312_v36  ;;  %v16335_v61 = vrot.slane %v3808_v20, 3  ;;  %v2896_v20 = vld [vmem:[%s21091_s5 + $0x108] sm:$0xff] }
 0x3e2   : > { %9692 = vmatprep.mubr.msk.f32.mxu0 %vm2844_vm15, %v16021_v47  ;;  %12052 = vmatpush1.bf16.msra.mxu0 %v12051_v31  ;;  %v2884_v47 = vld [vmem:[%s21091_s5 + $0xa8] sm:$0xff]  ;;  %v2894_v31 = vld [vmem:[%s21091_s5 + $0xf8] sm:$0xff] }
 0x3e3   : > { %9902 = vmatprep.mubr.msk.f32.mxu1 %vm2844_vm15, %v16333_v45  ;;  %12425 = vmatpush1.bf16.msra.mxu1 %v12424_v17  ;;  %v16369_v57 = vsel %vm2088_vm7, %v3916_v4, %v16335_v61  ;;  %v12059_v60 = vpack.c.bf16 %v2884_v47, %v2881_v40  ;;  %v2897_v4 = vld [vmem:[%s21091_s5 + $0x110] sm:$0xff]  ;;  %v12063_v17 = vpack.c.bf16 %v2890_v63, %v2887_v56  ;;  %v2899_v40 = vld [vmem:[%s21091_s5 + $0x120] sm:$0xff]  ;;  %v2902_v47 = vld [vmem:[%s21091_s5 + $0x138] sm:$0xff] }
 0x3e4   : > { %12054 = vmatprep.subr.bf16.mxu0 %v12053_v21  ;;  %12426 = vmatprep.subr.bf16.mxu1 %v21104_v53  ;;  %v4239_v21 = vrot.slane %v4138_v58, 4  ;;  %v12071_v34 = vpack.c.bf16 %v2902_v47, %v2899_v40  ;;  %v2905_v56 = vld [vmem:[%s21091_s5 + $0x150] sm:$0xff]  ;;  %v2908_v63 = vld [vmem:[%s21091_s5 + $0x168] sm:$0xff]  ;;  %v2915_v58 = vld [vmem:[%s21091_s5 + $0x1a0] sm:$0xff] }
 0x3e5   : > { %3261 = vmatmul.mubr.f32.gmra.mrb[20].mxu0 %v16039_v59  ;;  %4107 = vmatmul.mubr.f32.gmra.mrb[22].mxu1 %v16346_v43  ;;  %v12430_v59 = vpack.c.bf16 %v9928_v51, %v9925_v49  ;;  %v9946_v49 = vld [vmem:[%s21091_s5 + $0xc88] sm:$0xff]  ;;  %v2906_v51 = vld [vmem:[%s21091_s5 + $0x158] sm:$0xff] }
 0x3e6   : > { %9693 = vmatprep.mubr.msk.f32.mxu0 %vm2844_vm15, %v16052_v55  ;;  %12056 = vmatpush1.bf16.msra.mxu0 %v12055_v22  ;;  %v16381_v55 = vsel %vm2088_vm7, %v3914_v13, %v16349_v35  ;;  %v12065_v13 = vpack.c.bf16 %v2897_v4, %v2894_v31  ;;  %v16431_v37 = vsel %vm2273_vm8, %v4239_v21, %v4240_v19  ;;  %v2918_v21 = vld [vmem:[%s21091_s5 + $0x1b8] sm:$0xff]  ;;  %v2924_v47 = vld [vmem:[%s21091_s5 + $0x1e8] sm:$0xff] }
 0x3e7   : > { %9903 = vmatprep.mubr.msk.f32.mxu1 %vm2844_vm15, %v16369_v57  ;;  %12428 = vmatpush1.bf16.msra.mxu1 %v12427_v39  ;;  %v12067_v22 = vpack.c.bf16 %v2896_v20, %v2893_v44  ;;  %v12075_v31 = vpack.c.bf16 %v2908_v63, %v2905_v56  ;;  %v2914_v44 = vld [vmem:[%s21091_s5 + $0x198] sm:$0xff]  ;;  %v9955_v20 = vld [vmem:[%s21091_s5 + $0xcd0] sm:$0xff]  ;;  %v9970_v56 = vld [vmem:[%s21091_s5 + $0xd48] sm:$0xff] }
 0x3e8   : > { %12058 = vmatprep.subr.bf16.mxu0 %v12057_v23  ;;  %12429 = vmatprep.subr.bf16.mxu1 %v21104_v53  ;;  %v9943_v23 = vld [vmem:[%s21091_s5 + $0xc70] sm:$0xff]  ;;  %v9964_v40 = vld [vmem:[%s21091_s5 + $0xd18] sm:$0xff] }
 0x3e9   : > { %3266 = vmatmul.mubr.f32.gmra.mrb[22].mxu0 %v16078_v25  ;;  %4112 = vmatmul.mubr.f32.gmra.mrb[24].mxu1 %v16381_v55  ;;  %v12433_v25 = vpack.c.bf16 %v9934_v27, %v9931_v1  ;;  %v9952_v1 = vld [vmem:[%s21091_s5 + $0xcb8] sm:$0xff]  ;;  %v2912_v27 = vld [vmem:[%s21091_s5 + $0x188] sm:$0xff] }
 0x3ea   : > { %9694 = vmatprep.mubr.msk.f32.mxu0 %vm2844_vm15, %v16010_v9  ;;  %12060 = vmatpush1.bf16.msra.mxu0 %v12059_v60  ;;  %v9937_v9 = vld [vmem:[%s21091_s5 + $0xc40] sm:$0xff]  ;;  %v12439_v60 = vpack.c.bf16 %v9946_v49, %v9943_v23  ;;  %v2930_v63 = vld [vmem:[%s21091_s5 + $0x218] sm:$0xff] }
 0x3eb   : > { %9904 = vmatprep.mubr.msk.f32.mxu1 %vm2844_vm15, %v16335_v61  ;;  %12431 = vmatpush1.bf16.msra.mxu1 %v12430_v59  ;;  %v12436_v39 = vpack.c.bf16 %v9940_v24, %v9937_v9  ;;  %v12073_v59 = vpack.c.bf16 %v2909_v54, %v2906_v51  ;;  %v9958_v9 = vld [vmem:[%s21091_s5 + $0xce8] sm:$0xff]  ;;  %v2927_v23 = vld [vmem:[%s21091_s5 + $0x200] sm:$0xff] }
 0x3ec   : > { %12062 = vmatprep.subr.bf16.mxu0 %v12061_v0  ;;  %12432 = vmatprep.subr.bf16.mxu1 %v21104_v53  ;;  %v9949_v0 = vld [vmem:[%s21091_s5 + $0xca0] sm:$0xff]  ;;  %v12085_v54 = vpack.c.bf16 %v2927_v23, %v2924_v47 }
 0x3ed   : > { %3271 = vmatmul.mubr.f32.gmra.mrb[24].mxu0 %v16044_v15  ;;  %4117 = vmatmul.mubr.f32.gmra.mrb[26].mxu1 %v16349_v35  ;;  %v12069_v15 = vpack.c.bf16 %v2903_v32, %v2900_v29  ;;  %v12442_v4 = vpack.c.bf16 %v9952_v1, %v9949_v0  ;;  %v12445_v29 = vpack.c.bf16 %v9958_v9, %v9955_v20  ;;  %v2933_v0 = vld [vmem:[%s21091_s5 + $0x230] sm:$0xff]  ;;  %v2939_v20 = vld [vmem:[%s21091_s5 + $0x260] sm:$0xff] }
 0x3ee   : > { %12064 = vmatpush1.bf16.msra.mxu0 %v12063_v17  ;;  %9695 = vmatprep.mubr.msk.f32.mxu0 %vm2844_vm15, %v16424_v30  ;;  %v12077_v17 = vpack.c.bf16 %v2915_v58, %v2912_v27  ;;  %v12089_v58 = vpack.c.bf16 %v2933_v0, %v2930_v63 }
 0x3ef   : > { %12434 = vmatpush1.bf16.msra.mxu1 %v12433_v25  ;;  %10000 = vmatprep.mubr.msk.f32.mxu1 %vm2844_vm15, %v16431_v37  ;;  %v2911_v25 = vld [vmem:[%s21091_s5 + $0x180] sm:$0xff] }
 0x3f0   : > { %12066 = vmatprep.subr.bf16.mxu0 %v12065_v13  ;;  %12435 = vmatprep.subr.bf16.mxu1 %v21104_v53  ;;  %v2921_v13 = vld [vmem:[%s21091_s5 + $0x1d0] sm:$0xff]  ;;  %v12079_v24 = vpack.c.bf16 %v2914_v44, %v2911_v25  ;;  %v9976_v25 = vld [vmem:[%s21091_s5 + $0xd78] sm:$0xff]  ;;  %v2936_v44 = vld [vmem:[%s21091_s5 + $0x248] sm:$0xff] }
 0x3f1   : > { %v12081_v32 = vpack.c.bf16 %v2921_v13, %v2918_v21  ;;  %v12093_v13 = vpack.c.bf16 %v2939_v20, %v2936_v44  ;;  %v2865_v44 = vld [vmem:[%s21091_s5 + $0x10] sm:$0xff]  ;;  %v2868_v20 = vld [vmem:[%s21091_s5 + $0x28] sm:$0xff] }
 0x3f2   : > { %12068 = vmatpush1.bf16.msra.mxu0 %v12067_v22  ;;  %v2917_v22 = vld [vmem:[%s21091_s5 + $0x1b0] sm:$0xff] }
 0x3f3   : > { %12437 = vmatpush1.bf16.msra.mxu1 %v12436_v39  ;;  %12070 = vmatprep.subr.bf16.mxu0 %v12069_v15  ;;  %v2920_v39 = vld [vmem:[%s21091_s5 + $0x1c8] sm:$0xff]  ;;  %v9961_v15 = vld [vmem:[%s21091_s5 + $0xd00] sm:$0xff] }
 0x3f4   : > { %12438 = vmatprep.subr.bf16.mxu1 %v21104_v53  ;;  %v12083_v49 = vpack.c.bf16 %v2920_v39, %v2917_v22  ;;  %v12448_v51 = vpack.c.bf16 %v9964_v40, %v9961_v15  ;;  %v9982_v22 = vld [vmem:[%s21091_s5 + $0xda8] sm:$0xff]  ;;  %v2942_v39 = vld [vmem:[%s21091_s5 + $0x278] sm:$0xff]  ;;  %v2945_v15 = vld [vmem:[%s21091_s5 + $0x290] sm:$0xff] }
 0x3f5   : > { %v12097_v23 = vpack.c.bf16 %v2945_v15, %v2942_v39  ;;  %v2871_v15 = vld [vmem:[%s21091_s5 + $0x40] sm:$0xff] }
 0x3f6   : > { %12072 = vmatpush1.bf16.msra.mxu0 %v12071_v34  ;;  %v2923_v34 = vld [vmem:[%s21091_s5 + $0x1e0] sm:$0xff] }
 0x3f7   : > { %12440 = vmatpush1.bf16.msra.mxu1 %v12439_v60  ;;  %12074 = vmatprep.subr.bf16.mxu0 %v12073_v59  ;;  %v2926_v60 = vld [vmem:[%s21091_s5 + $0x1f8] sm:$0xff]  ;;  %v9967_v59 = vld [vmem:[%s21091_s5 + $0xd30] sm:$0xff] }
 0x3f8   : > { %12441 = vmatprep.subr.bf16.mxu1 %v21104_v53  ;;  %v12087_v1 = vpack.c.bf16 %v2926_v60, %v2923_v34  ;;  %v12451_v27 = vpack.c.bf16 %v9970_v56, %v9967_v59  ;;  %v9988_v34 = vld [vmem:[%s21091_s5 + $0xdd8] sm:$0xff]  ;;  %v2948_v60 = vld [vmem:[%s21091_s5 + $0x2a8] sm:$0xff]  ;;  %v2951_v59 = vld [vmem:[%s21091_s5 + $0x2c0] sm:$0xff] }
 0x3f9   : > { %v12101_v0 = vpack.c.bf16 %v2951_v59, %v2948_v60  ;;  %v16656_v59 = vld [vmem:[#allocation4 + $0x10] sm:$0xff] }
 0x3fa   : > { %12076 = vmatpush1.bf16.msra.mxu0 %v12075_v31  ;;  %v2929_v31 = vld [vmem:[%s21091_s5 + $0x210] sm:$0xff] }
 0x3fb   : > { %12443 = vmatpush1.bf16.msra.mxu1 %v12442_v4  ;;  %12078 = vmatprep.subr.bf16.mxu0 %v12077_v17  ;;  %v2932_v4 = vld [vmem:[%s21091_s5 + $0x228] sm:$0xff]  ;;  %v9973_v17 = vld [vmem:[%s21091_s5 + $0xd60] sm:$0xff] }
 0x3fc   : > { %12444 = vmatprep.subr.bf16.mxu1 %v21104_v53  ;;  %v12091_v9 = vpack.c.bf16 %v2932_v4, %v2929_v31  ;;  %v12454_v21 = vpack.c.bf16 %v9976_v25, %v9973_v17  ;;  %v9994_v31 = vld [vmem:[%s21091_s5 + $0xe08] sm:$0xff]  ;;  %v4137_v17 = vld [vmem:[#allocation4] sm:$0xf0] }
 0x3fe   : > { %12080 = vmatpush1.bf16.msra.mxu0 %v12079_v24  ;;  %v2935_v24 = vld [vmem:[%s21091_s5 + $0x240] sm:$0xff] }
 0x3ff   : > { %12446 = vmatpush1.bf16.msra.mxu1 %v12445_v29  ;;  %12082 = vmatprep.subr.bf16.mxu0 %v12081_v32  ;;  %v2938_v29 = vld [vmem:[%s21091_s5 + $0x258] sm:$0xff]  ;;  %v9979_v32 = vld [vmem:[%s21091_s5 + $0xd90] sm:$0xff] }
 0x400   : > { %12447 = vmatprep.subr.bf16.mxu1 %v21104_v53  ;;  %v12095_v40 = vpack.c.bf16 %v2938_v29, %v2935_v24  ;;  %v12457_v47 = vpack.c.bf16 %v9982_v22, %v9979_v32  ;;  %v4244_v24 = vrot.slane %v15964_v33, 4  ;;  %v4237_v29 = vrot.slane %v15901_v48, 4  ;;  %v16616_v22 = vld [vmem:[#allocation4] sm:$0xff] }
 0x401   : > { %v12106_v32 = vpack.c.bf16 %v2868_v20, %v2865_v44  ;;  %v4242_v48 = vrot.slane %v15907_v62, 4  ;;  %v4248_v62 = vrot.slane %v16002_v8, 4 }
 0x402   : > { %12084 = vmatpush1.bf16.msra.mxu0 %v12083_v49  ;;  %v2941_v49 = vld [vmem:[%s21091_s5 + $0x270] sm:$0xff] }
 0x403   : > { %12449 = vmatpush1.bf16.msra.mxu1 %v12448_v51  ;;  %12086 = vmatprep.subr.bf16.mxu0 %v12085_v54  ;;  %v2944_v51 = vld [vmem:[%s21091_s5 + $0x288] sm:$0xff]  ;;  %v9985_v54 = vld [vmem:[%s21091_s5 + $0xdc0] sm:$0xff] }
 0x404   : > { %12450 = vmatprep.subr.bf16.mxu1 %v21104_v53  ;;  %v12099_v56 = vpack.c.bf16 %v2944_v51, %v2941_v49  ;;  %v12460_v63 = vpack.c.bf16 %v9988_v34, %v9985_v54  ;;  %v10016_v49 = vld [vmem:[%s21091_s5 + $0xe68] sm:$0xff]  ;;  %v16642_v51 = vsel %vm2273_vm8, %v4240_v19, %v4244_v24  ;;  %v16647_v34 = vld [vmem:[#allocation4 + $0x48] sm:$0xff] }
 0x405   : > { %v2880_v19 = vld [vmem:[%s21091_s5 + $0x88] sm:$0xff] }
 0x406   : > { %12088 = vmatpush1.bf16.msra.mxu0 %v12087_v1  ;;  %v2947_v1 = vld [vmem:[%s21091_s5 + $0x2a0] sm:$0xff] }
 0x407   : > { %12452 = vmatpush1.bf16.msra.mxu1 %v12451_v27  ;;  %12090 = vmatprep.subr.bf16.mxu0 %v12089_v58  ;;  %v2950_v27 = vld [vmem:[%s21091_s5 + $0x2b8] sm:$0xff]  ;;  %v9991_v58 = vld [vmem:[%s21091_s5 + $0xdf0] sm:$0xff] }
 0x408   : > { %12453 = vmatprep.subr.bf16.mxu1 %v21104_v53  ;;  %v12103_v4 = vpack.c.bf16 %v2950_v27, %v2947_v1  ;;  %v12463_v25 = vpack.c.bf16 %v9994_v31, %v9991_v58  ;;  %v10022_v1 = vld [vmem:[%s21091_s5 + $0xe98] sm:$0xff]  ;;  %v16674_v27 = vsel %vm2273_vm8, %v4244_v24, %v4248_v62  ;;  %v16677_v58 = vrot.slane %v16647_v34, 4 }
 0x40a   : > { %12092 = vmatpush1.bf16.msra.mxu0 %v12091_v9  ;;  %v4236_v9 = vrot.slane %v4137_v17, 4  ;;  %v2886_v17 = vld [vmem:[%s21091_s5 + $0xb8] sm:$0xff] }
 0x40b   : > { %12455 = vmatpush1.bf16.msra.mxu1 %v12454_v21  ;;  %12094 = vmatprep.subr.bf16.mxu0 %v12093_v13  ;;  %v10007_v21 = vld [vmem:[%s21091_s5 + $0xe20] sm:$0xff]  ;;  %v10010_v13 = vld [vmem:[%s21091_s5 + $0xe38] sm:$0xff] }
 0x40c   : > { %12456 = vmatprep.subr.bf16.mxu1 %v21104_v53  ;;  %v12526_v39 = vpack.c.bf16 %v10010_v13, %v10007_v21  ;;  %v10028_v21 = vld [vmem:[%s21091_s5 + $0xec8] sm:$0xff]  ;;  %v16711_v13 = vsel %vm2273_vm8, %v4248_v62, %v16677_v58  ;;  %v10034_v62 = vld [vmem:[%s21091_s5 + $0xef8] sm:$0xff] }
 0x40e   : > { %12096 = vmatpush1.bf16.msra.mxu0 %v12095_v40  ;;  %v2874_v40 = vld [vmem:[%s21091_s5 + $0x58] sm:$0xff] }
 0x40f   : > { %12458 = vmatpush1.bf16.msra.mxu1 %v12457_v47  ;;  %12098 = vmatprep.subr.bf16.mxu0 %v12097_v23  ;;  %v16627_v47 = vsel %vm2273_vm8, %v4236_v9, %v4237_v29  ;;  %v10013_v23 = vld [vmem:[%s21091_s5 + $0xe50] sm:$0xff]  ;;  %v12109_v54 = vpack.c.bf16 %v2874_v40, %v2871_v15  ;;  %v4470_v15 = vld [vmem:[#allocation4 + $0x8] sm:$0xe0]  ;;  %v16724_v40 = vld [vmem:[#allocation4 + $0x30] sm:$0xff] }
 0x410   : > { %12459 = vmatprep.subr.bf16.mxu1 %v21104_v53  ;;  %v12529_v60 = vpack.c.bf16 %v10016_v49, %v10013_v23  ;;  %v10025_v9 = vld [vmem:[%s21091_s5 + $0xeb0] sm:$0xff]  ;;  %v16732_v23 = vld [vmem:[#allocation4 + $0x48] sm:$0xf]  ;;  %v10031_v49 = vld [vmem:[%s21091_s5 + $0xee0] sm:$0xff] }
 0x412   : > { %12100 = vmatpush1.bf16.msra.mxu0 %v12099_v56  ;;  %v16660_v56 = vsel %vm2273_vm8, %v4237_v29, %v4242_v48  ;;  %v16715_v29 = vld [vmem:[#allocation4 + $0x18] sm:$0xff] }
 0x413   : > { %12461 = vmatpush1.bf16.msra.mxu1 %v12460_v63  ;;  %12102 = vmatprep.subr.bf16.mxu0 %v12101_v0  ;;  %v4246_v63 = vrot.slane %v15916_v6, 4  ;;  %v10019_v0 = vld [vmem:[%s21091_s5 + $0xe80] sm:$0xff]  ;;  %v16679_v6 = vld [vmem:[#allocation4 + $0x40] sm:$0xff] }
 0x414   : > { %12462 = vmatprep.subr.bf16.mxu1 %v21104_v53  ;;  %v16698_v20 = vrot.slane %v16679_v6, 4 }
 0x415   : > { %v16694_v44 = vsel %vm2273_vm8, %v4242_v48, %v4246_v63 }
 0x416   : > { %12104 = vmatpush1.bf16.msra.mxu0 %v12103_v4  ;;  %v12532_v4 = vpack.c.bf16 %v10022_v1, %v10019_v0  ;;  %21124 = vst [vmem:[#allocation15_spill] sm:$0xff] %v16698_v20  ;;  %v16729_v48 = vsel %vm2273_vm8, %v4246_v63, %v16698_v20  ;;  %v4587_v63 = vrot.slane %v4470_v15, 5  ;;  %v2895_v0 = vld [vmem:[%s21091_s5 + $0x100] sm:$0xff]  ;;  %v2898_v1 = vld [vmem:[%s21091_s5 + $0x118] sm:$0xff] }
 0x417   : > { %12464 = vmatpush1.bf16.msra.mxu1 %v12463_v25  ;;  %12105 = vmatprep.subr.bf16.mxu0 %v21104_v53  ;;  %v16690_v25 = vld [vmem:[#allocation4 + $0x20] sm:$0xff]  ;;  %v2907_v15 = vld [vmem:[%s21091_s5 + $0x160] sm:$0xff] }
 0x418   : > { %12525 = vmatprep.subr.bf16.mxu1 %v21104_v53 }
 0x419   : > { %3353 = vmatmul.mubr.f32.vlgmr.msra.gmra.mrb[6].mxu0 %v16616_v22 }
 0x41a   : > { %4429 = vmatmul.mubr.f32.vlgmr.msra.gmra.mrb[28].mxu1 %v16627_v47  ;;  %9696 = vmatprep.mubr.msk.f32.mxu0 %vm2844_vm15, %v15929_v16  ;;  %v2877_v16 = vld [vmem:[%s21091_s5 + $0x70] sm:$0xff] }
 0x41b   : > { %12107 = vmatpush1.bf16.msra.mxu0 %v12106_v32  ;;  %10001 = vmatprep.mubr.msk.f32.mxu1 %vm2844_vm15, %v16642_v51  ;;  %v12112_v31 = vpack.c.bf16 %v2880_v19, %v2877_v16  ;;  %v12535_v32 = vpack.c.bf16 %v10028_v21, %v10025_v9  ;;  %v16746_v16 = vld [vmem:[#allocation4 + $0x40] sm:$0xf]  ;;  %v12538_v19 = vpack.c.bf16 %v10034_v62, %v10031_v49  ;;  %v2910_v49 = vld [vmem:[%s21091_s5 + $0x178] sm:$0xff] }
 0x41c   : > { %12527 = vmatpush1.bf16.msra.mxu1 %v12526_v39  ;;  %12108 = vmatprep.subr.bf16.mxu0 %v21104_v53  ;;  %v2889_v39 = vld [vmem:[%s21091_s5 + $0xd0] sm:$0xff] }
 0x41d   : > { %3359 = vmatmul.mubr.f32.gmra.mrb[8].mxu0 %v16656_v59  ;;  %12528 = vmatprep.subr.bf16.mxu1 %v21104_v53  ;;  %v2901_v21 = vld [vmem:[%s21091_s5 + $0x130] sm:$0xff] }
 0x41e   : > { %4434 = vmatmul.mubr.f32.gmra.mrb[30].mxu1 %v16660_v56  ;;  %9697 = vmatprep.mubr.msk.f32.mxu0 %vm2844_vm15, %v15964_v33  ;;  %v2883_v33 = vld [vmem:[%s21091_s5 + $0xa0] sm:$0xff]  ;;  %v10049_v62 = vld [vmem:[%s21091_s5 + $0xf70] sm:$0xff] }
 0x41f   : > { %12110 = vmatpush1.bf16.msra.mxu0 %v12109_v54  ;;  %10002 = vmatprep.mubr.msk.f32.mxu1 %vm2844_vm15, %v16674_v27  ;;  %v12115_v24 = vpack.c.bf16 %v2886_v17, %v2883_v33  ;;  %v21101_v54 = vrot.slane %v16715_v29, 5  ;;  %v12121_v17 = vpack.c.bf16 %v2898_v1, %v2895_v0  ;;  %v2913_v0 = vld [vmem:[%s21091_s5 + $0x190] sm:$0xff]  ;;  %v2916_v1 = vld [vmem:[%s21091_s5 + $0x1a8] sm:$0xff] }
 0x420   : > { %12530 = vmatpush1.bf16.msra.mxu1 %v12529_v60  ;;  %12111 = vmatprep.subr.bf16.mxu0 %v21104_v53 }
 0x421   : > { %3365 = vmatmul.mubr.f32.gmra.mrb[10].mxu0 %v16690_v25  ;;  %12531 = vmatprep.subr.bf16.mxu1 %v21104_v53  ;;  %v16769_v33 = vsel %vm2458_vm9, %v4587_v63, %v21101_v54 }
 0x422   : > { %4439 = vmatmul.mubr.f32.gmra.mrb[32].mxu1 %v16694_v44  ;;  %9698 = vmatprep.mubr.msk.f32.mxu0 %vm2844_vm15, %v16002_v8  ;;  %v2892_v8 = vld [vmem:[%s21091_s5 + $0xe8] sm:$0xff]  ;;  %21125 = vst [vmem:[#allocation16_spill] sm:$0xff] %v16769_v33 }
 0x423   : > { %12113 = vmatpush1.bf16.msra.mxu0 %v12112_v31  ;;  %10003 = vmatprep.mubr.msk.f32.mxu1 %vm2844_vm15, %v16711_v13  ;;  %v12118_v60 = vpack.c.bf16 %v2892_v8, %v2889_v39  ;;  %v10037_v31 = vld [vmem:[%s21091_s5 + $0xf10] sm:$0xff] }
 0x424   : > { %12533 = vmatpush1.bf16.msra.mxu1 %v12532_v4  ;;  %12114 = vmatprep.subr.bf16.mxu0 %v21104_v53  ;;  %v10040_v4 = vld [vmem:[%s21091_s5 + $0xf28] sm:$0xff] }
 0x425   : > { %3371 = vmatmul.mubr.f32.gmra.mrb[12].mxu0 %v16724_v40  ;;  %12534 = vmatprep.subr.bf16.mxu1 %v21104_v53  ;;  %v12541_v9 = vpack.c.bf16 %v10040_v4, %v10037_v31  ;;  %v10055_v31 = vld [vmem:[%s21091_s5 + $0xfa0] sm:$0xff]  ;;  %v10058_v4 = vld [vmem:[%s21091_s5 + $0xfb8] sm:$0xff] }
 0x426   : > { %4444 = vmatmul.mubr.f32.gmra.mrb[34].mxu1 %v16729_v48  ;;  %9699 = vmatprep.mubr.msk.f32.mxu0 %vm2844_vm15, %v16732_v23 }
 0x427   : > { %12116 = vmatpush1.bf16.msra.mxu0 %v12115_v24  ;;  %10004 = vmatprep.mubr.msk.f32.mxu1 %vm2844_vm15, %v16677_v58  ;;  %v10043_v24 = vld [vmem:[%s21091_s5 + $0xf40] sm:$0xff] }
 0x428   : > { %12536 = vmatpush1.bf16.msra.mxu1 %v12535_v32  ;;  %12117 = vmatprep.subr.bf16.mxu0 %v21104_v53  ;;  %v10046_v32 = vld [vmem:[%s21091_s5 + $0xf58] sm:$0xff] }
 0x429   : > { %3377 = vmatmul.mubr.f32.gmra.mrb[14].mxu0 %v16746_v16  ;;  %12537 = vmatprep.subr.bf16.mxu1 %v21104_v53  ;;  %v12544_v8 = vpack.c.bf16 %v10046_v32, %v10043_v24  ;;  %v10061_v24 = vld [vmem:[%s21091_s5 + $0xfd0] sm:$0xff]  ;;  %v10064_v32 = vld [vmem:[%s21091_s5 + $0xfe8] sm:$0xff] }
 0x42a   : > { %4449 = vmatmul.mubr.f32.gmra.mrb[36].mxu1 %v16698_v20  ;;  %9700 = vmatprep.mubr.msk.f32.mxu0 %vm2844_vm15, %v16424_v30  ;;  %v2904_v30 = vld [vmem:[%s21091_s5 + $0x148] sm:$0xff] }
 0x42b   : > { %12119 = vmatpush1.bf16.msra.mxu0 %v12118_v60  ;;  %10100 = vmatprep.mubr.msk.f32.mxu1 %vm2844_vm15, %v16769_v33  ;;  %v12124_v39 = vpack.c.bf16 %v2904_v30, %v2901_v21  ;;  %v10052_v60 = vld [vmem:[%s21091_s5 + $0xf88] sm:$0xff]  ;;  %v2919_v21 = vld [vmem:[%s21091_s5 + $0x1c0] sm:$0xff]  ;;  %v2922_v30 = vld [vmem:[%s21091_s5 + $0x1d8] sm:$0xff] }
 0x42c   : > { %12539 = vmatpush1.bf16.msra.mxu1 %v12538_v19  ;;  %12120 = vmatprep.subr.bf16.mxu0 %v21104_v53  ;;  %v12127_v19 = vpack.c.bf16 %v2910_v49, %v2907_v15  ;;  %v12547_v63 = vpack.c.bf16 %v10052_v60, %v10049_v62  ;;  %v2925_v15 = vld [vmem:[%s21091_s5 + $0x1f0] sm:$0xff]  ;;  %v2928_v49 = vld [vmem:[%s21091_s5 + $0x208] sm:$0xff]  ;;  %v10067_v62 = vld [vmem:[%s21091_s5 + $0x1000] sm:$0xff] }
 0x42d   : > { %12540 = vmatprep.subr.bf16.mxu1 %v21104_v53  ;;  %v10070_v60 = vld [vmem:[%s21091_s5 + $0x1018] sm:$0xff] }
 0x42f   : > { %12122 = vmatpush1.bf16.msra.mxu0 %v12121_v17  ;;  %v12130_v17 = vpack.c.bf16 %v2916_v1, %v2913_v0  ;;  %v2931_v0 = vld [vmem:[%s21091_s5 + $0x220] sm:$0xff]  ;;  %v2934_v1 = vld [vmem:[%s21091_s5 + $0x238] sm:$0xff] }
 0x430   : > { %12542 = vmatpush1.bf16.msra.mxu1 %v12541_v9  ;;  %12123 = vmatprep.subr.bf16.mxu0 %v21104_v53  ;;  %v12550_v9 = vpack.c.bf16 %v10058_v4, %v10055_v31  ;;  %v10073_v31 = vld [vmem:[%s21091_s5 + $0x1030] sm:$0xff]  ;;  %v10076_v4 = vld [vmem:[%s21091_s5 + $0x1048] sm:$0xff] }
 0x431   : > { %12543 = vmatprep.subr.bf16.mxu1 %v21104_v53 }
 0x433   : > { %12125 = vmatpush1.bf16.msra.mxu0 %v12124_v39  ;;  %v12133_v39 = vpack.c.bf16 %v2922_v30, %v2919_v21  ;;  %v2937_v21 = vld [vmem:[%s21091_s5 + $0x250] sm:$0xff]  ;;  %v2940_v30 = vld [vmem:[%s21091_s5 + $0x268] sm:$0xff] }
 0x434   : > { %12545 = vmatpush1.bf16.msra.mxu1 %v12544_v8  ;;  %12126 = vmatprep.subr.bf16.mxu0 %v21104_v53  ;;  %v12553_v8 = vpack.c.bf16 %v10064_v32, %v10061_v24  ;;  %v10079_v24 = vld [vmem:[%s21091_s5 + $0x1060] sm:$0xff]  ;;  %v10082_v32 = vld [vmem:[%s21091_s5 + $0x1078] sm:$0xff] }
 0x435   : > { %12546 = vmatprep.subr.bf16.mxu1 %v21104_v53 }
 0x437   : > { %12128 = vmatpush1.bf16.msra.mxu0 %v12127_v19  ;;  %v12136_v19 = vpack.c.bf16 %v2928_v49, %v2925_v15  ;;  %v2943_v15 = vld [vmem:[%s21091_s5 + $0x280] sm:$0xff]  ;;  %v2946_v49 = vld [vmem:[%s21091_s5 + $0x298] sm:$0xff] }
 0x438   : > { %12548 = vmatpush1.bf16.msra.mxu1 %v12547_v63  ;;  %12129 = vmatprep.subr.bf16.mxu0 %v21104_v53  ;;  %v12556_v63 = vpack.c.bf16 %v10070_v60, %v10067_v62  ;;  %v10085_v62 = vld [vmem:[%s21091_s5 + $0x1090] sm:$0xff]  ;;  %v10088_v60 = vld [vmem:[%s21091_s5 + $0x10a8] sm:$0xff] }
 0x439   : > { %12549 = vmatprep.subr.bf16.mxu1 %v21104_v53 }
 0x43b   : > { %12131 = vmatpush1.bf16.msra.mxu0 %v12130_v17  ;;  %v12139_v17 = vpack.c.bf16 %v2934_v1, %v2931_v0  ;;  %v2949_v0 = vld [vmem:[%s21091_s5 + $0x2b0] sm:$0xff]  ;;  %v2952_v1 = vld [vmem:[%s21091_s5 + $0x2c8] sm:$0xff] }
 0x43c   : > { %12551 = vmatpush1.bf16.msra.mxu1 %v12550_v9  ;;  %12132 = vmatprep.subr.bf16.mxu0 %v21104_v53  ;;  %v12559_v9 = vpack.c.bf16 %v10076_v4, %v10073_v31  ;;  %v10091_v31 = vld [vmem:[%s21091_s5 + $0x10c0] sm:$0xff]  ;;  %v10094_v4 = vld [vmem:[%s21091_s5 + $0x10d8] sm:$0xff] }
 0x43d   : > { %12552 = vmatprep.subr.bf16.mxu1 %v21104_v53 }
 0x43f   : > { %12134 = vmatpush1.bf16.msra.mxu0 %v12133_v39  ;;  %v12142_v39 = vpack.c.bf16 %v2940_v30, %v2937_v21  ;;  %v12148_v21 = vpack.c.bf16 %v2952_v1, %v2949_v0  ;;  %v16905_v30 = vld [vmem:[#allocation4 + $0x10] sm:$0xff]  ;;  %v9715_v0 = vld [vmem:[%s21091_s5 + $0x5f0] sm:$0xff] }
 0x440   : > { %12554 = vmatpush1.bf16.msra.mxu1 %v12553_v8  ;;  %12135 = vmatprep.subr.bf16.mxu0 %v21104_v53  ;;  %v12562_v8 = vpack.c.bf16 %v10082_v32, %v10079_v24  ;;  %v12568_v24 = vpack.c.bf16 %v10094_v4, %v10091_v31  ;;  %v16931_v31 = vld [vmem:[#allocation4 + $0x20] sm:$0xff] }
 0x441   : > { %12555 = vmatprep.subr.bf16.mxu1 %v21104_v53 }
 0x443   : > { %12137 = vmatpush1.bf16.msra.mxu0 %v12136_v19  ;;  %v12145_v19 = vpack.c.bf16 %v2946_v49, %v2943_v15  ;;  %v9705_v15 = vld [vmem:[%s21091_s5 + $0x5a0] sm:$0xff]  ;;  %v9708_v49 = vld [vmem:[%s21091_s5 + $0x5b8] sm:$0xff] }
 0x444   : > { %12557 = vmatpush1.bf16.msra.mxu1 %v12556_v63  ;;  %12138 = vmatprep.subr.bf16.mxu0 %v21104_v53  ;;  %v12565_v63 = vpack.c.bf16 %v10088_v60, %v10085_v62  ;;  %v10107_v62 = vld [vmem:[%s21091_s5 + $0x10f0] sm:$0xff]  ;;  %v4585_v60 = vrot.slane %v16905_v30, 5 }
 0x445   : > { %12558 = vmatprep.subr.bf16.mxu1 %v21104_v53 }
 0x447   : > { %12140 = vmatpush1.bf16.msra.mxu0 %v12139_v17  ;;  %v9706_v17 = vld [vmem:[%s21091_s5 + $0x5a8] sm:$0xff] }
 0x448   : > { %12560 = vmatpush1.bf16.msra.mxu1 %v12559_v9  ;;  %12141 = vmatprep.subr.bf16.mxu0 %v21104_v53  ;;  %v9709_v9 = vld [vmem:[%s21091_s5 + $0x5c0] sm:$0xff] }
 0x449   : > { %12561 = vmatprep.subr.bf16.mxu1 %v21104_v53  ;;  %v12150_v32 = vpack.c.bf16 %v9709_v9, %v9706_v17  ;;  %v12152_v17 = vpack.c.bf16 %v9708_v49, %v9705_v15  ;;  %v16933_v9 = vld [vmem:[#allocation4 + $0x38] sm:$0xff]  ;;  %v10116_v15 = vld [vmem:[%s21091_s5 + $0x1138] sm:$0xff] }
 0x44a   : > { %v9718_v49 = vld [vmem:[%s21091_s5 + $0x608] sm:$0xff] }
 0x44b   : > { %12143 = vmatpush1.bf16.msra.mxu0 %v12142_v39  ;;  %v4469_v39 = vld [vmem:[#allocation4] sm:$0xe0] }
 0x44c   : > { %12563 = vmatpush1.bf16.msra.mxu1 %v12562_v8  ;;  %12144 = vmatprep.subr.bf16.mxu0 %v21104_v53  ;;  %v16908_v8 = vld [vmem:[#allocation4 + $0x28] sm:$0xff]  ;;  %v4584_v4 = vrot.slane %v4469_v39, 5  ;;  %v4590_v39 = vrot.slane %v16931_v31, 5 }
 0x44d   : > { %12564 = vmatprep.subr.bf16.mxu1 %v21104_v53  ;;  %v4592_v1 = vrot.slane %v16908_v8, 5 }
 0x44f   : > { %12146 = vmatpush1.bf16.msra.mxu0 %v12145_v19  ;;  %v10110_v19 = vld [vmem:[%s21091_s5 + $0x1108] sm:$0xff] }
 0x450   : > { %12566 = vmatpush1.bf16.msra.mxu1 %v12565_v63  ;;  %12147 = vmatprep.subr.bf16.mxu0 %v21104_v53  ;;  %v9712_v63 = vld [vmem:[%s21091_s5 + $0x5d8] sm:$0xff]  ;;  %v12631_v7 = vpack.c.bf16 %v10110_v19, %v10107_v62  ;;  %v9721_v62 = vld [vmem:[%s21091_s5 + $0x620] sm:$0xff]  ;;  %v21127_v19 = vrot.slane %v16715_v29, 5 }
 0x451   : > { %12567 = vmatprep.subr.bf16.mxu1 %v21104_v53  ;;  %v12154_v54 = vpack.c.bf16 %v9715_v0, %v9712_v63  ;;  %v4596_v0 = vrot.slane %v16933_v9, 5  ;;  %v12158_v10 = vpack.c.bf16 %v9721_v62, %v9718_v49  ;;  %v4600_v49 = vrot.slane %v16647_v34, 5 }
 0x452   : > { %v16964_v63 = vsel %vm2458_vm9, %v21127_v19, %v4592_v1  ;;  %v9720_v19 = vld [vmem:[%s21091_s5 + $0x618] sm:$0xff] }
 0x453   : > { %12149 = vmatpush1.bf16.msra.mxu0 %v12148_v21  ;;  %v9714_v21 = vld [vmem:[%s21091_s5 + $0x5e8] sm:$0xff]  ;;  %21128 = vst [vmem:[#allocation18_spill] sm:$0xff] %v16964_v63 }
 0x454   : > { %12569 = vmatpush1.bf16.msra.mxu1 %v12568_v24  ;;  %12151 = vmatprep.subr.bf16.mxu0 %v12150_v32  ;;  %v10113_v24 = vld [vmem:[%s21091_s5 + $0x1120] sm:$0xff]  ;;  %v16947_v32 = vsel %vm2458_vm9, %v4584_v4, %v4585_v60 }
 0x455   : > { %12630 = vmatprep.subr.bf16.mxu1 %v21104_v53  ;;  %21126 = vst [vmem:[#allocation17_spill] sm:$0xff] %v16947_v32  ;;  %v16967_v4 = vld [vmem:[#allocation4 + $0x30] sm:$0xff]  ;;  %v12156_v53 = vpack.c.bf16 %v9714_v21, %v9711_v14  ;;  %v12634_v11 = vpack.c.bf16 %v10116_v15, %v10113_v24  ;;  %v16982_v14 = vsel %vm2458_vm9, %v4585_v60, %v4590_v39  ;;  %v10122_v21 = vld [vmem:[%s21091_s5 + $0x1168] sm:$0xff]  ;;  %v9724_v24 = vld [vmem:[%s21091_s5 + $0x638] sm:$0xff] }
 0x456   : > { %3448 = vmatmul.mubr.f32.vlgmr.msra.gmra.mrb[26].mxu0 %v16616_v22  ;;  %v13675_v22 = vld [vmem:[#allocation4 + $0x18] sm:$0xff]  ;;  %21129 = vst [vmem:[#allocation19_spill] sm:$0xff] %v16982_v14  ;;  %v9727_v15 = vld [vmem:[%s21091_s5 + $0x650] sm:$0xff]  ;;  %v16998_v60 = vsel %vm2458_vm9, %v4592_v1, %v4596_v0 }
 0x457   : > { %4781 = vmatmul.mubr.f32.vlgmr.msra.gmra.mrb[38].mxu1 %v16947_v32  ;;  %9701 = vmatprep.mubr.msk.f32.mxu0 %vm2844_vm15, %v13675_v22  ;;  %v9717_v22 = vld [vmem:[%s21091_s5 + $0x600] sm:$0xff]  ;;  %21131 = vst [vmem:[#allocation20_spill] sm:$0xff] %v16998_v60  ;;  %v12162_v33 = vpack.c.bf16 %v9727_v15, %v9724_v24  ;;  %v9726_v1 = vld [vmem:[%s21091_s5 + $0x648] sm:$0xff] }
 0x458   : > { %12153 = vmatpush1.bf16.msra.mxu0 %v12152_v17  ;;  %10101 = vmatprep.mubr.msk.f32.mxu1 %vm2844_vm15, %v16964_v63  ;;  %v10119_v17 = vld [vmem:[%s21091_s5 + $0x1150] sm:$0xff]  ;;  %v12160_v62 = vpack.c.bf16 %v9720_v19, %v9717_v22  ;;  %v4480_v63 = vld [vmem:[#allocation4 + $0x58] sm:$0x1]  ;;  %v4479_v24 = vld [vmem:[#allocation4 + $0x50] sm:$0x1] }
 0x459   : > { %12632 = vmatpush1.bf16.msra.mxu1 %v12631_v7  ;;  %12155 = vmatprep.subr.bf16.mxu0 %v12154_v54  ;;  %v21130_v7 = vmov 0.0|0.0   ;;  %v4594_v54 = vrot.slane %v16967_v4, 5  ;;  %v12637_v32 = vpack.c.bf16 %v10122_v21, %v10119_v17  ;;  %v9730_v19 = vld [vmem:[%s21091_s5 + $0x668] sm:$0xff]  ;;  %v9733_v17 = vld [vmem:[%s21091_s5 + $0x680] sm:$0xff]  ;;  %v4604_v21 = vrot.slane %v4480_v63, 5  ;;  %v10131_v63 = vld [vmem:[%s21091_s5 + $0x11b0] sm:$0xff] }
 0x45a   : > { %3453 = vmatmul.mubr.f32.gmra.mrb[28].mxu0 %v16656_v59  ;;  %12633 = vmatprep.subr.bf16.mxu1 %v21130_v7  ;;  %v13676_v59 = vld [vmem:[#allocation4 + $0x28] sm:$0xff]  ;;  %v12166_v20 = vpack.c.bf16 %v9733_v17, %v9730_v19 }
 0x45b   : > { %4786 = vmatmul.mubr.f32.gmra.mrb[40].mxu1 %v16982_v14  ;;  %9702 = vmatprep.mubr.msk.f32.mxu0 %vm2844_vm15, %v13676_v59  ;;  %v9723_v14 = vld [vmem:[%s21091_s5 + $0x630] sm:$0xff]  ;;  %v17014_v22 = vsel %vm2458_vm9, %v4590_v39, %v4594_v54  ;;  %v17030_v39 = vsel %vm2458_vm9, %v4596_v0, %v4600_v49  ;;  %v4822_v59 = vld [vmem:[#allocation4 + $0x8] sm:$0xc0] }
 0x45c   : > { %12157 = vmatpush1.bf16.msra.mxu0 %v12156_v53  ;;  %10102 = vmatprep.mubr.msk.f32.mxu1 %vm2844_vm15, %v16998_v60  ;;  %v10125_v53 = vld [vmem:[%s21091_s5 + $0x1180] sm:$0xff]  ;;  %21132 = vst [vmem:[#allocation21_spill] sm:$0xff] %v17014_v22  ;;  %v12164_v15 = vpack.c.bf16 %v9726_v1, %v9723_v14  ;;  %v9732_v0 = vld [vmem:[%s21091_s5 + $0x678] sm:$0xff]  ;;  %v9739_v1 = vld [vmem:[%s21091_s5 + $0x6b0] sm:$0xff]  ;;  %v4923_v19 = vrot.slane %v4822_v59, 6 }
 0x45d   : > { %12635 = vmatpush1.bf16.msra.mxu1 %v12634_v11  ;;  %12159 = vmatprep.subr.bf16.mxu0 %v12158_v10  ;;  %v4598_v10 = vrot.slane %v16679_v6, 5  ;;  %v10128_v11 = vld [vmem:[%s21091_s5 + $0x1198] sm:$0xff]  ;;  %v9741_v59 = vld [vmem:[%s21091_s5 + $0x6c0] sm:$0xff] }
 0x45e   : > { %3458 = vmatmul.mubr.f32.gmra.mrb[30].mxu0 %v16690_v25  ;;  %12636 = vmatprep.subr.bf16.mxu1 %v21130_v7  ;;  %v13677_v25 = vld [vmem:[#allocation4 + $0x38] sm:$0xff]  ;;  %v12640_v60 = vpack.c.bf16 %v10128_v11, %v10125_v53 }
 0x45f   : > { %4791 = vmatmul.mubr.f32.gmra.mrb[42].mxu1 %v17014_v22  ;;  %9703 = vmatprep.mubr.msk.f32.mxu0 %vm2844_vm15, %v13677_v25  ;;  %v9729_v22 = vld [vmem:[%s21091_s5 + $0x660] sm:$0xff]  ;;  %v17045_v14 = vsel %vm2458_vm9, %v4594_v54, %v4598_v10  ;;  %v4924_v54 = vrot.slane %v16715_v29, 6  ;;  %v9735_v25 = vld [vmem:[%s21091_s5 + $0x690] sm:$0xff] }
 0x460   : > { %12161 = vmatpush1.bf16.msra.mxu0 %v12160_v62  ;;  %10103 = vmatprep.mubr.msk.f32.mxu1 %vm2844_vm15, %v17030_v39  ;;  %v9736_v62 = vld [vmem:[%s21091_s5 + $0x698] sm:$0xff]  ;;  %v12168_v53 = vpack.c.bf16 %v9732_v0, %v9729_v22  ;;  %v9742_v22 = vld [vmem:[%s21091_s5 + $0x6c8] sm:$0xff]  ;;  %v10143_v0 = vld [vmem:[%s21091_s5 + $0x1210] sm:$0xff] }
 0x461   : > { %12638 = vmatpush1.bf16.msra.mxu1 %v12637_v32  ;;  %12163 = vmatprep.subr.bf16.mxu0 %v12162_v33  ;;  %v4602_v33 = vrot.slane %v4479_v24, 5  ;;  %v10134_v32 = vld [vmem:[%s21091_s5 + $0x11c8] sm:$0xff]  ;;  %v12170_v17 = vpack.c.bf16 %v9739_v1, %v9736_v62 }
 0x462   : > { %3463 = vmatmul.mubr.f32.gmra.mrb[32].mxu0 %v16724_v40  ;;  %12639 = vmatprep.subr.bf16.mxu1 %v21130_v7  ;;  %v17061_v40 = vsel %vm2458_vm9, %v4600_v49, %v4604_v21  ;;  %v12643_v11 = vpack.c.bf16 %v10134_v32, %v10131_v63  ;;  %v10137_v49 = vld [vmem:[%s21091_s5 + $0x11e0] sm:$0xff]  ;;  %v10146_v63 = vld [vmem:[%s21091_s5 + $0x1228] sm:$0xff]  ;;  %v9751_v32 = vld [vmem:[%s21091_s5 + $0x710] sm:$0xff] }
 0x463   : > { %4796 = vmatmul.mubr.f32.gmra.mrb[44].mxu1 %v17045_v14  ;;  %9704 = vmatprep.mubr.msk.f32.mxu0 %vm2844_vm15, %v16732_v23  ;;  %v9738_v23 = vld [vmem:[%s21091_s5 + $0x6a8] sm:$0xff]  ;;  %v9745_v21 = vld [vmem:[%s21091_s5 + $0x6e0] sm:$0xff]  ;;  %v12649_v1 = vpack.c.bf16 %v10146_v63, %v10143_v0  ;;  %v9763_v0 = vld [vmem:[%s21091_s5 + $0x770] sm:$0xff] }
 0x464   : > { %12165 = vmatpush1.bf16.msra.mxu0 %v12164_v15  ;;  %10104 = vmatprep.mubr.msk.f32.mxu1 %vm2844_vm15, %v17061_v40  ;;  %v12174_v15 = vpack.c.bf16 %v9745_v21, %v9742_v22 }
 0x465   : > { %12641 = vmatpush1.bf16.msra.mxu1 %v12640_v60  ;;  %12167 = vmatprep.subr.bf16.mxu0 %v12166_v20  ;;  %v17077_v60 = vsel %vm2458_vm9, %v4598_v10, %v4602_v33  ;;  %v10140_v20 = vld [vmem:[%s21091_s5 + $0x11f8] sm:$0xff]  ;;  %v12172_v10 = vpack.c.bf16 %v9738_v23, %v9735_v25  ;;  %v9754_v23 = vld [vmem:[%s21091_s5 + $0x728] sm:$0xff]  ;;  %vm13756_vm9 = vmmov 0  }
 0x466   : > { %3468 = vmatmul.mubr.f32.gmra.mrb[34].mxu0 %v16746_v16  ;;  %12642 = vmatprep.subr.bf16.mxu1 %v21130_v7  ;;  %v17095_v16 = vsel %vm2643_vm10, %v4923_v19, %v4924_v54  ;;  %v12646_v24 = vpack.c.bf16 %v10140_v20, %v10137_v49  ;;  %v9748_v33 = vld [vmem:[%s21091_s5 + $0x6f8] sm:$0xff]  ;;  %v9750_v19 = vld [vmem:[%s21091_s5 + $0x708] sm:$0xff]  ;;  %v9757_v49 = vld [vmem:[%s21091_s5 + $0x740] sm:$0xff] }
 0x467   : > { %4801 = vmatmul.mubr.f32.gmra.mrb[46].mxu1 %v17077_v60  ;;  %9795 = vmatprep.mubr.msk.f32.mxu0 %vm2844_vm15, %v15943_v5  ;;  %v9744_v5 = vld [vmem:[%s21091_s5 + $0x6d8] sm:$0xff]  ;;  %v12182_v21 = vpack.c.bf16 %v9757_v49, %v9754_v23  ;;  %v9769_v23 = vld [vmem:[%s21091_s5 + $0x7a0] sm:$0xff] }
 0x468   : > { %12169 = vmatpush1.bf16.msra.mxu0 %v12168_v53  ;;  %10200 = vmatprep.mubr.msk.f32.mxu1 %vm2844_vm15, %v17095_v16  ;;  %v12176_v62 = vpack.c.bf16 %v9744_v5, %v9741_v59  ;;  %v12178_v53 = vpack.c.bf16 %v9751_v32, %v9748_v33  ;;  %v10152_v25 = vld [vmem:[%s21091_s5 + $0x1258] sm:$0xff]  ;;  %v10158_v59 = vld [vmem:[%s21091_s5 + $0x1288] sm:$0xff] }
 0x469   : > { %12644 = vmatpush1.bf16.msra.mxu1 %v12643_v11  ;;  %12171 = vmatprep.subr.bf16.mxu0 %v12170_v17  ;;  %v9747_v11 = vld [vmem:[%s21091_s5 + $0x6f0] sm:$0xff]  ;;  %v10149_v17 = vld [vmem:[%s21091_s5 + $0x1240] sm:$0xff]  ;;  %v9760_v5 = vld [vmem:[%s21091_s5 + $0x758] sm:$0xff] }
 0x46a   : > { %12645 = vmatprep.subr.bf16.mxu1 %v21130_v7  ;;  %v12180_v20 = vpack.c.bf16 %v9750_v19, %v9747_v11  ;;  %v12652_v22 = vpack.c.bf16 %v10152_v25, %v10149_v17  ;;  %v9762_v11 = vld [vmem:[%s21091_s5 + $0x768] sm:$0xff]  ;;  %v10161_v19 = vld [vmem:[%s21091_s5 + $0x12a0] sm:$0xff]  ;;  %v10164_v17 = vld [vmem:[%s21091_s5 + $0x12b8] sm:$0xff] }
 0x46b   : > { %v9766_v25 = vld [vmem:[%s21091_s5 + $0x788] sm:$0xff] }
 0x46c   : > { %12173 = vmatpush1.bf16.msra.mxu0 %v12172_v10  ;;  %v9753_v10 = vld [vmem:[%s21091_s5 + $0x720] sm:$0xff] }
 0x46d   : > { %12647 = vmatpush1.bf16.msra.mxu1 %v12646_v24  ;;  %12175 = vmatprep.subr.bf16.mxu0 %v12174_v15  ;;  %v9756_v24 = vld [vmem:[%s21091_s5 + $0x738] sm:$0xff]  ;;  %v10155_v15 = vld [vmem:[%s21091_s5 + $0x1270] sm:$0xff] }
 0x46e   : > { %12648 = vmatprep.subr.bf16.mxu1 %v21130_v7  ;;  %v12184_v33 = vpack.c.bf16 %v9756_v24, %v9753_v10  ;;  %v12190_v10 = vpack.c.bf16 %v9769_v23, %v9766_v25  ;;  %v9765_v24 = vld [vmem:[%s21091_s5 + $0x780] sm:$0xff]  ;;  %v10176_v23 = vld [vmem:[%s21091_s5 + $0x1318] sm:$0xff] }
 0x46f   : > { %v10173_v25 = vld [vmem:[%s21091_s5 + $0x1300] sm:$0xff] }
 0x470   : > { %12177 = vmatpush1.bf16.msra.mxu0 %v12176_v62  ;;  %v12655_v62 = vpack.c.bf16 %v10158_v59, %v10155_v15  ;;  %v9768_v15 = vld [vmem:[%s21091_s5 + $0x798] sm:$0xff]  ;;  %v10167_v59 = vld [vmem:[%s21091_s5 + $0x12d0] sm:$0xff] }
 0x471   : > { %12650 = vmatpush1.bf16.msra.mxu1 %v12649_v1  ;;  %12179 = vmatprep.subr.bf16.mxu0 %v12178_v53  ;;  %v12186_v1 = vpack.c.bf16 %v9763_v0, %v9760_v5  ;;  %v9759_v53 = vld [vmem:[%s21091_s5 + $0x750] sm:$0xff]  ;;  %v10170_v5 = vld [vmem:[%s21091_s5 + $0x12e8] sm:$0xff]  ;;  %v9772_v0 = vld [vmem:[%s21091_s5 + $0x7b8] sm:$0xff] }
 0x472   : > { %12651 = vmatprep.subr.bf16.mxu1 %v21130_v7 }
 0x474   : > { %12181 = vmatpush1.bf16.msra.mxu0 %v12180_v20  ;;  %v17156_v63 = vpop.f32.mrb[8].mxu1  ;;  %v12188_v20 = vpack.c.bf16 %v9762_v11, %v9759_v53  ;;  %v12661_v53 = vpack.c.bf16 %v10170_v5, %v10167_v59  ;;  %v9777_v5 = vld [vmem:[%s21091_s5 + $0x7e0] sm:$0xff] }
 0x475   : > { %12653 = vmatpush1.bf16.msra.mxu1 %v12652_v22  ;;  %12183 = vmatprep.subr.bf16.mxu0 %v12182_v21  ;;  %v3768_v32 = vpop.f32.mrb[9].mxu1  ;;  %v12658_v21 = vpack.c.bf16 %v10164_v17, %v10161_v19  ;;  %v9771_v19 = vld [vmem:[%s21091_s5 + $0x7b0] sm:$0xff]  ;;  %v9774_v17 = vld [vmem:[%s21091_s5 + $0x7c8] sm:$0xff] }
 0x476   : > { %12654 = vmatprep.subr.bf16.mxu1 %v21130_v7 }
 0x478   : > { %12185 = vmatpush1.bf16.msra.mxu0 %v12184_v33  ;;  %v17177_v49 = vpop.f32.mrb[10].mxu1  ;;  %v9775_v33 = vld [vmem:[%s21091_s5 + $0x7d0] sm:$0xff] }
 0x479   : > { %12656 = vmatpush1.bf16.msra.mxu1 %v12655_v62  ;;  %12187 = vmatprep.subr.bf16.mxu0 %v12186_v1  ;;  %v3773_v22 = vpop.f32.mrb[11].mxu1  ;;  %v12192_v62 = vpack.c.bf16 %v9768_v15, %v9765_v24  ;;  %v12194_v11 = vpack.c.bf16 %v9775_v33, %v9772_v0  ;;  %v12664_v15 = vpack.c.bf16 %v10176_v23, %v10173_v25  ;;  %v9780_v0 = vld [vmem:[%s21091_s5 + $0x7f8] sm:$0xff]  ;;  %v10179_v33 = vld [vmem:[%s21091_s5 + $0x1330] sm:$0xff] }
 0x47a   : > { %12657 = vmatprep.subr.bf16.mxu1 %v21130_v7  ;;  %v9781_v22 = vld [vmem:[%s21091_s5 + $0x800] sm:$0xff] }
 0x47c   : > { %12189 = vmatpush1.bf16.msra.mxu0 %v12188_v20  ;;  %v17198_v32 = vpop.f32.mrb[12].mxu1  ;;  %v9778_v20 = vld [vmem:[%s21091_s5 + $0x7e8] sm:$0xff] }
 0x47d   : > { %12659 = vmatpush1.bf16.msra.mxu1 %v12658_v21  ;;  %12191 = vmatprep.subr.bf16.mxu0 %v12190_v10  ;;  %v3778_v1 = vpop.f32.mrb[13].mxu1  ;;  %v12196_v10 = vpack.c.bf16 %v9774_v17, %v9771_v19  ;;  %v12198_v59 = vpack.c.bf16 %v9781_v22, %v9778_v20  ;;  %v12200_v19 = vpack.c.bf16 %v9780_v0, %v9777_v5  ;;  %v9783_v20 = vld [vmem:[%s21091_s5 + $0x810] sm:$0xff]  ;;  %v9786_v22 = vld [vmem:[%s21091_s5 + $0x828] sm:$0xff] }
 0x47e   : > { %12660 = vmatprep.subr.bf16.mxu1 %v21130_v7  ;;  %v9784_v1 = vld [vmem:[%s21091_s5 + $0x818] sm:$0xff]  ;;  %v12204_v5 = vpack.c.bf16 %v9786_v22, %v9783_v20 }
 0x480   : > { %12193 = vmatpush1.bf16.msra.mxu0 %v12192_v62  ;;  %v17219_v21 = vpop.f32.mrb[14].mxu1  ;;  %v10182_v62 = vld [vmem:[%s21091_s5 + $0x1348] sm:$0xff] }
 0x481   : > { %12662 = vmatpush1.bf16.msra.mxu1 %v12661_v53  ;;  %12195 = vmatprep.subr.bf16.mxu0 %v12194_v11  ;;  %v3783_v24 = vpop.f32.mrb[15].mxu1  ;;  %v9787_v53 = vld [vmem:[%s21091_s5 + $0x830] sm:$0xff]  ;;  %v12667_v25 = vpack.c.bf16 %v10182_v62, %v10179_v33  ;;  %v9789_v62 = vld [vmem:[%s21091_s5 + $0x840] sm:$0xff] }
 0x482   : > { %12663 = vmatprep.subr.bf16.mxu1 %v21130_v7  ;;  %v12202_v23 = vpack.c.bf16 %v9787_v53, %v9784_v1  ;;  %v10188_v24 = vld [vmem:[%s21091_s5 + $0x1378] sm:$0xff]  ;;  %v10191_v53 = vld [vmem:[%s21091_s5 + $0x1390] sm:$0xff] }
 0x483   : > { %v9792_v1 = vld [vmem:[%s21091_s5 + $0x858] sm:$0xff] }
 0x484   : > { %12197 = vmatpush1.bf16.msra.mxu0 %v12196_v10  ;;  %v17240_v11 = vpop.f32.mrb[16].mxu1  ;;  %v10185_v10 = vld [vmem:[%s21091_s5 + $0x1360] sm:$0xff] }
 0x485   : > { %12665 = vmatpush1.bf16.msra.mxu1 %v12664_v15  ;;  %12199 = vmatprep.subr.bf16.mxu0 %v12198_v59  ;;  %v3788_v17 = vpop.f32.mrb[17].mxu1  ;;  %v9790_v15 = vld [vmem:[%s21091_s5 + $0x848] sm:$0xff]  ;;  %v9793_v59 = vld [vmem:[%s21091_s5 + $0x860] sm:$0xff]  ;;  %v12670_v0 = vpack.c.bf16 %v10188_v24, %v10185_v10  ;;  %v4821_v10 = vld [vmem:[#allocation4] sm:$0xc0] }
 0x486   : > { %12666 = vmatprep.subr.bf16.mxu1 %v21130_v7  ;;  %v12206_v33 = vpack.c.bf16 %v9793_v59, %v9790_v15  ;;  %v9806_v17 = vld [vmem:[%s21091_s5 + $0x878] sm:$0xff]  ;;  %v9805_v24 = vld [vmem:[%s21091_s5 + $0x870] sm:$0xff]  ;;  %v9808_v15 = vld [vmem:[%s21091_s5 + $0x888] sm:$0xff]  ;;  %v4921_v59 = vrot.slane %v16905_v30, 6 }
 0x487   : > { %v9811_v30 = vld [vmem:[%s21091_s5 + $0x8a0] sm:$0xff] }
 0x488   : > { %12201 = vmatpush1.bf16.msra.mxu0 %v12200_v19  ;;  %v10194_v19 = vld [vmem:[%s21091_s5 + $0x13a8] sm:$0xff] }
 0x489   : > { %12668 = vmatpush1.bf16.msra.mxu1 %v12667_v25  ;;  %12203 = vmatprep.subr.bf16.mxu0 %v12202_v23  ;;  %v9809_v25 = vld [vmem:[%s21091_s5 + $0x890] sm:$0xff]  ;;  %v12208_v23 = vpack.c.bf16 %v9792_v1, %v9789_v62  ;;  %v12673_v20 = vpack.c.bf16 %v10194_v19, %v10191_v53  ;;  %v4920_v62 = vrot.slane %v4821_v10, 6  ;;  %v12257_v1 = vpack.c.bf16 %v9808_v15, %v9805_v24  ;;  %v9814_v19 = vld [vmem:[%s21091_s5 + $0x8b8] sm:$0xff]  ;;  %v9827_v24 = vld [vmem:[%s21091_s5 + $0x920] sm:$0xff] }
 0x48a   : > { %12669 = vmatprep.subr.bf16.mxu1 %v21130_v7  ;;  %v12255_v22 = vpack.c.bf16 %v9809_v25, %v9806_v17  ;;  %v9818_v25 = vld [vmem:[%s21091_s5 + $0x8d8] sm:$0xff]  ;;  %v9817_v10 = vld [vmem:[%s21091_s5 + $0x8d0] sm:$0xff]  ;;  %v4936_v15 = vrot.slane %v16647_v34, 6 }
 0x48b   : > { %v17303_v17 = vsel %vm2643_vm10, %v4920_v62, %v4921_v59  ;;  %v9830_v62 = vld [vmem:[%s21091_s5 + $0x938] sm:$0xff] }
 0x48c   : > { %12205 = vmatpush1.bf16.msra.mxu0 %v12204_v5  ;;  %v9812_v5 = vld [vmem:[%s21091_s5 + $0x8a8] sm:$0xff] }
 0x48d   : > { %12671 = vmatpush1.bf16.msra.mxu1 %v12670_v0  ;;  %12207 = vmatprep.subr.bf16.mxu0 %v12206_v33  ;;  %v9815_v0 = vld [vmem:[%s21091_s5 + $0x8c0] sm:$0xff]  ;;  %v4928_v33 = vrot.slane %v16908_v8, 6  ;;  %v4926_v8 = vrot.slane %v16931_v31, 6  ;;  %v4932_v31 = vrot.slane %v16933_v9, 6  ;;  %v4930_v9 = vrot.slane %v16967_v4, 6 }
 0x48e   : > { %12672 = vmatprep.subr.bf16.mxu1 %v21130_v7  ;;  %v12259_v53 = vpack.c.bf16 %v9815_v0, %v9812_v5  ;;  %v9823_v0 = vld [vmem:[%s21091_s5 + $0x900] sm:$0xff] }
 0x48f   : > { %v17331_v29 = vsel %vm2643_vm10, %v4921_v59, %v4926_v8  ;;  %v4824_v59 = vld [vmem:[#allocation4 + $0x58] sm:$0x3]  ;;  %v17357_v34 = vsel %vm2643_vm10, %v4926_v8, %v4930_v9  ;;  %v9829_v8 = vld [vmem:[%s21091_s5 + $0x930] sm:$0xff] }
 0x490   : > { %12209 = vmatpush1.bf16.msra.mxu0 %v12208_v23  ;;  %v9821_v23 = vld [vmem:[%s21091_s5 + $0x8f0] sm:$0xff] }
 0x491   : > { %12674 = vmatpush1.bf16.msra.mxu1 %v12673_v20  ;;  %12256 = vmatprep.subr.bf16.mxu0 %v12255_v22  ;;  %v12261_v20 = vpack.c.bf16 %v9814_v19, %v9811_v30  ;;  %v12263_v22 = vpack.c.bf16 %v9821_v23, %v9818_v25  ;;  %v4823_v30 = vld [vmem:[#allocation4 + $0x50] sm:$0x3] }
 0x492   : > { %v4938_v23 = vrot.slane %v4823_v30, 6 }
 0x493   : > { %3670 = vmatmul.mubr.f32.vlgmr.msra.gmra.mrb[6].mxu0 %v15962_v41  ;;  %v17318_v41 = vsel %vm2643_vm10, %v4924_v54, %v4928_v33  ;;  %v9824_v54 = vld [vmem:[%s21091_s5 + $0x908] sm:$0xff] }
 0x494   : > { %5117 = vmatmul.mubr.f32.vlgmr.msra.gmra.mrb[48].mxu1 %v17303_v17  ;;  %9796 = vmatprep.mubr.msk.f32.mxu0 %vm2844_vm15, %v15986_v46  ;;  %v9820_v46 = vld [vmem:[%s21091_s5 + $0x8e8] sm:$0xff]  ;;  %v12267_v5 = vpack.c.bf16 %v9827_v24, %v9824_v54  ;;  %v9842_v54 = vld [vmem:[%s21091_s5 + $0x998] sm:$0xff]  ;;  %v9845_v24 = vld [vmem:[%s21091_s5 + $0x9b0] sm:$0xff] }
 0x495   : > { %12258 = vmatpush1.bf16.msra.mxu0 %v12257_v1  ;;  %10201 = vmatprep.mubr.msk.f32.mxu1 %vm2844_vm15, %v17318_v41  ;;  %v12265_v4 = vpack.c.bf16 %v9820_v46, %v9817_v10  ;;  %v9833_v1 = vld [vmem:[%s21091_s5 + $0x950] sm:$0xff]  ;;  %v9835_v46 = vld [vmem:[%s21091_s5 + $0x960] sm:$0xff] }
 0x496   : > { %12260 = vmatprep.subr.bf16.mxu0 %v12259_v53  ;;  %v4940_v53 = vrot.slane %v4824_v59, 6  ;;  %v12271_v19 = vpack.c.bf16 %v9833_v1, %v9830_v62  ;;  %v9844_v59 = vld [vmem:[%s21091_s5 + $0x9a8] sm:$0xff]  ;;  %v9850_v62 = vld [vmem:[%s21091_s5 + $0x9d8] sm:$0xff] }
 0x497   : > { %3676 = vmatmul.mubr.f32.gmra.mrb[8].mxu0 %v16000_v52  ;;  %v17344_v52 = vsel %vm2643_vm10, %v4928_v33, %v4932_v31  ;;  %v4934_v33 = vrot.slane %v16679_v6, 6  ;;  %v9854_v1 = vld [vmem:[%s21091_s5 + $0x9f8] sm:$0xff] }
 0x498   : > { %5122 = vmatmul.mubr.f32.gmra.mrb[50].mxu1 %v17331_v29  ;;  %9797 = vmatprep.mubr.msk.f32.mxu0 %vm2844_vm15, %v16025_v50  ;;  %v9826_v50 = vld [vmem:[%s21091_s5 + $0x918] sm:$0xff] }
 0x499   : > { %12262 = vmatpush1.bf16.msra.mxu0 %v12261_v20  ;;  %10202 = vmatprep.mubr.msk.f32.mxu1 %vm2844_vm15, %v17344_v52  ;;  %v12269_v6 = vpack.c.bf16 %v9826_v50, %v9823_v0  ;;  %v17382_v25 = vsel %vm2643_vm10, %v4930_v9, %v4934_v33  ;;  %v9839_v20 = vld [vmem:[%s21091_s5 + $0x980] sm:$0xff]  ;;  %v9838_v9 = vld [vmem:[%s21091_s5 + $0x978] sm:$0xff] }
 0x49a   : > { %12264 = vmatprep.subr.bf16.mxu0 %v12263_v22  ;;  %v17394_v22 = vsel %vm2643_vm10, %v4936_v15, %v4940_v53  ;;  %v9857_v53 = vld [vmem:[%s21091_s5 + $0xa10] sm:$0xff] }
 0x49b   : > { %3682 = vmatmul.mubr.f32.gmra.mrb[10].mxu0 %v16042_v12  ;;  %v17370_v12 = vsel %vm2643_vm10, %v4932_v31, %v4936_v15  ;;  %v9836_v31 = vld [vmem:[%s21091_s5 + $0x968] sm:$0xff]  ;;  %v12277_v15 = vpack.c.bf16 %v9838_v9, %v9835_v46 }
 0x49c   : > { %5127 = vmatmul.mubr.f32.gmra.mrb[52].mxu1 %v17357_v34  ;;  %9798 = vmatprep.mubr.msk.f32.mxu0 %vm2844_vm15, %v16056_v18  ;;  %v9832_v18 = vld [vmem:[%s21091_s5 + $0x948] sm:$0xff]  ;;  %v12275_v10 = vpack.c.bf16 %v9839_v20, %v9836_v31 }
 0x49d   : > { %12266 = vmatpush1.bf16.msra.mxu0 %v12265_v4  ;;  %10203 = vmatprep.mubr.msk.f32.mxu1 %vm2844_vm15, %v17370_v12  ;;  %v9841_v4 = vld [vmem:[%s21091_s5 + $0x990] sm:$0xff] }
 0x49e   : > { %12268 = vmatprep.subr.bf16.mxu0 %v12267_v5  ;;  %v9848_v5 = vld [vmem:[%s21091_s5 + $0x9c8] sm:$0xff]  ;;  %v12281_v0 = vpack.c.bf16 %v9844_v59, %v9841_v4 }
 0x49f   : > { %3688 = vmatmul.mubr.f32.gmra.mrb[12].mxu0 %v16082_v28  ;;  %v12273_v28 = vpack.c.bf16 %v9832_v18, %v9829_v8  ;;  %v9856_v8 = vld [vmem:[%s21091_s5 + $0xa08] sm:$0xff] }
 0x4a0   : > { %5132 = vmatmul.mubr.f32.gmra.mrb[54].mxu1 %v17382_v25  ;;  %9799 = vmatprep.mubr.msk.f32.mxu0 %vm2844_vm15, %v16012_v2  ;;  %v17406_v2 = vsel %vm2643_vm10, %v4934_v33, %v4938_v23  ;;  %v9847_v33 = vld [vmem:[%s21091_s5 + $0x9c0] sm:$0xff]  ;;  %v9860_v18 = vld [vmem:[%s21091_s5 + $0xa28] sm:$0xff]  ;;  %vm8157_vm10 = vcmask 516096  }
 0x4a1   : > { %12270 = vmatpush1.bf16.msra.mxu0 %v12269_v6  ;;  %10204 = vmatprep.mubr.msk.f32.mxu1 %vm2844_vm15, %v17394_v22  ;;  %v12285_v30 = vpack.c.bf16 %v9850_v62, %v9847_v33  ;;  %v12287_v6 = vpack.c.bf16 %v9857_v53, %v9854_v1  ;;  %v9863_v23 = vld [vmem:[%s21091_s5 + $0xa40] sm:$0xff]  ;;  %v9865_v33 = vld [vmem:[%s21091_s5 + $0xa50] sm:$0xff]  ;;  %v9868_v62 = vld [vmem:[%s21091_s5 + $0xa68] sm:$0xff] }
 0x4a2   : > { %12272 = vmatprep.subr.bf16.mxu0 %v12271_v19  ;;  %v9853_v19 = vld [vmem:[%s21091_s5 + $0x9f0] sm:$0xff]  ;;  %v12291_v9 = vpack.c.bf16 %v9863_v23, %v9860_v18  ;;  %v9872_v1 = vld [vmem:[%s21091_s5 + $0xa88] sm:$0xff]  ;;  %v9875_v53 = vld [vmem:[%s21091_s5 + $0xaa0] sm:$0xff]  ;;  %v12297_v18 = vpack.c.bf16 %v9868_v62, %v9865_v33 }
 0x4a3   : > { %3694 = vmatmul.mubr.f32.gmra.mrb[14].mxu0 %v16046_v26  ;;  %v12279_v26 = vpack.c.bf16 %v9845_v24, %v9842_v54  ;;  %v12289_v46 = vpack.c.bf16 %v9856_v8, %v9853_v19  ;;  %v9859_v54 = vld [vmem:[%s21091_s5 + $0xa20] sm:$0xff]  ;;  %v9862_v24 = vld [vmem:[%s21091_s5 + $0xa38] sm:$0xff]  ;;  %v12299_v23 = vpack.c.bf16 %v9875_v53, %v9872_v1  ;;  %v9884_v33 = vld [vmem:[%s21091_s5 + $0xae8] sm:$0xff] }
 0x4a4   : > { %5137 = vmatmul.mubr.f32.gmra.mrb[56].mxu1 %v17406_v2  ;;  %9895 = vmatprep.mubr.msk.f32.mxu0 %vm2844_vm15, %v16110_v42  ;;  %v9851_v42 = vld [vmem:[%s21091_s5 + $0x9e0] sm:$0xff] }
 0x4a5   : > { %12274 = vmatpush1.bf16.msra.mxu0 %v12273_v28  ;;  %v12283_v50 = vpack.c.bf16 %v9851_v42, %v9848_v5  ;;  %v9887_v62 = vld [vmem:[%s21091_s5 + $0xb00] sm:$0xff] }
 0x4a6   : > { %12276 = vmatprep.subr.bf16.mxu0 %v12275_v10 }
 0x4a9   : > { %12278 = vmatpush1.bf16.msra.mxu0 %v12277_v15  ;;  %v9866_v15 = vld [vmem:[%s21091_s5 + $0xa58] sm:$0xff] }
 0x4aa   : > { %12280 = vmatprep.subr.bf16.mxu0 %v12279_v26  ;;  %v9869_v26 = vld [vmem:[%s21091_s5 + $0xa70] sm:$0xff] }
 0x4ad   : > { %12282 = vmatpush1.bf16.msra.mxu0 %v12281_v0  ;;  %v12293_v0 = vpack.c.bf16 %v9862_v24, %v9859_v54 }
 0x4ae   : > { %12284 = vmatprep.subr.bf16.mxu0 %v12283_v50  ;;  %v12295_v50 = vpack.c.bf16 %v9869_v26, %v9866_v15 }
 0x4b0   : > { %v17453_v31 = vpop.f32.mrb[16].mxu0  ;;  %v17455_v20 = vpop.f32.mrb[18].mxu1 }
 0x4b1   : > { %12286 = vmatpush1.bf16.msra.mxu0 %v12285_v30  ;;  %v3254_v28 = vpop.f32.mrb[17].mxu0  ;;  %v4100_v10 = vpop.f32.mrb[19].mxu1 }
 0x4b2   : > { %12288 = vmatprep.subr.bf16.mxu0 %v12287_v6  ;;  %v9871_v28 = vld [vmem:[%s21091_s5 + $0xa80] sm:$0xff]  ;;  %v9874_v10 = vld [vmem:[%s21091_s5 + $0xa98] sm:$0xff] }
 0x4b4   : > { %v17469_v4 = vpop.f32.mrb[18].mxu0  ;;  %v17471_v59 = vpop.f32.mrb[20].mxu1 }
 0x4b5   : > { %12290 = vmatpush1.bf16.msra.mxu0 %v12289_v46  ;;  %v3259_v5 = vpop.f32.mrb[19].mxu0  ;;  %v4105_v42 = vpop.f32.mrb[21].mxu1  ;;  %v9878_v46 = vld [vmem:[%s21091_s5 + $0xab8] sm:$0xff] }
 0x4b6   : > { %12292 = vmatprep.subr.bf16.mxu0 %v12291_v9  ;;  %v9881_v9 = vld [vmem:[%s21091_s5 + $0xad0] sm:$0xff]  ;;  %v12301_v5 = vpack.c.bf16 %v9874_v10, %v9871_v28  ;;  %v9883_v28 = vld [vmem:[%s21091_s5 + $0xae0] sm:$0xff]  ;;  %v9886_v10 = vld [vmem:[%s21091_s5 + $0xaf8] sm:$0xff] }
 0x4b7   : > { %v12303_v42 = vpack.c.bf16 %v9881_v9, %v9878_v46  ;;  %v9890_v46 = vld [vmem:[%s21091_s5 + $0xb18] sm:$0xff]  ;;  %v9893_v9 = vld [vmem:[%s21091_s5 + $0xb30] sm:$0xff] }
 0x4b8   : > { %v17485_v30 = vpop.f32.mrb[20].mxu0  ;;  %v17487_v6 = vpop.f32.mrb[22].mxu1 }
 0x4b9   : > { %12294 = vmatpush1.bf16.msra.mxu0 %v12293_v0  ;;  %v3264_v19 = vpop.f32.mrb[21].mxu0  ;;  %v4110_v8 = vpop.f32.mrb[23].mxu1  ;;  %v9877_v0 = vld [vmem:[%s21091_s5 + $0xab0] sm:$0xff] }
 0x4ba   : > { %12296 = vmatprep.subr.bf16.mxu0 %v12295_v50  ;;  %v9880_v50 = vld [vmem:[%s21091_s5 + $0xac8] sm:$0xff] }
 0x4bc   : > { %v17501_v54 = vpop.f32.mrb[22].mxu0  ;;  %v17503_v24 = vpop.f32.mrb[24].mxu1 }
 0x4bd   : > { %12298 = vmatpush1.bf16.msra.mxu0 %v12297_v18  ;;  %v3269_v15 = vpop.f32.mrb[23].mxu0  ;;  %v4115_v26 = vpop.f32.mrb[25].mxu1  ;;  %v12305_v18 = vpack.c.bf16 %v9880_v50, %v9877_v0  ;;  %v9906_v0 = vld [vmem:[%s21091_s5 + $0xb48] sm:$0xff]  ;;  %v9909_v50 = vld [vmem:[%s21091_s5 + $0xb60] sm:$0xff] }
 0x4be   : > { %12300 = vmatprep.subr.bf16.mxu0 %v12299_v23  ;;  %v12307_v23 = vpack.c.bf16 %v9887_v62, %v9884_v33  ;;  %v12309_v15 = vpack.c.bf16 %v9886_v10, %v9883_v28  ;;  %v12311_v26 = vpack.c.bf16 %v9893_v9, %v9890_v46  ;;  %v12360_v62 = vpack.c.bf16 %v9909_v50, %v9906_v0  ;;  %v9911_v46 = vld [vmem:[%s21091_s5 + $0xb70] sm:$0xff]  ;;  %v9914_v9 = vld [vmem:[%s21091_s5 + $0xb88] sm:$0xff]  ;;  %v9917_v0 = vld [vmem:[%s21091_s5 + $0xba0] sm:$0xff] }
 0x4bf   : > { %v9920_v50 = vld [vmem:[%s21091_s5 + $0xbb8] sm:$0xff] }
 0x4c0   : > { %v17517_v1 = vpop.f32.mrb[24].mxu0  ;;  %v17519_v53 = vpop.f32.mrb[26].mxu1 }
 0x4c1   : > { %12302 = vmatpush1.bf16.msra.mxu0 %v12301_v5  ;;  %v3274_v19 = vpop.f32.mrb[25].mxu0  ;;  %v4120_v8 = vpop.f32.mrb[27].mxu1  ;;  %v9889_v5 = vld [vmem:[%s21091_s5 + $0xb10] sm:$0xff] }
 0x4c2   : > { %12304 = vmatprep.subr.bf16.mxu0 %v12303_v42  ;;  %v9892_v42 = vld [vmem:[%s21091_s5 + $0xb28] sm:$0xff]  ;;  %v9905_v19 = vld [vmem:[%s21091_s5 + $0xb40] sm:$0xff]  ;;  %v9908_v8 = vld [vmem:[%s21091_s5 + $0xb58] sm:$0xff] }
 0x4c3   : > { %v12313_v33 = vpack.c.bf16 %v9892_v42, %v9889_v5  ;;  %v12362_v28 = vpack.c.bf16 %v9908_v8, %v9905_v19  ;;  %v12366_v5 = vpack.c.bf16 %v9914_v9, %v9911_v46  ;;  %v9923_v19 = vld [vmem:[%s21091_s5 + $0xbd0] sm:$0xff]  ;;  %v9926_v8 = vld [vmem:[%s21091_s5 + $0xbe8] sm:$0xff]  ;;  %v9936_v46 = vld [vmem:[%s21091_s5 + $0xc38] sm:$0xff] }
 0x4c5   : > { %12306 = vmatpush1.bf16.msra.mxu0 %v12305_v18  ;;  %v9912_v18 = vld [vmem:[%s21091_s5 + $0xb78] sm:$0xff] }
 0x4c6   : > { %12308 = vmatprep.subr.bf16.mxu0 %v12307_v23  ;;  %v9915_v23 = vld [vmem:[%s21091_s5 + $0xb90] sm:$0xff] }
 0x4c7   : > { %v12364_v10 = vpack.c.bf16 %v9915_v23, %v9912_v18  ;;  %v9930_v18 = vld [vmem:[%s21091_s5 + $0xc08] sm:$0xff] }
 0x4c9   : > { %12310 = vmatpush1.bf16.msra.mxu0 %v12309_v15  ;;  %v9918_v15 = vld [vmem:[%s21091_s5 + $0xba8] sm:$0xff] }
 0x4ca   : > { %12312 = vmatprep.subr.bf16.mxu0 %v12311_v26  ;;  %v9921_v26 = vld [vmem:[%s21091_s5 + $0xbc0] sm:$0xff] }
 0x4cb   : > { %v12368_v42 = vpack.c.bf16 %v9921_v26, %v9918_v15  ;;  %v9935_v15 = vld [vmem:[%s21091_s5 + $0xc30] sm:$0xff]  ;;  %v9938_v26 = vld [vmem:[%s21091_s5 + $0xc48] sm:$0xff] }
 0x4cd   : > { %12314 = vmatpush1.bf16.msra.mxu0 %v12313_v33  ;;  %v9924_v33 = vld [vmem:[%s21091_s5 + $0xbd8] sm:$0xff] }
 0x4ce   : > { %12361 = vmatprep.subr.bf16.mxu0 %v12360_v62 }
 0x4d0   : > { %4002 = vmatmul.mubr.f32.vlgmr.msra.gmra.mrb[6].mxu0 %v16278_v38  ;;  %v9927_v38 = vld [vmem:[%s21091_s5 + $0xbf0] sm:$0xff] }
 0x4d1   : > { %9896 = vmatprep.mubr.msk.f32.mxu0 %vm2844_vm15, %v16300_v3  ;;  %12363 = vmatpush1.bf16.msra.mxu0 %v12362_v28  ;;  %v12370_v3 = vpack.c.bf16 %v9920_v50, %v9917_v0  ;;  %v12372_v62 = vpack.c.bf16 %v9927_v38, %v9924_v33  ;;  %v9929_v28 = vld [vmem:[%s21091_s5 + $0xc00] sm:$0xff]  ;;  %v9944_v50 = vld [vmem:[%s21091_s5 + $0xc78] sm:$0xff] }
 0x4d2   : > { %12365 = vmatprep.subr.bf16.mxu0 %v12364_v10  ;;  %v9932_v10 = vld [vmem:[%s21091_s5 + $0xc18] sm:$0xff]  ;;  %v9941_v0 = vld [vmem:[%s21091_s5 + $0xc60] sm:$0xff] }
 0x4d3   : > { %v9948_v33 = vld [vmem:[%s21091_s5 + $0xc98] sm:$0xff] }
 0x4d4   : > { %4008 = vmatmul.mubr.f32.gmra.mrb[8].mxu0 %v16312_v36  ;;  %v9933_v36 = vld [vmem:[%s21091_s5 + $0xc20] sm:$0xff] }
 0x4d5   : > { %9897 = vmatprep.mubr.msk.f32.mxu0 %vm2844_vm15, %v16333_v45  ;;  %12367 = vmatpush1.bf16.msra.mxu0 %v12366_v5  ;;  %v12374_v45 = vpack.c.bf16 %v9926_v8, %v9923_v19  ;;  %v12376_v23 = vpack.c.bf16 %v9933_v36, %v9930_v18  ;;  %v9942_v5 = vld [vmem:[%s21091_s5 + $0xc68] sm:$0xff]  ;;  %v9957_v8 = vld [vmem:[%s21091_s5 + $0xce0] sm:$0xff] }
 0x4d6   : > { %12369 = vmatprep.subr.bf16.mxu0 %v12368_v42  ;;  %v9954_v19 = vld [vmem:[%s21091_s5 + $0xcc8] sm:$0xff] }
 0x4d7   : > { %v12392_v36 = vpack.c.bf16 %v9957_v8, %v9954_v19 }
 0x4d8   : > { %4014 = vmatmul.mubr.f32.gmra.mrb[10].mxu0 %v16346_v43  ;;  %v9939_v43 = vld [vmem:[%s21091_s5 + $0xc50] sm:$0xff] }
 0x4d9   : > { %9898 = vmatprep.mubr.msk.f32.mxu0 %vm2844_vm15, %v16369_v57  ;;  %12371 = vmatpush1.bf16.msra.mxu0 %v12370_v3  ;;  %v12378_v57 = vpack.c.bf16 %v9932_v10, %v9929_v28  ;;  %v12380_v9 = vpack.c.bf16 %v9939_v43, %v9936_v46  ;;  %v9947_v3 = vld [vmem:[%s21091_s5 + $0xc90] sm:$0xff]  ;;  %v9960_v28 = vld [vmem:[%s21091_s5 + $0xcf8] sm:$0xff] }
 0x4da   : > { %12373 = vmatprep.subr.bf16.mxu0 %v12372_v62  ;;  %v9950_v62 = vld [vmem:[%s21091_s5 + $0xca8] sm:$0xff]  ;;  %v9963_v10 = vld [vmem:[%s21091_s5 + $0xd10] sm:$0xff] }
 0x4db   : > { %v12390_v18 = vpack.c.bf16 %v9950_v62, %v9947_v3 }
 0x4dc   : > { %4020 = vmatmul.mubr.f32.gmra.mrb[12].mxu0 %v16381_v55  ;;  %v12382_v55 = vpack.c.bf16 %v9938_v26, %v9935_v15  ;;  %v9959_v15 = vld [vmem:[%s21091_s5 + $0xcf0] sm:$0xff]  ;;  %v9962_v26 = vld [vmem:[%s21091_s5 + $0xd08] sm:$0xff] }
 0x4dd   : > { %9899 = vmatprep.mubr.msk.f32.mxu0 %vm2844_vm15, %v16335_v61  ;;  %12375 = vmatpush1.bf16.msra.mxu0 %v12374_v45  ;;  %v9945_v61 = vld [vmem:[%s21091_s5 + $0xc80] sm:$0xff] }
 0x4de   : > { %12377 = vmatprep.subr.bf16.mxu0 %v12376_v23  ;;  %v12384_v42 = vpack.c.bf16 %v9945_v61, %v9942_v5  ;;  %v9953_v45 = vld [vmem:[%s21091_s5 + $0xcc0] sm:$0xff]  ;;  %v9956_v23 = vld [vmem:[%s21091_s5 + $0xcd8] sm:$0xff]  ;;  %v9966_v5 = vld [vmem:[%s21091_s5 + $0xd28] sm:$0xff] }
 0x4df   : > { %v12394_v43 = vpack.c.bf16 %v9956_v23, %v9953_v45  ;;  %v9969_v61 = vld [vmem:[%s21091_s5 + $0xd40] sm:$0xff]  ;;  %v9978_v45 = vld [vmem:[%s21091_s5 + $0xd88] sm:$0xff] }
 0x4e0   : > { %4026 = vmatmul.mubr.f32.gmra.mrb[14].mxu0 %v16349_v35  ;;  %v9951_v35 = vld [vmem:[%s21091_s5 + $0xcb0] sm:$0xff]  ;;  %v9981_v23 = vld [vmem:[%s21091_s5 + $0xda0] sm:$0xff] }
 0x4e1   : > { %12379 = vmatpush1.bf16.msra.mxu0 %v12378_v57  ;;  %9995 = vmatprep.mubr.msk.f32.mxu0 %vm2844_vm15, %v16431_v37  ;;  %v12386_v37 = vpack.c.bf16 %v9944_v50, %v9941_v0  ;;  %v12388_v38 = vpack.c.bf16 %v9951_v35, %v9948_v33  ;;  %v12400_v50 = vpack.c.bf16 %v9969_v61, %v9966_v5  ;;  %v9965_v33 = vld [vmem:[%s21091_s5 + $0xd20] sm:$0xff]  ;;  %v9968_v35 = vld [vmem:[%s21091_s5 + $0xd38] sm:$0xff]  ;;  %v9987_v5 = vld [vmem:[%s21091_s5 + $0xdd0] sm:$0xff] }
 0x4e2   : > { %12381 = vmatprep.subr.bf16.mxu0 %v12380_v9  ;;  %v12396_v9 = vpack.c.bf16 %v9963_v10, %v9960_v28  ;;  %v12402_v62 = vpack.c.bf16 %v9968_v35, %v9965_v33  ;;  %v9983_v33 = vld [vmem:[%s21091_s5 + $0xdb0] sm:$0xff]  ;;  %v9986_v35 = vld [vmem:[%s21091_s5 + $0xdc8] sm:$0xff] }
 0x4e5   : > { %12383 = vmatpush1.bf16.msra.mxu0 %v12382_v55 }
 0x4e6   : > { %12385 = vmatprep.subr.bf16.mxu0 %v12384_v42  ;;  %v12398_v42 = vpack.c.bf16 %v9962_v26, %v9959_v15  ;;  %v9980_v15 = vld [vmem:[%s21091_s5 + $0xd98] sm:$0xff] }
 0x4e7   : > { %v9984_v26 = vld [vmem:[%s21091_s5 + $0xdb8] sm:$0xff] }
 0x4e9   : > { %12387 = vmatpush1.bf16.msra.mxu0 %v12386_v37  ;;  %v9972_v37 = vld [vmem:[%s21091_s5 + $0xd58] sm:$0xff] }
 0x4ea   : > { %12389 = vmatprep.subr.bf16.mxu0 %v12388_v38  ;;  %v9975_v38 = vld [vmem:[%s21091_s5 + $0xd70] sm:$0xff] }
 0x4eb   : > { %v12404_v8 = vpack.c.bf16 %v9975_v38, %v9972_v37  ;;  %v9990_v37 = vld [vmem:[%s21091_s5 + $0xde8] sm:$0xff]  ;;  %v9993_v38 = vld [vmem:[%s21091_s5 + $0xe00] sm:$0xff] }
 0x4ed   : > { %12391 = vmatpush1.bf16.msra.mxu0 %v12390_v18  ;;  %v17668_v46 = vpop.f32.mrb[28].mxu1  ;;  %v9971_v18 = vld [vmem:[%s21091_s5 + $0xd50] sm:$0xff] }
 0x4ee   : > { %12393 = vmatprep.subr.bf16.mxu0 %v12392_v36  ;;  %v4432_v57 = vpop.f32.mrb[29].mxu1  ;;  %v9974_v36 = vld [vmem:[%s21091_s5 + $0xd68] sm:$0xff] }
 0x4ef   : > { %v12406_v10 = vpack.c.bf16 %v9974_v36, %v9971_v18  ;;  %v12408_v57 = vpack.c.bf16 %v9981_v23, %v9978_v45  ;;  %v9992_v18 = vld [vmem:[%s21091_s5 + $0xdf8] sm:$0xff]  ;;  %v10009_v45 = vld [vmem:[%s21091_s5 + $0xe30] sm:$0xff] }
 0x4f0   : > { %v10006_v36 = vld [vmem:[%s21091_s5 + $0xe18] sm:$0xff] }
 0x4f1   : > { %12395 = vmatpush1.bf16.msra.mxu0 %v12394_v43  ;;  %v17682_v55 = vpop.f32.mrb[30].mxu1 }
 0x4f2   : > { %12397 = vmatprep.subr.bf16.mxu0 %v12396_v9  ;;  %v4437_v0 = vpop.f32.mrb[31].mxu1  ;;  %v9977_v9 = vld [vmem:[%s21091_s5 + $0xd80] sm:$0xff] }
 0x4f5   : > { %12399 = vmatpush1.bf16.msra.mxu0 %v12398_v42  ;;  %v17696_v3 = vpop.f32.mrb[32].mxu1  ;;  %v12410_v42 = vpack.c.bf16 %v9980_v15, %v9977_v9  ;;  %v10012_v9 = vld [vmem:[%s21091_s5 + $0xe48] sm:$0xff]  ;;  %v10015_v15 = vld [vmem:[%s21091_s5 + $0xe60] sm:$0xff] }
 0x4f6   : > { %12401 = vmatprep.subr.bf16.mxu0 %v12400_v50  ;;  %v4442_v19 = vpop.f32.mrb[33].mxu1  ;;  %v12412_v50 = vpack.c.bf16 %v9987_v5, %v9984_v26  ;;  %v21133_v26 = vmov 0.0  }
 0x4f7   : > { %v12416_v19 = vpack.c.bf16 %v9993_v38, %v9990_v37  ;;  %5207 = vst.msk [vmem:[#allocation5 + $0x10] sm:$0xf] %vm5206_vm2, %v21133_v26  ;;  %5210 = vst.msk [vmem:[#allocation5 + $0x88] sm:$0xf] %vm5206_vm2, %v21133_v26 }
 0x4f9   : > { %12403 = vmatpush1.bf16.msra.mxu0 %v12402_v62  ;;  %v17710_v28 = vpop.f32.mrb[34].mxu1  ;;  %v12414_v62 = vpack.c.bf16 %v9986_v35, %v9983_v33  ;;  %v10018_v33 = vld [vmem:[%s21091_s5 + $0xe78] sm:$0xff]  ;;  %v10021_v35 = vld [vmem:[%s21091_s5 + $0xe90] sm:$0xff] }
 0x4fa   : > { %12405 = vmatprep.subr.bf16.mxu0 %v12404_v8  ;;  %v4447_v43 = vpop.f32.mrb[35].mxu1  ;;  %v9989_v8 = vld [vmem:[%s21091_s5 + $0xde0] sm:$0xff]  ;;  %v12473_v38 = vpack.c.bf16 %v10021_v35, %v10018_v33 }
 0x4fb   : > { %v12418_v23 = vpack.c.bf16 %v9992_v18, %v9989_v8  ;;  %v10005_v43 = vld [vmem:[%s21091_s5 + $0xe10] sm:$0xff]  ;;  %v10024_v8 = vld [vmem:[%s21091_s5 + $0xea8] sm:$0xff] }
 0x4fd   : > { %12407 = vmatpush1.bf16.msra.mxu0 %v12406_v10  ;;  %v17724_v61 = vpop.f32.mrb[36].mxu1  ;;  %v12465_v10 = vpack.c.bf16 %v10009_v45, %v10006_v36  ;;  %v10023_v36 = vld [vmem:[%s21091_s5 + $0xea0] sm:$0xff]  ;;  %v10026_v45 = vld [vmem:[%s21091_s5 + $0xeb8] sm:$0xff] }
 0x4fe   : > { %12409 = vmatprep.subr.bf16.mxu0 %v12408_v57  ;;  %v4452_v0 = vpop.f32.mrb[37].mxu1  ;;  %v10008_v57 = vld [vmem:[%s21091_s5 + $0xe28] sm:$0xff] }
 0x4ff   : > { %v12467_v5 = vpack.c.bf16 %v10008_v57, %v10005_v43  ;;  %v10011_v0 = vld [vmem:[%s21091_s5 + $0xe40] sm:$0xff]  ;;  %v10206_v43 = vld [vmem:[%s21093_s7 + $0x368] sm:$0xff] }
 0x500   : > { %v10209_v57 = vld [vmem:[%s21093_s7 + $0x380] sm:$0xff] }
 0x501   : > { %12411 = vmatpush1.bf16.msra.mxu0 %v12410_v42  ;;  %v12469_v42 = vpack.c.bf16 %v10015_v15, %v10012_v9  ;;  %v12479_v9 = vpack.c.bf16 %v10026_v45, %v10023_v36  ;;  %v12675_v15 = vpack.c.bf16 %v10209_v57, %v10206_v43  ;;  %v10217_v36 = vld [vmem:[%s21093_s7 + $0x3c0] sm:$0xff]  ;;  %v10220_v45 = vld [vmem:[%s21093_s7 + $0x3d8] sm:$0xff]  ;;  %v10045_v43 = vld [vmem:[%s21091_s5 + $0xf50] sm:$0xff] }
 0x502   : > { %12413 = vmatprep.subr.bf16.mxu0 %v12412_v50  ;;  %v10014_v50 = vld [vmem:[%s21091_s5 + $0xe58] sm:$0xff] }
 0x503   : > { %v12471_v37 = vpack.c.bf16 %v10014_v50, %v10011_v0  ;;  %v10215_v0 = vld [vmem:[%s21093_s7 + $0x3b0] sm:$0xff]  ;;  %12676 = vmatprep.subr.bf16.mxu1 %v12675_v15  ;;  %v21134_v57 = vld [vmem:[#allocation15_spill] sm:$0xff] }
 0x505   : > { %12415 = vmatpush1.bf16.msra.mxu0 %v12414_v62  ;;  %v10017_v62 = vld [vmem:[%s21091_s5 + $0xe70] sm:$0xff] }
 0x506   : > { %12417 = vmatprep.subr.bf16.mxu0 %v12416_v19  ;;  %v10020_v19 = vld [vmem:[%s21091_s5 + $0xe88] sm:$0xff] }
 0x509   : > { %12419 = vmatpush1.bf16.msra.mxu0 %v12418_v23  ;;  %v10030_v23 = vld [vmem:[%s21091_s5 + $0xed8] sm:$0xff] }
 0x50a   : > { %12466 = vmatprep.subr.bf16.mxu0 %v12465_v10  ;;  %v10032_v10 = vld [vmem:[%s21091_s5 + $0xee8] sm:$0xff] }
 0x50c   : > { %4334 = vmatmul.mubr.f32.vlgmr.msra.gmra.mrb[6].mxu0 %v16627_v47  ;;  %v10027_v47 = vld [vmem:[%s21091_s5 + $0xec0] sm:$0xff] }
 0x50d   : > { %9996 = vmatprep.mubr.msk.f32.mxu0 %vm2844_vm15, %v16642_v51  ;;  %12468 = vmatpush1.bf16.msra.mxu0 %v12467_v5  ;;  %v12475_v51 = vpack.c.bf16 %v10020_v19, %v10017_v62  ;;  %v12477_v18 = vpack.c.bf16 %v10027_v47, %v10024_v8  ;;  %v10208_v5 = vld [vmem:[%s21093_s7 + $0x378] sm:$0xff]  ;;  %v10039_v62 = vld [vmem:[%s21091_s5 + $0xf20] sm:$0xff]  ;;  %v10218_v19 = vld [vmem:[%s21093_s7 + $0x3c8] sm:$0xff] }
 0x50e   : > { %12470 = vmatprep.subr.bf16.mxu0 %v12469_v42  ;;  %v10212_v42 = vld [vmem:[%s21093_s7 + $0x398] sm:$0xff]  ;;  %v10221_v8 = vld [vmem:[%s21093_s7 + $0x3e0] sm:$0xff] }
 0x50f   : > { %v12679_v35 = vpack.c.bf16 %v10215_v0, %v10212_v42  ;;  %v10223_v0 = vld [vmem:[%s21093_s7 + $0x3f0] sm:$0xff] }
 0x510   : > { %4340 = vmatmul.mubr.f32.gmra.mrb[8].mxu0 %v16660_v56  ;;  %v10033_v56 = vld [vmem:[%s21091_s5 + $0xef0] sm:$0xff] }
 0x511   : > { %9997 = vmatprep.mubr.msk.f32.mxu0 %vm2844_vm15, %v16674_v27  ;;  %12472 = vmatpush1.bf16.msra.mxu0 %v12471_v37  ;;  %v10029_v27 = vld [vmem:[%s21091_s5 + $0xed0] sm:$0xff]  ;;  %v12481_v50 = vpack.c.bf16 %v10033_v56, %v10030_v23  ;;  %v12683_v23 = vpack.c.bf16 %v10221_v8, %v10218_v19  ;;  %v10224_v56 = vld [vmem:[%s21093_s7 + $0x3f8] sm:$0xff] }
 0x512   : > { %12474 = vmatprep.subr.bf16.mxu0 %v12473_v38  ;;  %v10211_v37 = vld [vmem:[%s21093_s7 + $0x390] sm:$0xff]  ;;  %v10214_v38 = vld [vmem:[%s21093_s7 + $0x3a8] sm:$0xff] }
 0x513   : > { %v12681_v47 = vpack.c.bf16 %v10214_v38, %v10211_v37  ;;  %v10233_v37 = vld [vmem:[%s21093_s7 + $0x440] sm:$0xff]  ;;  %v10048_v38 = vld [vmem:[%s21091_s5 + $0xf68] sm:$0xff] }
 0x514   : > { %4346 = vmatmul.mubr.f32.gmra.mrb[10].mxu0 %v16694_v44  ;;  %v10205_v44 = vld [vmem:[%s21093_s7 + $0x360] sm:$0xff] }
 0x515   : > { %9998 = vmatprep.mubr.msk.f32.mxu0 %vm2844_vm15, %v16711_v13  ;;  %12476 = vmatpush1.bf16.msra.mxu0 %v12475_v51  ;;  %v10036_v13 = vld [vmem:[%s21091_s5 + $0xf08] sm:$0xff]  ;;  %v12677_v33 = vpack.c.bf16 %v10208_v5, %v10205_v44  ;;  %v12483_v51 = vpack.c.bf16 %v10032_v10, %v10029_v27  ;;  %v10227_v27 = vld [vmem:[%s21093_s7 + $0x410] sm:$0xff]  ;;  %v10042_v10 = vld [vmem:[%s21091_s5 + $0xf38] sm:$0xff]  ;;  %v12685_v44 = vpack.c.bf16 %v10220_v45, %v10217_v36 }
 0x516   : > { %12478 = vmatprep.subr.bf16.mxu0 %v12477_v18  ;;  %v10035_v18 = vld [vmem:[%s21091_s5 + $0xf00] sm:$0xff]  ;;  %v10041_v5 = vld [vmem:[%s21091_s5 + $0xf30] sm:$0xff]  ;;  %v12687_v42 = vpack.c.bf16 %v10227_v27, %v10224_v56  ;;  %v10232_v36 = vld [vmem:[%s21093_s7 + $0x438] sm:$0xff] }
 0x517   : > { %12678 = vmatpush1.bf16.msra.mxu1 %v12677_v33  ;;  %v10044_v33 = vld [vmem:[%s21091_s5 + $0xf48] sm:$0xff]  ;;  %v10054_v56 = vld [vmem:[%s21091_s5 + $0xf98] sm:$0xff]  ;;  %v10057_v27 = vld [vmem:[%s21091_s5 + $0xfb0] sm:$0xff] }
 0x518   : > { %4352 = vmatmul.mubr.f32.gmra.mrb[12].mxu0 %v16729_v48  ;;  %v12485_v48 = vpack.c.bf16 %v10039_v62, %v10036_v13  ;;  %12680 = vmatprep.subr.bf16.mxu1 %v12679_v35  ;;  %v12489_v13 = vpack.c.bf16 %v10045_v43, %v10042_v10  ;;  %v10230_v35 = vld [vmem:[%s21093_s7 + $0x428] sm:$0xff]  ;;  %v10051_v62 = vld [vmem:[%s21091_s5 + $0xf80] sm:$0xff]  ;;  %v12491_v8 = vpack.c.bf16 %v10044_v33, %v10041_v5 }
 0x519   : > { %9999 = vmatprep.mubr.msk.f32.mxu0 %vm2844_vm15, %v16677_v58  ;;  %12480 = vmatpush1.bf16.msra.mxu0 %v12479_v9  ;;  %v10038_v58 = vld [vmem:[%s21091_s5 + $0xf18] sm:$0xff]  ;;  %v21135_v9 = vld [vmem:[#allocation16_spill] sm:$0xff]  ;;  %v12493_v45 = vpack.c.bf16 %v10051_v62, %v10048_v38  ;;  %v12497_v5 = vpack.c.bf16 %v10057_v27, %v10054_v56  ;;  %v10069_v27 = vld [vmem:[%s21091_s5 + $0x1010] sm:$0xff] }
 0x51a   : > { %12482 = vmatprep.subr.bf16.mxu0 %v12481_v50  ;;  %v12487_v15 = vpack.c.bf16 %v10038_v58, %v10035_v18  ;;  %v10226_v50 = vld [vmem:[%s21093_s7 + $0x408] sm:$0xff]  ;;  %v10229_v18 = vld [vmem:[%s21093_s7 + $0x420] sm:$0xff]  ;;  %v10236_v58 = vld [vmem:[%s21093_s7 + $0x458] sm:$0xff] }
 0x51b   : > { %12682 = vmatpush1.bf16.msra.mxu1 %v12681_v47  ;;  %v12689_v19 = vpack.c.bf16 %v10226_v50, %v10223_v0  ;;  %v10047_v47 = vld [vmem:[%s21091_s5 + $0xf60] sm:$0xff]  ;;  %v12693_v10 = vpack.c.bf16 %v10232_v36, %v10229_v18  ;;  %v10242_v0 = vld [vmem:[%s21093_s7 + $0x488] sm:$0xff] }
 0x51c   : > { %4358 = vmatmul.mubr.f32.gmra.mrb[14].mxu0 %v21134_v57  ;;  %12684 = vmatprep.subr.bf16.mxu1 %v12683_v23  ;;  %v10239_v23 = vld [vmem:[%s21093_s7 + $0x470] sm:$0xff]  ;;  %v10245_v50 = vld [vmem:[%s21093_s7 + $0x4a0] sm:$0xff] }
 0x51d   : > { %12484 = vmatpush1.bf16.msra.mxu0 %v12483_v51  ;;  %10095 = vmatprep.mubr.msk.f32.mxu0 %vm2844_vm15, %v21135_v9  ;;  %v12691_v51 = vpack.c.bf16 %v10233_v37, %v10230_v35  ;;  %v10053_v57 = vld [vmem:[%s21091_s5 + $0xf90] sm:$0xff]  ;;  %v10063_v33 = vld [vmem:[%s21091_s5 + $0xfe0] sm:$0xff] }
 0x51e   : > { %12486 = vmatprep.subr.bf16.mxu0 %v12485_v48  ;;  %v10050_v48 = vld [vmem:[%s21091_s5 + $0xf78] sm:$0xff]  ;;  %v10235_v9 = vld [vmem:[%s21093_s7 + $0x450] sm:$0xff]  ;;  %v10059_v62 = vld [vmem:[%s21091_s5 + $0xfc0] sm:$0xff] }
 0x51f   : > { %12686 = vmatpush1.bf16.msra.mxu1 %v12685_v44  ;;  %v12495_v43 = vpack.c.bf16 %v10050_v48, %v10047_v47  ;;  %v12695_v44 = vpack.c.bf16 %v10239_v23, %v10236_v58  ;;  %v10244_v47 = vld [vmem:[%s21093_s7 + $0x498] sm:$0xff]  ;;  %v10251_v23 = vld [vmem:[%s21093_s7 + $0x4d0] sm:$0xff] }
 0x520   : > { %12688 = vmatprep.subr.bf16.mxu1 %v12687_v42  ;;  %v10056_v42 = vld [vmem:[%s21091_s5 + $0xfa8] sm:$0xff]  ;;  %v10062_v48 = vld [vmem:[%s21091_s5 + $0xfd8] sm:$0xff] }
 0x521   : > { %12488 = vmatpush1.bf16.msra.mxu0 %v12487_v15  ;;  %v10238_v15 = vld [vmem:[%s21093_s7 + $0x468] sm:$0xff]  ;;  %v12499_v38 = vpack.c.bf16 %v10056_v42, %v10053_v57  ;;  %v10248_v58 = vld [vmem:[%s21093_s7 + $0x4b8] sm:$0xff] }
 0x522   : > { %12490 = vmatprep.subr.bf16.mxu0 %v12489_v13  ;;  %v10060_v13 = vld [vmem:[%s21091_s5 + $0xfc8] sm:$0xff]  ;;  %v12697_v35 = vpack.c.bf16 %v10238_v15, %v10235_v9  ;;  %v10065_v9 = vld [vmem:[%s21091_s5 + $0xff0] sm:$0xff]  ;;  %v12703_v15 = vpack.c.bf16 %v10251_v23, %v10248_v58  ;;  %v10253_v58 = vld [vmem:[%s21093_s7 + $0x4e0] sm:$0xff] }
 0x523   : > { %12690 = vmatpush1.bf16.msra.mxu1 %v12689_v19  ;;  %v12699_v19 = vpack.c.bf16 %v10245_v50, %v10242_v0  ;;  %v10250_v42 = vld [vmem:[%s21093_s7 + $0x4c8] sm:$0xff] }
 0x524   : > { %12692 = vmatprep.subr.bf16.mxu1 %v12691_v51 }
 0x525   : > { %12492 = vmatpush1.bf16.msra.mxu0 %v12491_v8  ;;  %v10241_v8 = vld [vmem:[%s21093_s7 + $0x480] sm:$0xff] }
 0x526   : > { %12494 = vmatprep.subr.bf16.mxu0 %v12493_v45  ;;  %v12501_v45 = vpack.c.bf16 %v10063_v33, %v10060_v13 }
 0x527   : > { %12694 = vmatpush1.bf16.msra.mxu1 %v12693_v10 }
 0x528   : > { %12696 = vmatprep.subr.bf16.mxu1 %v12695_v44  ;;  %v12503_v44 = vpack.c.bf16 %v10062_v48, %v10059_v62 }
 0x529   : > { %12496 = vmatpush1.bf16.msra.mxu0 %v12495_v43  ;;  %v3449_v37 = vpop.f32.mrb[26].mxu0  ;;  %v12701_v43 = vpack.c.bf16 %v10244_v47, %v10241_v8 }
 0x52a   : > { %v3450_v51 = vadd.f32 %v3449_v37, %v17453_v31  ;;  %v4782_v18 = vpop.f32.mrb[38].mxu1  ;;  %v3451_v36 = vpop.f32.mrb[27].mxu0  ;;  %12498 = vmatprep.subr.bf16.mxu0 %v12497_v5  ;;  %v10066_v31 = vld [vmem:[%s21091_s5 + $0xff8] sm:$0xff]  ;;  %v10247_v5 = vld [vmem:[%s21093_s7 + $0x4b0] sm:$0xff]  ;;  %v10254_v37 = vld [vmem:[%s21093_s7 + $0x4e8] sm:$0xff] }
 0x52b   : > { %v4784_v56 = vpop.f32.mrb[39].mxu1  ;;  %12698 = vmatpush1.bf16.msra.mxu1 %v12697_v35  ;;  %v12505_v33 = vpack.c.bf16 %v10069_v27, %v10066_v31  ;;  %v10068_v35 = vld [vmem:[%s21091_s5 + $0x1008] sm:$0xff]  ;;  %v12705_v47 = vpack.c.bf16 %v10250_v42, %v10247_v5 }
 0x52c   : > { %v3792_v10 = vadd.f32 %v17156_v63, %v3450_v51  ;;  %12700 = vmatprep.subr.bf16.mxu1 %v12699_v19  ;;  %v12507_v36 = vpack.c.bf16 %v10068_v35, %v10065_v9 }
 0x52d   : > { %12500 = vmatpush1.bf16.msra.mxu0 %v12499_v38  ;;  %v3454_v57 = vpop.f32.mrb[28].mxu0  ;;  %v10257_v38 = vld [vmem:[%s21093_s7 + $0x500] sm:$0xff] }
 0x52e   : > { %v4124_v63 = vadd.f32 %v17455_v20, %v3792_v10  ;;  %v3455_v0 = vadd.f32 %v3454_v57, %v17469_v4  ;;  %v4787_v50 = vpop.f32.mrb[40].mxu1  ;;  %v3456_v13 = vpop.f32.mrb[29].mxu0  ;;  %12502 = vmatprep.subr.bf16.mxu0 %v12501_v45  ;;  %v10072_v20 = vld [vmem:[%s21091_s5 + $0x1028] sm:$0xff]  ;;  %v10075_v4 = vld [vmem:[%s21091_s5 + $0x1040] sm:$0xff]  ;;  %v12707_v48 = vpack.c.bf16 %v10257_v38, %v10254_v37  ;;  %v10260_v57 = vld [vmem:[%s21093_s7 + $0x518] sm:$0xff] }
 0x52f   : > { %v4789_v62 = vpop.f32.mrb[41].mxu1  ;;  %12702 = vmatpush1.bf16.msra.mxu1 %v12701_v43  ;;  %v10071_v45 = vld [vmem:[%s21091_s5 + $0x1020] sm:$0xff]  ;;  %v12509_v10 = vpack.c.bf16 %v10075_v4, %v10072_v20  ;;  %v10074_v43 = vld [vmem:[%s21091_s5 + $0x1038] sm:$0xff]  ;;  %v10259_v13 = vld [vmem:[%s21093_s7 + $0x510] sm:$0xff] }
 0x530   : > { %v4456_v19 = vadd.f32 %v17668_v46, %v4124_v63  ;;  %v3795_v8 = vadd.f32 %v17177_v49, %v3455_v0  ;;  %12704 = vmatprep.subr.bf16.mxu1 %v12703_v15  ;;  %v10256_v46 = vld [vmem:[%s21093_s7 + $0x4f8] sm:$0xff]  ;;  %v12511_v63 = vpack.c.bf16 %v10074_v43, %v10071_v45  ;;  %v10077_v20 = vld [vmem:[%s21091_s5 + $0x1050] sm:$0xff]  ;;  %v10080_v4 = vld [vmem:[%s21091_s5 + $0x1068] sm:$0xff] }
 0x531   : > { %12504 = vmatpush1.bf16.msra.mxu0 %v12503_v44  ;;  %v3459_v51 = vpop.f32.mrb[30].mxu0  ;;  %v12709_v5 = vpack.c.bf16 %v10256_v46, %v10253_v58 }
 0x532   : > { %v18016_v49 = vadd.f32 %v4782_v18, %v4456_v19  ;;  %v4127_v23 = vadd.f32 %v17471_v59, %v3795_v8  ;;  %v3460_v56 = vadd.f32 %v3459_v51, %v17485_v30  ;;  %v4792_v31 = vpop.f32.mrb[42].mxu1  ;;  %v3461_v27 = vpop.f32.mrb[31].mxu0  ;;  %12506 = vmatprep.subr.bf16.mxu0 %v12505_v33  ;;  %v10263_v18 = vld [vmem:[%s21093_s7 + $0x530] sm:$0xff]  ;;  %v10078_v59 = vld [vmem:[%s21091_s5 + $0x1058] sm:$0xff]  ;;  %v10262_v33 = vld [vmem:[%s21093_s7 + $0x528] sm:$0xff] }
 0x533   : > { %v4794_v44 = vpop.f32.mrb[43].mxu1  ;;  %v10081_v30 = vld [vmem:[%s21091_s5 + $0x1070] sm:$0xff]  ;;  %12706 = vmatpush1.bf16.msra.mxu1 %v12705_v47  ;;  %v12711_v0 = vpack.c.bf16 %v10263_v18, %v10260_v57  ;;  %v12713_v47 = vpack.c.bf16 %v10262_v33, %v10259_v13 }
 0x534   : > { %v4459_v9 = vadd.f32 %v17682_v55, %v4127_v23  ;;  %v3798_v15 = vadd.f32 %v17198_v32, %v3460_v56  ;;  %12708 = vmatprep.subr.bf16.mxu1 %v12707_v48  ;;  %v12513_v62 = vpack.c.bf16 %v10081_v30, %v10078_v59  ;;  %v10089_v59 = vld [vmem:[%s21091_s5 + $0x10b0] sm:$0xff]  ;;  %v10092_v30 = vld [vmem:[%s21091_s5 + $0x10c8] sm:$0xff] }
 0x535   : > { %12508 = vmatpush1.bf16.msra.mxu0 %v12507_v36  ;;  %v3464_v42 = vpop.f32.mrb[32].mxu0  ;;  %v12515_v36 = vpack.c.bf16 %v10080_v4, %v10077_v20  ;;  %v21137_v20 = vld [vmem:[#allocation18_spill] sm:$0xff] }
 0x536   : > { %v18043_v35 = vadd.f32 %v4787_v50, %v4459_v9  ;;  %v4130_v55 = vadd.f32 %v17487_v6, %v3798_v15  ;;  %v3465_v32 = vadd.f32 %v3464_v42, %v17501_v54  ;;  %v4797_v37 = vpop.f32.mrb[44].mxu1  ;;  %v3466_v38 = vpop.f32.mrb[33].mxu0  ;;  %12510 = vmatprep.subr.bf16.mxu0 %v12509_v10  ;;  %v10084_v50 = vld [vmem:[%s21091_s5 + $0x1088] sm:$0xff]  ;;  %v10087_v6 = vld [vmem:[%s21091_s5 + $0x10a0] sm:$0xff]  ;;  %v12523_v9 = vpack.c.bf16 %v10092_v30, %v10089_v59 }
 0x537   : > { %v4799_v19 = vpop.f32.mrb[45].mxu1  ;;  %12710 = vmatpush1.bf16.msra.mxu1 %v12709_v5  ;;  %v12517_v56 = vpack.c.bf16 %v10087_v6, %v10084_v50  ;;  %v10105_v42 = vld [vmem:[%s21091_s5 + $0x10e0] sm:$0xff]  ;;  %v10120_v6 = vld [vmem:[%s21091_s5 + $0x1158] sm:$0xff]  ;;  %v10142_v59 = vld [vmem:[%s21091_s5 + $0x1208] sm:$0xff] }
 0x538   : > { %v4462_v54 = vadd.f32 %v17696_v3, %v4130_v55  ;;  %v3801_v8 = vadd.f32 %v17219_v21, %v3465_v32  ;;  %12712 = vmatprep.subr.bf16.mxu1 %v12711_v0  ;;  %v10083_v21 = vld [vmem:[%s21091_s5 + $0x1080] sm:$0xff]  ;;  %v10086_v3 = vld [vmem:[%s21091_s5 + $0x1098] sm:$0xff]  ;;  %v10111_v55 = vld [vmem:[%s21091_s5 + $0x1110] sm:$0xff] }
 0x539   : > { %12512 = vmatpush1.bf16.msra.mxu0 %v12511_v63  ;;  %v3469_v51 = vpop.f32.mrb[34].mxu0  ;;  %v12519_v43 = vpack.c.bf16 %v10086_v3, %v10083_v21  ;;  %v10108_v63 = vld [vmem:[%s21091_s5 + $0x10f8] sm:$0xff]  ;;  %v10114_v32 = vld [vmem:[%s21091_s5 + $0x1128] sm:$0xff]  ;;  %v10121_v38 = vld [vmem:[%s21091_s5 + $0x1160] sm:$0xff] }
 0x53a   : > { %v18061_v45 = vadd.f32 %v4792_v31, %v4462_v54  ;;  %v4133_v48 = vadd.f32 %v17503_v24, %v3801_v8  ;;  %v3470_v58 = vadd.f32 %v3469_v51, %v17517_v1  ;;  %v4802_v46 = vpop.f32.mrb[46].mxu1  ;;  %v3471_v23 = vpop.f32.mrb[35].mxu0  ;;  %12514 = vmatprep.subr.bf16.mxu0 %v12513_v62  ;;  %v10090_v31 = vld [vmem:[%s21091_s5 + $0x10b8] sm:$0xff]  ;;  %v10093_v24 = vld [vmem:[%s21091_s5 + $0x10d0] sm:$0xff]  ;;  %v12572_v13 = vpack.c.bf16 %v10108_v63, %v10105_v42  ;;  %v21136_v62 = vld [vmem:[#allocation17_spill] sm:$0xff] }
 0x53b   : > { %v4804_v27 = vpop.f32.mrb[47].mxu1  ;;  %12714 = vmatpush1.bf16.msra.mxu1 %v12713_v47  ;;  %v12521_v44 = vpack.c.bf16 %v10093_v24, %v10090_v31  ;;  %v10112_v0 = vld [vmem:[%s21091_s5 + $0x1118] sm:$0xff]  ;;  %v12576_v4 = vpack.c.bf16 %v10114_v32, %v10111_v55  ;;  %v10117_v50 = vld [vmem:[%s21091_s5 + $0x1140] sm:$0xff]  ;;  %v10127_v8 = vld [vmem:[%s21091_s5 + $0x1190] sm:$0xff] }
 0x53c   : > { %v4465_v1 = vadd.f32 %v17710_v28, %v4133_v48  ;;  %v3804_v10 = vadd.f32 %v17240_v11, %v3470_v58  ;;  %v10106_v11 = vld [vmem:[%s21091_s5 + $0x10e8] sm:$0xff]  ;;  %v10109_v28 = vld [vmem:[%s21091_s5 + $0x1100] sm:$0xff]  ;;  %v10124_v54 = vld [vmem:[%s21091_s5 + $0x1178] sm:$0xff] }
 0x53d   : > { %12516 = vmatpush1.bf16.msra.mxu0 %v12515_v36  ;;  %v12570_v5 = vpack.c.bf16 %v10109_v28, %v10106_v11  ;;  %v21138_v47 = vld [vmem:[#allocation19_spill] sm:$0xff]  ;;  %v21139_v51 = vld [vmem:[#allocation20_spill] sm:$0xff]  ;;  %v12580_v36 = vpack.c.bf16 %v10120_v6, %v10117_v50  ;;  %v12582_v48 = vpack.c.bf16 %v10127_v8, %v10124_v54  ;;  %v10123_v58 = vld [vmem:[%s21091_s5 + $0x1170] sm:$0xff] }
 0x53e   : > { %v18079_v57 = vadd.f32 %v4797_v37, %v4465_v1  ;;  %v4136_v18 = vadd.f32 %v17519_v53, %v3804_v10  ;;  %12518 = vmatprep.subr.bf16.mxu0 %v12517_v56  ;;  %v10118_v37 = vld [vmem:[%s21091_s5 + $0x1148] sm:$0xff]  ;;  %v10133_v56 = vld [vmem:[%s21091_s5 + $0x11c0] sm:$0xff]  ;;  %v10132_v24 = vld [vmem:[%s21091_s5 + $0x11b8] sm:$0xff] }
 0x53f   : > { %v12578_v19 = vpack.c.bf16 %v10121_v38, %v10118_v37  ;;  %v10130_v23 = vld [vmem:[%s21091_s5 + $0x11a8] sm:$0xff]  ;;  %v10129_v31 = vld [vmem:[%s21091_s5 + $0x11a0] sm:$0xff]  ;;  %v10136_v1 = vld [vmem:[%s21091_s5 + $0x11d8] sm:$0xff] }
 0x540   : > { %v4468_v53 = vadd.f32 %v17724_v61, %v4136_v18  ;;  %v10115_v61 = vld [vmem:[%s21091_s5 + $0x1130] sm:$0xff]  ;;  %v21140_v21 = vld [vmem:[#allocation21_spill] sm:$0xff]  ;;  %v12586_v27 = vpack.c.bf16 %v10133_v56, %v10130_v23  ;;  %v12588_v10 = vpack.c.bf16 %v10132_v24, %v10129_v31  ;;  %v10141_v11 = vld [vmem:[%s21091_s5 + $0x1200] sm:$0xff] }
 0x541   : > { %12520 = vmatpush1.bf16.msra.mxu0 %v12519_v43  ;;  %v12574_v33 = vpack.c.bf16 %v10115_v61, %v10112_v0  ;;  %v10135_v18 = vld [vmem:[%s21091_s5 + $0x11d0] sm:$0xff]  ;;  %v10144_v28 = vld [vmem:[%s21091_s5 + $0x1218] sm:$0xff]  ;;  %v10150_v42 = vld [vmem:[%s21091_s5 + $0x1248] sm:$0xff] }
 0x542   : > { %v18095_v15 = vadd.f32 %v4802_v46, %v4468_v53  ;;  %12522 = vmatprep.subr.bf16.mxu0 %v12521_v44  ;;  %v10126_v46 = vld [vmem:[%s21091_s5 + $0x1188] sm:$0xff]  ;;  %v10148_v53 = vld [vmem:[%s21091_s5 + $0x1238] sm:$0xff]  ;;  %v10157_v0 = vld [vmem:[%s21091_s5 + $0x1280] sm:$0xff] }
 0x543   : > { %v12584_v3 = vpack.c.bf16 %v10126_v46, %v10123_v58  ;;  %v10138_v44 = vld [vmem:[%s21091_s5 + $0x11e8] sm:$0xff]  ;;  %v10153_v32 = vld [vmem:[%s21091_s5 + $0x1260] sm:$0xff]  ;;  %v10156_v37 = vld [vmem:[%s21091_s5 + $0x1278] sm:$0xff] }
 0x544   : > { %v10154_v63 = vld [vmem:[%s21091_s5 + $0x1268] sm:$0xff]  ;;  %v18218_v38 = vld [vmem:[%s21092_s6] sm:$0x7]  ;;  %v10159_v6 = vld [vmem:[%s21091_s5 + $0x1290] sm:$0xff] }
 0x545   : > { %12524 = vmatpush1.bf16.msra.mxu0 %v12523_v9  ;;  %v12602_v55 = vpack.c.bf16 %v10157_v0, %v10154_v63  ;;  %v10162_v54 = vld [vmem:[%s21091_s5 + $0x12a8] sm:$0xff]  ;;  %v10165_v56 = vld [vmem:[%s21091_s5 + $0x12c0] sm:$0xff]  ;;  %v10187_v0 = vld [vmem:[%s21091_s5 + $0x1370] sm:$0xff] }
 0x546   : > { %12571 = vmatprep.subr.bf16.mxu0 %v12570_v5  ;;  %v10147_v5 = vld [vmem:[%s21091_s5 + $0x1230] sm:$0xff]  ;;  %v12608_v58 = vpack.c.bf16 %v10162_v54, %v10159_v6  ;;  %v10186_v54 = vld [vmem:[%s21091_s5 + $0x1368] sm:$0xff] }
 0x547   : > { %v12600_v61 = vpack.c.bf16 %v10150_v42, %v10147_v5  ;;  %v10177_v5 = vld [vmem:[%s21091_s5 + $0x1320] sm:$0xff]  ;;  %v10180_v42 = vld [vmem:[%s21091_s5 + $0x1338] sm:$0xff]  ;;  %v10183_v6 = vld [vmem:[%s21091_s5 + $0x1350] sm:$0xff] }
 0x548   : > { %4686 = vmatmul.mubr.f32.vlgmr.msra.gmra.mrb[6].mxu0 %v21136_v62  ;;  %v10160_v62 = vld [vmem:[%s21091_s5 + $0x1298] sm:$0xff] }
 0x549   : > { %10096 = vmatprep.mubr.msk.f32.mxu0 %vm2844_vm15, %v21137_v20  ;;  %12573 = vmatpush1.bf16.msra.mxu0 %v12572_v13  ;;  %v21141_v13 = vld [vmem:[#allocation12_spill] sm:$0xff]  ;;  %v10163_v20 = vld [vmem:[%s21091_s5 + $0x12b0] sm:$0xff] }
 0x54a   : > { %12575 = vmatprep.subr.bf16.mxu0 %v12574_v33  ;;  %v5169_v33 = vsub.s32 2, %v21141_v13  ;;  %v12606_v50 = vpack.c.bf16 %v10163_v20, %v10160_v62  ;;  %v12620_v62 = vpack.c.bf16 %v10180_v42, %v10177_v5  ;;  %v10273_v5 = vld [vmem:[%s21093_s7 + $0x580] sm:$0xff]  ;;  %v10708_v13 = vld [vmem:[%s21095_s9 + $0x1e8] sm:$0xff] }
 0x54c   : > { %4692 = vmatmul.mubr.f32.gmra.mrb[8].mxu0 %v21138_v47  ;;  %v10166_v47 = vld [vmem:[%s21091_s5 + $0x12c8] sm:$0xff] }
 0x54d   : > { %10097 = vmatprep.mubr.msk.f32.mxu0 %vm2844_vm15, %v21139_v51  ;;  %12577 = vmatpush1.bf16.msra.mxu0 %v12576_v4  ;;  %v12604_v4 = vpack.c.bf16 %v10156_v37, %v10153_v32  ;;  %v10169_v51 = vld [vmem:[%s21091_s5 + $0x12e0] sm:$0xff] }
 0x54e   : > { %12579 = vmatprep.subr.bf16.mxu0 %v12578_v19  ;;  %v18229_v19 = vrot.slane %v18218_v38, %v5169_v33  ;;  %v12610_v23 = vpack.c.bf16 %v10169_v51, %v10166_v47  ;;  %v10193_v47 = vld [vmem:[%s21091_s5 + $0x13a0] sm:$0xff] }
 0x550   : > { %4698 = vmatmul.mubr.f32.gmra.mrb[10].mxu0 %v21140_v21  ;;  %v10168_v21 = vld [vmem:[%s21091_s5 + $0x12d8] sm:$0xff] }
 0x551   : > { %10098 = vmatprep.mubr.msk.f32.mxu0 %vm2844_vm15, %v17030_v39  ;;  %12581 = vmatpush1.bf16.msra.mxu0 %v12580_v36  ;;  %v10139_v39 = vld [vmem:[%s21091_s5 + $0x11f0] sm:$0xff] }
 0x552   : > { %12583 = vmatprep.subr.bf16.mxu0 %v12582_v48  ;;  %v12590_v43 = vpack.c.bf16 %v10139_v39, %v10136_v1  ;;  %v12612_v39 = vpack.c.bf16 %v10168_v21, %v10165_v56 }
 0x554   : > { %4704 = vmatmul.mubr.f32.gmra.mrb[12].mxu0 %v17045_v14  ;;  %v10145_v14 = vld [vmem:[%s21091_s5 + $0x1220] sm:$0xff] }
 0x555   : > { %10099 = vmatprep.mubr.msk.f32.mxu0 %vm2844_vm15, %v17061_v40  ;;  %12585 = vmatpush1.bf16.msra.mxu0 %v12584_v3  ;;  %v12592_v40 = vpack.c.bf16 %v10138_v44, %v10135_v18  ;;  %v12594_v30 = vpack.c.bf16 %v10145_v14, %v10142_v59  ;;  %v10171_v44 = vld [vmem:[%s21091_s5 + $0x12f0] sm:$0xff]  ;;  %v10174_v59 = vld [vmem:[%s21091_s5 + $0x1308] sm:$0xff] }
 0x556   : > { %12587 = vmatprep.subr.bf16.mxu0 %v12586_v27  ;;  %v10175_v27 = vld [vmem:[%s21091_s5 + $0x1310] sm:$0xff] }
 0x558   : > { %4710 = vmatmul.mubr.f32.gmra.mrb[14].mxu0 %v17077_v60  ;;  %v10151_v60 = vld [vmem:[%s21091_s5 + $0x1250] sm:$0xff] }
 0x559   : > { %12589 = vmatpush1.bf16.msra.mxu0 %v12588_v10  ;;  %10195 = vmatprep.mubr.msk.f32.mxu0 %vm2844_vm15, %v17095_v16  ;;  %v12596_v16 = vpack.c.bf16 %v10144_v28, %v10141_v11  ;;  %v12598_v9 = vpack.c.bf16 %v10151_v60, %v10148_v53  ;;  %v12616_v53 = vpack.c.bf16 %v10174_v59, %v10171_v44  ;;  %v10264_v44 = vld [vmem:[%s21093_s7 + $0x538] sm:$0xff] }
 0x55a   : > { %12591 = vmatprep.subr.bf16.mxu0 %v12590_v43 }
 0x55d   : > { %12593 = vmatpush1.bf16.msra.mxu0 %v12592_v40  ;;  %v10181_v40 = vld [vmem:[%s21091_s5 + $0x1340] sm:$0xff] }
 0x55e   : > { %12595 = vmatprep.subr.bf16.mxu0 %v12594_v30 }
 0x561   : > { %12597 = vmatpush1.bf16.msra.mxu0 %v12596_v16 }
 0x562   : > { %12599 = vmatprep.subr.bf16.mxu0 %v12598_v9 }
 0x565   : > { %12601 = vmatpush1.bf16.msra.mxu0 %v12600_v61 }
 0x566   : > { %12603 = vmatprep.subr.bf16.mxu0 %v12602_v55 }
 0x567   : > { %v5118_v8 = vpop.f32.mrb[48].mxu1 }
 0x568   : > { %v5144_v36 = vadd.f32 %v5118_v8, %v18016_v49  ;;  %v5120_v48 = vpop.f32.mrb[49].mxu1  ;;  %v10172_v49 = vld [vmem:[%s21091_s5 + $0x12f8] sm:$0xff] }
 0x569   : > { %12605 = vmatpush1.bf16.msra.mxu0 %v12604_v4  ;;  %v12614_v18 = vpack.c.bf16 %v10175_v27, %v10172_v49  ;;  %v10192_v49 = vld [vmem:[%s21091_s5 + $0x1398] sm:$0xff]  ;;  %v10258_v27 = vld [vmem:[%s21093_s7 + $0x508] sm:$0xff] }
 0x56a   : > { %v5176_v46 = vadd.f32 %v18229_v19, %v5144_v36  ;;  %12607 = vmatprep.subr.bf16.mxu0 %v12606_v50 }
 0x56b   : > { %v5123_v3 = vpop.f32.mrb[50].mxu1 }
 0x56c   : > { %v5191_v31 = vmax.f32 %v5176_v46, 0.0  ;;  %v5147_v24 = vadd.f32 %v5123_v3, %v18043_v35  ;;  %v5125_v1 = vpop.f32.mrb[51].mxu1  ;;  %v10178_v35 = vld [vmem:[%s21091_s5 + $0x1328] sm:$0xff]  ;;  %v12624_v46 = vpack.c.bf16 %v10186_v54, %v10183_v6  ;;  %v10189_v3 = vld [vmem:[%s21091_s5 + $0x1380] sm:$0xff] }
 0x56d   : > { %12609 = vmatpush1.bf16.msra.mxu0 %v12608_v58  ;;  %v12618_v9 = vpack.c.bf16 %v10181_v40, %v10178_v35  ;;  %v10213_v40 = vld [vmem:[%s21093_s7 + $0x3a0] sm:$0xff]  ;;  %v10282_v54 = vld [vmem:[%s21093_s7 + $0x5c8] sm:$0xff] }
 0x56e   : > { %v5228_v10 = vrot.slane %v5191_v31, 4  ;;  %v5179_v43 = vadd.f32 %v18229_v19, %v5147_v24  ;;  %12611 = vmatprep.subr.bf16.mxu0 %v12610_v23  ;;  %v12628_v24 = vpack.c.bf16 %v10192_v49, %v10189_v3  ;;  %v10288_v3 = vld [vmem:[%s21093_s7 + $0x5f8] sm:$0xff]  ;;  %v10283_v49 = vld [vmem:[%s21093_s7 + $0x5d0] sm:$0xff] }
 0x56f   : > { %v5128_v14 = vpop.f32.mrb[52].mxu1 }
 0x570   : > { %5271 = vst.msk [vmem:[#allocation5 + $0x10] sm:$0xf0] %vm5270_vm3, %v5228_v10  ;;  %v5194_v30 = vmax.f32 %v5179_v43, 0.0  ;;  %v5150_v11 = vadd.f32 %v5128_v14, %v18061_v45  ;;  %v5130_v28 = vpop.f32.mrb[53].mxu1  ;;  %v10184_v45 = vld [vmem:[%s21091_s5 + $0x1358] sm:$0xff]  ;;  %v10210_v43 = vld [vmem:[%s21093_s7 + $0x388] sm:$0xff] }
 0x571   : > { %12613 = vmatpush1.bf16.msra.mxu0 %v12612_v39  ;;  %v12622_v50 = vpack.c.bf16 %v10187_v0, %v10184_v45  ;;  %v10219_v28 = vld [vmem:[%s21093_s7 + $0x3d0] sm:$0xff]  ;;  %v10274_v0 = vld [vmem:[%s21093_s7 + $0x588] sm:$0xff] }
 0x572   : > { %v5233_v60 = vrot.slane %v5194_v30, 4  ;;  %v5182_v16 = vadd.f32 %v18229_v19, %v5150_v11  ;;  %12615 = vmatprep.subr.bf16.mxu0 %v12614_v18  ;;  %v10261_v18 = vld [vmem:[%s21093_s7 + $0x520] sm:$0xff]  ;;  %v10216_v30 = vld [vmem:[%s21093_s7 + $0x3b8] sm:$0xff]  ;;  %v10271_v45 = vld [vmem:[%s21093_s7 + $0x570] sm:$0xff] }
 0x573   : > { %v5133_v63 = vpop.f32.mrb[54].mxu1  ;;  %v12751_v35 = vpack.c.bf16 %v10264_v44, %v10261_v18  ;;  %v12753_v11 = vpack.c.bf16 %v10216_v30, %v10213_v40  ;;  %v10294_v44 = vld [vmem:[%s21093_s7 + $0x628] sm:$0xff]  ;;  %v10243_v30 = vld [vmem:[%s21093_s7 + $0x490] sm:$0xff] }
 0x574   : > { %v5234_v61 = vsel %vm2273_vm8, %v5228_v10, %v5233_v60  ;;  %v5197_v55 = vmax.f32 %v5182_v16, 0.0  ;;  %v5153_v32 = vadd.f32 %v5133_v63, %v18079_v57  ;;  %v5135_v37 = vpop.f32.mrb[55].mxu1  ;;  %v10190_v57 = vld [vmem:[%s21091_s5 + $0x1388] sm:$0xff]  ;;  %v10207_v10 = vld [vmem:[%s21093_s7 + $0x370] sm:$0xff]  ;;  %v10272_v16 = vld [vmem:[%s21093_s7 + $0x578] sm:$0xff] }
 0x575   : > { %5275 = vst.msk [vmem:[#allocation5 + $0x28] sm:$0xff] %vm5274_vm4, %v5234_v61  ;;  %12617 = vmatpush1.bf16.msra.mxu0 %v12616_v53  ;;  %v12626_v21 = vpack.c.bf16 %v10193_v47, %v10190_v57  ;;  %v12749_v14 = vpack.c.bf16 %v10210_v43, %v10207_v10  ;;  %v10222_v53 = vld [vmem:[%s21093_s7 + $0x3e8] sm:$0xff]  ;;  %v10276_v63 = vld [vmem:[%s21093_s7 + $0x598] sm:$0xff]  ;;  %v10293_v10 = vld [vmem:[%s21093_s7 + $0x620] sm:$0xff] }
 0x576   : > { %v5239_v20 = vrot.slane %v5197_v55, 4  ;;  %v5185_v4 = vadd.f32 %v18229_v19, %v5153_v32  ;;  %12619 = vmatprep.subr.bf16.mxu0 %v12618_v9  ;;  %v10275_v9 = vld [vmem:[%s21093_s7 + $0x590] sm:$0xff]  ;;  %v12759_v61 = vpack.c.bf16 %v10276_v63, %v10273_v5  ;;  %v12721_v55 = vpack.c.bf16 %v10274_v0, %v10271_v45  ;;  %v10225_v32 = vld [vmem:[%s21093_s7 + $0x400] sm:$0xff]  ;;  %v10228_v37 = vld [vmem:[%s21093_s7 + $0x418] sm:$0xff] }
 0x577   : > { %v5138_v8 = vpop.f32.mrb[56].mxu1  ;;  %v12719_v42 = vpack.c.bf16 %v10275_v9, %v10272_v16  ;;  %v10280_v57 = vld [vmem:[%s21093_s7 + $0x5b8] sm:$0xff]  ;;  %v10291_v43 = vld [vmem:[%s21093_s7 + $0x610] sm:$0xff]  ;;  %v10302_v16 = vld [vmem:[%s21093_s7 + $0x668] sm:$0xff] }
 0x578   : > { %v5240_v51 = vsel %vm2273_vm8, %v5233_v60, %v5239_v20  ;;  %v5200_v36 = vmax.f32 %v5185_v4, 0.0  ;;  %v5156_v48 = vadd.f32 %v5138_v8, %v18095_v15  ;;  %v5140_v58 = vpop.f32.mrb[57].mxu1  ;;  %v10255_v15 = vld [vmem:[%s21093_s7 + $0x4f0] sm:$0xff]  ;;  %v12757_v60 = vpack.c.bf16 %v10222_v53, %v10219_v28  ;;  %v10281_v4 = vld [vmem:[%s21093_s7 + $0x5c0] sm:$0xff]  ;;  %v21142_v63 = vld [vmem:[#allocation13_spill] sm:$0xff] }
 0x579   : > { %5278 = vst.msk [vmem:[#allocation5 + $0x40] sm:$0xff] %vm5274_vm4, %v5240_v51  ;;  %12621 = vmatpush1.bf16.msra.mxu0 %v12620_v62  ;;  %v12747_v39 = vpack.c.bf16 %v10258_v27, %v10255_v15  ;;  %v12761_v62 = vpack.c.bf16 %v10228_v37, %v10225_v32  ;;  %v10277_v8 = vld [vmem:[%s21093_s7 + $0x5a0] sm:$0xff]  ;;  %v10286_v15 = vld [vmem:[%s21093_s7 + $0x5e8] sm:$0xff]  ;;  %v5162_v45 = vrot.slane %v18218_v38, %v21142_v63  ;;  %v21143_v0 = vld [vmem:[#allocation14_spill] sm:$0xff] }
 0x57a   : > { %v5245_v23 = vrot.slane %v5200_v36, 4  ;;  %v5188_v56 = vadd.f32 %v18229_v19, %v5156_v48  ;;  %12623 = vmatprep.subr.bf16.mxu0 %v12622_v50  ;;  %v10279_v50 = vld [vmem:[%s21093_s7 + $0x5b0] sm:$0xff]  ;;  %v12725_v51 = vpack.c.bf16 %v10280_v57, %v10277_v8  ;;  %v10234_v48 = vld [vmem:[%s21093_s7 + $0x448] sm:$0xff]  ;;  %v10249_v28 = vld [vmem:[%s21093_s7 + $0x4c0] sm:$0xff] }
 0x57b   : > { %v12763_v47 = vpack.c.bf16 %v10282_v54, %v10279_v50  ;;  %v10231_v36 = vld [vmem:[%s21093_s7 + $0x430] sm:$0xff]  ;;  %v10305_v9 = vld [vmem:[%s21093_s7 + $0x680] sm:$0xff] }
 0x57c   : > { %v5246_v19 = vsel %vm2273_vm8, %v5239_v20, %v5245_v23  ;;  %v5203_v31 = vmax.f32 %v5188_v56, 0.0  ;;  %v10278_v20 = vld [vmem:[%s21093_s7 + $0x5a8] sm:$0xff]  ;;  %v12765_v58 = vpack.c.bf16 %v10234_v48, %v10231_v36  ;;  %v10285_v56 = vld [vmem:[%s21093_s7 + $0x5e0] sm:$0xff] }
 0x57d   : > { %5281 = vst.msk [vmem:[#allocation5 + $0x58] sm:$0xff] %vm5274_vm4, %v5246_v19  ;;  %12625 = vmatpush1.bf16.msra.mxu0 %v12624_v46  ;;  %v12723_v6 = vpack.c.bf16 %v10281_v4, %v10278_v20  ;;  %v10284_v46 = vld [vmem:[%s21093_s7 + $0x5d8] sm:$0xff]  ;;  %v12767_v27 = vpack.c.bf16 %v10288_v3, %v10285_v56  ;;  %v12729_v19 = vpack.c.bf16 %v10286_v15, %v10283_v49 }
 0x57e   : > { %v5251_v1 = vrot.slane %v5203_v31, 4  ;;  %12627 = vmatprep.subr.bf16.mxu0 %v12626_v21  ;;  %v10237_v31 = vld [vmem:[%s21093_s7 + $0x460] sm:$0xff]  ;;  %v10304_v15 = vld [vmem:[%s21093_s7 + $0x678] sm:$0xff] }
 0x580   : > { %v5252_v59 = vsel %vm2273_vm8, %v5245_v23, %v5251_v1  ;;  %v10287_v23 = vld [vmem:[%s21093_s7 + $0x5f0] sm:$0xff] }
 0x581   : > { %5284 = vst.msk [vmem:[#allocation5 + $0x70] sm:$0xff] %vm5274_vm4, %v5252_v59  ;;  %12629 = vmatpush1.bf16.msra.mxu0 %v12628_v24  ;;  %v12727_v21 = vpack.c.bf16 %v10287_v23, %v10284_v46  ;;  %v10240_v24 = vld [vmem:[%s21093_s7 + $0x478] sm:$0xff]  ;;  %v10289_v59 = vld [vmem:[%s21093_s7 + $0x600] sm:$0xff] }
 0x582   : > { %12748 = vmatprep.subr.bf16.mxu0 %v12747_v39  ;;  %v12769_v1 = vpack.c.bf16 %v10240_v24, %v10237_v31  ;;  %v10290_v39 = vld [vmem:[%s21093_s7 + $0x608] sm:$0xff] }
 0x583   : > { %v12731_v18 = vpack.c.bf16 %v10293_v10, %v10290_v39  ;;  %v18529_v39 = vld [vmem:[%s21093_s7 + $0x670] sm:$0xff]  ;;  %v18534_v10 = vld [vmem:[%s21093_s7 + $0x688] sm:$0xff] }
 0x584   : > { %5022 = vmatmul.mubr.f32.vlgmr.msra.gmra.mrb[6].mxu0 %v17303_v17  ;;  %v10266_v17 = vld [vmem:[%s21093_s7 + $0x548] sm:$0xff] }
 0x585   : > { %10196 = vmatprep.mubr.msk.f32.mxu0 %vm2844_vm15, %v17318_v41  ;;  %12750 = vmatpush3.bf16.msra.mxu0 %v12749_v14  ;;  %v10269_v41 = vld [vmem:[%s21093_s7 + $0x560] sm:$0xff]  ;;  %v10292_v14 = vld [vmem:[%s21093_s7 + $0x618] sm:$0xff] }
 0x586   : > { %12752 = vmatprep.subr.bf16.mxu0 %v12751_v35  ;;  %v12771_v35 = vpack.c.bf16 %v10294_v44, %v10291_v43  ;;  %v12733_v40 = vpack.c.bf16 %v10292_v14, %v10289_v59 }
 0x588   : > { %5028 = vmatmul.mubr.f32.gmra.mrb[8].mxu0 %v17331_v29  ;;  %v10267_v29 = vld [vmem:[%s21093_s7 + $0x550] sm:$0xff] }
 0x589   : > { %10197 = vmatprep.mubr.msk.f32.mxu0 %vm2844_vm15, %v17344_v52  ;;  %12754 = vmatpush3.bf16.msra.mxu0 %v12753_v11  ;;  %v12715_v52 = vpack.c.bf16 %v10269_v41, %v10266_v17  ;;  %v10246_v11 = vld [vmem:[%s21093_s7 + $0x4a8] sm:$0xff]  ;;  %v10296_v17 = vld [vmem:[%s21093_s7 + $0x638] sm:$0xff] }
 0x58a   : > { %v12773_v41 = vpack.c.bf16 %v10246_v11, %v10243_v30 }
 0x58b   : > { %12716 = vmatprep.subr.bf16.mxu1 %v12715_v52  ;;  %v10297_v52 = vld [vmem:[%s21093_s7 + $0x640] sm:$0xff] }
 0x58c   : > { %5034 = vmatmul.mubr.f32.gmra.mrb[10].mxu0 %v17357_v34  ;;  %v10270_v34 = vld [vmem:[%s21093_s7 + $0x568] sm:$0xff] }
 0x58d   : > { %10198 = vmatprep.mubr.msk.f32.mxu0 %vm2844_vm15, %v17370_v12  ;;  %v10265_v12 = vld [vmem:[%s21093_s7 + $0x540] sm:$0xff] }
 0x590   : > { %5040 = vmatmul.mubr.f32.gmra.mrb[12].mxu0 %v17382_v25  ;;  %v10268_v25 = vld [vmem:[%s21093_s7 + $0x558] sm:$0xff] }
 0x591   : > { %10199 = vmatprep.mubr.msk.f32.mxu0 %vm2844_vm15, %v17394_v22  ;;  %v12755_v22 = vpack.c.bf16 %v10270_v34, %v10267_v29  ;;  %v10299_v29 = vld [vmem:[%s21093_s7 + $0x650] sm:$0xff]  ;;  %v10300_v34 = vld [vmem:[%s21093_s7 + $0x658] sm:$0xff] }
 0x593   : > { %12756 = vmatprep.subr.bf16.mxu0 %v12755_v22  ;;  %v10295_v22 = vld [vmem:[%s21093_s7 + $0x630] sm:$0xff] }
 0x594   : > { %5046 = vmatmul.mubr.f32.gmra.mrb[14].mxu0 %v17406_v2  ;;  %v12717_v2 = vpack.c.bf16 %v10268_v25, %v10265_v12  ;;  %v12735_v12 = vpack.c.bf16 %v10299_v29, %v10296_v17  ;;  %v12775_v25 = vpack.c.bf16 %v10300_v34, %v10297_v52  ;;  %v12780_v52 = vpack.c.bf16 %v18534_v10, %v18529_v39 }
 0x595   : > { %12758 = vmatpush3.bf16.msra.mxu0 %v12757_v60  ;;  %v10252_v60 = vld [vmem:[%s21093_s7 + $0x4d8] sm:$0xff] }
 0x596   : > { %12718 = vmatpush1.bf16.msra.mxu1 %v12717_v2  ;;  %12760 = vmatprep.subr.bf16.mxu0 %v12759_v61  ;;  %v10298_v2 = vld [vmem:[%s21093_s7 + $0x648] sm:$0xff]  ;;  %v12777_v5 = vpack.c.bf16 %v10252_v60, %v10249_v28  ;;  %v5166_v61 = vrot.slane %v18218_v38, %v21143_v0 }
 0x597   : > { %12720 = vmatprep.subr.bf16.mxu1 %v12719_v42  ;;  %v12737_v53 = vpack.c.bf16 %v10298_v2, %v10295_v22  ;;  %v12739_v42 = vpack.c.bf16 %v10305_v9, %v10302_v16 }
 0x599   : > { %12762 = vmatpush3.bf16.msra.mxu0 %v12761_v62 }
 0x59a   : > { %12722 = vmatpush1.bf16.msra.mxu1 %v12721_v55  ;;  %12764 = vmatprep.subr.bf16.mxu0 %v12763_v47 }
 0x59b   : > { %12724 = vmatprep.subr.bf16.mxu1 %v12723_v6 }
 0x59d   : > { %12766 = vmatpush3.bf16.msra.mxu0 %v12765_v58 }
 0x59e   : > { %12726 = vmatpush1.bf16.msra.mxu1 %v12725_v51  ;;  %12768 = vmatprep.subr.bf16.mxu0 %v12767_v27  ;;  %v10308_v27 = vld [vmem:[%s21093_s7 + $0x698] sm:$0xff] }
 0x59f   : > { %12728 = vmatprep.subr.bf16.mxu1 %v12727_v21  ;;  %v10301_v21 = vld [vmem:[%s21093_s7 + $0x660] sm:$0xff] }
 0x5a1   : > { %12770 = vmatpush3.bf16.msra.mxu0 %v12769_v1 }
 0x5a2   : > { %12730 = vmatpush1.bf16.msra.mxu1 %v12729_v19  ;;  %12772 = vmatprep.subr.bf16.mxu0 %v12771_v35  ;;  %v10311_v19 = vld [vmem:[%s21093_s7 + $0x6b0] sm:$0xff] }
 0x5a3   : > { %12732 = vmatprep.subr.bf16.mxu1 %v12731_v18  ;;  %v12743_v30 = vpack.c.bf16 %v10311_v19, %v10308_v27  ;;  %v5353_v27 = vld [vmem:[%s21093_s7 + $0x1a8] sm:$0xff] }
 0x5a5   : > { %12774 = vmatpush3.bf16.msra.mxu0 %v12773_v41 }
 0x5a6   : > { %12734 = vmatpush1.bf16.msra.mxu1 %v12733_v40  ;;  %12776 = vmatprep.subr.bf16.mxu0 %v12775_v25  ;;  %v12741_v40 = vpack.c.bf16 %v10304_v15, %v10301_v21  ;;  %v5350_v15 = vld [vmem:[%s21093_s7 + $0x190] sm:$0xff] }
 0x5a7   : > { %12736 = vmatprep.subr.bf16.mxu1 %v12735_v12  ;;  %v12857_v39 = vpack.c.bf16 %v5353_v27, %v5350_v15 }
 0x5a9   : > { %12778 = vmatpush3.bf16.msra.mxu0 %v12777_v5 }
 0x5aa   : > { %12738 = vmatpush1.bf16.msra.mxu1 %v12737_v53  ;;  %12779 = vmatprep.subr.bf16.mxu0 %v21130_v7 }
 0x5ab   : > { %12740 = vmatprep.subr.bf16.mxu1 %v12739_v42 }
 0x657   : > { %v5023_v55 = vpop.f32.mrb[6].mxu0 }
 0x658   : > { %v5174_v32 = vadd.f32 %v5162_v45, %v5023_v55  ;;  %v5025_v37 = vpop.f32.mrb[7].mxu0 }
 0x659   : > { %v5175_v62 = vadd.f32 %v5166_v61, %v5025_v37  ;;  %v10307_v37 = vld [vmem:[%s21093_s7 + $0x690] sm:$0xff] }
 0x65a   : > { %v5189_v20 = vmax.f32 %v5174_v32, 0.0 }
 0x65b   : > { %v5190_v4 = vmax.f32 %v5175_v62, 0.0  ;;  %v5029_v50 = vpop.f32.mrb[8].mxu0  ;;  %v10310_v62 = vld [vmem:[%s21093_s7 + $0x6a8] sm:$0xff] }
 0x65c   : > { %v5226_v6 = vrot.slane %v5189_v20, 4  ;;  %v5177_v54 = vadd.f32 %v5162_v45, %v5029_v50  ;;  %v5031_v8 = vpop.f32.mrb[9].mxu0 }
 0x65d   : > { %v5227_v57 = vrot.slane %v5190_v4, 4  ;;  %v5178_v47 = vadd.f32 %v5166_v61, %v5031_v8  ;;  %v5304_v8 = vld [vmem:[%s21093_s7 + $0x20] sm:$0xff] }
 0x65e   : > { %5268 = vst [vmem:[#allocation5] sm:$0xf0] %v5226_v6  ;;  %v5192_v51 = vmax.f32 %v5177_v54, 0.0  ;;  %v5301_v54 = vld [vmem:[%s21093_s7 + $0x8] sm:$0xff] }
 0x65f   : > { %5269 = vst [vmem:[#allocation5 + $0x8] sm:$0xf0] %v5227_v57  ;;  %v5193_v36 = vmax.f32 %v5178_v47, 0.0  ;;  %v5035_v48 = vpop.f32.mrb[10].mxu0 }
 0x660   : > { %v5229_v58 = vrot.slane %v5192_v51, 4  ;;  %v5180_v46 = vadd.f32 %v5162_v45, %v5035_v48  ;;  %v5037_v38 = vpop.f32.mrb[11].mxu0 }
 0x661   : > { %v5231_v23 = vrot.slane %v5193_v36, 4  ;;  %v5181_v56 = vadd.f32 %v5166_v61, %v5037_v38  ;;  %v12785_v38 = vpack.c.bf16 %v5304_v8, %v5301_v54  ;;  %v18655_v54 = vld [vmem:[#allocation5 + $0x58] sm:$0xff]  ;;  %v5316_v8 = vld [vmem:[%s21093_s7 + $0x80] sm:$0xff] }
 0x662   : > { %v18511_v3 = vsel %vm2273_vm8, %v5226_v6, %v5229_v58  ;;  %v5195_v49 = vmax.f32 %v5180_v46, 0.0  ;;  %v10312_v6 = vld [vmem:[%s21093_s7 + $0x6b8] sm:$0xff]  ;;  %v5560_v27 = vrot.slane %v18655_v54, 1 }
 0x663   : > { %5272 = vst [vmem:[#allocation5 + $0x18] sm:$0xff] %v18511_v3  ;;  %v18524_v31 = vsel %vm2273_vm8, %v5227_v57, %v5231_v23  ;;  %v5196_v24 = vmax.f32 %v5181_v56, 0.0  ;;  %v5041_v1 = vpop.f32.mrb[12].mxu0  ;;  %v5542_v16 = vrot.slane %v18511_v3, 1 }
 0x664   : > { %5273 = vst [vmem:[#allocation5 + $0x20] sm:$0xff] %v18524_v31  ;;  %v5235_v43 = vrot.slane %v5195_v49, 4  ;;  %v5183_v18 = vadd.f32 %v5162_v45, %v5041_v1  ;;  %v5043_v44 = vpop.f32.mrb[13].mxu0  ;;  %v5545_v2 = vrot.slane %v18524_v31, 1  ;;  %v5412_v1 = vld [vmem:[#allocation5 + $0x80] sm:$0x1] }
 0x665   : > { %v5237_v59 = vrot.slane %v5196_v24, 4  ;;  %v5184_v14 = vadd.f32 %v5166_v61, %v5043_v44  ;;  %v5408_v35 = vld [vmem:[#allocation5] sm:$0xfe]  ;;  %v5570_v44 = vrot.slane %v5412_v1, 1  ;;  %v18688_v1 = vld [vmem:[#allocation5 + $0x70] sm:$0xff] }
 0x666   : > { %v18538_v11 = vsel %vm2273_vm8, %v5229_v58, %v5235_v43  ;;  %v5198_v17 = vmax.f32 %v5183_v18, 0.0  ;;  %v5409_v41 = vld [vmem:[#allocation5 + $0x8] sm:$0xfe]  ;;  %v5541_v29 = vrot.slane %v5408_v35, 1  ;;  %v12745_v58 = vpack.c.bf16 %v10310_v62, %v10307_v37  ;;  %v5308_v37 = vld [vmem:[%s21093_s7 + $0x40] sm:$0xff] }
 0x667   : > { %5276 = vst [vmem:[#allocation5 + $0x30] sm:$0xff] %v18538_v11  ;;  %v18544_v34 = vsel %vm2273_vm8, %v5231_v23, %v5237_v59  ;;  %v5199_v12 = vmax.f32 %v5184_v14, 0.0  ;;  %v5047_v25 = vpop.f32.mrb[14].mxu0  ;;  %v5544_v22 = vrot.slane %v5409_v41, 1  ;;  %v5550_v32 = vrot.slane %v18538_v11, 1  ;;  %v5300_v41 = vld [vmem:[%s21093_s7] sm:$0xff] }
 0x668   : > { %5277 = vst [vmem:[#allocation5 + $0x38] sm:$0xff] %v18544_v34  ;;  %v5241_v28 = vrot.slane %v5198_v17, 4  ;;  %v5186_v53 = vadd.f32 %v5162_v45, %v5047_v25  ;;  %v5049_v60 = vpop.f32.mrb[15].mxu0  ;;  %v5552_v9 = vrot.slane %v18544_v34, 1  ;;  %v10309_v45 = vld [vmem:[%s21093_s7 + $0x6a0] sm:$0xff]  ;;  %v5543_v4 = vsel %vm1624_vm6, %v5541_v29, %v5542_v16  ;;  %v5303_v29 = vld [vmem:[%s21093_s7 + $0x18] sm:$0xff] }
 0x669   : > { %v5243_v5 = vrot.slane %v5199_v12, 4  ;;  %v5187_v42 = vadd.f32 %v5166_v61, %v5049_v60  ;;  %v5546_v55 = vsel %vm1624_vm6, %v5544_v22, %v5545_v2  ;;  %v12783_v46 = vpack.c.bf16 %v10312_v6, %v10309_v45  ;;  %v5410_v17 = vld [vmem:[#allocation5 + $0x10] sm:$0xfe]  ;;  %v5305_v12 = vld [vmem:[%s21093_s7 + $0x28] sm:$0xff]  ;;  %v5311_v62 = vld [vmem:[%s21093_s7 + $0x58] sm:$0xff] }
 0x66a   : > { %v18562_v20 = vsel %vm2273_vm8, %v5235_v43, %v5241_v28  ;;  %v5201_v61 = vmax.f32 %v5186_v53, 0.0  ;;  %5658 = vmatprep.mubr.f32.mxu1 %v5546_v55  ;;  %5848 = vmatprep.mubr.f32.mxu0 %v5546_v55  ;;  %v5553_v50 = vsel %vm1624_vm6, %v5545_v2, %v5552_v9  ;;  %v5551_v56 = vsel %vm1624_vm6, %v5542_v16, %v5550_v32  ;;  %v5307_v2 = vld [vmem:[%s21093_s7 + $0x38] sm:$0xff]  ;;  %v5310_v53 = vld [vmem:[%s21093_s7 + $0x50] sm:$0xff]  ;;  %v5356_v60 = vld [vmem:[%s21093_s7 + $0x1c0] sm:$0xff] }
 0x66b   : > { %5279 = vst [vmem:[#allocation5 + $0x48] sm:$0xff] %v18562_v20  ;;  %v18577_v57 = vsel %vm2273_vm8, %v5237_v59, %v5243_v5  ;;  %v5202_v47 = vmax.f32 %v5187_v42, 0.0  ;;  %5659 = vmatmul.mubr.f32.vlgmr.msra.gmra.mrb[58].mxu1 %v5543_v4  ;;  %5849 = vmatmul.mubr.f32.vlgmr.msra.gmra.mrb[36].mxu0 %v5543_v4  ;;  %v5556_v49 = vrot.slane %v18562_v20, 1  ;;  %v5411_v59 = vld [vmem:[#allocation5 + $0x78] sm:$0x1]  ;;  %v5359_v16 = vld [vmem:[%s21093_s7 + $0x1d8] sm:$0xff] }
 0x66c   : > { %5280 = vst [vmem:[#allocation5 + $0x50] sm:$0xff] %v18577_v57  ;;  %v5247_v51 = vrot.slane %v5201_v61, 4  ;;  %12742 = vmatpush1.bf16.msra.mxu1 %v12741_v40  ;;  %5664 = vmatprep.mubr.f32.mxu1 %v5553_v50  ;;  %v5558_v36 = vrot.slane %v18577_v57, 1  ;;  %v5568_v35 = vrot.slane %v5411_v59, 1  ;;  %v5306_v55 = vld [vmem:[%s21093_s7 + $0x30] sm:$0xff]  ;;  %v12789_v61 = vpack.c.bf16 %v5310_v53, %v5307_v2  ;;  %v5313_v6 = vld [vmem:[%s21093_s7 + $0x68] sm:$0xff] }
 0x66d   : > { %v5249_v48 = vrot.slane %v5202_v47, 4  ;;  %5853 = vmatprep.mubr.f32.mxu0 %v5553_v50  ;;  %12744 = vmatprep.subr.bf16.mxu1 %v12743_v30  ;;  %v5557_v10 = vsel %vm1624_vm6, %v5550_v32, %v5556_v49  ;;  %v18605_v30 = vld [vmem:[#allocation5 + $0x28] sm:$0xff]  ;;  %v5309_v32 = vld [vmem:[%s21093_s7 + $0x48] sm:$0xff]  ;;  %v12861_v4 = vpack.c.bf16 %v5359_v16, %v5356_v60  ;;  %v5362_v47 = vld [vmem:[%s21093_s7 + $0x1f0] sm:$0xff] }
 0x66e   : > { %v18582_v23 = vsel %vm2273_vm8, %v5241_v28, %v5247_v51  ;;  %v5559_v21 = vsel %vm1624_vm6, %v5552_v9, %v5558_v36  ;;  %12781 = vmatpush3.bf16.msra.mxu0 %v12780_v52  ;;  %v5302_v52 = vld [vmem:[%s21093_s7 + $0x10] sm:$0xff]  ;;  %v5548_v22 = vrot.slane %v18605_v30, 1  ;;  %v5547_v9 = vrot.slane %v5410_v17, 1  ;;  %v5365_v51 = vld [vmem:[%s21093_s7 + $0x208] sm:$0xff] }
 0x66f   : > { %5282 = vst [vmem:[#allocation5 + $0x60] sm:$0xff] %v18582_v23  ;;  %v18595_v19 = vsel %vm2273_vm8, %v5243_v5, %v5249_v48  ;;  %5665 = vmatmul.mubr.f32.gmra.mrb[60].mxu1 %v5551_v56  ;;  %5854 = vmatmul.mubr.f32.gmra.mrb[38].mxu0 %v5551_v56  ;;  %v5562_v18 = vrot.slane %v18582_v23, 1  ;;  %v18624_v28 = vld [vmem:[#allocation5 + $0x40] sm:$0xff]  ;;  %v12787_v5 = vpack.c.bf16 %v5303_v29, %v5300_v41  ;;  %v5317_v56 = vld [vmem:[%s21093_s7 + $0x88] sm:$0xff] }
 0x670   : > { %5283 = vst [vmem:[#allocation5 + $0x68] sm:$0xff] %v18595_v19  ;;  %5670 = vmatprep.mubr.f32.mxu1 %v5559_v21  ;;  %5858 = vmatprep.mubr.f32.mxu0 %v5559_v21  ;;  %v5564_v24 = vrot.slane %v18595_v19, 1  ;;  %v12859_v42 = vpack.c.bf16 %v5305_v12, %v5302_v52  ;;  %v5549_v45 = vsel %vm1624_vm6, %v5547_v9, %v5548_v22  ;;  %v5554_v50 = vrot.slane %v18624_v28, 1  ;;  %v5318_v59 = vld [vmem:[%s21093_s7 + $0x90] sm:$0xff]  ;;  %v5325_v12 = vld [vmem:[%s21093_s7 + $0xc8] sm:$0xff]  ;;  %v5324_v9 = vld [vmem:[%s21093_s7 + $0xc0] sm:$0xff] }
 0x671   : > { %12746 = vmatpush1.bf16.msra.mxu1 %v12745_v58  ;;  %12782 = vmatprep.subr.bf16.mxu0 %v21130_v7  ;;  %v5563_v14 = vsel %vm1624_vm6, %v5556_v49, %v5562_v18  ;;  %v5569_v25 = vsel %vm1624_vm6, %v5562_v18, %v5568_v35  ;;  %v12863_v48 = vpack.c.bf16 %v5311_v62, %v5308_v37  ;;  %v5312_v58 = vld [vmem:[%s21093_s7 + $0x60] sm:$0xff]  ;;  %v5566_v52 = vrot.slane %v18688_v1, 1  ;;  %v5374_v2 = vld [vmem:[%s21093_s7 + $0x250] sm:$0xff]  ;;  %v5377_v53 = vld [vmem:[%s21093_s7 + $0x268] sm:$0xff] }
 0x672   : > { %v5565_v43 = vsel %vm1624_vm6, %v5558_v36, %v5564_v24  ;;  %12784 = vmatpush3.bf16.msra.mxu0 %v12783_v46  ;;  %12786 = vmatprep.subr.bf16.mxu1 %v12785_v38  ;;  %v5571_v40 = vsel %vm1624_vm6, %v5564_v24, %v5570_v44  ;;  %v12791_v36 = vpack.c.bf16 %v5309_v32, %v5306_v55  ;;  %v5315_v46 = vld [vmem:[%s21093_s7 + $0x78] sm:$0xff]  ;;  %v5314_v38 = vld [vmem:[%s21093_s7 + $0x70] sm:$0xff]  ;;  %v5320_v35 = vld [vmem:[%s21093_s7 + $0xa0] sm:$0xff] }
 0x673   : > { %5671 = vmatmul.mubr.f32.gmra.mrb[62].mxu1 %v5557_v10  ;;  %5859 = vmatmul.mubr.f32.gmra.mrb[40].mxu0 %v5557_v10  ;;  %v5555_v21 = vsel %vm1624_vm6, %v5548_v22, %v5554_v50  ;;  %v12793_v49 = vpack.c.bf16 %v5316_v8, %v5313_v6  ;;  %v12865_v15 = vpack.c.bf16 %v5365_v51, %v5362_v47  ;;  %v5319_v24 = vld [vmem:[%s21093_s7 + $0x98] sm:$0xff]  ;;  %v5368_v10 = vld [vmem:[%s21093_s7 + $0x220] sm:$0xff]  ;;  %v5329_v55 = vld [vmem:[%s21093_s7 + $0xe8] sm:$0xff] }
 0x674   : > { %5676 = vmatprep.mubr.f32.mxu1 %v5565_v43  ;;  %5863 = vmatprep.mubr.f32.mxu0 %v5565_v43  ;;  %v5371_v43 = vld [vmem:[%s21093_s7 + $0x238] sm:$0xff]  ;;  %v12795_v18 = vpack.c.bf16 %v5315_v46, %v5312_v58  ;;  %v12867_v44 = vpack.c.bf16 %v5317_v56, %v5314_v38  ;;  %v5561_v17 = vsel %vm1624_vm6, %v5554_v50, %v5560_v27  ;;  %v5328_v22 = vld [vmem:[%s21093_s7 + $0xe0] sm:$0xff]  ;;  %v5330_v51 = vld [vmem:[%s21093_s7 + $0xf0] sm:$0xff] }
 0x675   : > { %12858 = vmatprep.subr.bf16.mxu0 %v12857_v39  ;;  %v5322_v39 = vld [vmem:[%s21093_s7 + $0xb0] sm:$0xff]  ;;  %v12869_v29 = vpack.c.bf16 %v5371_v43, %v5368_v10  ;;  %v5567_v32 = vsel %vm1624_vm6, %v5560_v27, %v5566_v52  ;;  %v12801_v37 = vpack.c.bf16 %v5328_v22, %v5325_v12  ;;  %v12873_v62 = vpack.c.bf16 %v5377_v53, %v5374_v2  ;;  %v5380_v50 = vld [vmem:[%s21093_s7 + $0x280] sm:$0xff]  ;;  %v5383_v6 = vld [vmem:[%s21093_s7 + $0x298] sm:$0xff] }
 0x676   : > { %v12797_v41 = vpack.c.bf16 %v5322_v39, %v5319_v24  ;;  %v5335_v58 = vld [vmem:[%s21093_s7 + $0x118] sm:$0xff]  ;;  %v5337_v46 = vld [vmem:[%s21093_s7 + $0x128] sm:$0xff]  ;;  %v5336_v43 = vld [vmem:[%s21093_s7 + $0x120] sm:$0xff] }
 0x677   : > { %5677 = vmatmul.mubr.f32.gmra.mrb[64].mxu1 %v5563_v14  ;;  %5864 = vmatmul.mubr.f32.gmra.mrb[42].mxu0 %v5563_v14  ;;  %v5321_v14 = vld [vmem:[%s21093_s7 + $0xa8] sm:$0xff]  ;;  %v5286_v24 = vld [vmem:[#allocation5 + $0x8] sm:$0xff] }
 0x678   : > { %5682 = vmatprep.mubr.f32.mxu1 %v5571_v40  ;;  %5868 = vmatprep.mubr.f32.mxu0 %v5571_v40  ;;  %v5323_v40 = vld [vmem:[%s21093_s7 + $0xb8] sm:$0xff]  ;;  %v12799_v60 = vpack.c.bf16 %v5321_v14, %v5318_v59  ;;  %v5389_v27 = vld [vmem:[%s21093_s7 + $0x2c8] sm:$0xff]  ;;  %v5338_v14 = vld [vmem:[%s21093_s7 + $0x130] sm:$0xff] }
 0x679   : > { %v12871_v16 = vpack.c.bf16 %v5323_v40, %v5320_v35  ;;  %v5341_v35 = vld [vmem:[%s21093_s7 + $0x148] sm:$0xff]  ;;  %v5343_v40 = vld [vmem:[%s21093_s7 + $0x158] sm:$0xff] }
 0x67a   : > { %v12883_v12 = vpack.c.bf16 %v5341_v35, %v5338_v14  ;;  %v5345_v53 = vld [vmem:[%s21093_s7 + $0x168] sm:$0xff]  ;;  %v5366_v35 = vld [vmem:[%s21093_s7 + $0x210] sm:$0xff] }
 0x67b   : > { %5683 = vmatmul.mubr.f32.gmra.mrb[66].mxu1 %v5569_v25  ;;  %5869 = vmatmul.mubr.f32.gmra.mrb[44].mxu0 %v5569_v25  ;;  %v5413_v25 = vld [vmem:[#allocation5 + $0x88] sm:$0x1] }
 0x67c   : > { %5753 = vmatprep.mubr.f32.mxu1 %v21133_v26  ;;  %11260 = vmatprep.mubr.msk.f32.mxu0 %vm13756_vm9, %v21133_v26 }
 0x67f   : > { %10313 = vmatmul.mubr.msk.f32.vlgmr.msra.gmra.mrb[58].mxu1 %vm5274_vm4, %v5549_v45  ;;  %11261 = vmatmul.mubr.msk.f32.vlgmr.msra.gmra.mrb[46].mxu0 %vm5274_vm4, %v5549_v45  ;;  %v5572_v45 = vrot.slane %v5413_v25, 1  ;;  %v5342_v25 = vld [vmem:[%s21093_s7 + $0x150] sm:$0xff] }
 0x680   : > { %12788 = vmatpush1.bf16.msra.mxu1 %v12787_v5  ;;  %12860 = vmatpush3.bf16.msra.mxu0 %v12859_v42  ;;  %v5327_v5 = vld [vmem:[%s21093_s7 + $0xd8] sm:$0xff]  ;;  %v5326_v42 = vld [vmem:[%s21093_s7 + $0xd0] sm:$0xff] }
 0x681   : > { %5759 = vmatprep.mubr.f32.mxu1 %v21133_v26  ;;  %11263 = vmatprep.mubr.msk.f32.mxu0 %vm13756_vm9, %v21133_v26  ;;  %v12803_v8 = vpack.c.bf16 %v5327_v5, %v5324_v9  ;;  %v12875_v47 = vpack.c.bf16 %v5329_v55, %v5326_v42  ;;  %v5573_v38 = vsel %vm1624_vm6, %v5566_v52, %v5572_v45  ;;  %v5349_v9 = vld [vmem:[%s21093_s7 + $0x188] sm:$0xff]  ;;  %v5352_v5 = vld [vmem:[%s21093_s7 + $0x1a0] sm:$0xff]  ;;  %v5355_v45 = vld [vmem:[%s21093_s7 + $0x1b8] sm:$0xff] }
 0x682   : > { %12790 = vmatprep.subr.bf16.mxu1 %v12789_v61  ;;  %12862 = vmatprep.subr.bf16.mxu0 %v12861_v4  ;;  %v5331_v61 = vld [vmem:[%s21093_s7 + $0xf8] sm:$0xff]  ;;  %v5334_v4 = vld [vmem:[%s21093_s7 + $0x110] sm:$0xff]  ;;  %v12815_v42 = vpack.c.bf16 %v5345_v53, %v5342_v25 }
 0x683   : > { %10314 = vmatmul.mubr.msk.f32.gmra.mrb[60].mxu1 %vm5274_vm4, %v5555_v21  ;;  %11264 = vmatmul.mubr.msk.f32.gmra.mrb[48].mxu0 %vm5274_vm4, %v5555_v21  ;;  %v12805_v56 = vpack.c.bf16 %v5334_v4, %v5331_v61  ;;  %v12877_v21 = vpack.c.bf16 %v5383_v6, %v5380_v50  ;;  %v5358_v61 = vld [vmem:[%s21093_s7 + $0x1d0] sm:$0xff]  ;;  %v5401_v50 = vld [vmem:[%s21093_s7 + $0x328] sm:$0xff]  ;;  %v5375_v25 = vld [vmem:[%s21093_s7 + $0x258] sm:$0xff] }
 0x684   : > { %12792 = vmatpush1.bf16.msra.mxu1 %v12791_v36  ;;  %12864 = vmatpush3.bf16.msra.mxu0 %v12863_v48  ;;  %v5333_v36 = vld [vmem:[%s21093_s7 + $0x108] sm:$0xff]  ;;  %v5332_v48 = vld [vmem:[%s21093_s7 + $0x100] sm:$0xff]  ;;  %v5398_v4 = vld [vmem:[%s21093_s7 + $0x310] sm:$0xff] }
 0x685   : > { %5765 = vmatprep.mubr.f32.mxu1 %v21133_v26  ;;  %11266 = vmatprep.mubr.msk.f32.mxu0 %vm13756_vm9, %v21133_v26  ;;  %v12807_v39 = vpack.c.bf16 %v5333_v36, %v5330_v51  ;;  %v12879_v10 = vpack.c.bf16 %v5335_v58, %v5332_v48  ;;  %v5357_v51 = vld [vmem:[%s21093_s7 + $0x1c8] sm:$0xff]  ;;  %v5364_v48 = vld [vmem:[%s21093_s7 + $0x200] sm:$0xff]  ;;  %v12890_v58 = vpack.c.bf16 %v5401_v50, %v5398_v4 }
 0x686   : > { %12794 = vmatprep.subr.bf16.mxu1 %v12793_v49  ;;  %12866 = vmatprep.subr.bf16.mxu0 %v12865_v15  ;;  %v5340_v49 = vld [vmem:[%s21093_s7 + $0x140] sm:$0xff]  ;;  %v5386_v15 = vld [vmem:[%s21093_s7 + $0x2b0] sm:$0xff]  ;;  %v5361_v36 = vld [vmem:[%s21093_s7 + $0x1e8] sm:$0xff] }
 0x687   : > { %10315 = vmatmul.mubr.msk.f32.gmra.mrb[62].mxu1 %vm5274_vm4, %v5561_v17  ;;  %11267 = vmatmul.mubr.msk.f32.gmra.mrb[50].mxu0 %vm5274_vm4, %v5561_v17  ;;  %v12881_v59 = vpack.c.bf16 %v5389_v27, %v5386_v15  ;;  %v5346_v17 = vld [vmem:[%s21093_s7 + $0x170] sm:$0xff]  ;;  %v12825_v27 = vpack.c.bf16 %v5364_v48, %v5361_v36  ;;  %v10341_v4 = vld [vmem:[%s21093_s7 + $0x700] sm:$0xff] }
 0x688   : > { %12796 = vmatpush1.bf16.msra.mxu1 %v12795_v18  ;;  %12868 = vmatpush3.bf16.msra.mxu0 %v12867_v44  ;;  %v5339_v18 = vld [vmem:[%s21093_s7 + $0x138] sm:$0xff]  ;;  %v12809_v44 = vpack.c.bf16 %v5340_v49, %v5337_v46  ;;  %v12813_v22 = vpack.c.bf16 %v5346_v17, %v5343_v40  ;;  %v18865_v46 = vld [vmem:[#allocation5] sm:$0xff]  ;;  %v10386_v49 = vld [vmem:[%s21093_s7 + $0x868] sm:$0xff] }
 0x689   : > { %5771 = vmatprep.mubr.f32.mxu1 %v21133_v26  ;;  %11269 = vmatprep.mubr.msk.f32.mxu0 %vm13756_vm9, %v21133_v26  ;;  %v12811_v52 = vpack.c.bf16 %v5339_v18, %v5336_v43  ;;  %v5367_v43 = vld [vmem:[%s21093_s7 + $0x218] sm:$0xff]  ;;  %v5370_v18 = vld [vmem:[%s21093_s7 + $0x230] sm:$0xff]  ;;  %v5369_v40 = vld [vmem:[%s21093_s7 + $0x228] sm:$0xff] }
 0x68a   : > { %12798 = vmatprep.subr.bf16.mxu1 %v12797_v41  ;;  %12870 = vmatprep.subr.bf16.mxu0 %v12869_v29  ;;  %v5392_v41 = vld [vmem:[%s21093_s7 + $0x2e0] sm:$0xff]  ;;  %v5395_v29 = vld [vmem:[%s21093_s7 + $0x2f8] sm:$0xff]  ;;  %v12829_v14 = vpack.c.bf16 %v5370_v18, %v5367_v43  ;;  %v5373_v17 = vld [vmem:[%s21093_s7 + $0x248] sm:$0xff] }
 0x68b   : > { %10316 = vmatmul.mubr.msk.f32.gmra.mrb[64].mxu1 %vm5274_vm4, %v5567_v32  ;;  %11270 = vmatmul.mubr.msk.f32.gmra.mrb[52].mxu0 %vm5274_vm4, %v5567_v32  ;;  %v12885_v2 = vpack.c.bf16 %v5395_v29, %v5392_v41  ;;  %v12817_v32 = vpack.c.bf16 %v5352_v5, %v5349_v9  ;;  %v5376_v41 = vld [vmem:[%s21093_s7 + $0x260] sm:$0xff]  ;;  %v12831_v29 = vpack.c.bf16 %v5369_v40, %v5366_v35  ;;  %v10338_v9 = vld [vmem:[%s21093_s7 + $0x6e8] sm:$0xff]  ;;  %v5378_v5 = vld [vmem:[%s21093_s7 + $0x270] sm:$0xff] }
 0x68c   : > { %12800 = vmatpush1.bf16.msra.mxu1 %v12799_v60  ;;  %12872 = vmatpush3.bf16.msra.mxu0 %v12871_v16  ;;  %v5344_v60 = vld [vmem:[%s21093_s7 + $0x160] sm:$0xff]  ;;  %v5347_v16 = vld [vmem:[%s21093_s7 + $0x178] sm:$0xff]  ;;  %v10395_v48 = vld [vmem:[%s21093_s7 + $0x8b0] sm:$0xff] }
 0x68d   : > { %5777 = vmatprep.mubr.f32.mxu1 %v21133_v26  ;;  %11272 = vmatprep.mubr.msk.f32.mxu0 %vm13756_vm9, %v21133_v26  ;;  %v12887_v55 = vpack.c.bf16 %v5347_v16, %v5344_v60  ;;  %v10335_v60 = vld [vmem:[%s21093_s7 + $0x6d0] sm:$0xff]  ;;  %v10401_v18 = vld [vmem:[%s21093_s7 + $0x8e0] sm:$0xff] }
 0x68e   : > { %12802 = vmatprep.subr.bf16.mxu1 %v12801_v37  ;;  %12874 = vmatprep.subr.bf16.mxu0 %v12873_v62  ;;  %v5348_v37 = vld [vmem:[%s21093_s7 + $0x180] sm:$0xff]  ;;  %v5351_v62 = vld [vmem:[%s21093_s7 + $0x198] sm:$0xff] }
 0x68f   : > { %10317 = vmatmul.mubr.msk.f32.gmra.mrb[66].mxu1 %vm5274_vm4, %v5573_v38  ;;  %11273 = vmatmul.mubr.msk.f32.gmra.mrb[54].mxu0 %vm5274_vm4, %v5573_v38  ;;  %v12819_v6 = vpack.c.bf16 %v5351_v62, %v5348_v37  ;;  %v5404_v38 = vld [vmem:[%s21093_s7 + $0x340] sm:$0xff]  ;;  %v5385_v37 = vld [vmem:[%s21093_s7 + $0x2a8] sm:$0xff] }
 0x690   : > { %12804 = vmatpush1.bf16.msra.mxu1 %v12803_v8  ;;  %12876 = vmatpush3.bf16.msra.mxu0 %v12875_v47  ;;  %v5354_v8 = vld [vmem:[%s21093_s7 + $0x1b0] sm:$0xff]  ;;  %v12821_v47 = vpack.c.bf16 %v5358_v61, %v5355_v45  ;;  %v5388_v62 = vld [vmem:[%s21093_s7 + $0x2c0] sm:$0xff]  ;;  %v12969_v45 = vpack.c.bf16 %v10338_v9, %v10335_v60 }
 0x691   : > { %6039 = vmatprep.mubr.f32.mxu1 %v5286_v24  ;;  %6229 = vmatprep.mubr.f32.mxu0 %v5286_v24  ;;  %v12823_v15 = vpack.c.bf16 %v5357_v51, %v5354_v8  ;;  %v5360_v24 = vld [vmem:[%s21093_s7 + $0x1e0] sm:$0xff]  ;;  %v12841_v36 = vpack.c.bf16 %v5388_v62, %v5385_v37  ;;  %v5406_v60 = vld [vmem:[%s21093_s7 + $0x350] sm:$0xff]  ;;  %v10416_v62 = vld [vmem:[%s21093_s7 + $0x958] sm:$0xff] }
 0x692   : > { %12806 = vmatprep.subr.bf16.mxu1 %v12805_v56  ;;  %12878 = vmatprep.subr.bf16.mxu0 %v12877_v21  ;;  %v5407_v56 = vld [vmem:[%s21093_s7 + $0x358] sm:$0xff]  ;;  %v10383_v21 = vld [vmem:[%s21093_s7 + $0x850] sm:$0xff]  ;;  %v5384_v8 = vld [vmem:[%s21093_s7 + $0x2a0] sm:$0xff] }
 0x693   : > { %v18963_v51 = vld [vmem:[#allocation5 + $0x10] sm:$0xff] }
 0x694   : > { %12808 = vmatpush1.bf16.msra.mxu1 %v12807_v39  ;;  %12880 = vmatpush3.bf16.msra.mxu0 %v12879_v10  ;;  %v5363_v39 = vld [vmem:[%s21093_s7 + $0x1f8] sm:$0xff]  ;;  %v12893_v10 = vpack.c.bf16 %v5407_v56, %v5404_v38  ;;  %v5394_v56 = vld [vmem:[%s21093_s7 + $0x2f0] sm:$0xff]  ;;  %v10413_v37 = vld [vmem:[%s21093_s7 + $0x940] sm:$0xff] }
 0x695   : > { %12810 = vmatprep.subr.bf16.mxu1 %v12809_v44  ;;  %12882 = vmatprep.subr.bf16.mxu0 %v12881_v59  ;;  %v12967_v44 = vpack.c.bf16 %v10386_v49, %v10383_v21  ;;  %v12827_v59 = vpack.c.bf16 %v5363_v39, %v5360_v24  ;;  %v5391_v38 = vld [vmem:[%s21093_s7 + $0x2d8] sm:$0xff]  ;;  %v10350_v24 = vld [vmem:[%s21093_s7 + $0x748] sm:$0xff]  ;;  %v5390_v39 = vld [vmem:[%s21093_s7 + $0x2d0] sm:$0xff] }
 0x696   : > { %v12845_v43 = vpack.c.bf16 %v5394_v56, %v5391_v38  ;;  %v10419_v56 = vld [vmem:[%s21093_s7 + $0x970] sm:$0xff] }
 0x698   : > { %12812 = vmatpush1.bf16.msra.mxu1 %v12811_v52  ;;  %12884 = vmatpush3.bf16.msra.mxu0 %v12883_v12  ;;  %v12833_v52 = vpack.c.bf16 %v5376_v41, %v5373_v17  ;;  %v5372_v12 = vld [vmem:[%s21093_s7 + $0x240] sm:$0xff] }
 0x699   : > { %12814 = vmatprep.subr.bf16.mxu1 %v12813_v22  ;;  %12886 = vmatprep.subr.bf16.mxu0 %v12885_v2  ;;  %v5379_v22 = vld [vmem:[%s21093_s7 + $0x278] sm:$0xff]  ;;  %v5382_v2 = vld [vmem:[%s21093_s7 + $0x290] sm:$0xff]  ;;  %v12835_v53 = vpack.c.bf16 %v5375_v25, %v5372_v12  ;;  %v10353_v41 = vld [vmem:[%s21093_s7 + $0x760] sm:$0xff] }
 0x69a   : > { %v12837_v16 = vpack.c.bf16 %v5382_v2, %v5379_v22  ;;  %v5396_v12 = vld [vmem:[%s21093_s7 + $0x300] sm:$0xff]  ;;  %v5399_v25 = vld [vmem:[%s21093_s7 + $0x318] sm:$0xff]  ;;  %v10407_v22 = vld [vmem:[%s21093_s7 + $0x910] sm:$0xff] }
 0x69b   : > { %v10410_v2 = vld [vmem:[%s21093_s7 + $0x928] sm:$0xff]  ;;  %v12851_v9 = vpack.c.bf16 %v5399_v25, %v5396_v12  ;;  %v10343_v12 = vld [vmem:[%s21093_s7 + $0x710] sm:$0xff]  ;;  %v6477_v25 = vrot.slane %v18544_v34, 2 }
 0x69c   : > { %12816 = vmatpush1.bf16.msra.mxu1 %v12815_v42  ;;  %12888 = vmatpush3.bf16.msra.mxu0 %v12887_v55  ;;  %v5381_v42 = vld [vmem:[%s21093_s7 + $0x288] sm:$0xff]  ;;  %v10389_v55 = vld [vmem:[%s21093_s7 + $0x880] sm:$0xff] }
 0x69d   : > { %12818 = vmatprep.subr.bf16.mxu1 %v12817_v32  ;;  %12889 = vmatprep.subr.bf16.mxu0 %v21130_v7  ;;  %v10392_v32 = vld [vmem:[%s21093_s7 + $0x898] sm:$0xff]  ;;  %v12839_v61 = vpack.c.bf16 %v5381_v42, %v5378_v5  ;;  %v10359_v5 = vld [vmem:[%s21093_s7 + $0x790] sm:$0xff]  ;;  %v10362_v42 = vld [vmem:[%s21093_s7 + $0x7a8] sm:$0xff] }
 0x69e   : > { %v12971_v50 = vpack.c.bf16 %v10392_v32, %v10389_v55  ;;  %v6346_v55 = vld [vmem:[#allocation5 + $0x8] sm:$0xfc]  ;;  %v12983_v32 = vpack.c.bf16 %v10410_v2, %v10407_v22  ;;  %v10431_v22 = vld [vmem:[%s21093_s7 + $0x9d0] sm:$0xff]  ;;  %v10434_v2 = vld [vmem:[%s21093_s7 + $0x9e8] sm:$0xff] }
 0x69f   : > { %6230 = vmatmul.mubr.f32.vlgmr.msra.gmra.mrb[56].mxu0 %v18865_v46 }
 0x6a0   : > { %12820 = vmatpush1.bf16.msra.mxu1 %v12819_v6  ;;  %6234 = vmatprep.mubr.f32.mxu0 %v18524_v31  ;;  %v10344_v6 = vld [vmem:[%s21093_s7 + $0x718] sm:$0xff] }
 0x6a1   : > { %12822 = vmatprep.subr.bf16.mxu1 %v12821_v47  ;;  %12891 = vmatpush3.bf16.msra.mxu0 %v12890_v58  ;;  %v5387_v47 = vld [vmem:[%s21093_s7 + $0x2b8] sm:$0xff]  ;;  %v10398_v58 = vld [vmem:[%s21093_s7 + $0x8c8] sm:$0xff]  ;;  %v12973_v21 = vpack.c.bf16 %v10344_v6, %v10341_v4  ;;  %v6469_v6 = vrot.slane %v6346_v55, 2  ;;  %v10349_v55 = vld [vmem:[%s21093_s7 + $0x740] sm:$0xff] }
 0x6a2   : > { %12892 = vmatprep.subr.bf16.mxu0 %v21130_v7  ;;  %v12843_v49 = vpack.c.bf16 %v5387_v47, %v5384_v8  ;;  %v5405_v4 = vld [vmem:[%s21093_s7 + $0x348] sm:$0xff]  ;;  %v10337_v8 = vld [vmem:[%s21093_s7 + $0x6e0] sm:$0xff]  ;;  %v12987_v47 = vpack.c.bf16 %v10416_v62, %v10413_v37  ;;  %v6483_v62 = vrot.slane %v18577_v57, 2 }
 0x6a3   : > { %6235 = vmatmul.mubr.f32.gmra.mrb[58].mxu0 %v18511_v3 }
 0x6a4   : > { %12824 = vmatpush1.bf16.msra.mxu1 %v12823_v15  ;;  %6239 = vmatprep.mubr.f32.mxu0 %v18544_v34  ;;  %v10347_v15 = vld [vmem:[%s21093_s7 + $0x730] sm:$0xff] }
 0x6a5   : > { %12826 = vmatprep.subr.bf16.mxu1 %v12825_v27  ;;  %12894 = vmatpush3.bf16.msra.mxu0 %v12893_v10  ;;  %v12975_v27 = vpack.c.bf16 %v10398_v58, %v10395_v48  ;;  %v5393_v10 = vld [vmem:[%s21093_s7 + $0x2e8] sm:$0xff]  ;;  %v12977_v35 = vpack.c.bf16 %v10350_v24, %v10347_v15  ;;  %v10368_v48 = vld [vmem:[%s21093_s7 + $0x7d8] sm:$0xff]  ;;  %v6470_v58 = vrot.slane %v18524_v31, 2  ;;  %v10371_v24 = vld [vmem:[%s21093_s7 + $0x7f0] sm:$0xff] }
 0x6a6   : > { %12968 = vmatprep.subr.bf16.mxu0 %v12967_v44  ;;  %v10404_v44 = vld [vmem:[%s21093_s7 + $0x8f8] sm:$0xff]  ;;  %v12847_v40 = vpack.c.bf16 %v5393_v10, %v5390_v39  ;;  %v10374_v39 = vld [vmem:[%s21093_s7 + $0x808] sm:$0xff]  ;;  %v10425_v10 = vld [vmem:[%s21093_s7 + $0x9a0] sm:$0xff] }
 0x6a7   : > { %6240 = vmatmul.mubr.f32.gmra.mrb[60].mxu0 %v18538_v11  ;;  %v12979_v17 = vpack.c.bf16 %v10404_v44, %v10401_v18  ;;  %v12993_v18 = vpack.c.bf16 %v10374_v39, %v10371_v24  ;;  %v19153_v37 = vsel %vm1480_vm5, %v6470_v58, %v6477_v25  ;;  %v6348_v39 = vld [vmem:[#allocation5 + $0x78] sm:$0x3] }
 0x6a8   : > { %12828 = vmatpush1.bf16.msra.mxu1 %v12827_v59  ;;  %6244 = vmatprep.mubr.f32.mxu0 %v18577_v57  ;;  %v5397_v59 = vld [vmem:[%s21093_s7 + $0x308] sm:$0xff] }
 0x6a9   : > { %12830 = vmatprep.subr.bf16.mxu1 %v12829_v14  ;;  %v5400_v14 = vld [vmem:[%s21093_s7 + $0x320] sm:$0xff] }
 0x6ab   : > { %6245 = vmatmul.mubr.f32.gmra.mrb[62].mxu0 %v18562_v20 }
 0x6ac   : > { %12832 = vmatpush1.bf16.msra.mxu1 %v12831_v29  ;;  %6249 = vmatprep.mubr.f32.mxu0 %v18595_v19  ;;  %v10356_v29 = vld [vmem:[%s21093_s7 + $0x778] sm:$0xff] }
 0x6ad   : > { %12834 = vmatprep.subr.bf16.mxu1 %v12833_v52  ;;  %v12849_v52 = vpack.c.bf16 %v5400_v14, %v5397_v59  ;;  %v10377_v59 = vld [vmem:[%s21093_s7 + $0x820] sm:$0xff]  ;;  %v10380_v14 = vld [vmem:[%s21093_s7 + $0x838] sm:$0xff] }
 0x6af   : > { %6250 = vmatmul.mubr.f32.gmra.mrb[64].mxu0 %v18582_v23 }
 0x6b0   : > { %12836 = vmatpush1.bf16.msra.mxu1 %v12835_v53  ;;  %11283 = vmatprep.mubr.msk.f32.mxu0 %vm13756_vm9, %v21133_v26  ;;  %v5403_v53 = vld [vmem:[%s21093_s7 + $0x338] sm:$0xff] }
 0x6b1   : > { %12838 = vmatprep.subr.bf16.mxu1 %v12837_v16  ;;  %v12981_v16 = vpack.c.bf16 %v10356_v29, %v10353_v41  ;;  %v10336_v41 = vld [vmem:[%s21093_s7 + $0x6d8] sm:$0xff] }
 0x6b3   : > { %11284 = vmatmul.mubr.msk.f32.vlgmr.msra.gmra.mrb[66].mxu0 %vm5274_vm4, %v18963_v51 }
 0x6b4   : > { %12970 = vmatpush3.bf16.msra.mxu0 %v12969_v45  ;;  %12840 = vmatpush1.bf16.msra.mxu1 %v12839_v61  ;;  %v12853_v45 = vpack.c.bf16 %v5406_v60, %v5403_v53  ;;  %v5402_v61 = vld [vmem:[%s21093_s7 + $0x330] sm:$0xff]  ;;  %v6467_v53 = vrot.slane %v18511_v3, 2 }
 0x6b5   : > { %11286 = vmatprep.mubr.msk.f32.mxu0 %vm13756_vm9, %v21133_v26  ;;  %12972 = vmatprep.subr.bf16.mxu0 %v12971_v50  ;;  %v12985_v50 = vpack.c.bf16 %v10362_v42, %v10359_v5  ;;  %v12855_v38 = vpack.c.bf16 %v5405_v4, %v5402_v61  ;;  %v6475_v42 = vrot.slane %v18538_v11, 2  ;;  %v10345_v61 = vld [vmem:[%s21093_s7 + $0x720] sm:$0xff] }
 0x6b6   : > { %12842 = vmatprep.subr.bf16.mxu1 %v12841_v36  ;;  %v10365_v36 = vld [vmem:[%s21093_s7 + $0x7c0] sm:$0xff] }
 0x6b7   : > { %11287 = vmatmul.mubr.msk.f32.gmra.mrb[68].mxu0 %vm5274_vm4, %v18605_v30  ;;  %v12989_v15 = vpack.c.bf16 %v10368_v48, %v10365_v36  ;;  %v19165_v4 = vsel %vm1480_vm5, %v6467_v53, %v6475_v42  ;;  %v6349_v48 = vld [vmem:[#allocation5 + $0x80] sm:$0x3] }
 0x6b8   : > { %12974 = vmatpush3.bf16.msra.mxu0 %v12973_v21  ;;  %12844 = vmatpush1.bf16.msra.mxu1 %v12843_v49  ;;  %v10422_v21 = vld [vmem:[%s21093_s7 + $0x988] sm:$0xff] }
 0x6b9   : > { %11289 = vmatprep.mubr.msk.f32.mxu0 %vm13756_vm9, %v21133_v26  ;;  %12976 = vmatprep.subr.bf16.mxu0 %v12975_v27  ;;  %v12991_v27 = vpack.c.bf16 %v10422_v21, %v10419_v56  ;;  %v6487_v21 = vrot.slane %v18582_v23, 2 }
 0x6ba   : > { %12846 = vmatprep.subr.bf16.mxu1 %v12845_v43  ;;  %v10428_v43 = vld [vmem:[%s21093_s7 + $0x9b8] sm:$0xff] }
 0x6bb   : > { %11290 = vmatmul.mubr.msk.f32.gmra.mrb[70].mxu0 %vm5274_vm4, %v18624_v28  ;;  %v12995_v44 = vpack.c.bf16 %v10428_v43, %v10425_v10  ;;  %v10501_v10 = vld [vmem:[%s21093_s7 + $0xbb0] sm:$0xff]  ;;  %v10504_v43 = vld [vmem:[%s21093_s7 + $0xbc8] sm:$0xff] }
 0x6bc   : > { %12978 = vmatpush3.bf16.msra.mxu0 %v12977_v35  ;;  %12848 = vmatpush1.bf16.msra.mxu1 %v12847_v40  ;;  %v6345_v35 = vld [vmem:[#allocation5] sm:$0xfc]  ;;  %v12997_v40 = vpack.c.bf16 %v10380_v14, %v10377_v59  ;;  %v10357_v59 = vld [vmem:[%s21093_s7 + $0x780] sm:$0xff]  ;;  %v10360_v14 = vld [vmem:[%s21093_s7 + $0x798] sm:$0xff] }
 0x6bd   : > { %11292 = vmatprep.mubr.msk.f32.mxu0 %vm13756_vm9, %v21133_v26  ;;  %12980 = vmatprep.subr.bf16.mxu0 %v12979_v17  ;;  %v10333_v17 = vld [vmem:[%s21093_s7 + $0x6c0] sm:$0xff]  ;;  %v6466_v29 = vrot.slane %v6345_v35, 2 }
 0x6be   : > { %12850 = vmatprep.subr.bf16.mxu1 %v12849_v52  ;;  %v10340_v52 = vld [vmem:[%s21093_s7 + $0x6f8] sm:$0xff]  ;;  %v12897_v60 = vpack.c.bf16 %v10336_v41, %v10333_v17  ;;  %v13077_v17 = vpack.c.bf16 %v10504_v43, %v10501_v10  ;;  %v10519_v10 = vld [vmem:[%s21093_s7 + $0xc40] sm:$0xff] }
 0x6bf   : > { %6040 = vmatmul.mubr.f32.vlgmr.msra.gmra.mrb[58].mxu1 %v18865_v46  ;;  %11293 = vmatmul.mubr.msk.f32.gmra.mrb[72].mxu0 %vm5274_vm4, %v18655_v54  ;;  %v10334_v46 = vld [vmem:[%s21093_s7 + $0x6c8] sm:$0xff]  ;;  %v19140_v5 = vsel %vm1480_vm5, %v6466_v29, %v6467_v53  ;;  %v10364_v41 = vld [vmem:[%s21093_s7 + $0x7b8] sm:$0xff]  ;;  %v10367_v29 = vld [vmem:[%s21093_s7 + $0x7d0] sm:$0xff] }
 0x6c0   : > { %12982 = vmatpush3.bf16.msra.mxu0 %v12981_v16  ;;  %6045 = vmatprep.mubr.f32.mxu1 %v18524_v31  ;;  %v12895_v49 = vpack.c.bf16 %v10337_v8, %v10334_v46  ;;  %v19085_v31 = vsel %vm1480_vm5, %v6469_v6, %v6470_v58  ;;  %v12899_v16 = vpack.c.bf16 %v10343_v12, %v10340_v52  ;;  %v10355_v6 = vld [vmem:[%s21093_s7 + $0x770] sm:$0xff]  ;;  %v6489_v8 = vrot.slane %v18595_v19, 2  ;;  %v10456_v53 = vld [vmem:[%s21093_s7 + $0xa48] sm:$0xff]  ;;  %v10522_v43 = vld [vmem:[%s21093_s7 + $0xc58] sm:$0xff] }
 0x6c1   : > { %12852 = vmatpush1.bf16.msra.mxu1 %v12851_v9  ;;  %11295 = vmatprep.mubr.msk.f32.mxu0 %vm13756_vm9, %v21133_v26  ;;  %v10339_v9 = vld [vmem:[%s21093_s7 + $0x6f0] sm:$0xff]  ;;  %v19178_v46 = vsel %vm1480_vm5, %v6477_v25, %v6483_v62  ;;  %v12913_v12 = vpack.c.bf16 %v10360_v14, %v10357_v59  ;;  %v6347_v25 = vld [vmem:[#allocation5 + $0x10] sm:$0xfc] }
 0x6c2   : > { %12984 = vmatprep.subr.bf16.mxu0 %v12983_v32  ;;  %12854 = vmatprep.subr.bf16.mxu1 %v12853_v45  ;;  %v13000_v32 = vpack.c.bf16 %v10434_v2, %v10431_v22  ;;  %v19210_v24 = vsel %vm1480_vm5, %v6483_v62, %v6489_v8  ;;  %v10453_v22 = vld [vmem:[%s21093_s7 + $0xa30] sm:$0xff]  ;;  %v12915_v2 = vpack.c.bf16 %v10367_v29, %v10364_v41  ;;  %v10471_v14 = vld [vmem:[%s21093_s7 + $0xac0] sm:$0xff]  ;;  %v10384_v29 = vld [vmem:[%s21093_s7 + $0x858] sm:$0xff] }
 0x6c3   : > { %6046 = vmatmul.mubr.f32.gmra.mrb[60].mxu1 %v18511_v3  ;;  %11296 = vmatmul.mubr.msk.f32.gmra.mrb[74].mxu0 %vm5274_vm4, %v18688_v1  ;;  %v10346_v3 = vld [vmem:[%s21093_s7 + $0x728] sm:$0xff]  ;;  %v13079_v62 = vpack.c.bf16 %v10456_v53, %v10453_v22  ;;  %v10381_v41 = vld [vmem:[%s21093_s7 + $0x840] sm:$0xff]  ;;  %v6491_v22 = vrot.slane %v18688_v1, 2 }
 0x6c4   : > { %12986 = vmatpush3.bf16.msra.mxu0 %v12985_v50  ;;  %6051 = vmatprep.mubr.f32.mxu1 %v18544_v34  ;;  %v10342_v34 = vld [vmem:[%s21093_s7 + $0x708] sm:$0xff]  ;;  %v12903_v45 = vpack.c.bf16 %v10349_v55, %v10346_v3  ;;  %v10352_v50 = vld [vmem:[%s21093_s7 + $0x758] sm:$0xff] }
 0x6c5   : > { %6773 = vmatprep.mubr.f32.mxu0 %v19085_v31  ;;  %12988 = vmatprep.subr.bf16.mxu0 %v12987_v47  ;;  %v10440_v47 = vld [vmem:[%s21093_s7 + $0xa18] sm:$0xff]  ;;  %v12907_v58 = vpack.c.bf16 %v10355_v6, %v10352_v50  ;;  %v10370_v55 = vld [vmem:[%s21093_s7 + $0x7e8] sm:$0xff] }
 0x6c6   : > { %12856 = vmatpush1.bf16.msra.mxu1 %v12855_v38  ;;  %v10354_v38 = vld [vmem:[%s21093_s7 + $0x768] sm:$0xff]  ;;  %v10510_v3 = vld [vmem:[%s21093_s7 + $0xbf8] sm:$0xff] }
 0x6c7   : > { %6052 = vmatmul.mubr.f32.gmra.mrb[62].mxu1 %v18538_v11  ;;  %12896 = vmatprep.subr.bf16.mxu1 %v12895_v49  ;;  %v12901_v11 = vpack.c.bf16 %v10342_v34, %v10339_v9  ;;  %v10358_v49 = vld [vmem:[%s21093_s7 + $0x788] sm:$0xff]  ;;  %v6473_v34 = vrot.slane %v18605_v30, 2 }
 0x6c8   : > { %12990 = vmatpush3.bf16.msra.mxu0 %v12989_v15  ;;  %6057 = vmatprep.mubr.f32.mxu1 %v18577_v57  ;;  %v6481_v57 = vrot.slane %v18562_v20, 2  ;;  %v10361_v15 = vld [vmem:[%s21093_s7 + $0x7a0] sm:$0xff]  ;;  %v10528_v53 = vld [vmem:[%s21093_s7 + $0xc88] sm:$0xff] }
 0x6c9   : > { %12992 = vmatprep.subr.bf16.mxu0 %v12991_v27 }
 0x6ca   : > { %v19196_v56 = vsel %vm1480_vm5, %v6475_v42, %v6481_v57  ;;  %v19227_v35 = vsel %vm1480_vm5, %v6481_v57, %v6487_v21  ;;  %v10507_v42 = vld [vmem:[%s21093_s7 + $0xbe0] sm:$0xff]  ;;  %v10372_v57 = vld [vmem:[%s21093_s7 + $0x7f8] sm:$0xff] }
 0x6cb   : > { %6058 = vmatmul.mubr.f32.gmra.mrb[64].mxu1 %v18562_v20  ;;  %v10437_v20 = vld [vmem:[%s21093_s7 + $0xa00] sm:$0xff] }
 0x6cc   : > { %12994 = vmatpush3.bf16.msra.mxu0 %v12993_v18  ;;  %6063 = vmatprep.mubr.f32.mxu1 %v18595_v19  ;;  %v10351_v19 = vld [vmem:[%s21093_s7 + $0x750] sm:$0xff]  ;;  %v13003_v27 = vpack.c.bf16 %v10440_v47, %v10437_v20  ;;  %v10516_v47 = vld [vmem:[%s21093_s7 + $0xc28] sm:$0xff] }
 0x6cd   : > { %12996 = vmatprep.subr.bf16.mxu0 %v12995_v44  ;;  %v12909_v18 = vpack.c.bf16 %v10354_v38, %v10351_v19  ;;  %v12911_v44 = vpack.c.bf16 %v10361_v15, %v10358_v49  ;;  %v10513_v20 = vld [vmem:[%s21093_s7 + $0xc10] sm:$0xff]  ;;  %v10378_v15 = vld [vmem:[%s21093_s7 + $0x828] sm:$0xff] }
 0x6ce   : > { %v10465_v19 = vld [vmem:[%s21093_s7 + $0xa90] sm:$0xff]  ;;  %v13085_v38 = vpack.c.bf16 %v10516_v47, %v10513_v20 }
 0x6cf   : > { %6064 = vmatmul.mubr.f32.gmra.mrb[66].mxu1 %v18582_v23  ;;  %v6495_v23 = vrot.slane %v6349_v48, 2  ;;  %v10379_v48 = vld [vmem:[%s21093_s7 + $0x830] sm:$0xff] }
 0x6d0   : > { %12998 = vmatpush3.bf16.msra.mxu0 %v12997_v40  ;;  %6134 = vmatprep.mubr.f32.mxu1 %v21133_v26  ;;  %v6493_v40 = vrot.slane %v6348_v39, 2  ;;  %v10375_v49 = vld [vmem:[%s21093_s7 + $0x810] sm:$0xff]  ;;  %v6485_v39 = vrot.slane %v18655_v54, 2 }
 0x6d1   : > { %12999 = vmatprep.subr.bf16.mxu0 %v21130_v7  ;;  %v19239_v52 = vsel %vm1480_vm5, %v6489_v8, %v6495_v23  ;;  %v6479_v8 = vrot.slane %v18624_v28, 2  ;;  %v12925_v59 = vpack.c.bf16 %v10378_v15, %v10375_v49  ;;  %v19422_v15 = vld [vmem:[#allocation5 + $0x20] sm:$0xff] }
 0x6d2   : > { %v19256_v9 = vsel %vm1480_vm5, %v6487_v21, %v6493_v40  ;;  %v10468_v21 = vld [vmem:[%s21093_s7 + $0xaa8] sm:$0xff]  ;;  %v13089_v40 = vpack.c.bf16 %v10522_v43, %v10519_v10  ;;  %v10400_v43 = vld [vmem:[%s21093_s7 + $0x8d8] sm:$0xff] }
 0x6d3   : > { %6774 = vmatmul.mubr.f32.vlgmr.msra.gmra.mrb[76].mxu0 %v19140_v5  ;;  %10323 = vmatmul.mubr.msk.f32.vlgmr.msra.gmra.mrb[58].mxu1 %vm5274_vm4, %v18963_v51  ;;  %v10348_v51 = vld [vmem:[%s21093_s7 + $0x738] sm:$0xff]  ;;  %v10540_v10 = vld [vmem:[%s21093_s7 + $0xce8] sm:$0xff] }
 0x6d4   : > { %12898 = vmatpush1.bf16.msra.mxu1 %v12897_v60  ;;  %6778 = vmatprep.mubr.f32.mxu0 %v19153_v37  ;;  %v12905_v36 = vpack.c.bf16 %v10348_v51, %v10345_v61  ;;  %v10363_v60 = vld [vmem:[%s21093_s7 + $0x7b0] sm:$0xff]  ;;  %v13081_v61 = vpack.c.bf16 %v10510_v3, %v10507_v42  ;;  %v10462_v51 = vld [vmem:[%s21093_s7 + $0xa78] sm:$0xff]  ;;  %v12929_v42 = vpack.c.bf16 %v10384_v29, %v10381_v41 }
 0x6d5   : > { %6140 = vmatprep.mubr.f32.mxu1 %v21133_v26  ;;  %12900 = vmatprep.subr.bf16.mxu1 %v12899_v16  ;;  %v10366_v16 = vld [vmem:[%s21093_s7 + $0x7c8] sm:$0xff]  ;;  %v10477_v3 = vld [vmem:[%s21093_s7 + $0xaf0] sm:$0xff] }
 0x6d6   : > { %13001 = vmatpush3.bf16.msra.mxu0 %v13000_v32  ;;  %v6472_v32 = vrot.slane %v6347_v25, 2  ;;  %v10399_v29 = vld [vmem:[%s21093_s7 + $0x8d0] sm:$0xff] }
 0x6d7   : > { %6779 = vmatmul.mubr.f32.gmra.mrb[78].mxu0 %v19165_v4  ;;  %10324 = vmatmul.mubr.msk.f32.gmra.mrb[60].mxu1 %vm5274_vm4, %v18605_v30  ;;  %v10373_v30 = vld [vmem:[%s21093_s7 + $0x800] sm:$0xff] }
 0x6d8   : > { %12902 = vmatpush1.bf16.msra.mxu1 %v12901_v11  ;;  %6783 = vmatprep.mubr.f32.mxu0 %v19178_v46  ;;  %v12917_v11 = vpack.c.bf16 %v10366_v16, %v10363_v60  ;;  %v19290_v50 = vsel %vm1480_vm5, %v6472_v32, %v6473_v34  ;;  %v12919_v6 = vpack.c.bf16 %v10373_v30, %v10370_v55  ;;  %v10388_v60 = vld [vmem:[%s21093_s7 + $0x878] sm:$0xff]  ;;  %v10391_v16 = vld [vmem:[%s21093_s7 + $0x890] sm:$0xff]  ;;  %v10480_v32 = vld [vmem:[%s21093_s7 + $0xb08] sm:$0xff] }
 0x6d9   : > { %6146 = vmatprep.mubr.f32.mxu1 %v21133_v26  ;;  %12904 = vmatprep.subr.bf16.mxu1 %v12903_v45  ;;  %v10459_v45 = vld [vmem:[%s21093_s7 + $0xa60] sm:$0xff]  ;;  %v6905_v55 = vld [vmem:[#allocation5 + $0x8] sm:$0xf8]  ;;  %v13095_v20 = vpack.c.bf16 %v10480_v32, %v10477_v3 }
 0x6da   : > { %13002 = vmatprep.subr.bf16.mxu0 %v21130_v7  ;;  %v10408_v32 = vld [vmem:[%s21093_s7 + $0x918] sm:$0xff] }
 0x6db   : > { %6784 = vmatmul.mubr.f32.gmra.mrb[80].mxu0 %v19196_v56  ;;  %10325 = vmatmul.mubr.msk.f32.gmra.mrb[62].mxu1 %vm5274_vm4, %v18624_v28  ;;  %v13083_v28 = vpack.c.bf16 %v10462_v51, %v10459_v45  ;;  %v19386_v45 = vsel %vm1480_vm5, %v6485_v39, %v6491_v22 }
 0x6dc   : > { %12906 = vmatpush1.bf16.msra.mxu1 %v12905_v36  ;;  %6788 = vmatprep.mubr.f32.mxu0 %v19210_v24  ;;  %v10376_v36 = vld [vmem:[%s21093_s7 + $0x818] sm:$0xff] }
 0x6dd   : > { %6152 = vmatprep.mubr.f32.mxu1 %v21133_v26  ;;  %12908 = vmatprep.subr.bf16.mxu1 %v12907_v58  ;;  %v12923_v23 = vpack.c.bf16 %v10379_v48, %v10376_v36  ;;  %v7028_v36 = vrot.slane %v6905_v55, 3  ;;  %v10483_v48 = vld [vmem:[%s21093_s7 + $0xb20] sm:$0xff]  ;;  %v10498_v55 = vld [vmem:[%s21093_s7 + $0xb98] sm:$0xff] }
 0x6de   : > { %13004 = vmatpush3.bf16.msra.mxu0 %v13003_v27  ;;  %v19322_v27 = vsel %vm1480_vm5, %v6473_v34, %v6479_v8 }
 0x6df   : > { %6789 = vmatmul.mubr.f32.gmra.mrb[82].mxu0 %v19227_v35  ;;  %10326 = vmatmul.mubr.msk.f32.gmra.mrb[64].mxu1 %vm5274_vm4, %v18655_v54  ;;  %v13087_v54 = vpack.c.bf16 %v10468_v21, %v10465_v19  ;;  %v10393_v19 = vld [vmem:[%s21093_s7 + $0x8a0] sm:$0xff]  ;;  %v10537_v21 = vld [vmem:[%s21093_s7 + $0xcd0] sm:$0xff] }
 0x6e0   : > { %12910 = vmatpush1.bf16.msra.mxu1 %v12909_v18  ;;  %6793 = vmatprep.mubr.f32.mxu0 %v19239_v52  ;;  %v10382_v18 = vld [vmem:[%s21093_s7 + $0x848] sm:$0xff] }
 0x6e1   : > { %6158 = vmatprep.mubr.f32.mxu1 %v21133_v26  ;;  %12912 = vmatprep.subr.bf16.mxu1 %v12911_v44  ;;  %v10385_v44 = vld [vmem:[%s21093_s7 + $0x860] sm:$0xff] }
 0x6e2   : > { %13078 = vmatprep.subr.bf16.mxu0 %v13077_v17  ;;  %v10474_v17 = vld [vmem:[%s21093_s7 + $0xad8] sm:$0xff]  ;;  %v12927_v25 = vpack.c.bf16 %v10385_v44, %v10382_v18  ;;  %v10403_v18 = vld [vmem:[%s21093_s7 + $0x8f0] sm:$0xff] }
 0x6e3   : > { %6794 = vmatmul.mubr.f32.gmra.mrb[84].mxu0 %v19256_v9  ;;  %10327 = vmatmul.mubr.msk.f32.gmra.mrb[66].mxu1 %vm5274_vm4, %v18688_v1  ;;  %v6350_v1 = vld [vmem:[#allocation5 + $0x88] sm:$0x3]  ;;  %v13091_v34 = vpack.c.bf16 %v10474_v17, %v10471_v14  ;;  %v10489_v14 = vld [vmem:[%s21093_s7 + $0xb50] sm:$0xff]  ;;  %v13101_v17 = vpack.c.bf16 %v10540_v10, %v10537_v21  ;;  %v12939_v41 = vpack.c.bf16 %v10403_v18, %v10400_v43  ;;  %v10417_v43 = vld [vmem:[%s21093_s7 + $0x960] sm:$0xff] }
 0x6e4   : > { %12914 = vmatpush1.bf16.msra.mxu1 %v12913_v12  ;;  %6583 = vmatprep.mubr.f32.mxu1 %v19085_v31  ;;  %v10369_v31 = vld [vmem:[%s21093_s7 + $0x7e0] sm:$0xff]  ;;  %v19354_v12 = vsel %vm1480_vm5, %v6479_v8, %v6485_v39  ;;  %v6497_v51 = vrot.slane %v6350_v1, 2  ;;  %v10420_v18 = vld [vmem:[%s21093_s7 + $0x978] sm:$0xff] }
 0x6e5   : > { %11306 = vmatprep.mubr.msk.f32.mxu0 %vm13756_vm9, %v21133_v26  ;;  %12916 = vmatprep.subr.bf16.mxu1 %v12915_v2  ;;  %v12921_v58 = vpack.c.bf16 %v10372_v57, %v10369_v31  ;;  %v10525_v2 = vld [vmem:[%s21093_s7 + $0xc70] sm:$0xff]  ;;  %v10531_v31 = vld [vmem:[%s21093_s7 + $0xca0] sm:$0xff]  ;;  %v10534_v57 = vld [vmem:[%s21093_s7 + $0xcb8] sm:$0xff] }
 0x6e6   : > { %v13093_v30 = vpack.c.bf16 %v10528_v53, %v10525_v2  ;;  %v10397_v8 = vld [vmem:[%s21093_s7 + $0x8c0] sm:$0xff]  ;;  %v19420_v49 = vsel %vm1480_vm5, %v6491_v22, %v6497_v51  ;;  %v10546_v2 = vld [vmem:[%s21093_s7 + $0xd18] sm:$0xff]  ;;  %v10406_v53 = vld [vmem:[%s21093_s7 + $0x908] sm:$0xff] }
 0x6e7   : > { %11307 = vmatmul.mubr.msk.f32.vlgmr.msra.gmra.mrb[86].mxu0 %vm5274_vm4, %v19290_v50  ;;  %v10543_v22 = vld [vmem:[%s21093_s7 + $0xd00] sm:$0xff] }
 0x6e8   : > { %13080 = vmatpush3.bf16.msra.mxu0 %v13079_v62  ;;  %12918 = vmatpush1.bf16.msra.mxu1 %v12917_v11  ;;  %v10387_v62 = vld [vmem:[%s21093_s7 + $0x870] sm:$0xff]  ;;  %v10390_v11 = vld [vmem:[%s21093_s7 + $0x888] sm:$0xff] }
 0x6e9   : > { %11309 = vmatprep.mubr.msk.f32.mxu0 %vm13756_vm9, %v21133_v26  ;;  %13082 = vmatprep.subr.bf16.mxu0 %v13081_v61  ;;  %v12931_v61 = vpack.c.bf16 %v10391_v16, %v10388_v60  ;;  %v12933_v47 = vpack.c.bf16 %v10390_v11, %v10387_v62  ;;  %v10409_v60 = vld [vmem:[%s21093_s7 + $0x920] sm:$0xff]  ;;  %v10412_v62 = vld [vmem:[%s21093_s7 + $0x938] sm:$0xff]  ;;  %v10415_v11 = vld [vmem:[%s21093_s7 + $0x950] sm:$0xff] }
 0x6ea   : > { %12920 = vmatprep.subr.bf16.mxu1 %v12919_v6  ;;  %v10394_v6 = vld [vmem:[%s21093_s7 + $0x8a8] sm:$0xff]  ;;  %v12943_v3 = vpack.c.bf16 %v10409_v60, %v10406_v53  ;;  %v10619_v60 = vld [vmem:[%s21093_s7 + $0xf10] sm:$0xff] }
 0x6eb   : > { %11310 = vmatmul.mubr.msk.f32.gmra.mrb[88].mxu0 %vm5274_vm4, %v19322_v27  ;;  %v12935_v39 = vpack.c.bf16 %v10397_v8, %v10394_v6  ;;  %v10411_v6 = vld [vmem:[%s21093_s7 + $0x930] sm:$0xff]  ;;  %v10414_v8 = vld [vmem:[%s21093_s7 + $0x948] sm:$0xff] }
 0x6ec   : > { %13084 = vmatpush3.bf16.msra.mxu0 %v13083_v28  ;;  %12922 = vmatpush1.bf16.msra.mxu1 %v12921_v58  ;;  %v10486_v28 = vld [vmem:[%s21093_s7 + $0xb38] sm:$0xff]  ;;  %v13097_v58 = vpack.c.bf16 %v10534_v57, %v10531_v31  ;;  %v12947_v57 = vpack.c.bf16 %v10415_v11, %v10412_v62  ;;  %v10430_v62 = vld [vmem:[%s21093_s7 + $0x9c8] sm:$0xff]  ;;  %v10433_v11 = vld [vmem:[%s21093_s7 + $0x9e0] sm:$0xff] }
 0x6ed   : > { %11312 = vmatprep.mubr.msk.f32.mxu0 %vm13756_vm9, %v21133_v26  ;;  %13086 = vmatprep.subr.bf16.mxu0 %v13085_v38  ;;  %v10396_v38 = vld [vmem:[%s21093_s7 + $0x8b8] sm:$0xff] }
 0x6ee   : > { %12924 = vmatprep.subr.bf16.mxu1 %v12923_v23  ;;  %v7029_v23 = vrot.slane %v19422_v15, 3 }
 0x6ef   : > { %11313 = vmatmul.mubr.msk.f32.gmra.mrb[90].mxu0 %vm5274_vm4, %v19354_v12 }
 0x6f0   : > { %13088 = vmatpush3.bf16.msra.mxu0 %v13087_v54  ;;  %12926 = vmatpush1.bf16.msra.mxu1 %v12925_v59  ;;  %v19439_v44 = vsel %vm2088_vm7, %v7028_v36, %v7029_v23  ;;  %v13099_v54 = vpack.c.bf16 %v10486_v28, %v10483_v48  ;;  %v12937_v59 = vpack.c.bf16 %v10396_v38, %v10393_v19  ;;  %v10421_v36 = vld [vmem:[%s21093_s7 + $0x980] sm:$0xff]  ;;  %v10549_v48 = vld [vmem:[%s21093_s7 + $0xd30] sm:$0xff]  ;;  %v10552_v28 = vld [vmem:[%s21093_s7 + $0xd48] sm:$0xff] }
 0x6f1   : > { %11315 = vmatprep.mubr.msk.f32.mxu0 %vm13756_vm9, %v21133_v26  ;;  %13090 = vmatprep.subr.bf16.mxu0 %v13089_v40  ;;  %v10492_v40 = vld [vmem:[%s21093_s7 + $0xb68] sm:$0xff] }
 0x6f2   : > { %12928 = vmatprep.subr.bf16.mxu1 %v12927_v25  ;;  %v10402_v25 = vld [vmem:[%s21093_s7 + $0x8e8] sm:$0xff]  ;;  %v13103_v16 = vpack.c.bf16 %v10492_v40, %v10489_v14  ;;  %v19521_v40 = vld [vmem:[#allocation5 + $0x30] sm:$0xff] }
 0x6f3   : > { %11316 = vmatmul.mubr.msk.f32.gmra.mrb[92].mxu0 %vm5274_vm4, %v19386_v45  ;;  %v12941_v1 = vpack.c.bf16 %v10402_v25, %v10399_v29  ;;  %v19505_v38 = vld [vmem:[#allocation5 + $0x18] sm:$0xff]  ;;  %v10555_v29 = vld [vmem:[%s21093_s7 + $0xd60] sm:$0xff]  ;;  %v10558_v25 = vld [vmem:[%s21093_s7 + $0xd78] sm:$0xff] }
 0x6f4   : > { %13092 = vmatpush3.bf16.msra.mxu0 %v13091_v34  ;;  %12930 = vmatpush1.bf16.msra.mxu1 %v12929_v42  ;;  %v10495_v34 = vld [vmem:[%s21093_s7 + $0xb80] sm:$0xff]  ;;  %v13105_v42 = vpack.c.bf16 %v10546_v2, %v10543_v22  ;;  %v7026_v21 = vrot.slane %v19505_v38, 3 }
 0x6f5   : > { %11318 = vmatprep.mubr.msk.f32.mxu0 %vm13756_vm9, %v21133_v26  ;;  %13094 = vmatprep.subr.bf16.mxu0 %v13093_v30  ;;  %v10405_v30 = vld [vmem:[%s21093_s7 + $0x900] sm:$0xff]  ;;  %v13107_v51 = vpack.c.bf16 %v10498_v55, %v10495_v34 }
 0x6f6   : > { %12932 = vmatprep.subr.bf16.mxu1 %v12931_v61  ;;  %v6904_v61 = vld [vmem:[#allocation5] sm:$0xf8]  ;;  %v12945_v31 = vpack.c.bf16 %v10408_v32, %v10405_v30  ;;  %v19539_v2 = vld [vmem:[#allocation5 + $0x50] sm:$0xff]  ;;  %v19558_v30 = vld [vmem:[#allocation5 + $0x48] sm:$0xff] }
 0x6f7   : > { %11319 = vmatmul.mubr.msk.f32.gmra.mrb[94].mxu0 %vm5274_vm4, %v19420_v49  ;;  %v7042_v53 = vrot.slane %v19539_v2, 3  ;;  %v7040_v32 = vrot.slane %v19558_v30, 3 }
 0x6f8   : > { %13096 = vmatpush3.bf16.msra.mxu0 %v13095_v20  ;;  %12934 = vmatpush1.bf16.msra.mxu1 %v12933_v47  ;;  %v10418_v20 = vld [vmem:[%s21093_s7 + $0x968] sm:$0xff]  ;;  %v7025_v47 = vrot.slane %v6904_v61, 3 }
 0x6f9   : > { %7332 = vmatprep.mubr.f32.mxu0 %v19439_v44  ;;  %13098 = vmatprep.subr.bf16.mxu0 %v13097_v58  ;;  %v19502_v58 = vld [vmem:[#allocation5 + $0x38] sm:$0xff]  ;;  %v12951_v10 = vpack.c.bf16 %v10421_v36, %v10418_v20  ;;  %v12959_v20 = vpack.c.bf16 %v10433_v11, %v10430_v62  ;;  %v19579_v36 = vld [vmem:[#allocation5 + $0x60] sm:$0xff]  ;;  %v10628_v62 = vld [vmem:[%s21093_s7 + $0xf58] sm:$0xff] }
 0x6fa   : > { %12936 = vmatprep.subr.bf16.mxu1 %v12935_v39  ;;  %v7036_v19 = vrot.slane %v19502_v58, 3  ;;  %v12949_v39 = vpack.c.bf16 %v10414_v8, %v10411_v6  ;;  %v19519_v14 = vsel %vm2088_vm7, %v7025_v47, %v7026_v21  ;;  %v6908_v8 = vld [vmem:[#allocation5 + $0x80] sm:$0x7] }
 0x6fc   : > { %13100 = vmatpush3.bf16.msra.mxu0 %v13099_v54  ;;  %12938 = vmatpush1.bf16.msra.mxu1 %v12937_v59  ;;  %v10424_v54 = vld [vmem:[%s21093_s7 + $0x998] sm:$0xff]  ;;  %v13110_v59 = vpack.c.bf16 %v10552_v28, %v10549_v48  ;;  %v19537_v22 = vsel %vm2088_vm7, %v7029_v23, %v7036_v19  ;;  %v10423_v23 = vld [vmem:[%s21093_s7 + $0x990] sm:$0xff]  ;;  %v7046_v48 = vrot.slane %v19579_v36, 3  ;;  %v10429_v28 = vld [vmem:[%s21093_s7 + $0x9c0] sm:$0xff] }
 0x6fd   : > { %13102 = vmatprep.subr.bf16.mxu0 %v13101_v17  ;;  %12940 = vmatprep.subr.bf16.mxu1 %v12939_v41  ;;  %v7034_v17 = vrot.slane %v19521_v40, 3  ;;  %v10427_v41 = vld [vmem:[%s21093_s7 + $0x9b0] sm:$0xff] }
 0x6fe   : > { %v12955_v34 = vpack.c.bf16 %v10427_v41, %v10424_v54 }
 0x6ff   : > { %v19556_v55 = vsel %vm2088_vm7, %v7026_v21, %v7034_v17  ;;  %v19577_v47 = vsel %vm2088_vm7, %v7034_v17, %v7040_v32 }
 0x700   : > { %13104 = vmatpush3.bf16.msra.mxu0 %v13103_v16  ;;  %12942 = vmatpush1.bf16.msra.mxu1 %v12941_v1  ;;  %v10622_v16 = vld [vmem:[%s21093_s7 + $0xf28] sm:$0xff]  ;;  %v12953_v1 = vpack.c.bf16 %v10420_v18, %v10417_v43  ;;  %v10436_v43 = vld [vmem:[%s21093_s7 + $0x9f8] sm:$0xff]  ;;  %v10439_v18 = vld [vmem:[%s21093_s7 + $0xa10] sm:$0xff] }
 0x701   : > { %13106 = vmatprep.subr.bf16.mxu0 %v13105_v42  ;;  %12944 = vmatprep.subr.bf16.mxu1 %v12943_v3  ;;  %v10426_v42 = vld [vmem:[%s21093_s7 + $0x9a8] sm:$0xff]  ;;  %v13113_v3 = vpack.c.bf16 %v10558_v25, %v10555_v29  ;;  %v13187_v61 = vpack.c.bf16 %v10622_v16, %v10619_v60  ;;  %v12963_v41 = vpack.c.bf16 %v10439_v18, %v10436_v43  ;;  %v10435_v29 = vld [vmem:[%s21093_s7 + $0x9f0] sm:$0xff]  ;;  %v10455_v16 = vld [vmem:[%s21093_s7 + $0xa40] sm:$0xff] }
 0x702   : > { %v12957_v6 = vpack.c.bf16 %v10426_v42, %v10423_v23  ;;  %v10438_v25 = vld [vmem:[%s21093_s7 + $0xa08] sm:$0xff]  ;;  %v10583_v43 = vld [vmem:[%s21093_s7 + $0xdf0] sm:$0xff] }
 0x703   : > { %v10452_v60 = vld [vmem:[%s21093_s7 + $0xa28] sm:$0xff]  ;;  %v12965_v23 = vpack.c.bf16 %v10438_v25, %v10435_v29  ;;  %v10589_v25 = vld [vmem:[%s21093_s7 + $0xe20] sm:$0xff] }
 0x704   : > { %13108 = vmatpush3.bf16.msra.mxu0 %v13107_v51  ;;  %12946 = vmatpush1.bf16.msra.mxu1 %v12945_v31  ;;  %v19570_v51 = vsel %vm2088_vm7, %v7036_v19, %v7042_v53  ;;  %v19572_v31 = vld [vmem:[#allocation5 + $0x68] sm:$0xff]  ;;  %v13005_v11 = vpack.c.bf16 %v10455_v16, %v10452_v60  ;;  %v10586_v18 = vld [vmem:[%s21093_s7 + $0xe08] sm:$0xff] }
 0x705   : > { %12948 = vmatprep.subr.bf16.mxu1 %v12947_v57  ;;  %13109 = vmatprep.subr.bf16.mxu0 %v21130_v7  ;;  %v7048_v57 = vrot.slane %v19572_v31, 3  ;;  %v10432_v19 = vld [vmem:[%s21093_s7 + $0x9d8] sm:$0xff]  ;;  %v13197_v29 = vpack.c.bf16 %v10586_v18, %v10583_v43  ;;  %v10649_v43 = vld [vmem:[%s21093_s7 + $0x1000] sm:$0xff] }
 0x706   : > { %v12961_v54 = vpack.c.bf16 %v10432_v19, %v10429_v28  ;;  %v10631_v28 = vld [vmem:[%s21093_s7 + $0xf70] sm:$0xff]  ;;  %v10634_v19 = vld [vmem:[%s21093_s7 + $0xf88] sm:$0xff]  ;;  %v10592_v16 = vld [vmem:[%s21093_s7 + $0xe38] sm:$0xff] }
 0x707   : > { %7333 = vmatmul.mubr.f32.vlgmr.msra.gmra.mrb[96].mxu0 %v19519_v14  ;;  %v19590_v21 = vsel %vm2088_vm7, %v7042_v53, %v7048_v57  ;;  %v10652_v18 = vld [vmem:[%s21093_s7 + $0x1018] sm:$0xff] }
 0x708   : > { %7337 = vmatprep.mubr.f32.mxu0 %v19537_v22  ;;  %12950 = vmatpush1.bf16.msra.mxu1 %v12949_v39  ;;  %v7054_v39 = vrot.slane %v6908_v8, 3  ;;  %v10577_v8 = vld [vmem:[%s21093_s7 + $0xdc0] sm:$0xff] }
 0x709   : > { %12952 = vmatprep.subr.bf16.mxu1 %v12951_v10  ;;  %13111 = vmatpush3.bf16.msra.mxu0 %v13110_v59  ;;  %v6907_v10 = vld [vmem:[#allocation5 + $0x78] sm:$0x7]  ;;  %v19600_v59 = vsel %vm2088_vm7, %v7040_v32, %v7046_v48 }
 0x70a   : > { %13112 = vmatprep.subr.bf16.mxu0 %v21130_v7  ;;  %v7052_v17 = vrot.slane %v6907_v10, 3  ;;  %v19611_v53 = vsel %vm2088_vm7, %v7048_v57, %v7054_v39  ;;  %v13195_v10 = vpack.c.bf16 %v10634_v19, %v10631_v28  ;;  %v10460_v28 = vld [vmem:[%s21093_s7 + $0xa68] sm:$0xff] }
 0x70b   : > { %7338 = vmatmul.mubr.f32.gmra.mrb[98].mxu0 %v19556_v55 }
 0x70c   : > { %7342 = vmatprep.mubr.f32.mxu0 %v19570_v51  ;;  %12954 = vmatpush1.bf16.msra.mxu1 %v12953_v1  ;;  %v6906_v1 = vld [vmem:[#allocation5 + $0x10] sm:$0xf8]  ;;  %v19628_v42 = vsel %vm2088_vm7, %v7046_v48, %v7052_v17 }
 0x70d   : > { %12956 = vmatprep.subr.bf16.mxu1 %v12955_v34  ;;  %13114 = vmatpush3.bf16.msra.mxu0 %v13113_v3  ;;  %v10574_v34 = vld [vmem:[%s21093_s7 + $0xda8] sm:$0xff]  ;;  %v19630_v3 = vld [vmem:[#allocation5 + $0x28] sm:$0xff]  ;;  %v10637_v17 = vld [vmem:[%s21093_s7 + $0xfa0] sm:$0xff] }
 0x70e   : > { %13188 = vmatprep.subr.bf16.mxu0 %v13187_v61  ;;  %v7032_v32 = vrot.slane %v19630_v3, 3  ;;  %v7031_v61 = vrot.slane %v6906_v1, 3 }
 0x70f   : > { %7343 = vmatmul.mubr.f32.gmra.mrb[100].mxu0 %v19577_v47 }
 0x710   : > { %7347 = vmatprep.mubr.f32.mxu0 %v19590_v21  ;;  %12958 = vmatpush1.bf16.msra.mxu1 %v12957_v6  ;;  %v19651_v48 = vsel %vm2088_vm7, %v7031_v61, %v7032_v32  ;;  %v13201_v61 = vpack.c.bf16 %v10592_v16, %v10589_v25  ;;  %v10604_v16 = vld [vmem:[%s21093_s7 + $0xe98] sm:$0xff] }
 0x711   : > { %12960 = vmatprep.subr.bf16.mxu1 %v12959_v20  ;;  %v10580_v20 = vld [vmem:[%s21093_s7 + $0xdd8] sm:$0xff] }
 0x712   : > { %v13193_v39 = vpack.c.bf16 %v10580_v20, %v10577_v8  ;;  %v10598_v20 = vld [vmem:[%s21093_s7 + $0xe68] sm:$0xff] }
 0x713   : > { %7348 = vmatmul.mubr.f32.gmra.mrb[102].mxu0 %v19600_v59  ;;  %6584 = vmatmul.mubr.f32.vlgmr.msra.gmra.mrb[58].mxu1 %v19140_v5  ;;  %v10571_v5 = vld [vmem:[%s21093_s7 + $0xd90] sm:$0xff] }
 0x714   : > { %7352 = vmatprep.mubr.f32.mxu0 %v19611_v53  ;;  %6589 = vmatprep.mubr.f32.mxu1 %v19153_v37  ;;  %v10625_v37 = vld [vmem:[%s21093_s7 + $0xf40] sm:$0xff]  ;;  %v13189_v57 = vpack.c.bf16 %v10574_v34, %v10571_v5 }
 0x715   : > { %12962 = vmatpush1.bf16.msra.mxu1 %v12961_v54  ;;  %v13191_v6 = vpack.c.bf16 %v10628_v62, %v10625_v37  ;;  %v19707_v5 = vld [vmem:[#allocation5 + $0x70] sm:$0xff]  ;;  %v10458_v37 = vld [vmem:[%s21093_s7 + $0xa58] sm:$0xff]  ;;  %v10461_v62 = vld [vmem:[%s21093_s7 + $0xa70] sm:$0xff] }
 0x716   : > { %12964 = vmatprep.subr.bf16.mxu1 %v12963_v41  ;;  %v10640_v41 = vld [vmem:[%s21093_s7 + $0xfb8] sm:$0xff]  ;;  %v7050_v34 = vrot.slane %v19707_v5, 3 }
 0x717   : > { %7353 = vmatmul.mubr.f32.gmra.mrb[104].mxu0 %v19628_v42  ;;  %6590 = vmatmul.mubr.f32.gmra.mrb[60].mxu1 %v19165_v4  ;;  %v19653_v4 = vld [vmem:[#allocation5 + $0x40] sm:$0xff]  ;;  %v13199_v60 = vpack.c.bf16 %v10640_v41, %v10637_v17  ;;  %v10467_v17 = vld [vmem:[%s21093_s7 + $0xaa0] sm:$0xff] }
 0x718   : > { %6595 = vmatprep.mubr.f32.mxu1 %v19178_v46  ;;  %11329 = vmatprep.mubr.msk.f32.mxu0 %vm13756_vm9, %v21133_v26  ;;  %v7038_v46 = vrot.slane %v19653_v4, 3 }
 0x719   : > { %12966 = vmatpush1.bf16.msra.mxu1 %v12965_v23  ;;  %v10643_v23 = vld [vmem:[%s21093_s7 + $0xfd0] sm:$0xff] }
 0x71a   : > { %13006 = vmatprep.subr.bf16.mxu1 %v13005_v11  ;;  %v19675_v54 = vsel %vm2088_vm7, %v7032_v32, %v7038_v46  ;;  %v10646_v32 = vld [vmem:[%s21093_s7 + $0xfe8] sm:$0xff]  ;;  %v6909_v11 = vld [vmem:[#allocation5 + $0x88] sm:$0x7] }
 0x71b   : > { %11330 = vmatmul.mubr.msk.f32.vlgmr.msra.gmra.mrb[106].mxu0 %vm5274_vm4, %v19651_v48  ;;  %6596 = vmatmul.mubr.f32.gmra.mrb[62].mxu1 %v19196_v56  ;;  %v19677_v56 = vld [vmem:[#allocation5 + $0x58] sm:$0xff]  ;;  %v13203_v8 = vpack.c.bf16 %v10646_v32, %v10643_v23  ;;  %v7588_v32 = vrot.slane %v19422_v15, 4 }
 0x71c   : > { %13190 = vmatpush3.bf16.msra.mxu0 %v13189_v57  ;;  %6601 = vmatprep.mubr.f32.mxu1 %v19210_v24  ;;  %v7044_v24 = vrot.slane %v19677_v56, 3 }
 0x71d   : > { %11332 = vmatprep.mubr.msk.f32.mxu0 %vm13756_vm9, %v21133_v26  ;;  %13192 = vmatprep.subr.bf16.mxu0 %v13191_v6  ;;  %v10595_v6 = vld [vmem:[%s21093_s7 + $0xe50] sm:$0xff] }
 0x71e   : > { %v19705_v1 = vsel %vm2088_vm7, %v7038_v46, %v7044_v24  ;;  %v10457_v46 = vld [vmem:[%s21093_s7 + $0xa50] sm:$0xff]  ;;  %v19741_v19 = vsel %vm2088_vm7, %v7044_v24, %v7050_v34  ;;  %v10464_v24 = vld [vmem:[%s21093_s7 + $0xa88] sm:$0xff]  ;;  %v13205_v41 = vpack.c.bf16 %v10598_v20, %v10595_v6 }
 0x71f   : > { %11333 = vmatmul.mubr.msk.f32.gmra.mrb[108].mxu0 %vm5274_vm4, %v19675_v54  ;;  %6602 = vmatmul.mubr.f32.gmra.mrb[64].mxu1 %v19227_v35  ;;  %v10451_v35 = vld [vmem:[%s21093_s7 + $0xa20] sm:$0xff]  ;;  %v10610_v20 = vld [vmem:[%s21093_s7 + $0xec8] sm:$0xff] }
 0x720   : > { %13194 = vmatpush3.bf16.msra.mxu0 %v13193_v39  ;;  %6607 = vmatprep.mubr.f32.mxu1 %v19239_v52  ;;  %v10454_v52 = vld [vmem:[%s21093_s7 + $0xa38] sm:$0xff]  ;;  %v13009_v39 = vpack.c.bf16 %v10461_v62, %v10458_v37  ;;  %v13013_v37 = vpack.c.bf16 %v10467_v17, %v10464_v24  ;;  %v10655_v62 = vld [vmem:[%s21093_s7 + $0x1030] sm:$0xff]  ;;  %v10479_v24 = vld [vmem:[%s21093_s7 + $0xb00] sm:$0xff] }
 0x721   : > { %11335 = vmatprep.mubr.msk.f32.mxu0 %vm13756_vm9, %v21133_v26  ;;  %13196 = vmatprep.subr.bf16.mxu0 %v13195_v10  ;;  %v13007_v57 = vpack.c.bf16 %v10454_v52, %v10451_v35  ;;  %v7056_v10 = vrot.slane %v6909_v11, 3  ;;  %v10463_v35 = vld [vmem:[%s21093_s7 + $0xa80] sm:$0xff]  ;;  %v10466_v52 = vld [vmem:[%s21093_s7 + $0xa98] sm:$0xff]  ;;  %v10658_v11 = vld [vmem:[%s21093_s7 + $0x1048] sm:$0xff] }
 0x723   : > { %11336 = vmatmul.mubr.msk.f32.gmra.mrb[110].mxu0 %vm5274_vm4, %v19705_v1  ;;  %6608 = vmatmul.mubr.f32.gmra.mrb[66].mxu1 %v19256_v9  ;;  %v7464_v9 = vld [vmem:[#allocation5 + $0x8] sm:$0xf0]  ;;  %v19775_v23 = vsel %vm2088_vm7, %v7050_v34, %v7056_v10  ;;  %v10661_v10 = vld [vmem:[%s21093_s7 + $0x1060] sm:$0xff]  ;;  %vm8141_vm7 = vcmask 523265  }
 0x724   : > { %13198 = vmatpush3.bf16.msra.mxu0 %v13197_v29  ;;  %11338 = vmatprep.mubr.msk.f32.mxu0 %vm13756_vm9, %v21133_v26  ;;  %v13011_v29 = vpack.c.bf16 %v10460_v28, %v10457_v46  ;;  %v7587_v25 = vrot.slane %v7464_v9, 4  ;;  %v10470_v34 = vld [vmem:[%s21093_s7 + $0xab8] sm:$0xff]  ;;  %v13015_v9 = vpack.c.bf16 %v10466_v52, %v10463_v35  ;;  %v10469_v46 = vld [vmem:[%s21093_s7 + $0xab0] sm:$0xff]  ;;  %v10472_v28 = vld [vmem:[%s21093_s7 + $0xac8] sm:$0xff] }
 0x725   : > { %13200 = vmatprep.subr.bf16.mxu0 %v13199_v60  ;;  %6678 = vmatprep.mubr.f32.mxu1 %v21133_v26  ;;  %v10601_v60 = vld [vmem:[%s21093_s7 + $0xe80] sm:$0xff]  ;;  %v10482_v35 = vld [vmem:[%s21093_s7 + $0xb18] sm:$0xff]  ;;  %v10485_v52 = vld [vmem:[%s21093_s7 + $0xb30] sm:$0xff] }
 0x726   : > { %v13209_v6 = vpack.c.bf16 %v10604_v16, %v10601_v60  ;;  %v10475_v60 = vld [vmem:[%s21093_s7 + $0xae0] sm:$0xff] }
 0x727   : > { %11339 = vmatmul.mubr.msk.f32.gmra.mrb[112].mxu0 %vm5274_vm4, %v19741_v19  ;;  %10441 = vmatmul.mubr.msk.f32.vlgmr.msra.gmra.mrb[58].mxu1 %vm5274_vm4, %v19290_v50  ;;  %v13207_v50 = vpack.c.bf16 %v10652_v18, %v10649_v43  ;;  %v10664_v43 = vld [vmem:[%s21093_s7 + $0x1078] sm:$0xff]  ;;  %v10476_v18 = vld [vmem:[%s21093_s7 + $0xae8] sm:$0xff] }
 0x728   : > { %13202 = vmatpush3.bf16.msra.mxu0 %v13201_v61  ;;  %13008 = vmatpush1.bf16.msra.mxu1 %v13007_v57  ;;  %v10473_v61 = vld [vmem:[%s21093_s7 + $0xad0] sm:$0xff]  ;;  %v19797_v57 = vsel %vm2273_vm8, %v7587_v25, %v7588_v32  ;;  %v10616_v25 = vld [vmem:[%s21093_s7 + $0xef8] sm:$0xff]  ;;  %v13021_v16 = vpack.c.bf16 %v10479_v24, %v10476_v18 }
 0x729   : > { %11341 = vmatprep.mubr.msk.f32.mxu0 %vm13756_vm9, %v21133_v26  ;;  %13204 = vmatprep.subr.bf16.mxu0 %v13203_v8  ;;  %v13211_v8 = vpack.c.bf16 %v10658_v11, %v10655_v62  ;;  %v10490_v18 = vld [vmem:[%s21093_s7 + $0xb58] sm:$0xff]  ;;  %v10497_v24 = vld [vmem:[%s21093_s7 + $0xb90] sm:$0xff] }
 0x72a   : > { %6684 = vmatprep.mubr.f32.mxu1 %v21133_v26  ;;  %13010 = vmatprep.subr.bf16.mxu1 %v13009_v39  ;;  %v13017_v39 = vpack.c.bf16 %v10473_v61, %v10470_v34  ;;  %v13025_v34 = vpack.c.bf16 %v10485_v52, %v10482_v35  ;;  %v10481_v61 = vld [vmem:[%s21093_s7 + $0xb10] sm:$0xff]  ;;  %v10500_v35 = vld [vmem:[%s21093_s7 + $0xba8] sm:$0xff]  ;;  %v10503_v52 = vld [vmem:[%s21093_s7 + $0xbc0] sm:$0xff] }
 0x72b   : > { %11342 = vmatmul.mubr.msk.f32.gmra.mrb[114].mxu0 %vm5274_vm4, %v19775_v23  ;;  %10442 = vmatmul.mubr.msk.f32.gmra.mrb[60].mxu1 %vm5274_vm4, %v19322_v27  ;;  %v10607_v27 = vld [vmem:[%s21093_s7 + $0xeb0] sm:$0xff] }
 0x72c   : > { %13206 = vmatpush3.bf16.msra.mxu0 %v13205_v41  ;;  %13012 = vmatpush1.bf16.msra.mxu1 %v13011_v29  ;;  %v13213_v17 = vpack.c.bf16 %v10610_v20, %v10607_v27  ;;  %v13019_v41 = vpack.c.bf16 %v10472_v28, %v10469_v46  ;;  %v10613_v29 = vld [vmem:[%s21093_s7 + $0xee0] sm:$0xff]  ;;  %v10670_v20 = vld [vmem:[%s21093_s7 + $0x10a8] sm:$0xff]  ;;  %v7595_v46 = vrot.slane %v19502_v58, 4  ;;  %v7585_v28 = vrot.slane %v19505_v38, 4 }
 0x72d   : > { %7891 = vmatprep.mubr.f32.mxu0 %v19797_v57  ;;  %13208 = vmatprep.subr.bf16.mxu0 %v13207_v50  ;;  %v10478_v50 = vld [vmem:[%s21093_s7 + $0xaf8] sm:$0xff]  ;;  %v13217_v62 = vpack.c.bf16 %v10616_v25, %v10613_v29  ;;  %v10491_v27 = vld [vmem:[%s21093_s7 + $0xb60] sm:$0xff]  ;;  %v7601_v29 = vrot.slane %v19539_v2, 4 }
 0x72e   : > { %6690 = vmatprep.mubr.f32.mxu1 %v21133_v26  ;;  %13014 = vmatprep.subr.bf16.mxu1 %v13013_v37  ;;  %v7463_v37 = vld [vmem:[#allocation5] sm:$0xf0]  ;;  %v13023_v11 = vpack.c.bf16 %v10478_v50, %v10475_v60  ;;  %v10496_v50 = vld [vmem:[%s21093_s7 + $0xb88] sm:$0xff] }
 0x72f   : > { %10443 = vmatmul.mubr.msk.f32.gmra.mrb[62].mxu1 %vm5274_vm4, %v19354_v12  ;;  %v13215_v12 = vpack.c.bf16 %v10664_v43, %v10661_v10  ;;  %v10487_v43 = vld [vmem:[%s21093_s7 + $0xb40] sm:$0xff]  ;;  %v10493_v60 = vld [vmem:[%s21093_s7 + $0xb70] sm:$0xff] }
 0x730   : > { %13210 = vmatpush3.bf16.msra.mxu0 %v13209_v6  ;;  %13016 = vmatpush1.bf16.msra.mxu1 %v13015_v9  ;;  %v10484_v6 = vld [vmem:[%s21093_s7 + $0xb28] sm:$0xff]  ;;  %v7584_v9 = vrot.slane %v7463_v37, 4  ;;  %v19922_v37 = vsel %vm2273_vm8, %v7595_v46, %v7601_v29 }
 0x731   : > { %13212 = vmatprep.subr.bf16.mxu0 %v13211_v8  ;;  %6696 = vmatprep.mubr.f32.mxu1 %v21133_v26  ;;  %v10667_v8 = vld [vmem:[%s21093_s7 + $0x1090] sm:$0xff] }
 0x732   : > { %13018 = vmatprep.subr.bf16.mxu1 %v13017_v39  ;;  %v13027_v39 = vpack.c.bf16 %v10484_v6, %v10481_v61  ;;  %v13220_v58 = vpack.c.bf16 %v10670_v20, %v10667_v8  ;;  %v19882_v38 = vsel %vm2273_vm8, %v7584_v9, %v7585_v28  ;;  %v7467_v61 = vld [vmem:[#allocation5 + $0x80] sm:$0xf]  ;;  %v13037_v6 = vpack.c.bf16 %v10503_v52, %v10500_v35  ;;  %v10502_v9 = vld [vmem:[%s21093_s7 + $0xbb8] sm:$0xff]  ;;  %v10511_v35 = vld [vmem:[%s21093_s7 + $0xc00] sm:$0xff] }
 0x733   : > { %10444 = vmatmul.mubr.msk.f32.gmra.mrb[64].mxu1 %vm5274_vm4, %v19386_v45  ;;  %v10488_v45 = vld [vmem:[%s21093_s7 + $0xb48] sm:$0xff]  ;;  %v7605_v8 = vrot.slane %v19579_v36, 4  ;;  %v10506_v20 = vld [vmem:[%s21093_s7 + $0xbd8] sm:$0xff] }
 0x734   : > { %13214 = vmatpush3.bf16.msra.mxu0 %v13213_v17  ;;  %13020 = vmatpush1.bf16.msra.mxu1 %v13019_v41  ;;  %v13029_v10 = vpack.c.bf16 %v10491_v27, %v10488_v45  ;;  %v10673_v17 = vld [vmem:[%s21093_s7 + $0x10c0] sm:$0xff]  ;;  %v10676_v41 = vld [vmem:[%s21093_s7 + $0x10d8] sm:$0xff] }
 0x735   : > { %13216 = vmatprep.subr.bf16.mxu0 %v13215_v12  ;;  %6702 = vmatprep.mubr.f32.mxu1 %v21133_v26  ;;  %v13031_v12 = vpack.c.bf16 %v10490_v18, %v10487_v43  ;;  %v13223_v15 = vpack.c.bf16 %v10676_v41, %v10673_v17  ;;  %v10499_v45 = vld [vmem:[%s21093_s7 + $0xba0] sm:$0xff]  ;;  %v7466_v43 = vld [vmem:[#allocation5 + $0x78] sm:$0xf]  ;;  %v10514_v52 = vld [vmem:[%s21093_s7 + $0xc18] sm:$0xff] }
 0x736   : > { %13022 = vmatprep.subr.bf16.mxu1 %v13021_v16  ;;  %v7599_v16 = vrot.slane %v19558_v30, 4  ;;  %v13039_v18 = vpack.c.bf16 %v10502_v9, %v10499_v45  ;;  %v7611_v41 = vrot.slane %v7466_v43, 4  ;;  %v7597_v43 = vrot.slane %v19653_v4, 4 }
 0x737   : > { %10445 = vmatmul.mubr.msk.f32.gmra.mrb[66].mxu1 %vm5274_vm4, %v19420_v49  ;;  %v10494_v49 = vld [vmem:[%s21093_s7 + $0xb78] sm:$0xff] }
 0x738   : > { %13218 = vmatpush3.bf16.msra.mxu0 %v13217_v62  ;;  %13024 = vmatpush1.bf16.msra.mxu1 %v13023_v11  ;;  %v13033_v25 = vpack.c.bf16 %v10497_v24, %v10494_v49  ;;  %v7607_v11 = vrot.slane %v19572_v31, 4  ;;  %v19958_v24 = vsel %vm2273_vm8, %v7599_v16, %v7605_v8 }
 0x739   : > { %7142 = vmatprep.mubr.f32.mxu1 %v19439_v44  ;;  %13026 = vmatprep.subr.bf16.mxu1 %v13025_v34  ;;  %v7593_v44 = vrot.slane %v19521_v40, 4  ;;  %v19899_v40 = vsel %vm2273_vm8, %v7588_v32, %v7595_v46  ;;  %v13035_v34 = vpack.c.bf16 %v10496_v50, %v10493_v60  ;;  %v10509_v46 = vld [vmem:[%s21093_s7 + $0xbf0] sm:$0xff] }
 0x73a   : > { %13219 = vmatprep.subr.bf16.mxu0 %v21130_v7  ;;  %v13041_v49 = vpack.c.bf16 %v10509_v46, %v10506_v20  ;;  %v10517_v20 = vld [vmem:[%s21093_s7 + $0xc30] sm:$0xff]  ;;  %v10520_v46 = vld [vmem:[%s21093_s7 + $0xc48] sm:$0xff] }
 0x73b   : > { %7892 = vmatmul.mubr.f32.vlgmr.msra.gmra.mrb[116].mxu0 %v19882_v38  ;;  %v19910_v32 = vsel %vm2273_vm8, %v7585_v28, %v7593_v44  ;;  %v19935_v31 = vsel %vm2273_vm8, %v7593_v44, %v7599_v16  ;;  %v19946_v28 = vsel %vm2273_vm8, %v7601_v29, %v7607_v11  ;;  %v10508_v44 = vld [vmem:[%s21093_s7 + $0xbe8] sm:$0xff] }
 0x73c   : > { %7896 = vmatprep.mubr.f32.mxu0 %v19899_v40  ;;  %13028 = vmatpush1.bf16.msra.mxu1 %v13027_v39  ;;  %v10512_v29 = vld [vmem:[%s21093_s7 + $0xc08] sm:$0xff] }
 0x73d   : > { %13030 = vmatprep.subr.bf16.mxu1 %v13029_v10  ;;  %13221 = vmatpush3.bf16.msra.mxu0 %v13220_v58  ;;  %v7613_v10 = vrot.slane %v7467_v61, 4  ;;  %v10505_v58 = vld [vmem:[%s21093_s7 + $0xbd0] sm:$0xff]  ;;  %v10518_v61 = vld [vmem:[%s21093_s7 + $0xc38] sm:$0xff] }
 0x73e   : > { %v10824_v2 = vpop.f32.mrb[36].mxu0  ;;  %13222 = vmatprep.subr.bf16.mxu0 %v21130_v7 }
 0x73f   : > { %7897 = vmatmul.mubr.f32.gmra.mrb[118].mxu0 %v19910_v32  ;;  %v10825_v62 = vpop.f32.mrb[37].mxu0 }
 0x740   : > { %7901 = vmatprep.mubr.f32.mxu0 %v19922_v37  ;;  %13032 = vmatpush1.bf16.msra.mxu1 %v13031_v12  ;;  %v19926_v30 = vadd.f32 %v10825_v62, %v10824_v2  ;;  %v10515_v12 = vld [vmem:[%s21093_s7 + $0xc20] sm:$0xff]  ;;  %v19980_v62 = vsel %vm2273_vm8, %v7605_v8, %v7611_v41  ;;  %v13047_v8 = vpack.c.bf16 %v10514_v52, %v10511_v35 }
 0x741   : > { %13034 = vmatprep.subr.bf16.mxu1 %v13033_v25  ;;  %13224 = vmatpush3.bf16.msra.mxu0 %v13223_v15  ;;  %v19968_v25 = vsel %vm2273_vm8, %v7607_v11, %v7613_v10  ;;  %v13043_v15 = vpack.c.bf16 %v10508_v44, %v10505_v58  ;;  %v7465_v2 = vld [vmem:[#allocation5 + $0x10] sm:$0xf0]  ;;  %v13045_v16 = vpack.c.bf16 %v10515_v12, %v10512_v29  ;;  %v10526_v29 = vld [vmem:[%s21093_s7 + $0xc78] sm:$0xff] }
 0x742   : > { %v10827_v27 = vpop.f32.mrb[38].mxu0  ;;  %v10523_v41 = vld [vmem:[%s21093_s7 + $0xc60] sm:$0xff] }
 0x743   : > { %7902 = vmatmul.mubr.f32.gmra.mrb[120].mxu0 %v19935_v31  ;;  %v10828_v39 = vpop.f32.mrb[39].mxu0 }
 0x744   : > { %7906 = vmatprep.mubr.f32.mxu0 %v19946_v28  ;;  %13036 = vmatpush1.bf16.msra.mxu1 %v13035_v34  ;;  %v19949_v36 = vadd.f32 %v10828_v39, %v10827_v27  ;;  %v7591_v34 = vrot.slane %v19630_v3, 4  ;;  %v7590_v27 = vrot.slane %v7465_v2, 4  ;;  %v10530_v2 = vld [vmem:[%s21093_s7 + $0xc98] sm:$0xff] }
 0x745   : > { %13038 = vmatprep.subr.bf16.mxu1 %v13037_v6  ;;  %v10521_v6 = vld [vmem:[%s21093_s7 + $0xc50] sm:$0xff] }
 0x746   : > { %v10830_v17 = vpop.f32.mrb[40].mxu0  ;;  %v13049_v3 = vpack.c.bf16 %v10521_v6, %v10518_v61  ;;  %v20001_v39 = vsel %vm2273_vm8, %v7590_v27, %v7591_v34  ;;  %v20023_v12 = vsel %vm2273_vm8, %v7591_v34, %v7597_v43  ;;  %v10529_v34 = vld [vmem:[%s21093_s7 + $0xc90] sm:$0xff]  ;;  %v10532_v61 = vld [vmem:[%s21093_s7 + $0xca8] sm:$0xff] }
 0x747   : > { %7907 = vmatmul.mubr.f32.gmra.mrb[122].mxu0 %v19958_v24  ;;  %v10831_v60 = vpop.f32.mrb[41].mxu0  ;;  %v10536_v27 = vld [vmem:[%s21093_s7 + $0xcc8] sm:$0xff] }
 0x748   : > { %7911 = vmatprep.mubr.f32.mxu0 %v19968_v25  ;;  %13040 = vmatpush1.bf16.msra.mxu1 %v13039_v18  ;;  %v19971_v50 = vadd.f32 %v10831_v60, %v10830_v17  ;;  %v10524_v18 = vld [vmem:[%s21093_s7 + $0xc68] sm:$0xff]  ;;  %v13051_v17 = vpack.c.bf16 %v10520_v46, %v10517_v20  ;;  %v7468_v46 = vld [vmem:[#allocation5 + $0x88] sm:$0xf] }
 0x749   : > { %13042 = vmatprep.subr.bf16.mxu1 %v13041_v49  ;;  %v10527_v49 = vld [vmem:[%s21093_s7 + $0xc80] sm:$0xff] }
 0x74a   : > { %v10833_v11 = vpop.f32.mrb[42].mxu0  ;;  %v13053_v4 = vpack.c.bf16 %v10527_v49, %v10524_v18  ;;  %v10538_v18 = vld [vmem:[%s21093_s7 + $0xcd8] sm:$0xff] }
 0x74b   : > { %7912 = vmatmul.mubr.f32.gmra.mrb[124].mxu0 %v19980_v62  ;;  %v10834_v45 = vpop.f32.mrb[43].mxu0 }
 0x74c   : > { %13044 = vmatpush1.bf16.msra.mxu1 %v13043_v15  ;;  %11352 = vmatprep.mubr.msk.f32.mxu0 %vm13756_vm9, %v21133_v26  ;;  %v19992_v9 = vadd.f32 %v10834_v45, %v10833_v11  ;;  %v7603_v15 = vrot.slane %v19677_v56, 4  ;;  %v13055_v56 = vpack.c.bf16 %v10526_v29, %v10523_v41  ;;  %v7609_v45 = vrot.slane %v19707_v5, 4 }
 0x74d   : > { %13046 = vmatprep.subr.bf16.mxu1 %v13045_v16  ;;  %v10533_v16 = vld [vmem:[%s21093_s7 + $0xcb0] sm:$0xff]  ;;  %v13059_v5 = vpack.c.bf16 %v10532_v61, %v10529_v34 }
 0x74e   : > { %v10836_v10 = vpop.f32.mrb[44].mxu0  ;;  %v13057_v11 = vpack.c.bf16 %v10533_v16, %v10530_v2  ;;  %v20046_v6 = vsel %vm2273_vm8, %v7597_v43, %v7603_v15  ;;  %v10535_v43 = vld [vmem:[%s21093_s7 + $0xcc0] sm:$0xff]  ;;  %v10541_v2 = vld [vmem:[%s21093_s7 + $0xcf0] sm:$0xff]  ;;  %v10544_v16 = vld [vmem:[%s21093_s7 + $0xd08] sm:$0xff] }
 0x74f   : > { %11353 = vmatmul.mubr.msk.f32.vlgmr.msra.gmra.mrb[126].mxu0 %vm5274_vm4, %v20001_v39  ;;  %v10837_v58 = vpop.f32.mrb[45].mxu0 }
 0x750   : > { %13048 = vmatpush1.bf16.msra.mxu1 %v13047_v8  ;;  %11355 = vmatprep.mubr.msk.f32.mxu0 %vm13756_vm9, %v21133_v26  ;;  %v20014_v44 = vadd.f32 %v10837_v58, %v10836_v10  ;;  %v10539_v8 = vld [vmem:[%s21093_s7 + $0xce0] sm:$0xff]  ;;  %v7615_v58 = vrot.slane %v7468_v46, 4  ;;  %v10554_v46 = vld [vmem:[%s21093_s7 + $0xd58] sm:$0xff] }
 0x751   : > { %13050 = vmatprep.subr.bf16.mxu1 %v13049_v3  ;;  %v13061_v10 = vpack.c.bf16 %v10539_v8, %v10536_v27  ;;  %v10547_v27 = vld [vmem:[%s21093_s7 + $0xd20] sm:$0xff]  ;;  %v10550_v8 = vld [vmem:[%s21093_s7 + $0xd38] sm:$0xff] }
 0x752   : > { %v5940_v60 = vpop.f32.mrb[46].mxu0 }
 0x753   : > { %11356 = vmatmul.mubr.msk.f32.gmra.mrb[128].mxu0 %vm5274_vm4, %v20023_v12  ;;  %v20035_v35 = vadd.f32 %v19926_v30, %v5940_v60  ;;  %v11262_v52 = vpop.f32.mrb[47].mxu0  ;;  %v13063_v60 = vpack.c.bf16 %v10538_v18, %v10535_v43  ;;  %v13071_v43 = vpack.c.bf16 %v10550_v8, %v10547_v27 }
 0x754   : > { %13052 = vmatpush1.bf16.msra.mxu1 %v13051_v17  ;;  %11358 = vmatprep.mubr.msk.f32.mxu0 %vm13756_vm9, %v21133_v26  ;;  %v10542_v17 = vld [vmem:[%s21093_s7 + $0xcf8] sm:$0xff]  ;;  %v20091_v52 = vsel %vm2273_vm8, %v7609_v45, %v7615_v58  ;;  %v10556_v58 = vld [vmem:[%s21093_s7 + $0xd68] sm:$0xff] }
 0x755   : > { %13054 = vmatprep.subr.bf16.mxu1 %v13053_v4  ;;  %v10545_v4 = vld [vmem:[%s21093_s7 + $0xd10] sm:$0xff] }
 0x756   : > { %v5945_v30 = vpop.f32.mrb[48].mxu0 }
 0x757   : > { %11359 = vmatmul.mubr.msk.f32.gmra.mrb[130].mxu0 %vm5274_vm4, %v20046_v6  ;;  %v20058_v3 = vadd.f32 %v19949_v36, %v5945_v30  ;;  %v11265_v20 = vpop.f32.mrb[49].mxu0  ;;  %v20069_v36 = vsel %vm2273_vm8, %v7603_v15, %v7609_v45  ;;  %v13065_v15 = vpack.c.bf16 %v10545_v4, %v10542_v17  ;;  %v13067_v30 = vpack.c.bf16 %v10544_v16, %v10541_v2  ;;  %v10570_v17 = vld [vmem:[%s21093_s7 + $0xd88] sm:$0xff] }
 0x758   : > { %13056 = vmatpush1.bf16.msra.mxu1 %v13055_v56  ;;  %11361 = vmatprep.mubr.msk.f32.mxu0 %vm13756_vm9, %v21133_v26  ;;  %v10548_v56 = vld [vmem:[%s21093_s7 + $0xd28] sm:$0xff]  ;;  %vm8093_vm8 = vcmask 1040384  }
 0x759   : > { %13058 = vmatprep.subr.bf16.mxu1 %v13057_v11  ;;  %v10551_v11 = vld [vmem:[%s21093_s7 + $0xd40] sm:$0xff] }
 0x75a   : > { %v5950_v49 = vpop.f32.mrb[50].mxu0  ;;  %v13069_v45 = vpack.c.bf16 %v10551_v11, %v10548_v56  ;;  %v10575_v56 = vld [vmem:[%s21093_s7 + $0xdb0] sm:$0xff]  ;;  %v10578_v11 = vld [vmem:[%s21093_s7 + $0xdc8] sm:$0xff] }
 0x75b   : > { %11362 = vmatmul.mubr.msk.f32.gmra.mrb[132].mxu0 %vm5274_vm4, %v20069_v36  ;;  %v20080_v41 = vadd.f32 %v19971_v50, %v5950_v49  ;;  %v11268_v29 = vpop.f32.mrb[51].mxu0  ;;  %v10553_v49 = vld [vmem:[%s21093_s7 + $0xd50] sm:$0xff]  ;;  %v13121_v8 = vpack.c.bf16 %v10578_v11, %v10575_v56 }
 0x75c   : > { %13060 = vmatpush1.bf16.msra.mxu1 %v13059_v5  ;;  %11364 = vmatprep.mubr.msk.f32.mxu0 %vm13756_vm9, %v21133_v26  ;;  %v13075_v4 = vpack.c.bf16 %v10556_v58, %v10553_v49  ;;  %v10599_v11 = vld [vmem:[%s21093_s7 + $0xe70] sm:$0xff] }
 0x75d   : > { %13062 = vmatprep.subr.bf16.mxu1 %v13061_v10 }
 0x75e   : > { %v5955_v50 = vpop.f32.mrb[52].mxu0 }
 0x75f   : > { %11365 = vmatmul.mubr.msk.f32.gmra.mrb[134].mxu0 %vm5274_vm4, %v20091_v52  ;;  %v20102_v34 = vadd.f32 %v19992_v9, %v5955_v50  ;;  %v11271_v61 = vpop.f32.mrb[53].mxu0  ;;  %v10557_v9 = vld [vmem:[%s21093_s7 + $0xd70] sm:$0xff] }
 0x760   : > { %13064 = vmatpush1.bf16.msra.mxu1 %v13063_v60  ;;  %v13073_v18 = vpack.c.bf16 %v10557_v9, %v10554_v46  ;;  %v10581_v46 = vld [vmem:[%s21093_s7 + $0xde0] sm:$0xff]  ;;  %v10584_v9 = vld [vmem:[%s21093_s7 + $0xdf8] sm:$0xff] }
 0x761   : > { %13066 = vmatprep.subr.bf16.mxu1 %v13065_v15  ;;  %v10569_v15 = vld [vmem:[%s21093_s7 + $0xd80] sm:$0xff]  ;;  %v13125_v58 = vpack.c.bf16 %v10584_v9, %v10581_v46 }
 0x762   : > { %v5960_v20 = vpop.f32.mrb[54].mxu0 }
 0x763   : > { %v20117_v5 = vadd.f32 %v20014_v44, %v5960_v20  ;;  %v11274_v10 = vpop.f32.mrb[55].mxu0  ;;  %v10573_v44 = vld [vmem:[%s21093_s7 + $0xda0] sm:$0xff] }
 0x764   : > { %13068 = vmatpush1.bf16.msra.mxu1 %v13067_v30  ;;  %v13115_v29 = vpack.c.bf16 %v10573_v44, %v10570_v17  ;;  %v10591_v10 = vld [vmem:[%s21093_s7 + $0xe30] sm:$0xff] }
 0x765   : > { %13070 = vmatprep.subr.bf16.mxu1 %v13069_v45  ;;  %v10587_v44 = vld [vmem:[%s21093_s7 + $0xe10] sm:$0xff] }
 0x767   : > { %7143 = vmatmul.mubr.f32.vlgmr.msra.gmra.mrb[58].mxu1 %v19519_v14 }
 0x768   : > { %7148 = vmatprep.mubr.f32.mxu1 %v19537_v22  ;;  %13072 = vmatpush1.bf16.msra.mxu1 %v13071_v43 }
 0x769   : > { %13074 = vmatprep.subr.bf16.mxu1 %v13073_v18 }
 0x76b   : > { %7149 = vmatmul.mubr.f32.gmra.mrb[60].mxu1 %v19556_v55  ;;  %v10572_v55 = vld [vmem:[%s21093_s7 + $0xd98] sm:$0xff] }
 0x76c   : > { %7154 = vmatprep.mubr.f32.mxu1 %v19570_v51  ;;  %13076 = vmatpush1.bf16.msra.mxu1 %v13075_v4  ;;  %v13117_v16 = vpack.c.bf16 %v10572_v55, %v10569_v15  ;;  %v10590_v4 = vld [vmem:[%s21093_s7 + $0xe28] sm:$0xff] }
 0x76d   : > { %13116 = vmatprep.subr.bf16.mxu1 %v13115_v29  ;;  %v10597_v29 = vld [vmem:[%s21093_s7 + $0xe60] sm:$0xff]  ;;  %v13129_v15 = vpack.c.bf16 %v10590_v4, %v10587_v44 }
 0x76f   : > { %7155 = vmatmul.mubr.f32.gmra.mrb[62].mxu1 %v19577_v47  ;;  %v10576_v47 = vld [vmem:[%s21093_s7 + $0xdb8] sm:$0xff] }
 0x770   : > { %7160 = vmatprep.mubr.f32.mxu1 %v19590_v21  ;;  %v10579_v21 = vld [vmem:[%s21093_s7 + $0xdd0] sm:$0xff] }
 0x771   : > { %v13119_v50 = vpack.c.bf16 %v10579_v21, %v10576_v47  ;;  %v10596_v47 = vld [vmem:[%s21093_s7 + $0xe58] sm:$0xff]  ;;  %v10603_v21 = vld [vmem:[%s21093_s7 + $0xe90] sm:$0xff] }
 0x772   : > { %v10880_v60 = vpop.f32.mrb[56].mxu0 }
 0x773   : > { %7161 = vmatmul.mubr.f32.gmra.mrb[64].mxu1 %v19600_v59  ;;  %v10881_v14 = vpop.f32.mrb[57].mxu0 }
 0x774   : > { %7166 = vmatprep.mubr.f32.mxu1 %v19611_v53  ;;  %v10882_v22 = vadd.f32 %v10881_v14, %v10880_v60 }
 0x776   : > { %v10883_v51 = vpop.f32.mrb[58].mxu0  ;;  %v6232_v59 = vadd.f32 %v10882_v22, %v20035_v35  ;;  %v10582_v35 = vld [vmem:[%s21093_s7 + $0xde8] sm:$0xff] }
 0x777   : > { %7167 = vmatmul.mubr.f32.gmra.mrb[66].mxu1 %v19628_v42  ;;  %v10884_v53 = vpop.f32.mrb[59].mxu0  ;;  %v10585_v42 = vld [vmem:[%s21093_s7 + $0xe00] sm:$0xff] }
 0x778   : > { %v10885_v2 = vadd.f32 %v10884_v53, %v10883_v51  ;;  %7237 = vmatprep.mubr.f32.mxu1 %v21133_v26  ;;  %v13123_v20 = vpack.c.bf16 %v10585_v42, %v10582_v35  ;;  %v10593_v51 = vld [vmem:[%s21093_s7 + $0xe40] sm:$0xff] }
 0x77a   : > { %v10886_v61 = vpop.f32.mrb[60].mxu0  ;;  %v6237_v30 = vadd.f32 %v10885_v2, %v20058_v3 }
 0x77b   : > { %10559 = vmatmul.mubr.msk.f32.vlgmr.msra.gmra.mrb[58].mxu1 %vm5274_vm4, %v19651_v48  ;;  %v10887_v45 = vpop.f32.mrb[61].mxu0  ;;  %v10588_v48 = vld [vmem:[%s21093_s7 + $0xe18] sm:$0xff] }
 0x77c   : > { %13118 = vmatpush1.bf16.msra.mxu1 %v13117_v16  ;;  %v10888_v27 = vadd.f32 %v10887_v45, %v10886_v61  ;;  %7243 = vmatprep.mubr.f32.mxu1 %v21133_v26  ;;  %v13127_v17 = vpack.c.bf16 %v10591_v10, %v10588_v48  ;;  %v10611_v10 = vld [vmem:[%s21093_s7 + $0xed0] sm:$0xff] }
 0x77d   : > { %13120 = vmatprep.subr.bf16.mxu1 %v13119_v50  ;;  %v13133_v50 = vpack.c.bf16 %v10596_v47, %v10593_v51 }
 0x77e   : > { %v10889_v3 = vpop.f32.mrb[62].mxu0  ;;  %v6242_v43 = vadd.f32 %v10888_v27, %v20080_v41 }
 0x77f   : > { %10560 = vmatmul.mubr.msk.f32.gmra.mrb[60].mxu1 %vm5274_vm4, %v19675_v54  ;;  %v10890_v18 = vpop.f32.mrb[63].mxu0  ;;  %v10594_v54 = vld [vmem:[%s21093_s7 + $0xe48] sm:$0xff] }
 0x780   : > { %13122 = vmatpush1.bf16.msra.mxu1 %v13121_v8  ;;  %v10891_v49 = vadd.f32 %v10890_v18, %v10889_v3  ;;  %7249 = vmatprep.mubr.f32.mxu1 %v21133_v26  ;;  %v13131_v55 = vpack.c.bf16 %v10597_v29, %v10594_v54  ;;  %v10605_v8 = vld [vmem:[%s21093_s7 + $0xea0] sm:$0xff]  ;;  %v10614_v18 = vld [vmem:[%s21093_s7 + $0xee8] sm:$0xff]  ;;  %v10620_v29 = vld [vmem:[%s21093_s7 + $0xf18] sm:$0xff] }
 0x781   : > { %13124 = vmatprep.subr.bf16.mxu1 %v13123_v20  ;;  %v10608_v20 = vld [vmem:[%s21093_s7 + $0xeb8] sm:$0xff]  ;;  %v13145_v4 = vpack.c.bf16 %v10614_v18, %v10611_v10  ;;  %v10617_v54 = vld [vmem:[%s21093_s7 + $0xf00] sm:$0xff] }
 0x782   : > { %v10892_v41 = vpop.f32.mrb[64].mxu0  ;;  %v6247_v60 = vadd.f32 %v10891_v49, %v20102_v34  ;;  %v13141_v3 = vpack.c.bf16 %v10608_v20, %v10605_v8  ;;  %v13149_v51 = vpack.c.bf16 %v10620_v29, %v10617_v54  ;;  %v10645_v8 = vld [vmem:[%s21093_s7 + $0xfe0] sm:$0xff] }
 0x783   : > { %10561 = vmatmul.mubr.msk.f32.gmra.mrb[62].mxu1 %vm5274_vm4, %v19705_v1  ;;  %v10893_v14 = vpop.f32.mrb[65].mxu0  ;;  %v10600_v1 = vld [vmem:[%s21093_s7 + $0xe78] sm:$0xff]  ;;  %v10657_v54 = vld [vmem:[%s21093_s7 + $0x1040] sm:$0xff] }
 0x784   : > { %13126 = vmatpush1.bf16.msra.mxu1 %v13125_v58  ;;  %v10894_v22 = vadd.f32 %v10893_v14, %v10892_v41  ;;  %7255 = vmatprep.mubr.f32.mxu1 %v21133_v26  ;;  %v13135_v56 = vpack.c.bf16 %v10603_v21, %v10600_v1  ;;  %v10618_v58 = vld [vmem:[%s21093_s7 + $0xf08] sm:$0xff] }
 0x785   : > { %13128 = vmatprep.subr.bf16.mxu1 %v13127_v17  ;;  %v10626_v1 = vld [vmem:[%s21093_s7 + $0xf48] sm:$0xff] }
 0x786   : > { %v6321_v34 = vpop.f32.mrb[66].mxu0  ;;  %v6252_v53 = vadd.f32 %v10894_v22, %v20117_v5  ;;  %v10602_v5 = vld [vmem:[%s21093_s7 + $0xe88] sm:$0xff]  ;;  %v10624_v22 = vld [vmem:[%s21093_s7 + $0xf38] sm:$0xff] }
 0x787   : > { %10562 = vmatmul.mubr.msk.f32.gmra.mrb[64].mxu1 %vm5274_vm4, %v19741_v19  ;;  %v20217_v2 = vadd.f32 %v6321_v34, %v6232_v59  ;;  %v11285_v16 = vpop.f32.mrb[67].mxu0  ;;  %v10606_v19 = vld [vmem:[%s21093_s7 + $0xea8] sm:$0xff]  ;;  %v10609_v59 = vld [vmem:[%s21093_s7 + $0xec0] sm:$0xff]  ;;  %v13137_v45 = vpack.c.bf16 %v10602_v5, %v10599_v11  ;;  %v10623_v34 = vld [vmem:[%s21093_s7 + $0xf30] sm:$0xff] }
 0x788   : > { %13130 = vmatpush1.bf16.msra.mxu1 %v13129_v15  ;;  %7261 = vmatprep.mubr.f32.mxu1 %v21133_v26  ;;  %v13139_v27 = vpack.c.bf16 %v10609_v59, %v10606_v19  ;;  %v10630_v21 = vld [vmem:[%s21093_s7 + $0xf68] sm:$0xff]  ;;  %v13153_v16 = vpack.c.bf16 %v10626_v1, %v10623_v34  ;;  %v10632_v11 = vld [vmem:[%s21093_s7 + $0xf78] sm:$0xff]  ;;  %v10663_v1 = vld [vmem:[%s21093_s7 + $0x1070] sm:$0xff] }
 0x789   : > { %13132 = vmatprep.subr.bf16.mxu1 %v13131_v55  ;;  %v10636_v5 = vld [vmem:[%s21093_s7 + $0xf98] sm:$0xff] }
 0x78a   : > { %v6326_v61 = vpop.f32.mrb[68].mxu0  ;;  %v10660_v34 = vld [vmem:[%s21093_s7 + $0x1058] sm:$0xff] }
 0x78b   : > { %10563 = vmatmul.mubr.msk.f32.gmra.mrb[66].mxu1 %vm5274_vm4, %v19775_v23  ;;  %v20234_v35 = vadd.f32 %v6326_v61, %v6237_v30  ;;  %v11288_v42 = vpop.f32.mrb[69].mxu0  ;;  %v10612_v23 = vld [vmem:[%s21093_s7 + $0xed8] sm:$0xff]  ;;  %v10639_v61 = vld [vmem:[%s21093_s7 + $0xfb0] sm:$0xff] }
 0x78c   : > { %13134 = vmatpush1.bf16.msra.mxu1 %v13133_v50  ;;  %7701 = vmatprep.mubr.f32.mxu1 %v19797_v57  ;;  %v10615_v57 = vld [vmem:[%s21093_s7 + $0xef0] sm:$0xff]  ;;  %v13159_v59 = vpack.c.bf16 %v10639_v61, %v10636_v5  ;;  %v10666_v61 = vld [vmem:[%s21093_s7 + $0x1088] sm:$0xff] }
 0x78d   : > { %13136 = vmatprep.subr.bf16.mxu1 %v13135_v56  ;;  %v13143_v48 = vpack.c.bf16 %v10615_v57, %v10612_v23  ;;  %v10629_v56 = vld [vmem:[%s21093_s7 + $0xf60] sm:$0xff]  ;;  %v10635_v42 = vld [vmem:[%s21093_s7 + $0xf90] sm:$0xff]  ;;  %v10644_v57 = vld [vmem:[%s21093_s7 + $0xfd8] sm:$0xff] }
 0x78e   : > { %v6331_v46 = vpop.f32.mrb[70].mxu0  ;;  %v13157_v19 = vpack.c.bf16 %v10632_v11, %v10629_v56  ;;  %v10641_v23 = vld [vmem:[%s21093_s7 + $0xfc0] sm:$0xff]  ;;  %v10659_v56 = vld [vmem:[%s21093_s7 + $0x1050] sm:$0xff]  ;;  %v10662_v11 = vld [vmem:[%s21093_s7 + $0x1068] sm:$0xff] }
 0x78f   : > { %v20249_v30 = vadd.f32 %v6331_v46, %v6242_v43  ;;  %v11291_v9 = vpop.f32.mrb[71].mxu0  ;;  %v10621_v43 = vld [vmem:[%s21093_s7 + $0xf20] sm:$0xff] }
 0x790   : > { %13138 = vmatpush1.bf16.msra.mxu1 %v13137_v45  ;;  %v13147_v41 = vpack.c.bf16 %v10621_v43, %v10618_v58  ;;  %v10638_v45 = vld [vmem:[%s21093_s7 + $0xfa8] sm:$0xff]  ;;  %v10647_v43 = vld [vmem:[%s21093_s7 + $0xff0] sm:$0xff] }
 0x791   : > { %13140 = vmatprep.subr.bf16.mxu1 %v13139_v27  ;;  %v10642_v27 = vld [vmem:[%s21093_s7 + $0xfc8] sm:$0xff]  ;;  %v13161_v20 = vpack.c.bf16 %v10638_v45, %v10635_v42  ;;  %v13177_v45 = vpack.c.bf16 %v10662_v11, %v10659_v56 }
 0x792   : > { %v6336_v49 = vpop.f32.mrb[72].mxu0  ;;  %v13163_v46 = vpack.c.bf16 %v10645_v8, %v10642_v27  ;;  %v10665_v8 = vld [vmem:[%s21093_s7 + $0x1080] sm:$0xff] }
 0x793   : > { %v20263_v17 = vadd.f32 %v6336_v49, %v6247_v60  ;;  %v11294_v44 = vpop.f32.mrb[73].mxu0  ;;  %v10627_v60 = vld [vmem:[%s21093_s7 + $0xf50] sm:$0xff]  ;;  %v13165_v49 = vpack.c.bf16 %v10644_v57, %v10641_v23  ;;  %v10672_v23 = vld [vmem:[%s21093_s7 + $0x10b8] sm:$0xff] }
 0x794   : > { %13142 = vmatpush1.bf16.msra.mxu1 %v13141_v3  ;;  %v13151_v47 = vpack.c.bf16 %v10627_v60, %v10624_v22  ;;  %v10648_v3 = vld [vmem:[%s21093_s7 + $0xff8] sm:$0xff]  ;;  %v10650_v44 = vld [vmem:[%s21093_s7 + $0x1008] sm:$0xff]  ;;  %v10675_v57 = vld [vmem:[%s21093_s7 + $0x10d0] sm:$0xff] }
 0x795   : > { %13144 = vmatprep.subr.bf16.mxu1 %v13143_v48  ;;  %v10651_v48 = vld [vmem:[%s21093_s7 + $0x1010] sm:$0xff]  ;;  %v13169_v22 = vpack.c.bf16 %v10650_v44, %v10647_v43 }
 0x796   : > { %v6341_v14 = vpop.f32.mrb[74].mxu0  ;;  %v13167_v58 = vpack.c.bf16 %v10651_v48, %v10648_v3 }
 0x797   : > { %v20277_v15 = vadd.f32 %v6341_v14, %v6252_v53  ;;  %v11297_v55 = vpop.f32.mrb[75].mxu0  ;;  %v10633_v53 = vld [vmem:[%s21093_s7 + $0xf80] sm:$0xff] }
 0x798   : > { %13146 = vmatpush1.bf16.msra.mxu1 %v13145_v4  ;;  %v13155_v50 = vpack.c.bf16 %v10633_v53, %v10630_v21  ;;  %v10653_v55 = vld [vmem:[%s21093_s7 + $0x1020] sm:$0xff] }
 0x799   : > { %13148 = vmatprep.subr.bf16.mxu1 %v13147_v41  ;;  %v10654_v41 = vld [vmem:[%s21093_s7 + $0x1028] sm:$0xff] }
 0x79a   : > { %v13171_v60 = vpack.c.bf16 %v10657_v54, %v10654_v41 }
 0x79c   : > { %13150 = vmatpush1.bf16.msra.mxu1 %v13149_v51  ;;  %v10656_v51 = vld [vmem:[%s21093_s7 + $0x1038] sm:$0xff] }
 0x79d   : > { %13152 = vmatprep.subr.bf16.mxu1 %v13151_v47 }
 0x7a0   : > { %13154 = vmatpush1.bf16.msra.mxu1 %v13153_v16  ;;  %v13173_v16 = vpack.c.bf16 %v10656_v51, %v10653_v55 }
 0x7a1   : > { %13156 = vmatprep.subr.bf16.mxu1 %v13155_v50  ;;  %v13175_v50 = vpack.c.bf16 %v10663_v1, %v10660_v34  ;;  %v10704_v1 = vld [vmem:[%s21095_s9 + $0x1c8] sm:$0xff] }
 0x7a4   : > { %13158 = vmatpush1.bf16.msra.mxu1 %v13157_v19  ;;  %v10669_v19 = vld [vmem:[%s21093_s7 + $0x10a0] sm:$0xff] }
 0x7a5   : > { %13160 = vmatprep.subr.bf16.mxu1 %v13159_v59  ;;  %v13179_v27 = vpack.c.bf16 %v10669_v19, %v10666_v61  ;;  %v10690_v61 = vld [vmem:[%s21095_s9 + $0x158] sm:$0xff] }
 0x7a6   : > { %v10936_v9 = vpop.f32.mrb[76].mxu0 }
 0x7a7   : > { %v10937_v10 = vpop.f32.mrb[77].mxu0 }
 0x7a8   : > { %13162 = vmatpush1.bf16.msra.mxu1 %v13161_v20  ;;  %v10938_v18 = vadd.f32 %v10937_v10, %v10936_v9  ;;  %v10668_v20 = vld [vmem:[%s21093_s7 + $0x1098] sm:$0xff]  ;;  %v13183_v10 = vpack.c.bf16 %v10675_v57, %v10672_v23 }
 0x7a9   : > { %13164 = vmatprep.subr.bf16.mxu1 %v13163_v46  ;;  %v13181_v48 = vpack.c.bf16 %v10668_v20, %v10665_v8  ;;  %v10776_v8 = vld [vmem:[%s21095_s9 + $0x3b8] sm:$0xff] }
 0x7aa   : > { %v10939_v4 = vpop.f32.mrb[78].mxu0 }
 0x7ab   : > { %v10940_v29 = vpop.f32.mrb[79].mxu0 }
 0x7ac   : > { %13166 = vmatpush1.bf16.msra.mxu1 %v13165_v49  ;;  %v10941_v14 = vadd.f32 %v10940_v29, %v10939_v4  ;;  %v10671_v49 = vld [vmem:[%s21093_s7 + $0x10b0] sm:$0xff] }
 0x7ad   : > { %13168 = vmatprep.subr.bf16.mxu1 %v13167_v58  ;;  %v10674_v58 = vld [vmem:[%s21093_s7 + $0x10c8] sm:$0xff] }
 0x7ae   : > { %v10942_v47 = vpop.f32.mrb[80].mxu0  ;;  %v13185_v41 = vpack.c.bf16 %v10674_v58, %v10671_v49 }
 0x7af   : > { %v10943_v21 = vpop.f32.mrb[81].mxu0 }
 0x7b0   : > { %13170 = vmatpush1.bf16.msra.mxu1 %v13169_v22  ;;  %v10944_v53 = vadd.f32 %v10943_v21, %v10942_v47  ;;  %v10687_v21 = vld [vmem:[%s21095_s9 + $0x140] sm:$0xff] }
 0x7b1   : > { %13172 = vmatprep.subr.bf16.mxu1 %v13171_v60 }
 0x7b2   : > { %v10945_v5 = vpop.f32.mrb[82].mxu0 }
 0x7b3   : > { %v10946_v59 = vpop.f32.mrb[83].mxu0 }
 0x7b4   : > { %13174 = vmatpush1.bf16.msra.mxu1 %v13173_v16  ;;  %v10947_v42 = vadd.f32 %v10946_v59, %v10945_v5  ;;  %v10688_v16 = vld [vmem:[%s21095_s9 + $0x148] sm:$0xff]  ;;  %v10689_v5 = vld [vmem:[%s21095_s9 + $0x150] sm:$0xff] }
 0x7b5   : > { %13176 = vmatprep.subr.bf16.mxu1 %v13175_v50  ;;  %v10706_v50 = vld [vmem:[%s21095_s9 + $0x1d8] sm:$0xff]  ;;  %v13227_v56 = vpack.c.bf16 %v10688_v16, %v10687_v21  ;;  %v10774_v59 = vld [vmem:[%s21095_s9 + $0x3a8] sm:$0xff] }
 0x7b6   : > { %v10948_v46 = vpop.f32.mrb[84].mxu0 }
 0x7b7   : > { %v10949_v9 = vpop.f32.mrb[85].mxu0 }
 0x7b8   : > { %13178 = vmatpush1.bf16.msra.mxu1 %v13177_v45  ;;  %v10950_v3 = vadd.f32 %v10949_v9, %v10948_v46 }
 0x7b9   : > { %13180 = vmatprep.subr.bf16.mxu1 %v13179_v27  ;;  %v10775_v27 = vld [vmem:[%s21095_s9 + $0x3b0] sm:$0xff] }
 0x7ba   : > { %v6865_v43 = vpop.f32.mrb[86].mxu0 }
 0x7bb   : > { %7702 = vmatmul.mubr.f32.vlgmr.msra.gmra.mrb[58].mxu1 %v19882_v38  ;;  %v6866_v44 = vadd.f32 %v10938_v18, %v6865_v43  ;;  %v11308_v4 = vpop.f32.mrb[87].mxu0 }
 0x7bc   : > { %7707 = vmatprep.mubr.f32.mxu1 %v19899_v40  ;;  %13182 = vmatpush1.bf16.msra.mxu1 %v13181_v48 }
 0x7bd   : > { %v20384_v54 = vadd.f32 %v6866_v44, %v20217_v2  ;;  %13184 = vmatprep.subr.bf16.mxu1 %v13183_v10 }
 0x7be   : > { %v6870_v29 = vpop.f32.mrb[88].mxu0 }
 0x7bf   : > { %7708 = vmatmul.mubr.f32.gmra.mrb[60].mxu1 %v19910_v32  ;;  %v6871_v22 = vadd.f32 %v10941_v14, %v6870_v29  ;;  %v11311_v60 = vpop.f32.mrb[89].mxu0 }
 0x7c0   : > { %7713 = vmatprep.mubr.f32.mxu1 %v19922_v37  ;;  %13186 = vmatpush1.bf16.msra.mxu1 %v13185_v41 }
 0x7c1   : > { %v20389_v38 = vadd.f32 %v6871_v22, %v20234_v35  ;;  %13345 = vmatprep.subr.bf16.mxu1 %v21130_v7 }
 0x7c2   : > { %v6875_v40 = vpop.f32.mrb[90].mxu0 }
 0x7c3   : > { %7714 = vmatmul.mubr.f32.gmra.mrb[62].mxu1 %v19935_v31  ;;  %v6876_v18 = vadd.f32 %v10944_v53, %v6875_v40  ;;  %v11314_v2 = vpop.f32.mrb[91].mxu0  ;;  %v10769_v31 = vld [vmem:[%s21095_s9 + $0x380] sm:$0xff] }
 0x7c4   : > { %7719 = vmatprep.mubr.f32.mxu1 %v19946_v28  ;;  %v10770_v28 = vld [vmem:[%s21095_s9 + $0x388] sm:$0xff] }
 0x7c5   : > { %v20395_v55 = vadd.f32 %v6876_v18, %v20249_v30  ;;  %v13346_v47 = vpack.c.bf16 %v10770_v28, %v10769_v31 }
 0x7c6   : > { %v6880_v32 = vpop.f32.mrb[92].mxu0 }
 0x7c7   : > { %7720 = vmatmul.mubr.f32.gmra.mrb[64].mxu1 %v19958_v24  ;;  %v6881_v37 = vadd.f32 %v10947_v42, %v6880_v32  ;;  %v11317_v14 = vpop.f32.mrb[93].mxu0  ;;  %v13231_v42 = vpack.c.bf16 %v10690_v61, %v10689_v5 }
 0x7c8   : > { %7725 = vmatprep.mubr.f32.mxu1 %v19968_v25  ;;  %v10771_v25 = vld [vmem:[%s21095_s9 + $0x390] sm:$0xff] }
 0x7c9   : > { %v20400_v35 = vadd.f32 %v6881_v37, %v20263_v17  ;;  %v10772_v17 = vld [vmem:[%s21095_s9 + $0x398] sm:$0xff] }
 0x7ca   : > { %v6885_v30 = vpop.f32.mrb[94].mxu0  ;;  %v13349_v19 = vpack.c.bf16 %v10772_v17, %v10771_v25 }
 0x7cb   : > { %7726 = vmatmul.mubr.f32.gmra.mrb[66].mxu1 %v19980_v62  ;;  %v6886_v51 = vadd.f32 %v10950_v3, %v6885_v30  ;;  %v11320_v24 = vpop.f32.mrb[95].mxu0  ;;  %v10703_v62 = vld [vmem:[%s21095_s9 + $0x1c0] sm:$0xff] }
 0x7cc   : > { %7796 = vmatprep.mubr.f32.mxu1 %v21133_v26  ;;  %v13225_v53 = vpack.c.bf16 %v10704_v1, %v10703_v62 }
 0x7cd   : > { %v20417_v34 = vadd.f32 %v6886_v51, %v20277_v15  ;;  %v10705_v15 = vld [vmem:[%s21095_s9 + $0x1d0] sm:$0xff] }
 0x7ce   : > { %v13229_v11 = vpack.c.bf16 %v10706_v50, %v10705_v15  ;;  %13226 = vmatprep.subr.bf16.mxu0 %v13225_v53 }
 0x7cf   : > { %10677 = vmatmul.mubr.msk.f32.vlgmr.msra.gmra.mrb[58].mxu1 %vm5274_vm4, %v20001_v39  ;;  %v10773_v39 = vld [vmem:[%s21095_s9 + $0x3a0] sm:$0xff]  ;;  %13228 = vmatpush3.bf16.msra.mxu0 %v13227_v56 }
 0x7d0   : > { %7802 = vmatprep.mubr.f32.mxu1 %v21133_v26  ;;  %13347 = vmatpush3.bf16.msra.mxu1 %v13346_v47  ;;  %v13352_v45 = vpack.c.bf16 %v10774_v59, %v10773_v39 }
 0x7d1   : > { %13348 = vmatprep.subr.bf16.mxu1 %v21130_v7  ;;  %13230 = vmatprep.subr.bf16.mxu0 %v13229_v11 }
 0x7d3   : > { %10678 = vmatmul.mubr.msk.f32.gmra.mrb[60].mxu1 %vm5274_vm4, %v20023_v12  ;;  %13232 = vmatpush3.bf16.msra.mxu0 %v13231_v42  ;;  %v13355_v12 = vpack.c.bf16 %v10776_v8, %v10775_v27 }
 0x7d4   : > { %7808 = vmatprep.mubr.f32.mxu1 %v21133_v26  ;;  %13350 = vmatpush3.bf16.msra.mxu1 %v13349_v19 }
 0x7d5   : > { %13351 = vmatprep.subr.bf16.mxu1 %v21130_v7 }
 0x7d7   : > { %10679 = vmatmul.mubr.msk.f32.gmra.mrb[62].mxu1 %vm5274_vm4, %v20046_v6 }
 0x7d8   : > { %7814 = vmatprep.mubr.f32.mxu1 %v21133_v26  ;;  %13353 = vmatpush3.bf16.msra.mxu1 %v13352_v45 }
 0x7d9   : > { %13354 = vmatprep.subr.bf16.mxu1 %v21130_v7 }
 0x7da   : > { %v10992_v20 = vpop.f32.mrb[96].mxu0 }
 0x7db   : > { %10680 = vmatmul.mubr.msk.f32.gmra.mrb[64].mxu1 %vm5274_vm4, %v20069_v36  ;;  %v10993_v46 = vpop.f32.mrb[97].mxu0 }
 0x7dc   : > { %v10994_v23 = vadd.f32 %v10993_v46, %v10992_v20  ;;  %7820 = vmatprep.mubr.f32.mxu1 %v21133_v26  ;;  %13356 = vmatpush3.bf16.msra.mxu1 %v13355_v12 }
 0x7de   : > { %v10995_v57 = vpop.f32.mrb[98].mxu0 }
 0x7df   : > { %10681 = vmatmul.mubr.msk.f32.gmra.mrb[66].mxu1 %vm5274_vm4, %v20091_v52  ;;  %v10996_v6 = vpop.f32.mrb[99].mxu0 }
 0x7e0   : > { %v10997_v9 = vadd.f32 %v10996_v6, %v10995_v57  ;;  %11445 = vmatprep.mubr.msk.f32.mxu1 %vm13756_vm9, %v21133_v26 }
 0x7e2   : > { %v10998_v3 = vpop.f32.mrb[100].mxu0 }
 0x7e3   : > { %v10999_v48 = vpop.f32.mrb[101].mxu0 }
 0x7e4   : > { %v11000_v10 = vadd.f32 %v10999_v48, %v10998_v3 }
 0x7e6   : > { %v11001_v49 = vpop.f32.mrb[102].mxu0 }
 0x7e7   : > { %v11002_v58 = vpop.f32.mrb[103].mxu0 }
 0x7e8   : > { %v11003_v36 = vadd.f32 %v11002_v58, %v11001_v49 }
 0x7ea   : > { %v11004_v43 = vpop.f32.mrb[104].mxu0 }
 0x7eb   : > { %v11005_v44 = vpop.f32.mrb[105].mxu0 }
 0x7ec   : > { %v11006_v4 = vadd.f32 %v11005_v44, %v11004_v43 }
 0x7ee   : > { %v7424_v41 = vpop.f32.mrb[106].mxu0 }
 0x7ef   : > { %v7425_v29 = vadd.f32 %v10994_v23, %v7424_v41  ;;  %v11331_v22 = vpop.f32.mrb[107].mxu0 }
 0x7f1   : > { %v7450_v60 = vadd.f32 %v7425_v29, %v20384_v54 }
 0x7f2   : > { %v7429_v52 = vpop.f32.mrb[108].mxu0 }
 0x7f3   : > { %v7430_v40 = vadd.f32 %v10997_v9, %v7429_v52  ;;  %v11334_v18 = vpop.f32.mrb[109].mxu0  ;;  %v10707_v9 = vld [vmem:[%s21095_s9 + $0x1e0] sm:$0xff] }
 0x7f4   : > { %v13233_v58 = vpack.c.bf16 %v10708_v13, %v10707_v9  ;;  %v10710_v18 = vld [vmem:[%s21095_s9 + $0x1f8] sm:$0xff]  ;;  %v10700_v13 = vld [vmem:[%s21095_s9 + $0x1a8] sm:$0xff] }
 0x7f5   : > { %v7453_v2 = vadd.f32 %v7430_v40, %v20389_v38  ;;  %v10709_v40 = vld [vmem:[%s21095_s9 + $0x1f0] sm:$0xff] }
 0x7f6   : > { %v7434_v32 = vpop.f32.mrb[110].mxu0  ;;  %13234 = vmatprep.subr.bf16.mxu0 %v13233_v58 }
 0x7f7   : > { %v7435_v37 = vadd.f32 %v11000_v10, %v7434_v32  ;;  %v11337_v14 = vpop.f32.mrb[111].mxu0  ;;  %v13237_v32 = vpack.c.bf16 %v10710_v18, %v10709_v40 }
 0x7f9   : > { %v7456_v31 = vadd.f32 %v7435_v37, %v20395_v55  ;;  %v10694_v37 = vld [vmem:[%s21095_s9 + $0x178] sm:$0xff] }
 0x7fa   : > { %v7439_v28 = vpop.f32.mrb[112].mxu0 }
 0x7fb   : > { %v7440_v30 = vadd.f32 %v11003_v36, %v7439_v28  ;;  %v11340_v51 = vpop.f32.mrb[113].mxu0  ;;  %v10692_v36 = vld [vmem:[%s21095_s9 + $0x168] sm:$0xff] }
 0x7fd   : > { %v7459_v24 = vadd.f32 %v7440_v30, %v20400_v35 }
 0x7fe   : > { %v7444_v47 = vpop.f32.mrb[114].mxu0 }
 0x7ff   : > { %v7445_v25 = vadd.f32 %v11006_v4, %v7444_v47  ;;  %v11343_v17 = vpop.f32.mrb[115].mxu0 }
 0x801   : > { %v20479_v54 = vadd.f32 %v7445_v25, %v20417_v34  ;;  %v20484_v34 = vld [vmem:[%s21094_s8] sm:$0x7] }
 0x802   : > { %v8035_v42 = vrot.slane %v20484_v34, %v5169_v33  ;;  %v10691_v33 = vld [vmem:[%s21095_s9 + $0x160] sm:$0xff] }
 0x803   : > { %v13235_v43 = vpack.c.bf16 %v10692_v36, %v10691_v33  ;;  %v10717_v33 = vld [vmem:[%s21095_s9 + $0x230] sm:$0xff] }
 0x804   : > { %v10701_v36 = vld [vmem:[%s21095_s9 + $0x1b0] sm:$0xff] }
 0x805   : > { %13236 = vmatpush3.bf16.msra.mxu0 %v13235_v43  ;;  %v10702_v43 = vld [vmem:[%s21095_s9 + $0x1b8] sm:$0xff] }
 0x806   : > { %13238 = vmatprep.subr.bf16.mxu0 %v13237_v32 }
 0x80e   : > { %v11048_v62 = vpop.f32.mrb[116].mxu0 }
 0x80f   : > { %v11049_v1 = vpop.f32.mrb[117].mxu0 }
 0x810   : > { %v11050_v21 = vadd.f32 %v11049_v1, %v11048_v62  ;;  %v10711_v1 = vld [vmem:[%s21095_s9 + $0x200] sm:$0xff] }
 0x812   : > { %v11051_v38 = vpop.f32.mrb[118].mxu0 }
 0x813   : > { %v11052_v53 = vpop.f32.mrb[119].mxu0 }
 0x814   : > { %v11053_v16 = vadd.f32 %v11052_v53, %v11051_v38  ;;  %v10696_v53 = vld [vmem:[%s21095_s9 + $0x188] sm:$0xff] }
 0x816   : > { %v11054_v15 = vpop.f32.mrb[120].mxu0 }
 0x817   : > { %v11055_v50 = vpop.f32.mrb[121].mxu0 }
 0x818   : > { %v11056_v55 = vadd.f32 %v11055_v50, %v11054_v15 }
 0x81a   : > { %v11057_v56 = vpop.f32.mrb[122].mxu0 }
 0x81b   : > { %v11058_v11 = vpop.f32.mrb[123].mxu0 }
 0x81c   : > { %v11059_v5 = vadd.f32 %v11058_v11, %v11057_v56 }
 0x81e   : > { %v11060_v61 = vpop.f32.mrb[124].mxu0 }
 0x81f   : > { %v11061_v35 = vpop.f32.mrb[125].mxu0 }
 0x820   : > { %v11062_v19 = vadd.f32 %v11061_v35, %v11060_v61  ;;  %v10713_v61 = vld [vmem:[%s21095_s9 + $0x210] sm:$0xff]  ;;  %v10714_v35 = vld [vmem:[%s21095_s9 + $0x218] sm:$0xff] }
 0x822   : > { %v7983_v39 = vpop.f32.mrb[126].mxu0 }
 0x823   : > { %v7984_v59 = vadd.f32 %v11050_v21, %v7983_v39  ;;  %v11354_v45 = vpop.f32.mrb[127].mxu0  ;;  %v10712_v21 = vld [vmem:[%s21095_s9 + $0x208] sm:$0xff]  ;;  %v10698_v39 = vld [vmem:[%s21095_s9 + $0x198] sm:$0xff] }
 0x824   : > { %v13241_v38 = vpack.c.bf16 %v10712_v21, %v10711_v1 }
 0x825   : > { %v8009_v27 = vadd.f32 %v7984_v59, %v7450_v60 }
 0x826   : > { %v7988_v8 = vpop.f32.mrb[128].mxu0 }
 0x827   : > { %v8041_v12 = vadd.f32 %v8035_v42, %v8009_v27  ;;  %v7989_v20 = vadd.f32 %v11053_v16, %v7988_v8  ;;  %v11357_v46 = vpop.f32.mrb[129].mxu0 }
 0x828   : > { %v10715_v46 = vld [vmem:[%s21095_s9 + $0x220] sm:$0xff] }
 0x829   : > { %v8056_v23 = vmax.f32 %v8041_v12, 0.0  ;;  %v8012_v57 = vadd.f32 %v7989_v20, %v7453_v2  ;;  %v10693_v2 = vld [vmem:[%s21095_s9 + $0x170] sm:$0xff] }
 0x82a   : > { %v7993_v6 = vpop.f32.mrb[130].mxu0  ;;  %v13239_v30 = vpack.c.bf16 %v10694_v37, %v10693_v2 }
 0x82b   : > { %v8096_v3 = vrot.slane %v8056_v23, 7  ;;  %v8044_v48 = vadd.f32 %v8035_v42, %v8012_v57  ;;  %v7994_v10 = vadd.f32 %v11056_v55, %v7993_v6  ;;  %v11360_v49 = vpop.f32.mrb[131].mxu0  ;;  %v10716_v23 = vld [vmem:[%s21095_s9 + $0x228] sm:$0xff]  ;;  %v10699_v57 = vld [vmem:[%s21095_s9 + $0x1a0] sm:$0xff] }
 0x82c   : > { %13240 = vmatpush3.bf16.msra.mxu0 %v13239_v30  ;;  %v13249_v9 = vpack.c.bf16 %v10716_v23, %v10715_v46  ;;  %v13251_v49 = vpack.c.bf16 %v10700_v13, %v10699_v57  ;;  %v20633_v13 = vld [vmem:[%s21095_s9 + $0x260] sm:$0xff] }
 0x82d   : > { %8142 = vst.msk [vmem:[#allocation6 + $0x10] sm:$0xfe] %vm8141_vm7, %v8096_v3  ;;  %v8059_v44 = vmax.f32 %v8044_v48, 0.0  ;;  %v8015_v4 = vadd.f32 %v7994_v10, %v7456_v31  ;;  %13242 = vmatprep.subr.bf16.mxu0 %v13241_v38 }
 0x82e   : > { %v7998_v41 = vpop.f32.mrb[132].mxu0 }
 0x82f   : > { %v8101_v29 = vrot.slane %v8059_v44, 7  ;;  %v8047_v22 = vadd.f32 %v8035_v42, %v8015_v4  ;;  %v7999_v60 = vadd.f32 %v11059_v5, %v7998_v41  ;;  %v11363_v52 = vpop.f32.mrb[133].mxu0  ;;  %v13255_v41 = vpack.c.bf16 %v10702_v43, %v10701_v36 }
 0x831   : > { %v8102_v14 = vsel %vm8093_vm8, %v8096_v3, %v8101_v29  ;;  %v8062_v31 = vmax.f32 %v8047_v22, 0.0  ;;  %v8018_v28 = vadd.f32 %v7999_v60, %v7459_v24  ;;  %v10695_v24 = vld [vmem:[%s21095_s9 + $0x180] sm:$0xff]  ;;  %v10718_v3 = vld [vmem:[%s21095_s9 + $0x238] sm:$0xff] }
 0x832   : > { %8145 = vst.msk [vmem:[#allocation6 + $0x28] sm:$0xff] %vm387_vm0, %v8102_v14  ;;  %v8003_v51 = vpop.f32.mrb[134].mxu0  ;;  %v13243_v56 = vpack.c.bf16 %v10696_v53, %v10695_v24  ;;  %v13253_v58 = vpack.c.bf16 %v10718_v3, %v10717_v33  ;;  %v8027_v14 = vrot.slane %v20484_v34, %v21142_v63  ;;  %v20638_v33 = vld [vmem:[%s21095_s9 + $0x268] sm:$0xff] }
 0x833   : > { %v8107_v47 = vrot.slane %v8062_v31, 7  ;;  %v8050_v25 = vadd.f32 %v8035_v42, %v8018_v28  ;;  %v8004_v17 = vadd.f32 %v11062_v19, %v8003_v51  ;;  %v11366_v62 = vpop.f32.mrb[135].mxu0  ;;  %v10697_v19 = vld [vmem:[%s21095_s9 + $0x190] sm:$0xff]  ;;  %v8031_v31 = vrot.slane %v20484_v34, %v21143_v0 }
 0x834   : > { %v8705_v55 = vld [vmem:[#allocation6 + $0x10] sm:$0xfc]  ;;  %13244 = vmatpush3.bf16.msra.mxu0 %v13243_v56  ;;  %v13247_v27 = vpack.c.bf16 %v10698_v39, %v10697_v19 }
 0x835   : > { %v8108_v16 = vsel %vm8093_vm8, %v8101_v29, %v8107_v47  ;;  %v8065_v15 = vmax.f32 %v8050_v25, 0.0  ;;  %v8021_v50 = vadd.f32 %v8004_v17, %v20479_v54  ;;  %v13245_v54 = vpack.c.bf16 %v10714_v35, %v10713_v61  ;;  %v20617_v19 = vld [vmem:[%s21095_s9 + $0x250] sm:$0xff] }
 0x836   : > { %8148 = vst.msk [vmem:[#allocation6 + $0x40] sm:$0xff] %vm387_vm0, %v8108_v16  ;;  %v8762_v8 = vrot.slane %v8705_v55, 2 }
 0x837   : > { %v8113_v11 = vrot.slane %v8065_v15, 7  ;;  %v8053_v5 = vadd.f32 %v8035_v42, %v8021_v50  ;;  %13246 = vmatprep.subr.bf16.mxu0 %v13245_v54  ;;  %v20622_v54 = vld [vmem:[%s21095_s9 + $0x258] sm:$0xff] }
 0x838   : > { %13248 = vmatpush3.bf16.msra.mxu0 %v13247_v27 }
 0x839   : > { %v8114_v59 = vsel %vm8093_vm8, %v8107_v47, %v8113_v11  ;;  %v8068_v42 = vmax.f32 %v8053_v5, 0.0  ;;  %v20543_v45 = vld [vmem:[#allocation6 + $0x28] sm:$0xff]  ;;  %13250 = vmatprep.subr.bf16.mxu0 %v13249_v9  ;;  %v13261_v9 = vpack.c.bf16 %v20622_v54, %v20617_v19 }
 0x83a   : > { %8151 = vst.msk [vmem:[#allocation6 + $0x58] sm:$0xff] %vm387_vm0, %v8114_v59  ;;  %v8763_v12 = vrot.slane %v20543_v45, 2  ;;  %v10720_v5 = vld [vmem:[%s21095_s9 + $0x248] sm:$0xff] }
 0x83b   : > { %v8119_v20 = vrot.slane %v8068_v42, 7 }
 0x83c   : > { %v8764_v6 = vsel %vm1480_vm5, %v8762_v8, %v8763_v12  ;;  %13252 = vmatpush3.bf16.msra.mxu0 %v13251_v49 }
 0x83d   : > { %v8120_v48 = vsel %vm8093_vm8, %v8113_v11, %v8119_v20  ;;  %8158 = vst.msk [vmem:[#allocation6 + $0x88] sm:$0x1] %vm8157_vm10, %v8119_v20  ;;  %11446 = vmatmul.mubr.msk.f32.vlgmr.msra.gmra.mrb[68].mxu1 %vm387_vm0, %v8764_v6  ;;  %v20568_v10 = vld [vmem:[#allocation6 + $0x40] sm:$0xff]  ;;  %13254 = vmatprep.subr.bf16.mxu0 %v13253_v58 }
 0x83e   : > { %8154 = vst.msk [vmem:[#allocation6 + $0x70] sm:$0xff] %vm387_vm0, %v8120_v48  ;;  %11448 = vmatprep.mubr.msk.f32.mxu1 %vm13756_vm9, %v21133_v26  ;;  %v8769_v44 = vrot.slane %v20568_v10, 2  ;;  %v10719_v11 = vld [vmem:[%s21095_s9 + $0x240] sm:$0xff] }
 0x83f   : > { %v13258_v20 = vpack.c.bf16 %v10720_v5, %v10719_v11 }
 0x840   : > { %v8770_v4 = vsel %vm1480_vm5, %v8763_v12, %v8769_v44  ;;  %13256 = vmatpush3.bf16.msra.mxu0 %v13255_v41 }
 0x841   : > { %11449 = vmatmul.mubr.msk.f32.gmra.mrb[70].mxu1 %vm387_vm0, %v8770_v4  ;;  %v20582_v29 = vld [vmem:[#allocation6 + $0x58] sm:$0xff]  ;;  %13257 = vmatprep.subr.bf16.mxu0 %v21130_v7 }
 0x842   : > { %11451 = vmatprep.mubr.msk.f32.mxu1 %vm13756_vm9, %v21133_v26  ;;  %v8775_v22 = vrot.slane %v20582_v29, 2 }
 0x844   : > { %v8776_v60 = vsel %vm1480_vm5, %v8769_v44, %v8775_v22  ;;  %v8708_v40 = vld [vmem:[#allocation6 + $0x88] sm:$0x3] }
 0x845   : > { %11452 = vmatmul.mubr.msk.f32.gmra.mrb[72].mxu1 %vm387_vm0, %v8776_v60  ;;  %v20589_v52 = vld [vmem:[#allocation6 + $0x70] sm:$0xff]  ;;  %v8787_v32 = vrot.slane %v8708_v40, 2 }
 0x846   : > { %11454 = vmatprep.mubr.msk.f32.mxu1 %vm13756_vm9, %v21133_v26  ;;  %v8781_v18 = vrot.slane %v20589_v52, 2 }
 0x848   : > { %v8782_v2 = vsel %vm1480_vm5, %v8775_v22, %v8781_v18  ;;  %v8788_v37 = vsel %vm1480_vm5, %v8781_v18, %v8787_v32  ;;  %v13264_v32 = vpack.c.bf16 %v20638_v33, %v20633_v13 }
 0x849   : > { %11455 = vmatmul.mubr.msk.f32.gmra.mrb[74].mxu1 %vm387_vm0, %v8782_v2 }
 0x84a   : > { %11457 = vmatprep.mubr.msk.f32.mxu1 %vm13756_vm9, %v21133_v26 }
 0x84d   : > { %11458 = vmatmul.mubr.msk.f32.gmra.mrb[76].mxu1 %vm387_vm0, %v8788_v37 }
 0x8a2   : > { %v7798_v28 = vpop.f32.mrb[58].mxu1 }
 0x8a3   : > { %v8039_v30 = vadd.f32 %v8027_v14, %v7798_v28  ;;  %v7800_v51 = vpop.f32.mrb[59].mxu1 }
 0x8a4   : > { %v8040_v47 = vadd.f32 %v8031_v31, %v7800_v51 }
 0x8a5   : > { %v8054_v25 = vmax.f32 %v8039_v30, 0.0 }
 0x8a6   : > { %v8055_v17 = vmax.f32 %v8040_v47, 0.0  ;;  %v7804_v62 = vpop.f32.mrb[60].mxu1 }
 0x8a7   : > { %v8094_v1 = vrot.slane %v8054_v25, 7  ;;  %v8042_v21 = vadd.f32 %v8027_v14, %v7804_v62  ;;  %v7806_v24 = vpop.f32.mrb[61].mxu1 }
 0x8a8   : > { %v8095_v38 = vrot.slane %v8055_v17, 7  ;;  %v8043_v53 = vadd.f32 %v8031_v31, %v7806_v24 }
 0x8a9   : > { %8139 = vst [vmem:[#allocation6] sm:$0xfe] %v8094_v1  ;;  %v8057_v16 = vmax.f32 %v8042_v21, 0.0 }
 0x8aa   : > { %8140 = vst [vmem:[#allocation6 + $0x8] sm:$0xfe] %v8095_v38  ;;  %v8058_v15 = vmax.f32 %v8043_v53, 0.0  ;;  %v7810_v63 = vpop.f32.mrb[62].mxu1 }
 0x8ab   : > { %v8097_v50 = vrot.slane %v8057_v16, 7  ;;  %v8045_v55 = vadd.f32 %v8027_v14, %v7810_v63  ;;  %v7812_v0 = vpop.f32.mrb[63].mxu1 }
 0x8ac   : > { %v8099_v34 = vrot.slane %v8058_v15, 7  ;;  %v8046_v56 = vadd.f32 %v8031_v31, %v7812_v0 }
 0x8ad   : > { %v20612_v61 = vsel %vm8093_vm8, %v8094_v1, %v8097_v50  ;;  %v8060_v35 = vmax.f32 %v8045_v55, 0.0 }
 0x8ae   : > { %v20625_v39 = vsel %vm8093_vm8, %v8095_v38, %v8099_v34  ;;  %v8061_v59 = vmax.f32 %v8046_v56, 0.0  ;;  %v7816_v42 = vpop.f32.mrb[64].mxu1  ;;  %v8280_v6 = vrot.slane %v20612_v61, 1  ;;  %v8757_v21 = vrot.slane %v20612_v61, 2 }
 0x8af   : > { %v8103_v27 = vrot.slane %v8060_v35, 7  ;;  %v8048_v8 = vadd.f32 %v8027_v14, %v7816_v42  ;;  %v7818_v12 = vpop.f32.mrb[65].mxu1  ;;  %v8283_v58 = vrot.slane %v20625_v39, 1  ;;  %v8760_v53 = vrot.slane %v20625_v39, 2 }
 0x8b0   : > { %v8105_v46 = vrot.slane %v8061_v59, 7  ;;  %v8049_v23 = vadd.f32 %v8031_v31, %v7818_v12  ;;  %v8214_v57 = vld [vmem:[#allocation6] sm:$0xfe] }
 0x8b1   : > { %v20641_v3 = vsel %vm8093_vm8, %v8097_v50, %v8103_v27  ;;  %v8063_v48 = vmax.f32 %v8048_v8, 0.0  ;;  %v8215_v49 = vld [vmem:[#allocation6 + $0x8] sm:$0xfe]  ;;  %v8279_v36 = vrot.slane %v8214_v57, 1  ;;  %v8190_v57 = vld [vmem:[%s21095_s9 + $0x80] sm:$0xff] }
 0x8b2   : > { %v20645_v43 = vsel %vm8093_vm8, %v8099_v34, %v8105_v46  ;;  %v8064_v44 = vmax.f32 %v8049_v23, 0.0  ;;  %v7822_v4 = vpop.f32.mrb[66].mxu1  ;;  %v8282_v41 = vrot.slane %v8215_v49, 1  ;;  %v8288_v22 = vrot.slane %v20641_v3, 1 }
 0x8b3   : > { %v8109_v60 = vrot.slane %v8063_v48, 7  ;;  %v8051_v40 = vadd.f32 %v8027_v14, %v7822_v4  ;;  %v7824_v18 = vpop.f32.mrb[67].mxu1  ;;  %v8290_v2 = vrot.slane %v20645_v43, 1  ;;  %v8281_v17 = vsel %vm1624_vm6, %v8279_v36, %v8280_v6 }
 0x8b4   : > { %v8111_v37 = vrot.slane %v8064_v44, 7  ;;  %v8052_v28 = vadd.f32 %v8031_v31, %v7824_v18  ;;  %v8284_v30 = vsel %vm1624_vm6, %v8282_v41, %v8283_v58  ;;  %v8289_v51 = vsel %vm1624_vm6, %v8280_v6, %v8288_v22  ;;  %v8191_v6 = vld [vmem:[%s21095_s9 + $0x88] sm:$0xff]  ;;  %v8216_v41 = vld [vmem:[#allocation6 + $0x10] sm:$0xfe] }
 0x8b5   : > { %v20654_v47 = vsel %vm8093_vm8, %v8103_v27, %v8109_v60  ;;  %v8066_v25 = vmax.f32 %v8051_v40, 0.0  ;;  %8396 = vmatprep.mubr.f32.mxu0 %v8284_v30  ;;  %v8291_v14 = vsel %vm1624_vm6, %v8283_v58, %v8290_v2  ;;  %v8767_v16 = vrot.slane %v20645_v43, 2 }
 0x8b6   : > { %v20659_v62 = vsel %vm8093_vm8, %v8105_v46, %v8111_v37  ;;  %v8067_v1 = vmax.f32 %v8052_v28, 0.0  ;;  %8397 = vmatmul.mubr.f32.vlgmr.msra.gmra.mrb[136].mxu0 %v8281_v17  ;;  %v8294_v31 = vrot.slane %v20654_v47, 1  ;;  %v8765_v50 = vrot.slane %v20641_v3, 2  ;;  %v10726_v46 = vld [vmem:[%s21095_s9 + $0x278] sm:$0xff] }
 0x8b7   : > { %v8115_v24 = vrot.slane %v8066_v25, 7  ;;  %13259 = vmatpush3.bf16.msra.mxu0 %v13258_v20  ;;  %8401 = vmatprep.mubr.f32.mxu0 %v8291_v14  ;;  %v8296_v38 = vrot.slane %v20659_v62, 1  ;;  %v8773_v55 = vrot.slane %v20659_v62, 2  ;;  %v20677_v56 = vsel %vm1480_vm5, %v8760_v53, %v8767_v16  ;;  %v10725_v20 = vld [vmem:[%s21095_s9 + $0x270] sm:$0xff]  ;;  %v8177_v25 = vld [vmem:[%s21095_s9 + $0x18] sm:$0xff] }
 0x8b8   : > { %v8117_v15 = vrot.slane %v8067_v1, 7  ;;  %13260 = vmatprep.subr.bf16.mxu0 %v21130_v7  ;;  %v8295_v63 = vsel %vm1624_vm6, %v8288_v22, %v8294_v31  ;;  %v8771_v11 = vrot.slane %v20654_v47, 2  ;;  %v20687_v19 = vsel %vm1480_vm5, %v8757_v21, %v8765_v50  ;;  %v8174_v22 = vld [vmem:[%s21095_s9] sm:$0xff] }
 0x8b9   : > { %v20671_v0 = vsel %vm8093_vm8, %v8109_v60, %v8115_v24  ;;  %8155 = vst [vmem:[#allocation6 + $0x78] sm:$0x1] %v8115_v24  ;;  %v8297_v34 = vsel %vm1624_vm6, %v8290_v2, %v8296_v38  ;;  %v20690_v54 = vsel %vm1480_vm5, %v8767_v16, %v8773_v55  ;;  %v13267_v33 = vpack.c.bf16 %v10726_v46, %v10725_v20  ;;  %v8175_v60 = vld [vmem:[%s21095_s9 + $0x8] sm:$0xff]  ;;  %v8192_v2 = vld [vmem:[%s21095_s9 + $0x90] sm:$0xff]  ;;  %v8194_v1 = vld [vmem:[%s21095_s9 + $0xa0] sm:$0xff] }
 0x8ba   : > { %v20681_v5 = vsel %vm8093_vm8, %v8111_v37, %v8117_v15  ;;  %8156 = vst [vmem:[#allocation6 + $0x80] sm:$0x1] %v8117_v15  ;;  %8402 = vmatmul.mubr.f32.gmra.mrb[138].mxu0 %v8289_v51  ;;  %v8300_v35 = vrot.slane %v20671_v0, 1  ;;  %v20694_v42 = vsel %vm1480_vm5, %v8765_v50, %v8771_v11  ;;  %v8777_v8 = vrot.slane %v20671_v0, 2  ;;  %v8176_v51 = vld [vmem:[%s21095_s9 + $0x10] sm:$0xff]  ;;  %v8178_v16 = vld [vmem:[%s21095_s9 + $0x20] sm:$0xff] }
 0x8bb   : > { %13262 = vmatpush3.bf16.msra.mxu0 %v13261_v9  ;;  %8406 = vmatprep.mubr.f32.mxu0 %v8297_v34  ;;  %v8302_v59 = vrot.slane %v20681_v5, 1  ;;  %v8779_v27 = vrot.slane %v20681_v5, 2  ;;  %v13269_v49 = vpack.c.bf16 %v8191_v6, %v8190_v57  ;;  %v8286_v18 = vrot.slane %v20543_v45, 1  ;;  %v8179_v15 = vld [vmem:[%s21095_s9 + $0x28] sm:$0xff]  ;;  %v8197_v34 = vld [vmem:[%s21095_s9 + $0xb8] sm:$0xff] }
 0x8bc   : > { %13263 = vmatprep.subr.bf16.mxu0 %v21130_v7  ;;  %v8301_v12 = vsel %vm1624_vm6, %v8294_v31, %v8300_v35  ;;  %v20721_v13 = vsel %vm1480_vm5, %v8771_v11, %v8777_v8  ;;  %v8285_v37 = vrot.slane %v8216_v41, 1  ;;  %v13271_v28 = vpack.c.bf16 %v8175_v60, %v8174_v22  ;;  %v8195_v31 = vld [vmem:[%s21095_s9 + $0xa8] sm:$0xff]  ;;  %v8201_v41 = vld [vmem:[%s21095_s9 + $0xd8] sm:$0xff] }
 0x8bd   : > { %v8303_v23 = vsel %vm1624_vm6, %v8296_v38, %v8302_v59  ;;  %v20716_v9 = vsel %vm1480_vm5, %v8773_v55, %v8779_v27  ;;  %v8292_v14 = vrot.slane %v20568_v10, 1  ;;  %v13275_v24 = vpack.c.bf16 %v8177_v25, %v8176_v51  ;;  %v8196_v55 = vld [vmem:[%s21095_s9 + $0xb0] sm:$0xff]  ;;  %v8199_v57 = vld [vmem:[%s21095_s9 + $0xc8] sm:$0xff]  ;;  %v8186_v25 = vld [vmem:[%s21095_s9 + $0x60] sm:$0xff] }
 0x8be   : > { %8407 = vmatmul.mubr.f32.gmra.mrb[140].mxu0 %v8295_v63  ;;  %v8287_v17 = vsel %vm1624_vm6, %v8285_v37, %v8286_v18  ;;  %v13277_v38 = vpack.c.bf16 %v8195_v31, %v8194_v1  ;;  %v8298_v50 = vrot.slane %v20582_v29, 1  ;;  %v13279_v11 = vpack.c.bf16 %v8179_v15, %v8178_v16  ;;  %v8219_v6 = vld [vmem:[#allocation6 + $0x88] sm:$0x1]  ;;  %v8205_v1 = vld [vmem:[%s21095_s9 + $0xf8] sm:$0xff] }
 0x8bf   : > { %8411 = vmatprep.mubr.f32.mxu0 %v8303_v23  ;;  %13265 = vmatpush3.bf16.msra.mxu0 %v13264_v32  ;;  %v8193_v32 = vld [vmem:[%s21095_s9 + $0x98] sm:$0xff]  ;;  %v8293_v63 = vsel %vm1624_vm6, %v8286_v18, %v8292_v14  ;;  %v8304_v46 = vrot.slane %v20589_v52, 1  ;;  %v8198_v23 = vld [vmem:[%s21095_s9 + $0xc0] sm:$0xff]  ;;  %v8203_v37 = vld [vmem:[%s21095_s9 + $0xe8] sm:$0xff] }
 0x8c0   : > { %13266 = vmatprep.subr.bf16.mxu0 %v21130_v7  ;;  %v8217_v48 = vld [vmem:[#allocation6 + $0x78] sm:$0x1]  ;;  %v13273_v30 = vpack.c.bf16 %v8193_v32, %v8192_v2  ;;  %v8299_v20 = vsel %vm1624_vm6, %v8292_v14, %v8298_v50  ;;  %v8202_v32 = vld [vmem:[%s21095_s9 + $0xe0] sm:$0xff]  ;;  %v8204_v14 = vld [vmem:[%s21095_s9 + $0xf0] sm:$0xff] }
 0x8c1   : > { %v8218_v58 = vld [vmem:[#allocation6 + $0x80] sm:$0x1]  ;;  %v8306_v36 = vrot.slane %v8217_v48, 1  ;;  %v13285_v48 = vpack.c.bf16 %v8199_v57, %v8198_v23  ;;  %v8185_v18 = vld [vmem:[%s21095_s9 + $0x58] sm:$0xff]  ;;  %v13293_v51 = vpack.c.bf16 %v8203_v37, %v8202_v32  ;;  %v8212_v23 = vld [vmem:[%s21095_s9 + $0x130] sm:$0xff] }
 0x8c2   : > { %8412 = vmatmul.mubr.f32.gmra.mrb[142].mxu0 %v8301_v12  ;;  %v8308_v44 = vrot.slane %v8218_v58, 1  ;;  %v8181_v12 = vld [vmem:[%s21095_s9 + $0x38] sm:$0xff]  ;;  %v8183_v58 = vld [vmem:[%s21095_s9 + $0x48] sm:$0xff]  ;;  %v10759_v32 = vld [vmem:[%s21095_s9 + $0x330] sm:$0xff] }
 0x8c3   : > { %13268 = vmatpush3.bf16.msra.mxu0 %v13267_v33  ;;  %v8307_v40 = vsel %vm1624_vm6, %v8300_v35, %v8306_v36  ;;  %v13281_v35 = vpack.c.bf16 %v8197_v34, %v8196_v55  ;;  %v8305_v36 = vsel %vm1624_vm6, %v8298_v50, %v8304_v46  ;;  %v8189_v16 = vld [vmem:[%s21095_s9 + $0x78] sm:$0xff]  ;;  %v8207_v50 = vld [vmem:[%s21095_s9 + $0x108] sm:$0xff]  ;;  %v8208_v34 = vld [vmem:[%s21095_s9 + $0x110] sm:$0xff] }
 0x8c4   : > { %v8309_v4 = vsel %vm1624_vm6, %v8302_v59, %v8308_v44  ;;  %13270 = vmatprep.subr.bf16.mxu0 %v13269_v49  ;;  %v8180_v59 = vld [vmem:[%s21095_s9 + $0x30] sm:$0xff]  ;;  %v8182_v49 = vld [vmem:[%s21095_s9 + $0x40] sm:$0xff]  ;;  %v8310_v44 = vrot.slane %v8219_v6, 1  ;;  %v8213_v57 = vld [vmem:[%s21095_s9 + $0x138] sm:$0xff] }
 0x8c5   : > { %8416 = vmatprep.mubr.f32.mxu0 %v8309_v4  ;;  %v13283_v33 = vpack.c.bf16 %v8181_v12, %v8180_v59  ;;  %v8200_v4 = vld [vmem:[%s21095_s9 + $0xd0] sm:$0xff]  ;;  %v13287_v22 = vpack.c.bf16 %v8183_v58, %v8182_v49  ;;  %v8210_v12 = vld [vmem:[%s21095_s9 + $0x120] sm:$0xff]  ;;  %v10760_v37 = vld [vmem:[%s21095_s9 + $0x338] sm:$0xff] }
 0x8c6   : > { %8417 = vmatmul.mubr.f32.gmra.mrb[144].mxu0 %v8307_v40  ;;  %v13289_v60 = vpack.c.bf16 %v8201_v41, %v8200_v4  ;;  %v8184_v40 = vld [vmem:[%s21095_s9 + $0x50] sm:$0xff]  ;;  %v8311_v2 = vsel %vm1624_vm6, %v8304_v46, %v8310_v44  ;;  %v10753_v6 = vld [vmem:[%s21095_s9 + $0x300] sm:$0xff]  ;;  %v10740_v44 = vld [vmem:[%s21095_s9 + $0x298] sm:$0xff] }
 0x8c7   : > { %11383 = vmatprep.mubr.msk.f32.mxu0 %vm13756_vm9, %v21133_v26  ;;  %v10737_v49 = vld [vmem:[%s21095_s9 + $0x280] sm:$0xff]  ;;  %v8161_v4 = vld [vmem:[#allocation6 + $0x10] sm:$0xff] }
 0x8c8   : > { %v10757_v41 = vld [vmem:[%s21095_s9 + $0x320] sm:$0xff] }
 0x8ca   : > { %11384 = vmatmul.mubr.msk.f32.vlgmr.msra.gmra.mrb[146].mxu0 %vm387_vm0, %v8287_v17  ;;  %v8187_v17 = vld [vmem:[%s21095_s9 + $0x68] sm:$0xff] }
 0x8cb   : > { %13272 = vmatpush3.bf16.msra.mxu0 %v13271_v28  ;;  %11386 = vmatprep.mubr.msk.f32.mxu0 %vm13756_vm9, %v21133_v26  ;;  %v8160_v28 = vld [vmem:[#allocation6 + $0x8] sm:$0xff]  ;;  %v13295_v31 = vpack.c.bf16 %v8187_v17, %v8186_v25  ;;  %v10744_v25 = vld [vmem:[%s21095_s9 + $0x2b8] sm:$0xff]  ;;  %v10761_v17 = vld [vmem:[%s21095_s9 + $0x340] sm:$0xff] }
 0x8cc   : > { %13274 = vmatprep.subr.bf16.mxu0 %v13273_v30  ;;  %v13291_v30 = vpack.c.bf16 %v8185_v18, %v8184_v40  ;;  %v10741_v18 = vld [vmem:[%s21095_s9 + $0x2a0] sm:$0xff] }
 0x8ce   : > { %11387 = vmatmul.mubr.msk.f32.gmra.mrb[148].mxu0 %vm387_vm0, %v8293_v63  ;;  %v8206_v63 = vld [vmem:[%s21095_s9 + $0x100] sm:$0xff] }
 0x8cf   : > { %13276 = vmatpush3.bf16.msra.mxu0 %v13275_v24  ;;  %11389 = vmatprep.mubr.msk.f32.mxu0 %vm13756_vm9, %v21133_v26  ;;  %v13297_v24 = vpack.c.bf16 %v8205_v1, %v8204_v14  ;;  %v13302_v55 = vpack.c.bf16 %v8207_v50, %v8206_v63  ;;  %v8704_v1 = vld [vmem:[#allocation6 + $0x8] sm:$0xfc] }
 0x8d0   : > { %13278 = vmatprep.subr.bf16.mxu0 %v13277_v38  ;;  %v8188_v38 = vld [vmem:[%s21095_s9 + $0x70] sm:$0xff] }
 0x8d1   : > { %v13299_v15 = vpack.c.bf16 %v8189_v16, %v8188_v38  ;;  %v10746_v38 = vld [vmem:[%s21095_s9 + $0x2c8] sm:$0xff]  ;;  %v10764_v16 = vld [vmem:[%s21095_s9 + $0x358] sm:$0xff] }
 0x8d2   : > { %11390 = vmatmul.mubr.msk.f32.gmra.mrb[150].mxu0 %vm387_vm0, %v8299_v20  ;;  %v8211_v20 = vld [vmem:[%s21095_s9 + $0x128] sm:$0xff] }
 0x8d3   : > { %13280 = vmatpush3.bf16.msra.mxu0 %v13279_v11  ;;  %11392 = vmatprep.mubr.msk.f32.mxu0 %vm13756_vm9, %v21133_v26  ;;  %v8209_v11 = vld [vmem:[%s21095_s9 + $0x118] sm:$0xff]  ;;  %v13308_v46 = vpack.c.bf16 %v8211_v20, %v8210_v12  ;;  %v10749_v20 = vld [vmem:[%s21095_s9 + $0x2e0] sm:$0xff] }
 0x8d4   : > { %13282 = vmatprep.subr.bf16.mxu0 %v13281_v35  ;;  %v8159_v35 = vld [vmem:[#allocation6] sm:$0xff]  ;;  %v13305_v59 = vpack.c.bf16 %v8209_v11, %v8208_v34  ;;  %v10748_v34 = vld [vmem:[%s21095_s9 + $0x2d8] sm:$0xff]  ;;  %v10766_v11 = vld [vmem:[%s21095_s9 + $0x368] sm:$0xff] }
 0x8d6   : > { %11393 = vmatmul.mubr.msk.f32.gmra.mrb[152].mxu0 %vm387_vm0, %v8305_v36  ;;  %v10739_v36 = vld [vmem:[%s21095_s9 + $0x290] sm:$0xff] }
 0x8d7   : > { %13284 = vmatpush3.bf16.msra.mxu0 %v13283_v33  ;;  %11395 = vmatprep.mubr.msk.f32.mxu0 %vm13756_vm9, %v21133_v26  ;;  %v13311_v33 = vpack.c.bf16 %v8213_v57, %v8212_v23 }
 0x8d8   : > { %13286 = vmatprep.subr.bf16.mxu0 %v13285_v48 }
 0x8da   : > { %11396 = vmatmul.mubr.msk.f32.gmra.mrb[154].mxu0 %vm387_vm0, %v8311_v2  ;;  %v10742_v2 = vld [vmem:[%s21095_s9 + $0x2a8] sm:$0xff] }
 0x8db   : > { %13288 = vmatpush3.bf16.msra.mxu0 %v13287_v22  ;;  %8587 = vmatprep.mubr.f32.mxu0 %v8160_v28  ;;  %v10758_v22 = vld [vmem:[%s21095_s9 + $0x328] sm:$0xff]  ;;  %v13323_v28 = vpack.c.bf16 %v10742_v2, %v10741_v18 }
 0x8dc   : > { %13290 = vmatprep.subr.bf16.mxu0 %v13289_v60  ;;  %v13319_v60 = vpack.c.bf16 %v10740_v44, %v10739_v36  ;;  %v13321_v40 = vpack.c.bf16 %v10758_v22, %v10757_v41  ;;  %v8707_v22 = vld [vmem:[#allocation6 + $0x80] sm:$0x3] }
 0x8df   : > { %13292 = vmatpush3.bf16.msra.mxu0 %v13291_v30  ;;  %v13325_v30 = vpack.c.bf16 %v10760_v37, %v10759_v32 }
 0x8e0   : > { %13294 = vmatprep.subr.bf16.mxu0 %v13293_v51  ;;  %v10743_v51 = vld [vmem:[%s21095_s9 + $0x2b0] sm:$0xff] }
 0x8e1   : > { %v13327_v14 = vpack.c.bf16 %v10744_v25, %v10743_v51 }
 0x8e3   : > { %13296 = vmatpush3.bf16.msra.mxu0 %v13295_v31 }
 0x8e4   : > { %13298 = vmatprep.subr.bf16.mxu0 %v13297_v24  ;;  %v10745_v24 = vld [vmem:[%s21095_s9 + $0x2c0] sm:$0xff] }
 0x8e5   : > { %v13331_v63 = vpack.c.bf16 %v10746_v38, %v10745_v24 }
 0x8e7   : > { %13300 = vmatpush3.bf16.msra.mxu0 %v13299_v15  ;;  %v8759_v15 = vrot.slane %v8704_v1, 2 }
 0x8e8   : > { %13301 = vmatprep.subr.bf16.mxu0 %v21130_v7 }
 0x8ea   : > { %8588 = vmatmul.mubr.f32.vlgmr.msra.gmra.mrb[156].mxu0 %v8159_v35 }
 0x8eb   : > { %8592 = vmatprep.mubr.f32.mxu0 %v20625_v39  ;;  %13303 = vmatpush3.bf16.msra.mxu0 %v13302_v55  ;;  %v10747_v55 = vld [vmem:[%s21095_s9 + $0x2d0] sm:$0xff] }
 0x8ec   : > { %13304 = vmatprep.subr.bf16.mxu0 %v21130_v7  ;;  %v13335_v35 = vpack.c.bf16 %v10748_v34, %v10747_v55  ;;  %v10767_v39 = vld [vmem:[%s21095_s9 + $0x370] sm:$0xff] }
 0x8ee   : > { %8593 = vmatmul.mubr.f32.gmra.mrb[158].mxu0 %v20612_v61 }
 0x8ef   : > { %8597 = vmatprep.mubr.f32.mxu0 %v20645_v43  ;;  %13306 = vmatpush3.bf16.msra.mxu0 %v13305_v59  ;;  %v10754_v43 = vld [vmem:[%s21095_s9 + $0x308] sm:$0xff] }
 0x8f0   : > { %13307 = vmatprep.subr.bf16.mxu0 %v21130_v7  ;;  %v13313_v48 = vpack.c.bf16 %v10754_v43, %v10753_v6  ;;  %v10751_v43 = vld [vmem:[%s21095_s9 + $0x2f0] sm:$0xff] }
 0x8f2   : > { %8598 = vmatmul.mubr.f32.gmra.mrb[160].mxu0 %v20641_v3  ;;  %v10738_v3 = vld [vmem:[%s21095_s9 + $0x288] sm:$0xff] }
 0x8f3   : > { %8602 = vmatprep.mubr.f32.mxu0 %v20659_v62  ;;  %13309 = vmatpush3.bf16.msra.mxu0 %v13308_v46  ;;  %v10755_v62 = vld [vmem:[%s21095_s9 + $0x310] sm:$0xff]  ;;  %v10750_v46 = vld [vmem:[%s21095_s9 + $0x2e8] sm:$0xff] }
 0x8f4   : > { %13310 = vmatprep.subr.bf16.mxu0 %v21130_v7  ;;  %v10756_v7 = vld [vmem:[%s21095_s9 + $0x318] sm:$0xff]  ;;  %v13339_v23 = vpack.c.bf16 %v10750_v46, %v10749_v20 }
 0x8f5   : > { %v13317_v58 = vpack.c.bf16 %v10756_v7, %v10755_v62 }
 0x8f6   : > { %8603 = vmatmul.mubr.f32.gmra.mrb[162].mxu0 %v20654_v47  ;;  %v13315_v47 = vpack.c.bf16 %v10738_v3, %v10737_v49  ;;  %v8703_v49 = vld [vmem:[#allocation6] sm:$0xfc] }
 0x8f7   : > { %8607 = vmatprep.mubr.f32.mxu0 %v20681_v5  ;;  %13312 = vmatpush3.bf16.msra.mxu0 %v13311_v33  ;;  %v10752_v33 = vld [vmem:[%s21095_s9 + $0x2f8] sm:$0xff] }
 0x8f8   : > { %13314 = vmatprep.subr.bf16.mxu0 %v13313_v48  ;;  %v13343_v3 = vpack.c.bf16 %v10752_v33, %v10751_v43 }
 0x8fa   : > { %8608 = vmatmul.mubr.f32.gmra.mrb[164].mxu0 %v20671_v0 }
 0x8fb   : > { %11414 = vmatprep.mubr.msk.f32.mxu0 %vm13756_vm9, %v21133_v26 }
 0x8fe   : > { %11415 = vmatmul.mubr.msk.f32.vlgmr.msra.gmra.mrb[166].mxu0 %vm387_vm0, %v8161_v4 }
 0x8ff   : > { %13316 = vmatpush3.bf16.msra.mxu0 %v13315_v47  ;;  %11417 = vmatprep.mubr.msk.f32.mxu0 %vm13756_vm9, %v21133_v26  ;;  %v8756_v47 = vrot.slane %v8703_v49, 2 }
 0x900   : > { %13318 = vmatprep.subr.bf16.mxu0 %v13317_v58 }
 0x901   : > { %v8758_v44 = vsel %vm1480_vm5, %v8756_v47, %v8757_v21 }
 0x902   : > { %11418 = vmatmul.mubr.msk.f32.gmra.mrb[168].mxu0 %vm387_vm0, %v20543_v45  ;;  %v10762_v45 = vld [vmem:[%s21095_s9 + $0x348] sm:$0xff] }
 0x903   : > { %13320 = vmatpush3.bf16.msra.mxu0 %v13319_v60  ;;  %11420 = vmatprep.mubr.msk.f32.mxu0 %vm13756_vm9, %v21133_v26  ;;  %v13329_v31 = vpack.c.bf16 %v10762_v45, %v10761_v17  ;;  %v8785_v60 = vrot.slane %v8707_v22, 2 }
 0x904   : > { %13322 = vmatprep.subr.bf16.mxu0 %v13321_v40  ;;  %v8706_v40 = vld [vmem:[#allocation6 + $0x78] sm:$0x3] }
 0x905   : > { %v8783_v61 = vrot.slane %v8706_v40, 2  ;;  %v8786_v21 = vsel %vm1480_vm5, %v8779_v27, %v8785_v60 }
 0x906   : > { %11421 = vmatmul.mubr.msk.f32.gmra.mrb[170].mxu0 %vm387_vm0, %v20568_v10  ;;  %v10763_v10 = vld [vmem:[%s21095_s9 + $0x350] sm:$0xff] }
 0x907   : > { %13324 = vmatpush3.bf16.msra.mxu0 %v13323_v28  ;;  %11423 = vmatprep.mubr.msk.f32.mxu0 %vm13756_vm9, %v21133_v26  ;;  %v13333_v50 = vpack.c.bf16 %v10764_v16, %v10763_v10 }
 0x908   : > { %13326 = vmatprep.subr.bf16.mxu0 %v13325_v30 }
 0x90a   : > { %11424 = vmatmul.mubr.msk.f32.gmra.mrb[172].mxu0 %vm387_vm0, %v20582_v29  ;;  %v10765_v29 = vld [vmem:[%s21095_s9 + $0x360] sm:$0xff] }
 0x90b   : > { %13328 = vmatpush3.bf16.msra.mxu0 %v13327_v14  ;;  %11426 = vmatprep.mubr.msk.f32.mxu0 %vm13756_vm9, %v21133_v26  ;;  %v8761_v26 = vsel %vm1480_vm5, %v8759_v15, %v8760_v53  ;;  %v13337_v12 = vpack.c.bf16 %v10766_v11, %v10765_v29  ;;  %v10768_v53 = vld [vmem:[%s21095_s9 + $0x378] sm:$0xff] }
 0x90c   : > { %13330 = vmatprep.subr.bf16.mxu0 %v13329_v31  ;;  %v13341_v6 = vpack.c.bf16 %v10768_v53, %v10767_v39 }
 0x90e   : > { %11427 = vmatmul.mubr.msk.f32.gmra.mrb[174].mxu0 %vm387_vm0, %v20589_v52  ;;  %vm9036_vm0 = vcmask 326656  }
 0x90f   : > { %13332 = vmatpush3.bf16.msra.mxu0 %v13331_v63  ;;  %8873 = vmatprep.mubr.f32.mxu0 %v8761_v26 }
 0x910   : > { %v20976_v59 = vpop.f32.mrb[68].mxu1  ;;  %13334 = vmatprep.subr.bf16.mxu0 %v13333_v50 }
 0x911   : > { %v11447_v52 = vpop.f32.mrb[69].mxu1 }
 0x913   : > { %13336 = vmatpush3.bf16.msra.mxu0 %v13335_v35 }
 0x914   : > { %v20990_v57 = vpop.f32.mrb[70].mxu1  ;;  %13338 = vmatprep.subr.bf16.mxu0 %v13337_v12 }
 0x915   : > { %v11450_v48 = vpop.f32.mrb[71].mxu1 }
 0x917   : > { %13340 = vmatpush3.bf16.msra.mxu0 %v13339_v23 }
 0x918   : > { %v20998_v62 = vpop.f32.mrb[72].mxu1  ;;  %13342 = vmatprep.subr.bf16.mxu0 %v13341_v6 }
 0x919   : > { %v11453_v7 = vpop.f32.mrb[73].mxu1 }
 0x91b   : > { %13344 = vmatpush3.bf16.msra.mxu0 %v13343_v3 }
 0x91c   : > { %v21000_v58 = vpop.f32.mrb[74].mxu1 }
 0x91d   : > { %v11456_v36 = vpop.f32.mrb[75].mxu1 }
 0x91e   : > { %8874 = vmatmul.mubr.f32.vlgmr.msra.gmra.mrb[176].mxu0 %v8758_v44 }
 0x91f   : > { %8878 = vmatprep.mubr.f32.mxu0 %v20677_v56  ;;  %v8784_v56 = vsel %vm1480_vm5, %v8777_v8, %v8783_v61 }
 0x920   : > { %v21006_v4 = vpop.f32.mrb[76].mxu1 }
 0x921   : > { %v11459_v41 = vpop.f32.mrb[77].mxu1 }
 0x922   : > { %8879 = vmatmul.mubr.f32.gmra.mrb[178].mxu0 %v20687_v19 }
 0x923   : > { %8883 = vmatprep.mubr.f32.mxu0 %v20690_v54 }
 0x926   : > { %8884 = vmatmul.mubr.f32.gmra.mrb[180].mxu0 %v20694_v42 }
 0x927   : > { %8888 = vmatprep.mubr.f32.mxu0 %v20716_v9 }
 0x92a   : > { %8889 = vmatmul.mubr.f32.gmra.mrb[182].mxu0 %v20721_v13 }
 0x92b   : > { %8893 = vmatprep.mubr.f32.mxu0 %v8786_v21 }
 0x92e   : > { %8894 = vmatmul.mubr.f32.gmra.mrb[184].mxu0 %v8784_v56 }
 0x989   : > { %v11104_v19 = vpop.f32.mrb[136].mxu0 }
 0x98a   : > { %v11105_v54 = vpop.f32.mrb[137].mxu0 }
 0x98b   : > { %v11106_v42 = vadd.f32 %v11105_v54, %v11104_v19 }
 0x98d   : > { %v11107_v18 = vpop.f32.mrb[138].mxu0 }
 0x98e   : > { %v11108_v2 = vpop.f32.mrb[139].mxu0 }
 0x98f   : > { %v11109_v32 = vadd.f32 %v11108_v2, %v11107_v18 }
 0x991   : > { %v11110_v9 = vpop.f32.mrb[140].mxu0 }
 0x992   : > { %v11111_v37 = vpop.f32.mrb[141].mxu0 }
 0x993   : > { %v11112_v28 = vadd.f32 %v11111_v37, %v11110_v9 }
 0x995   : > { %v11113_v13 = vpop.f32.mrb[142].mxu0 }
 0x996   : > { %v11114_v30 = vpop.f32.mrb[143].mxu0 }
 0x997   : > { %v11115_v5 = vadd.f32 %v11114_v30, %v11113_v13 }
 0x999   : > { %v11116_v51 = vpop.f32.mrb[144].mxu0 }
 0x99a   : > { %v11117_v27 = vpop.f32.mrb[145].mxu0 }
 0x99b   : > { %v11118_v25 = vadd.f32 %v11117_v27, %v11116_v51 }
 0x99d   : > { %v8488_v17 = vpop.f32.mrb[146].mxu0 }
 0x99e   : > { %v8489_v0 = vadd.f32 %v11106_v42, %v8488_v17  ;;  %v11385_v45 = vpop.f32.mrb[147].mxu0 }
 0x9a1   : > { %v8493_v8 = vpop.f32.mrb[148].mxu0 }
 0x9a2   : > { %v8494_v14 = vadd.f32 %v11109_v32, %v8493_v8  ;;  %v11388_v1 = vpop.f32.mrb[149].mxu0 }
 0x9a5   : > { %v8498_v31 = vpop.f32.mrb[150].mxu0 }
 0x9a6   : > { %v8499_v24 = vadd.f32 %v11112_v28, %v8498_v31  ;;  %v11391_v38 = vpop.f32.mrb[151].mxu0 }
 0x9a9   : > { %v8503_v10 = vpop.f32.mrb[152].mxu0 }
 0x9aa   : > { %v8504_v16 = vadd.f32 %v11115_v5, %v8503_v10  ;;  %v11394_v15 = vpop.f32.mrb[153].mxu0  ;;  %v10782_v5 = vld [vmem:[%s21096_s10] ss:$0 sm:$0xff] }
 0x9ad   : > { %v8508_v63 = vpop.f32.mrb[154].mxu0 }
 0x9ae   : > { %v8509_v50 = vadd.f32 %v11118_v25, %v8508_v63  ;;  %v11397_v55 = vpop.f32.mrb[155].mxu0 }
 0x9bd   : > { %v11164_v34 = vpop.f32.mrb[156].mxu0 }
 0x9be   : > { %v11165_v29 = vpop.f32.mrb[157].mxu0 }
 0x9bf   : > { %v11166_v11 = vadd.f32 %v11165_v29, %v11164_v34 }
 0x9c1   : > { %v11167_v26 = vpop.f32.mrb[158].mxu0  ;;  %v8590_v35 = vadd.f32 %v11166_v11, %v8489_v0 }
 0x9c2   : > { %v11168_v12 = vpop.f32.mrb[159].mxu0 }
 0x9c3   : > { %v11169_v20 = vadd.f32 %v11168_v12, %v11167_v26 }
 0x9c5   : > { %v11170_v46 = vpop.f32.mrb[160].mxu0  ;;  %v8595_v52 = vadd.f32 %v11169_v20, %v8494_v14 }
 0x9c6   : > { %v11171_v39 = vpop.f32.mrb[161].mxu0 }
 0x9c7   : > { %v11172_v53 = vadd.f32 %v11171_v39, %v11170_v46 }
 0x9c9   : > { %v11173_v23 = vpop.f32.mrb[162].mxu0  ;;  %v8600_v6 = vadd.f32 %v11172_v53, %v8499_v24 }
 0x9ca   : > { %v11174_v43 = vpop.f32.mrb[163].mxu0 }
 0x9cb   : > { %v11175_v33 = vadd.f32 %v11174_v43, %v11173_v23 }
 0x9cd   : > { %v11176_v48 = vpop.f32.mrb[164].mxu0  ;;  %v8605_v49 = vadd.f32 %v11175_v33, %v8504_v16 }
 0x9ce   : > { %v11177_v3 = vpop.f32.mrb[165].mxu0 }
 0x9cf   : > { %v11178_v7 = vadd.f32 %v11177_v3, %v11176_v48 }
 0x9d1   : > { %v8679_v47 = vpop.f32.mrb[166].mxu0  ;;  %v8610_v36 = vadd.f32 %v11178_v7, %v8509_v50 }
 0x9d2   : > { %v8680_v44 = vadd.f32 %v8679_v47, %v8590_v35  ;;  %v11416_v41 = vpop.f32.mrb[167].mxu0 }
 0x9d5   : > { %v8684_v22 = vpop.f32.mrb[168].mxu0 }
 0x9d6   : > { %v8685_v60 = vadd.f32 %v8684_v22, %v8595_v52  ;;  %v11419_v40 = vpop.f32.mrb[169].mxu0 }
 0x9d9   : > { %v8689_v61 = vpop.f32.mrb[170].mxu0 }
 0x9da   : > { %v8690_v21 = vadd.f32 %v8689_v61, %v8600_v6  ;;  %v11422_v56 = vpop.f32.mrb[171].mxu0 }
 0x9dd   : > { %v8694_v19 = vpop.f32.mrb[172].mxu0 }
 0x9de   : > { %v8695_v54 = vadd.f32 %v8694_v19, %v8605_v49  ;;  %v11425_v42 = vpop.f32.mrb[173].mxu0 }
 0x9e1   : > { %v8699_v18 = vpop.f32.mrb[174].mxu0 }
 0x9e2   : > { %v8700_v2 = vadd.f32 %v8699_v18, %v8610_v36  ;;  %v11428_v32 = vpop.f32.mrb[175].mxu0 }
 0x9f1   : > { %v11224_v9 = vpop.f32.mrb[176].mxu0 }
 0x9f2   : > { %v11225_v37 = vpop.f32.mrb[177].mxu0 }
 0x9f3   : > { %v11226_v28 = vadd.f32 %v11225_v37, %v11224_v9 }
 0x9f5   : > { %v8966_v13 = vadd.f32 %v11226_v28, %v20976_v59  ;;  %v11227_v30 = vpop.f32.mrb[178].mxu0 }
 0x9f6   : > { %v11228_v51 = vpop.f32.mrb[179].mxu0 }
 0x9f7   : > { %v8989_v27 = vadd.f32 %v8966_v13, %v8680_v44  ;;  %v11229_v25 = vadd.f32 %v11228_v51, %v11227_v30 }
 0x9f9   : > { %v9001_v17 = vadd.f32 %v10782_v5, %v8989_v27  ;;  %v8971_v0 = vadd.f32 %v11229_v25, %v20990_v57  ;;  %v11230_v45 = vpop.f32.mrb[180].mxu0 }
 0x9fa   : > { %v11231_v8 = vpop.f32.mrb[181].mxu0 }
 0x9fb   : > { %v10783_v14 = vmul.f32 -1.442695, %v9001_v17  ;;  %v8990_v1 = vadd.f32 %v8971_v0, %v8685_v60  ;;  %v11232_v31 = vadd.f32 %v11231_v8, %v11230_v45 }
 0x9fd   : > { %13649 = vpow2.f32 %v10783_v14  ;;  %v9002_v24 = vadd.f32 %v10782_v5, %v8990_v1  ;;  %v8976_v59 = vadd.f32 %v11232_v31, %v20998_v62  ;;  %v11233_v38 = vpop.f32.mrb[182].mxu0 }
 0x9fe   : > { %v11234_v10 = vpop.f32.mrb[183].mxu0 }
 0x9ff   : > { %v10784_v16 = vmul.f32 -1.442695, %v9002_v24  ;;  %v8991_v15 = vadd.f32 %v8976_v59, %v8690_v21  ;;  %v11235_v63 = vadd.f32 %v11234_v10, %v11233_v38 }
 0xa01   : > { %13651 = vpow2.f32 %v10784_v16  ;;  %v9003_v50 = vadd.f32 %v10782_v5, %v8991_v15  ;;  %v8981_v55 = vadd.f32 %v11235_v63, %v21000_v58  ;;  %v11236_v34 = vpop.f32.mrb[184].mxu0 }
 0xa02   : > { %v11237_v57 = vpop.f32.mrb[185].mxu0 }
 0xa03   : > { %v10785_v29 = vmul.f32 -1.442695, %v9003_v50  ;;  %v8992_v11 = vadd.f32 %v8981_v55, %v8695_v54  ;;  %v11238_v26 = vadd.f32 %v11237_v57, %v11236_v34 }
 0xa05   : > { %13653 = vpow2.f32 %v10785_v29  ;;  %v9004_v35 = vadd.f32 %v10782_v5, %v8992_v11  ;;  %v8986_v62 = vadd.f32 %v11238_v26, %v21006_v4 }
 0xa07   : > { %v13650_v12 = vpop.eup %13649  ;;  %v10786_v20 = vmul.f32 -1.442695, %v9004_v35  ;;  %v8993_v46 = vadd.f32 %v8986_v62, %v8700_v2 }
 0xa08   : > { %v9021_v52 = vadd.f32 1.0, %v13650_v12 }
 0xa09   : > { %13655 = vpow2.f32 %v10786_v20  ;;  %v9005_v39 = vadd.f32 %v10782_v5, %v8993_v46 }
 0xa0a   : > { %13657 = vrcp.f32 %v9021_v52 }
 0xa0b   : > { %v13652_v53 = vpop.eup %13651  ;;  %v10787_v58 = vmul.f32 -1.442695, %v9005_v39 }
 0xa0c   : > { %v9022_v23 = vadd.f32 1.0, %v13652_v53 }
 0xa0d   : > { %13659 = vpow2.f32 %v10787_v58 }
 0xa0e   : > { %13661 = vrcp.f32 %v9022_v23 }
 0xa0f   : > { %v13654_v6 = vpop.eup %13653 }
 0xa10   : > { %v9023_v43 = vadd.f32 1.0, %v13654_v6 }
 0xa12   : > { %13663 = vrcp.f32 %v9023_v43 }
 0xa13   : > { %v13656_v4 = vpop.eup %13655 }
 0xa14   : > { %v13658_v33 = vpop.eup %13657  ;;  %v9024_v48 = vadd.f32 1.0, %v13656_v4 }
 0xa15   : > { %9037 = vst.msk [vmem:[%s379_s25] sm:$0xff] %vm9036_vm0, %v13658_v33 }
 0xa16   : > { %13665 = vrcp.f32 %v9024_v48 }
 0xa17   : > { %v13660_v49 = vpop.eup %13659 }
 0xa18   : > { %v13662_v3 = vpop.eup %13661  ;;  %v9025_v7 = vadd.f32 1.0, %v13660_v49 }
 0xa19   : > { %9038 = vst.msk [vmem:[%s379_s25 + $0x8] sm:$0xff] %vm9036_vm0, %v13662_v3 }
 0xa1a   : > { %13667 = vrcp.f32 %v9025_v7 }
 0xa1c   : > { %v13664_v47 = vpop.eup %13663 }
 0xa1d   : > { %9039 = vst.msk [vmem:[%s379_s25 + $0x10] sm:$0xff] %vm9036_vm0, %v13664_v47 }
 0xa20   : > { %v13666_v36 = vpop.eup %13665 }
 0xa21   : > { %9040 = vst.msk [vmem:[%s379_s25 + $0x18] sm:$0xff] %vm9036_vm0, %v13666_v36 }
 0xa24   : > { %v13668_v44 = vpop.eup %13667 }
 0xa25   : > { %9041 = vst.msk [vmem:[%s379_s25 + $0x20] sm:$0xff] %vm9036_vm0, %v13668_v44 }
 0xa26   : > { %13703 = shalt.err (!%p13700_p3)
}
 0xa27   : > { %s13704_s16 = scalar_lea.hbm %s21038_s13, 640  ;;  %s13708_s29 = scalar_lea.hbm %s21097_s11, 1280 }
 0xa28   : > { %p13705_p4 = scmp.ne.s32.totalorder %s21038_s13, %s13704_s16  ;;  %p13709_p9 = scmp.lt.u32.totalorder %s21038_s13, %s21097_s11 }
 0xa29   : > { %p13710_p10 = scmp.lt.u32.totalorder %s13708_s29, %s13704_s16  ;;  %p13712_p12 = scmp.lt.u32.totalorder %s13704_s16, %s21038_s13 }
 0xa2a   : > { %p13706_p7 = pnand %p13705_p4, %p13858_p5 }
 0xa2b   : > { %p13711_p11 = por %p13710_p10, %p13709_p9 }
 0xa2c   : > { %p13707_p8 = pneg %p13706_p7 }
 0xa2d   : > { %p13713_p13 = por %p13712_p12, %p13711_p11 }
 0xa2f   : > { %p13714_p0 = pnand %p13713_p13, %p13707_p8 }
 0xa31   : > { %13717 = shalt.err (!%p13714_p0)
}
 0xa32   : > { %s13758_s21 = smov 128   ;;  %s13759_s14 = smov 8  }
 0xa33   : > { %13605 = dma.vmem_to_hbm [thread:$0]  (%p13858_p5), %s21040_s24, 640, %s21038_s13, %s21045_s30, %s13758_s21, %s13758_s21, %s13759_s14  }
 0xa34 PF: > { %p13611_p1 = scmp.ge.s32.totalorder %s13752_s20, 2  ;;  %s9071_s19 = sand.u32 1, %s13740_s17  }
 0xa35   : > { %s9072_s15 = scalar_lea.sflag [#allocation8], %s9071_s19 }
 0xa36   : > { %p13608_p2 = pnand %p13611_p1, %p13862_p6 }
 0xa38   : > { %13735 = dma.done.wait (!%p13608_p2), %s9072_s15, 640  }
 0xa39   : > { %13737 = vsyncadd (!%p13608_p2), %s9072_s15, 4294966656  ;;  %s21144_s16 = sld [smem:[#allocation10_spill]]  ;;  %s21145_s19 = sld [smem:[#allocation11_spill]] }
 0xa3a   : > { %p21_p3 = scmp.ge.s32.totalorder %s13845_s23, 4   ;;  %s21146_s17 = smov %s13744_s18 }
 0xa3b   : > { %s21148_s20 = smov %s13845_s23 }
 0xa3c   :  { %23 = sbr.rel (!%p21_p3) target bundleno = 3 (0x3), region = 126 }
 0xa3f   : > { %s21147_s18 = smov %s21144_s16 }
 0xa43   :  { %9077 = vsyncpa [#allocation8], 1 }
 0xa44   :  { %9079 = vsyncpa [#allocation8 + $0x1], 1 }

</bundles_post_ra>
